<compile_context>
chip_gen: v6e
topology: v6e:2x2x1
jax: 0.10.0
libtpu: 0.0.40
codegen_flags: <defaults>
</compile_context>

<pallas_src>
import functools
import itertools
import math

import jax
import jax.numpy as jnp
from jax.experimental import pallas as pl
from jax.experimental.pallas import tpu as pltpu

_BN_EPS = 1e-5

# Used (phase, od, oh) slots of the sub-pixel deconvolution (18 of 32).
_DECONV_SLOTS = [(p, od, oh)
                 for p, (pd, ph, pw) in enumerate(itertools.product((0, 1), repeat=3))
                 for od in range(pd + 1) for oh in range(ph + 1)]
_DECONV_SLOT_IDX = {s: i for i, s in enumerate(_DECONV_SLOTS)}


# --------------------- constant-operand BlockSpec helper --------------------- #

_UNBLOCKED_VMEM_OK = None


def _probe_unblocked_vmem():
    """Check whether pl.BlockSpec(memory_space=VMEM) whole-array operands work."""
    def k(x_ref, c_ref, o_ref):
        o_ref[...] = x_ref[...] + c_ref[...]
    try:
        out = pl.pallas_call(
            k,
            out_shape=jax.ShapeDtypeStruct((2, 8, 128), jnp.float32),
            grid=(2,),
            in_specs=[pl.BlockSpec((None, 8, 128), lambda i: (i, 0, 0)),
                      pl.BlockSpec(memory_space=pltpu.MemorySpace.VMEM)],
            out_specs=pl.BlockSpec((None, 8, 128), lambda i: (i, 0, 0)),
        )(jnp.zeros((2, 8, 128), jnp.float32), jnp.ones((8, 128), jnp.float32))
        jax.block_until_ready(out)
        return True
    except Exception:
        return False


def _const_operand_spec(shape):
    """Spec for a grid-constant operand: one resident VMEM copy, not
    double-buffered (perf item 5/7).  Falls back to a constant-index full block."""
    global _UNBLOCKED_VMEM_OK
    if _UNBLOCKED_VMEM_OK is None:
        _UNBLOCKED_VMEM_OK = _probe_unblocked_vmem()
    if _UNBLOCKED_VMEM_OK:
        return pl.BlockSpec(memory_space=pltpu.MemorySpace.VMEM)
    return pl.BlockSpec(shape, lambda n, t: (0,) * len(shape))


# ------------------------------ tiling heuristics ---------------------------- #

def _pick_depth_tile(n_out, rows_per_slice, row_cap=256):
    """Largest divisor T of n_out with T*rows_per_slice <= row_cap so each grid
    step feeds the MXU M = T*rows_per_slice rows (perf item 2)."""
    best = 1
    for d in range(1, n_out + 1):
        if n_out % d == 0 and d * rows_per_slice <= row_cap:
            best = d
    return best


def _pick_w_tile(Wo, Cin, Cout, *, stride, halo, lane_target=256, k_cap=512):
    """Smallest divisor Wt of Wo whose store lane width Wt*Cout reaches
    lane_target (then 128) while keeping the band contraction depth
    (stride*Wt+halo)*Cin <= k_cap (perf items 1 & 8).  Falls back to full W
    for small layers (e.g. the demo sizes)."""
    for tgt in (lane_target, 128):
        for wt in range(1, Wo + 1):
            if Wo % wt:
                continue
            if wt * Cout >= tgt and (stride * wt + halo) * Cin <= k_cap:
                return wt
    return Wo


# ----------------------------- Pallas kernels -------------------------------- #

def _conv_bn_kernel(*refs, stride, T, Ho, Wo, Wt, Cin, Cout, relu, has_res):
    """Fused 3x3x3 conv (pad=1, stride 1|2) + folded BN (+ residual) (+ ReLU).

    One grid step = one batch element x one tile of T output depth slices.
    x main : (T, DPH, HPH, Hq, Wp*Cin) bf16   -- non-overlapping depth block
    x halo : (1, 1,  HPH, Hq, Wp*Cin) bf16    -- (3 - stride) trailing halo slices
    w      : (9, (stride*Wt+2)*Cin, Wt*Cout) bf16 Toeplitz band per (kd, kh),
             shared by every W tile.
    s, b   : (1, Wt*Cout) f32 folded BN scale / bias.
    res    : (T, Ho, Wo*Cout) bf16 (optional).   out: (T, Ho, Wo*Cout) bf16.
    """
    nx = 3 if stride == 1 else 2
    x_refs = refs[:nx]
    w_ref, s_ref, b_ref = refs[nx], refs[nx + 1], refs[nx + 2]
    res_ref = refs[nx + 3] if has_res else None
    o_ref = refs[-1]

    # Assemble the depth window once: single-fetch main block + halo (item 3).
    if stride == 1:
        xw = jnp.concatenate([x_refs[0][...], x_refs[1][...], x_refs[2][...]],
                             axis=0)                      # (T+2, 1, 1, Hp, WK)
        DPH = HPH = 1
    else:
        halo = x_refs[1][...]                             # (1, 1, 2, Hq, WK)
        halo = jnp.concatenate([halo, jnp.zeros_like(halo)], axis=1)
        xw = jnp.concatenate([x_refs[0][...], halo], axis=0)   # (T+1, 2, 2, Hq, WK)
        DPH = HPH = 2

    n_wt = Wo // Wt
    WKt = (stride * Wt + 2) * Cin
    Nt = Wt * Cout

    accs = [jnp.zeros((T * Ho, Nt), jnp.float32) for _ in range(n_wt)]
    for kd in range(3):
        for kh in range(3):
            lhs = xw[kd // DPH:kd // DPH + T, kd % DPH, kh % HPH,
                     kh // HPH:kh // HPH + Ho, :]
            lhs = lhs.reshape(T * Ho, xw.shape[-1])       # M = T*Ho rows (item 2)
            wk = w_ref[kd * 3 + kh]
            for tw in range(n_wt):                        # W-tiled band (item 1)
                off = stride * tw * Wt * Cin
                accs[tw] = accs[tw] + jnp.dot(
                    lhs[:, off:off + WKt], wk, preferred_element_type=jnp.float32)

    for tw in range(n_wt):
        c0 = tw * Nt
        y = accs[tw] * s_ref[...] + b_ref[...]
        if res_ref is not None:
            y = y + res_ref[:, :, c0:c0 + Nt].astype(jnp.float32).reshape(T * Ho, Nt)
        if relu:
            y = jnp.maximum(y, 0.0)
        o_ref[:, :, c0:c0 + Nt] = y.reshape(T, Ho, Nt).astype(o_ref.dtype)


def _deconv_bn_kernel(*refs, T, Hi, Wi, Wt, Cin, Cout, relu, has_res):
    """Fused ConvTranspose3d(k=3,s=2,p=1,op=1) + BN (+res) (+ReLU), sub-pixel form.

    One grid step = one batch element x one tile of T input depth slices; the 8
    output phases of those slices are produced directly from the non-dilated
    input (every MAC maps to a non-zero tap).
    x main : (T, Hi+1, (Wi+1)*Cin) bf16     x halo : (1, Hi+1, (Wi+1)*Cin) bf16
    w      : (18, (Wt+1)*Cin, Wt*Cout) bf16 packed band (slot order _DECONV_SLOTS)
    s, b   : (1, Wt*Cout) f32.   res/out : (T, 8, Hi, Wi*Cout) bf16.
    """
    xm_ref, xh_ref, w_ref, s_ref, b_ref = refs[:5]
    res_ref = refs[5] if has_res else None
    o_ref = refs[-1]

    xw = jnp.concatenate([xm_ref[...], xh_ref[...]], axis=0)   # (T+1, Hi+1, WK)
    n_wt = Wi // Wt
    WKt = (Wt + 1) * Cin
    Nt = Wt * Cout

    lhs_cache = {(od, oh): xw[od:od + T, oh:oh + Hi, :].reshape(T * Hi, xw.shape[-1])
                 for od in range(2) for oh in range(2)}

    for p_lin, (pd, ph, pw) in enumerate(itertools.product((0, 1), repeat=3)):
        for tw in range(n_wt):
            off_in = tw * Wt * Cin
            c0 = tw * Nt
            acc = jnp.zeros((T * Hi, Nt), jnp.float32)
            for od in range(pd + 1):
                for oh in range(ph + 1):
                    acc = acc + jnp.dot(
                        lhs_cache[(od, oh)][:, off_in:off_in + WKt],
                        w_ref[_DECONV_SLOT_IDX[(p_lin, od, oh)]],
                        preferred_element_type=jnp.float32)
            y = acc * s_ref[...] + b_ref[...]
            if res_ref is not None:
                y = y + res_ref[:, p_lin, :, c0:c0 + Nt].astype(
                    jnp.float32).reshape(T * Hi, Nt)
            if relu:
                y = jnp.maximum(y, 0.0)
            o_ref[:, p_lin, :, c0:c0 + Nt] = y.reshape(T, Hi, Nt).astype(o_ref.dtype)


# ------------------------ banded weight construction ------------------------- #

def _banded_conv_weights(w, Wt, stride):
    """w: (3,3,3,Cin,Cout) -> (9, (stride*Wt+2)*Cin, Wt*Cout) bf16; the W taps
    and the W stride folded into a Toeplitz band shared by all W tiles."""
    Cin, Cout = w.shape[3], w.shape[4]
    Ku = stride * Wt + 2
    cols = jnp.arange(Wt)
    mats = []
    for kd in range(3):
        for kh in range(3):
            m = jnp.zeros((Ku * Cin, Wt * Cout), jnp.float32)
            for kw in range(3):
                e = jnp.zeros((Ku, Wt), jnp.float32).at[stride * cols + kw, cols].set(1.0)
                m = m + jnp.einsum('uv,io->uivo', e,
                                   w[kd, kh, kw].astype(jnp.float32)
                                   ).reshape(Ku * Cin, Wt * Cout)
            mats.append(m)
    return jnp.stack(mats).astype(jnp.bfloat16)


def _banded_deconv_weights(w_t, Wt):
    """w_t: (Cin, Cout, 3,3,3) PyTorch ConvTranspose3d layout
    -> (18, (Wt+1)*Cin, Wt*Cout) bf16, packed to the used slots (item 6)."""
    Cin, Cout = w_t.shape[0], w_t.shape[1]
    e0 = jnp.eye(Wt + 1, Wt, dtype=jnp.float32)        # input w == output wq
    e1 = jnp.eye(Wt + 1, Wt, k=-1, dtype=jnp.float32)  # input w == output wq + 1
    kmap = ((1, None), (2, 0))                         # per-dim (tap for od/oh = 0, 1)

    def band(e, kd_i, kh_i, kw_i):
        wk = w_t[:, :, kd_i, kh_i, kw_i].astype(jnp.float32)
        return jnp.einsum('uv,io->uivo', e, wk).reshape((Wt + 1) * Cin, Wt * Cout)

    mats = []
    for (p_lin, od, oh) in _DECONV_SLOTS:
        pd, ph, pw = (p_lin >> 2) & 1, (p_lin >> 1) & 1, p_lin & 1
        kd_i, kh_i = kmap[pd][od], kmap[ph][oh]
        if pw == 0:
            m = band(e0, kd_i, kh_i, 1)
        else:
            m = band(e0, kd_i, kh_i, 2) + band(e1, kd_i, kh_i, 0)
        mats.append(m)
    return jnp.stack(mats).astype(jnp.bfloat16)


# ------------------------------- layer wrappers ------------------------------- #

def conv3d_bn(x, w, scale, bias, *, stride, relu, residual=None):
    """x: (N, D, H, W, Cin) bf16 NDHWC; w: (3,3,3,Cin,Cout) f32; pad=1.
    residual (optional): (N, Do, Ho, Wo, Cout) bf16.  Returns bf16 NDHWC."""
    N, D, H, W, Cin = x.shape
    Cout = w.shape[4]
    s = stride
    assert s in (1, 2)
    if s == 2:
        assert D % 2 == 0 and H % 2 == 0 and W % 2 == 0
    Do, Ho, Wo = (D - 1) // s + 1, (H - 1) // s + 1, (W - 1) // s + 1
    Dp, Hp, Wp = D + 2, H + 2, W + 2
    WK = Wp * Cin

    xp = jnp.pad(x.astype(jnp.bfloat16), ((0, 0), (1, 1), (1, 1), (1, 1), (0, 0)))
    xp = xp.reshape(N, Dp, Hp, WK)
    if s == 1:
        DPH = HPH = 1
        Dq, Hq = Dp, Hp
        xq = xp.reshape(N, Dq, 1, 1, Hq, WK)
    else:
        DPH = HPH = 2
        Dq, Hq = Dp // 2, Hp // 2
        xq = xp.reshape(N, Dq, 2, Hq, 2, WK).transpose(0, 1, 2, 4, 3, 5)
        # -> (N, Dq, depth-phase, h-phase, Hq, WK); all in-kernel slices contiguous.

    T = _pick_depth_tile(Do, Ho)                    # item 2
    n_dt = Do // T
    Wt = _pick_w_tile(Wo, Cin, Cout, stride=s, halo=2)   # items 1 & 8
    n_wt = Wo // Wt
    WKt = (s * Wt + 2) * Cin
    Nt = Wt * Cout

    wband = _banded_conv_weights(w, Wt, s)                       # (9, WKt, Nt)
    srow = jnp.tile(scale.astype(jnp.float32), Wt).reshape(1, Nt)
    brow = jnp.tile(bias.astype(jnp.float32), Wt).reshape(1, Nt)

    main_spec = pl.BlockSpec((None, T, DPH, HPH, Hq, WK),
                             lambda n, t: (n, t, 0, 0, 0, 0))
    halo_specs = [pl.BlockSpec((None, 1, 1, HPH, Hq, WK),
                               lambda n, t, _j=j: (n, (t + 1) * T + _j, 0, 0, 0, 0))
                  for j in range(3 - s)]
    in_specs = [main_spec, *halo_specs,
                _const_operand_spec(wband.shape),
                _const_operand_spec(srow.shape),
                _const_operand_spec(brow.shape)]
    args = [xq] * (1 + (3 - s)) + [wband, srow, brow]
    if residual is not None:
        rr = residual.astype(jnp.bfloat16).reshape(N, Do, Ho, Wo * Cout)
        in_specs.append(pl.BlockSpec((None, T, Ho, Wo * Cout),
                                     lambda n, t: (n, t, 0, 0)))
        args.append(rr)

    kernel = functools.partial(_conv_bn_kernel, stride=s, T=T, Ho=Ho, Wo=Wo,
                               Wt=Wt, Cin=Cin, Cout=Cout, relu=relu,
                               has_res=residual is not None)

    flops = 2 * N * n_dt * 9 * n_wt * (T * Ho) * WKt * Nt
    in_bytes = N * n_dt * (T * DPH + (3 - s)) * HPH * Hq * WK * 2
    out_bytes = N * Do * Ho * Wo * Cout * 2
    res_bytes = out_bytes if residual is not None else 0
    w_bytes = wband.size * 2 + 2 * Nt * 4

    out = pl.pallas_call(
        kernel,
        out_shape=jax.ShapeDtypeStruct((N, Do, Ho, Wo * Cout), jnp.bfloat16),
        grid=(N, n_dt),
        in_specs=in_specs,
        out_specs=pl.BlockSpec((None, T, Ho, Wo * Cout), lambda n, t: (n, t, 0, 0)),
        compiler_params=pltpu.CompilerParams(
            dimension_semantics=("parallel", "parallel"),
            vmem_limit_bytes=32 * 1024 * 1024),
        cost_estimate=pl.CostEstimate(
            flops=int(flops), transcendentals=0,
            bytes_accessed=int(in_bytes + out_bytes + res_bytes + w_bytes)),
    )(*args)
    return out.reshape(N, Do, Ho, Wo, Cout)


def deconv3d_bn(x, w_t, scale, bias, *, relu, residual=None):
    """ConvTranspose3d(k=3, stride=2, pad=1, output_pad=1, bias=False) + BN.
    x: (N, Di, Hi, Wi, Cin) bf16 NDHWC; w_t: (Cin, Cout, 3,3,3) PyTorch layout.
    residual (optional): (N, 2Di, 2Hi, 2Wi, Cout).  Returns bf16 NDHWC."""
    N, Di, Hi, Wi, Cin = x.shape
    Cout = w_t.shape[1]
    WK = (Wi + 1) * Cin

    xp = jnp.pad(x.astype(jnp.bfloat16), ((0, 0), (0, 1), (0, 1), (0, 1), (0, 0)))
    xp = xp.reshape(N, Di + 1, Hi + 1, WK)

    T = _pick_depth_tile(Di, Hi)
    n_dt = Di // T
    Wt = _pick_w_tile(Wi, Cin, Cout, stride=1, halo=1)
    n_wt = Wi // Wt
    Nt = Wt * Cout

    wband = _banded_deconv_weights(w_t, Wt)                # (18, (Wt+1)*Cin, Nt)
    srow = jnp.tile(scale.astype(jnp.float32), Wt).reshape(1, Nt)
    brow = jnp.tile(bias.astype(jnp.float32), Wt).reshape(1, Nt)

    main_spec = pl.BlockSpec((None, T, Hi + 1, WK), lambda n, t: (n, t, 0, 0))
    halo_spec = pl.BlockSpec((None, 1, Hi + 1, WK), lambda n, t: (n, (t + 1) * T, 0, 0))
    in_specs = [main_spec, halo_spec,
                _const_operand_spec(wband.shape),
                _const_operand_spec(srow.shape),
                _const_operand_spec(brow.shape)]
    args = [xp, xp, wband, srow, brow]
    if residual is not None:
        r = residual.astype(jnp.bfloat16).reshape(N, Di, 2, Hi, 2, Wi, 2, Cout)
        r = r.transpose(0, 1, 2, 4, 6, 3, 5, 7).reshape(N, Di, 8, Hi, Wi * Cout)
        in_specs.append(pl.BlockSpec((None, T, 8, Hi, Wi * Cout),
                                     lambda n, t: (n, t, 0, 0, 0)))
        args.append(r)

    kernel = functools.partial(_deconv_bn_kernel, T=T, Hi=Hi, Wi=Wi, Wt=Wt,
                               Cin=Cin, Cout=Cout, relu=relu,
                               has_res=residual is not None)

    flops = 2 * N * n_dt * 18 * n_wt * (T * Hi) * ((Wt + 1) * Cin) * Nt
    in_bytes = N * n_dt * (T + 1) * (Hi + 1) * WK * 2
    out_bytes = N * Di * 8 * Hi * Wi * Cout * 2
    res_bytes = out_bytes if residual is not None else 0
    w_bytes = wband.size * 2 + 2 * Nt * 4

    out = pl.pallas_call(
        kernel,
        out_shape=jax.ShapeDtypeStruct((N, Di, 8, Hi, Wi * Cout), jnp.bfloat16),
        grid=(N, n_dt),
        in_specs=in_specs,
        out_specs=pl.BlockSpec((None, T, 8, Hi, Wi * Cout),
                               lambda n, t: (n, t, 0, 0, 0)),
        compiler_params=pltpu.CompilerParams(
            dimension_semantics=("parallel", "parallel"),
            vmem_limit_bytes=32 * 1024 * 1024),
        cost_estimate=pl.CostEstimate(
            flops=int(flops), transcendentals=0,
            bytes_accessed=int(in_bytes + out_bytes + res_bytes + w_bytes)),
    )(*args)
    out = out.reshape(N, Di, 2, 2, 2, Hi, Wi, Cout)
    out = out.transpose(0, 1, 2, 5, 3, 6, 4, 7).reshape(N, 2 * Di, 2 * Hi, 2 * Wi, Cout)
    return out


# ------------------------------ parameter setup ------------------------------- #

def _bn_fold(key, c):
    k1, k2, k3, k4 = jax.random.split(key, 4)
    gamma = 1.0 + 0.1 * jax.random.normal(k1, (c,), jnp.float32)
    beta = 0.1 * jax.random.normal(k2, (c,), jnp.float32)
    mean = 0.1 * jax.random.normal(k3, (c,), jnp.float32)
    var = 1.0 + 0.1 * jax.random.uniform(k4, (c,), jnp.float32)
    scale = gamma / jnp.sqrt(var + _BN_EPS)
    bias = beta - mean * scale
    return scale, bias


def _conv_weight(key, cout, cin, k=3):
    fan_in = cin * k ** 3
    w = jax.random.normal(key, (cout, cin, k, k, k), jnp.float32) / math.sqrt(fan_in)
    return jnp.transpose(w, (2, 3, 4, 1, 0))              # (k,k,k,Cin,Cout)


def _deconv_weight(key, cin, cout, k=3):
    fan_in = cin * k ** 3
    return jax.random.normal(key, (cin, cout, k, k, k), jnp.float32) / math.sqrt(fan_in)


def init_hourglass_params(key, inplanes):
    ks = jax.random.split(key, 12)
    p = {}
    p['conv1_w'] = _conv_weight(ks[0], inplanes * 2, inplanes)
    p['conv1_s'], p['conv1_b'] = _bn_fold(ks[1], inplanes * 2)
    p['conv2_w'] = _conv_weight(ks[2], inplanes * 2, inplanes * 2)
    p['conv2_s'], p['conv2_b'] = _bn_fold(ks[3], inplanes * 2)
    p['conv3_w'] = _conv_weight(ks[4], inplanes * 2, inplanes * 2)
    p['conv3_s'], p['conv3_b'] = _bn_fold(ks[5], inplanes * 2)
    p['conv4_w'] = _conv_weight(ks[6], inplanes * 2, inplanes * 2)
    p['conv4_s'], p['conv4_b'] = _bn_fold(ks[7], inplanes * 2)
    p['conv5_w'] = _deconv_weight(ks[8], inplanes * 2, inplanes * 2)
    p['conv5_s'], p['conv5_b'] = _bn_fold(ks[9], inplanes * 2)
    p['conv6_w'] = _deconv_weight(ks[10], inplanes * 2, inplanes)
    p['conv6_s'], p['conv6_b'] = _bn_fold(ks[11], inplanes)
    return p


# --------------------------------- forward ------------------------------------ #

def hourglass_forward(p, x, presqu=None, postsqu=None):
    """x, presqu, postsqu and all outputs in NCDHW (PyTorch convention).
    Internally runs NDHWC in bf16; only the returned tensors are cast to f32."""
    to_cl = lambda t: jnp.transpose(t, (0, 2, 3, 4, 1)).astype(jnp.bfloat16)
    to_cf = lambda t: jnp.transpose(t, (0, 4, 1, 2, 3)).astype(jnp.float32)

    xl = to_cl(x)
    out = conv3d_bn(xl, p['conv1_w'], p['conv1_s'], p['conv1_b'],
                    stride=2, relu=True)
    post_res = to_cl(postsqu) if postsqu is not None else None
    pre = conv3d_bn(out, p['conv2_w'], p['conv2_s'], p['conv2_b'],
                    stride=1, relu=True, residual=post_res)
    out = conv3d_bn(pre, p['conv3_w'], p['conv3_s'], p['conv3_b'],
                    stride=2, relu=True)
    out = conv3d_bn(out, p['conv4_w'], p['conv4_s'], p['conv4_b'],
                    stride=1, relu=True)
    res5 = to_cl(presqu) if presqu is not None else pre
    post = deconv3d_bn(out, p['conv5_w'], p['conv5_s'], p['conv5_b'],
                       relu=True, residual=res5)
    out = deconv3d_bn(post, p['conv6_w'], p['conv6_s'], p['conv6_b'],
                      relu=False)
    return to_cf(out), to_cf(pre), to_cf(post)


# ------------------------- pure-JAX reference (checks) ------------------------ #

def _ref_convbn(x, w, scale, bias, stride, relu, residual=None):
    y = jax.lax.conv_general_dilated(
        x, w, window_strides=(stride,) * 3, padding=[(1, 1)] * 3,
        dimension_numbers=('NDHWC', 'DHWIO', 'NDHWC'),
        precision=jax.lax.Precision.HIGHEST)
    y = y * scale + bias
    if residual is not None:
        y = y + residual
    return jnp.maximum(y, 0.0) if relu else y


def _ref_deconvbn(x, w_t, scale, bias, relu, residual=None):
    w_r = jnp.transpose(jnp.flip(w_t, axis=(2, 3, 4)), (2, 3, 4, 0, 1))
    y = jax.lax.conv_general_dilated(
        x, w_r, window_strides=(1, 1, 1), padding=[(1, 2)] * 3,
        lhs_dilation=(2, 2, 2),
        dimension_numbers=('NDHWC', 'DHWIO', 'NDHWC'),
        precision=jax.lax.Precision.HIGHEST)
    y = y * scale + bias
    if residual is not None:
        y = y + residual
    return jnp.maximum(y, 0.0) if relu else y


def hourglass_reference(p, x, presqu=None, postsqu=None):
    to_cl = lambda t: jnp.transpose(t, (0, 2, 3, 4, 1))
    to_cf = lambda t: jnp.transpose(t, (0, 4, 1, 2, 3))
    xl = to_cl(x)
    out = _ref_convbn(xl, p['conv1_w'], p['conv1_s'], p['conv1_b'], 2, True)
    post_res = to_cl(postsqu) if postsqu is not None else None
    pre = _ref_convbn(out, p['conv2_w'], p['conv2_s'], p['conv2_b'], 1, True, post_res)
    out = _ref_convbn(pre, p['conv3_w'], p['conv3_s'], p['conv3_b'], 2, True)
    out = _ref_convbn(out, p['conv4_w'], p['conv4_s'], p['conv4_b'], 1, True)
    res5 = to_cl(presqu) if presqu is not None else pre
    post = _ref_deconvbn(out, p['conv5_w'], p['conv5_s'], p['conv5_b'], True, res5)
    out = _ref_deconvbn(post, p['conv6_w'], p['conv6_s'], p['conv6_b'], False)
    return to_cf(out), to_cf(pre), to_cf(post)


# ----------------------------------- main -------------------------------------- #

if __name__ == "__main__":
    key = jax.random.PRNGKey(0)
    inplanes = 4
    Bn, D, H, W = 2, 8, 16, 16

    kp, kx, k1, k2 = jax.random.split(key, 4)
    params = init_hourglass_params(kp, inplanes)
    x = jax.random.normal(kx, (Bn, inplanes, D, H, W), jnp.float32)
    presqu = jax.random.normal(k1, (Bn, inplanes * 2, D // 2, H // 2, W // 2),
                               jnp.float32)
    postsqu = jax.random.normal(k2, (Bn, inplanes * 2, D // 2, H // 2, W // 2),
                                jnp.float32)

    fwd = jax.jit(hourglass_forward)
    out_a = fwd(params, x)                       # presqu=None, postsqu=None branch
    out_b = fwd(params, x, presqu, postsqu)      # residual branches
    jax.block_until_ready(out_a)
    jax.block_until_ready(out_b)

    # shape parity with the PyTorch module
    assert out_a[0].shape == (Bn, inplanes, D, H, W)
    assert out_a[1].shape == (Bn, inplanes * 2, D // 2, H // 2, W // 2)
    assert out_a[2].shape == (Bn, inplanes * 2, D // 2, H // 2, W // 2)

    # numerical check against a pure-JAX (XLA conv, f32) reference; bf16
    # inter-layer activations keep the end-to-end relative error ~1e-2.
    ref_a = hourglass_reference(params, x)
    ref_b = hourglass_reference(params, x, presqu, postsqu)
    for got, ref in list(zip(out_a, ref_a)) + list(zip(out_b, ref_b)):
        err = jnp.linalg.norm(got - ref) / (jnp.linalg.norm(ref) + 1e-6)
        assert float(err) < 5e-2, f"relative error too high: {float(err)}"

    print("KERNEL_OK")
</pallas_src>

<mosaic_0001>
module attributes {stable_mosaic.version = 11 : i64} {
  func.func @_conv_bn_kernel(%arg0: i32, %arg1: i32, %arg2: memref<1x4x2x2x9x72xbf16, #tpu.memory_space<vmem>>, %arg3: memref<1x1x1x2x9x72xbf16, #tpu.memory_space<vmem>>, %arg4: memref<9x72x64xbf16, #tpu.memory_space<vmem>>, %arg5: memref<1x64xf32, #tpu.memory_space<vmem>>, %arg6: memref<1x64xf32, #tpu.memory_space<vmem>>, %arg7: memref<1x4x8x64xbf16, #tpu.memory_space<vmem>>) attributes {dimension_semantics = [#tpu.dimension_semantics<parallel>, #tpu.dimension_semantics<parallel>], iteration_bounds = array<i64: 2, 1>, scalar_prefetch = 0 : i64, scratch_operands = 0 : i64, tpu.core_type = #tpu.core_type<tc>, window_params = [{transform_indices = @transform_0, window_bounds = array<i64: 1, 4, 2, 2, 9, 72>}, {transform_indices = @transform_1, window_bounds = array<i64: 1, 1, 1, 2, 9, 72>}, {pipeline_mode = #tpu.pipeline_mode<synchronous>, transform_indices = @transform_2, window_bounds = array<i64: 9, 72, 64>}, {pipeline_mode = #tpu.pipeline_mode<synchronous>, transform_indices = @transform_3, window_bounds = array<i64: 1, 64>}, {pipeline_mode = #tpu.pipeline_mode<synchronous>, transform_indices = @transform_4, window_bounds = array<i64: 1, 64>}, {transform_indices = @transform_5, window_bounds = array<i64: 1, 4, 8, 64>}]} {
    %c0 = arith.constant 0 : index
    %c0_0 = arith.constant 0 : index
    %c0_1 = arith.constant 0 : index
    %c0_2 = arith.constant 0 : index
    %c0_3 = arith.constant 0 : index
    %c0_4 = arith.constant 0 : index
    %0 = vector.load %arg3[%c0, %c0_0, %c0_1, %c0_2, %c0_3, %c0_4] : memref<1x1x1x2x9x72xbf16, #tpu.memory_space<vmem>>, vector<1x1x1x2x9x72xbf16>
    %1 = vector.shape_cast %0 : vector<1x1x1x2x9x72xbf16> to vector<1x1x2x9x72xbf16>
    %cst = arith.constant 0.000000e+00 : bf16
    %2 = vector.broadcast %cst : bf16 to vector<1x1x2x9x72xbf16>
    %3 = tpu.concatenate %1, %2 in 1 : vector<1x1x2x9x72xbf16>, vector<1x1x2x9x72xbf16> -> vector<1x2x2x9x72xbf16>
    %c0_5 = arith.constant 0 : index
    %c0_6 = arith.constant 0 : index
    %c0_7 = arith.constant 0 : index
    %c0_8 = arith.constant 0 : index
    %c0_9 = arith.constant 0 : index
    %c0_10 = arith.constant 0 : index
    %4 = vector.load %arg2[%c0_5, %c0_6, %c0_7, %c0_8, %c0_9, %c0_10] : memref<1x4x2x2x9x72xbf16, #tpu.memory_space<vmem>>, vector<1x4x2x2x9x72xbf16>
    %5 = vector.shape_cast %4 : vector<1x4x2x2x9x72xbf16> to vector<4x2x2x9x72xbf16>
    %6 = tpu.concatenate %5, %3 in 0 : vector<4x2x2x9x72xbf16>, vector<1x2x2x9x72xbf16> -> vector<5x2x2x9x72xbf16>
    %cst_11 = arith.constant 0.000000e+00 : f32
    %7 = vector.broadcast %cst_11 : f32 to vector<32x64xf32>
    %8 = vector.extract_strided_slice %6 {offsets = [0, 0, 0, 0, 0], sizes = [4, 1, 1, 8, 72], strides = [1, 1, 1, 1, 1]} : vector<5x2x2x9x72xbf16> to vector<4x1x1x8x72xbf16>
    %9 = vector.shape_cast %8 : vector<4x1x1x8x72xbf16> to vector<4x8x72xbf16>
    %10 = vector.shape_cast %9 : vector<4x8x72xbf16> to vector<32x72xbf16>
    %c0_12 = arith.constant 0 : index
    %c0_13 = arith.constant 0 : index
    %c0_14 = arith.constant 0 : index
    %11 = vector.load %arg4[%c0_12, %c0_13, %c0_14] : memref<9x72x64xbf16, #tpu.memory_space<vmem>>, vector<1x72x64xbf16>
    %12 = vector.shape_cast %11 : vector<1x72x64xbf16> to vector<72x64xbf16>
    %cst_15 = arith.constant dense<0.000000e+00> : vector<32x64xf32>
    %13 = tpu.matmul %10, %12, %cst_15 {dimension_numbers = #tpu.dot_dimension_numbers<[1], [0], [0], [1], [0, 0, 1, 1], [], []>} : vector<32x72xbf16>, vector<72x64xbf16>, vector<32x64xf32> -> vector<32x64xf32>
    %14 = arith.addf %7, %13 : vector<32x64xf32>
    %15 = vector.extract_strided_slice %6 {offsets = [0, 0, 1, 0, 0], sizes = [4, 1, 1, 8, 72], strides = [1, 1, 1, 1, 1]} : vector<5x2x2x9x72xbf16> to vector<4x1x1x8x72xbf16>
    %16 = vector.shape_cast %15 : vector<4x1x1x8x72xbf16> to vector<4x8x72xbf16>
    %17 = vector.shape_cast %16 : vector<4x8x72xbf16> to vector<32x72xbf16>
    %c1 = arith.constant 1 : index
    %c0_16 = arith.constant 0 : index
    %c0_17 = arith.constant 0 : index
    %18 = vector.load %arg4[%c1, %c0_16, %c0_17] : memref<9x72x64xbf16, #tpu.memory_space<vmem>>, vector<1x72x64xbf16>
    %19 = vector.shape_cast %18 : vector<1x72x64xbf16> to vector<72x64xbf16>
    %cst_18 = arith.constant dense<0.000000e+00> : vector<32x64xf32>
    %20 = tpu.matmul %17, %19, %cst_18 {dimension_numbers = #tpu.dot_dimension_numbers<[1], [0], [0], [1], [0, 0, 1, 1], [], []>} : vector<32x72xbf16>, vector<72x64xbf16>, vector<32x64xf32> -> vector<32x64xf32>
    %21 = arith.addf %14, %20 : vector<32x64xf32>
    %22 = vector.extract_strided_slice %6 {offsets = [0, 0, 0, 1, 0], sizes = [4, 1, 1, 8, 72], strides = [1, 1, 1, 1, 1]} : vector<5x2x2x9x72xbf16> to vector<4x1x1x8x72xbf16>
    %23 = vector.shape_cast %22 : vector<4x1x1x8x72xbf16> to vector<4x8x72xbf16>
    %24 = vector.shape_cast %23 : vector<4x8x72xbf16> to vector<32x72xbf16>
    %c2 = arith.constant 2 : index
    %c0_19 = arith.constant 0 : index
    %c0_20 = arith.constant 0 : index
    %25 = vector.load %arg4[%c2, %c0_19, %c0_20] : memref<9x72x64xbf16, #tpu.memory_space<vmem>>, vector<1x72x64xbf16>
    %26 = vector.shape_cast %25 : vector<1x72x64xbf16> to vector<72x64xbf16>
    %cst_21 = arith.constant dense<0.000000e+00> : vector<32x64xf32>
    %27 = tpu.matmul %24, %26, %cst_21 {dimension_numbers = #tpu.dot_dimension_numbers<[1], [0], [0], [1], [0, 0, 1, 1], [], []>} : vector<32x72xbf16>, vector<72x64xbf16>, vector<32x64xf32> -> vector<32x64xf32>
    %28 = arith.addf %21, %27 : vector<32x64xf32>
    %29 = vector.extract_strided_slice %6 {offsets = [0, 1, 0, 0, 0], sizes = [4, 1, 1, 8, 72], strides = [1, 1, 1, 1, 1]} : vector<5x2x2x9x72xbf16> to vector<4x1x1x8x72xbf16>
    %30 = vector.shape_cast %29 : vector<4x1x1x8x72xbf16> to vector<4x8x72xbf16>
    %31 = vector.shape_cast %30 : vector<4x8x72xbf16> to vector<32x72xbf16>
    %c3 = arith.constant 3 : index
    %c0_22 = arith.constant 0 : index
    %c0_23 = arith.constant 0 : index
    %32 = vector.load %arg4[%c3, %c0_22, %c0_23] : memref<9x72x64xbf16, #tpu.memory_space<vmem>>, vector<1x72x64xbf16>
    %33 = vector.shape_cast %32 : vector<1x72x64xbf16> to vector<72x64xbf16>
    %cst_24 = arith.constant dense<0.000000e+00> : vector<32x64xf32>
    %34 = tpu.matmul %31, %33, %cst_24 {dimension_numbers = #tpu.dot_dimension_numbers<[1], [0], [0], [1], [0, 0, 1, 1], [], []>} : vector<32x72xbf16>, vector<72x64xbf16>, vector<32x64xf32> -> vector<32x64xf32>
    %35 = arith.addf %28, %34 : vector<32x64xf32>
    %36 = vector.extract_strided_slice %6 {offsets = [0, 1, 1, 0, 0], sizes = [4, 1, 1, 8, 72], strides = [1, 1, 1, 1, 1]} : vector<5x2x2x9x72xbf16> to vector<4x1x1x8x72xbf16>
    %37 = vector.shape_cast %36 : vector<4x1x1x8x72xbf16> to vector<4x8x72xbf16>
    %38 = vector.shape_cast %37 : vector<4x8x72xbf16> to vector<32x72xbf16>
    %c4 = arith.constant 4 : index
    %c0_25 = arith.constant 0 : index
    %c0_26 = arith.constant 0 : index
    %39 = vector.load %arg4[%c4, %c0_25, %c0_26] : memref<9x72x64xbf16, #tpu.memory_space<vmem>>, vector<1x72x64xbf16>
    %40 = vector.shape_cast %39 : vector<1x72x64xbf16> to vector<72x64xbf16>
    %cst_27 = arith.constant dense<0.000000e+00> : vector<32x64xf32>
    %41 = tpu.matmul %38, %40, %cst_27 {dimension_numbers = #tpu.dot_dimension_numbers<[1], [0], [0], [1], [0, 0, 1, 1], [], []>} : vector<32x72xbf16>, vector<72x64xbf16>, vector<32x64xf32> -> vector<32x64xf32>
    %42 = arith.addf %35, %41 : vector<32x64xf32>
    %43 = vector.extract_strided_slice %6 {offsets = [0, 1, 0, 1, 0], sizes = [4, 1, 1, 8, 72], strides = [1, 1, 1, 1, 1]} : vector<5x2x2x9x72xbf16> to vector<4x1x1x8x72xbf16>
    %44 = vector.shape_cast %43 : vector<4x1x1x8x72xbf16> to vector<4x8x72xbf16>
    %45 = vector.shape_cast %44 : vector<4x8x72xbf16> to vector<32x72xbf16>
    %c5 = arith.constant 5 : index
    %c0_28 = arith.constant 0 : index
    %c0_29 = arith.constant 0 : index
    %46 = vector.load %arg4[%c5, %c0_28, %c0_29] : memref<9x72x64xbf16, #tpu.memory_space<vmem>>, vector<1x72x64xbf16>
    %47 = vector.shape_cast %46 : vector<1x72x64xbf16> to vector<72x64xbf16>
    %cst_30 = arith.constant dense<0.000000e+00> : vector<32x64xf32>
    %48 = tpu.matmul %45, %47, %cst_30 {dimension_numbers = #tpu.dot_dimension_numbers<[1], [0], [0], [1], [0, 0, 1, 1], [], []>} : vector<32x72xbf16>, vector<72x64xbf16>, vector<32x64xf32> -> vector<32x64xf32>
    %49 = arith.addf %42, %48 : vector<32x64xf32>
    %50 = vector.extract_strided_slice %6 {offsets = [1, 0, 0, 0, 0], sizes = [4, 1, 1, 8, 72], strides = [1, 1, 1, 1, 1]} : vector<5x2x2x9x72xbf16> to vector<4x1x1x8x72xbf16>
    %51 = vector.shape_cast %50 : vector<4x1x1x8x72xbf16> to vector<4x8x72xbf16>
    %52 = vector.shape_cast %51 : vector<4x8x72xbf16> to vector<32x72xbf16>
    %c6 = arith.constant 6 : index
    %c0_31 = arith.constant 0 : index
    %c0_32 = arith.constant 0 : index
    %53 = vector.load %arg4[%c6, %c0_31, %c0_32] : memref<9x72x64xbf16, #tpu.memory_space<vmem>>, vector<1x72x64xbf16>
    %54 = vector.shape_cast %53 : vector<1x72x64xbf16> to vector<72x64xbf16>
    %cst_33 = arith.constant dense<0.000000e+00> : vector<32x64xf32>
    %55 = tpu.matmul %52, %54, %cst_33 {dimension_numbers = #tpu.dot_dimension_numbers<[1], [0], [0], [1], [0, 0, 1, 1], [], []>} : vector<32x72xbf16>, vector<72x64xbf16>, vector<32x64xf32> -> vector<32x64xf32>
    %56 = arith.addf %49, %55 : vector<32x64xf32>
    %57 = vector.extract_strided_slice %6 {offsets = [1, 0, 1, 0, 0], sizes = [4, 1, 1, 8, 72], strides = [1, 1, 1, 1, 1]} : vector<5x2x2x9x72xbf16> to vector<4x1x1x8x72xbf16>
    %58 = vector.shape_cast %57 : vector<4x1x1x8x72xbf16> to vector<4x8x72xbf16>
    %59 = vector.shape_cast %58 : vector<4x8x72xbf16> to vector<32x72xbf16>
    %c7 = arith.constant 7 : index
    %c0_34 = arith.constant 0 : index
    %c0_35 = arith.constant 0 : index
    %60 = vector.load %arg4[%c7, %c0_34, %c0_35] : memref<9x72x64xbf16, #tpu.memory_space<vmem>>, vector<1x72x64xbf16>
    %61 = vector.shape_cast %60 : vector<1x72x64xbf16> to vector<72x64xbf16>
    %cst_36 = arith.constant dense<0.000000e+00> : vector<32x64xf32>
    %62 = tpu.matmul %59, %61, %cst_36 {dimension_numbers = #tpu.dot_dimension_numbers<[1], [0], [0], [1], [0, 0, 1, 1], [], []>} : vector<32x72xbf16>, vector<72x64xbf16>, vector<32x64xf32> -> vector<32x64xf32>
    %63 = arith.addf %56, %62 : vector<32x64xf32>
    %64 = vector.extract_strided_slice %6 {offsets = [1, 0, 0, 1, 0], sizes = [4, 1, 1, 8, 72], strides = [1, 1, 1, 1, 1]} : vector<5x2x2x9x72xbf16> to vector<4x1x1x8x72xbf16>
    %65 = vector.shape_cast %64 : vector<4x1x1x8x72xbf16> to vector<4x8x72xbf16>
    %66 = vector.shape_cast %65 : vector<4x8x72xbf16> to vector<32x72xbf16>
    %c8 = arith.constant 8 : index
    %c0_37 = arith.constant 0 : index
    %c0_38 = arith.constant 0 : index
    %67 = vector.load %arg4[%c8, %c0_37, %c0_38] : memref<9x72x64xbf16, #tpu.memory_space<vmem>>, vector<1x72x64xbf16>
    %68 = vector.shape_cast %67 : vector<1x72x64xbf16> to vector<72x64xbf16>
    %cst_39 = arith.constant dense<0.000000e+00> : vector<32x64xf32>
    %69 = tpu.matmul %66, %68, %cst_39 {dimension_numbers = #tpu.dot_dimension_numbers<[1], [0], [0], [1], [0, 0, 1, 1], [], []>} : vector<32x72xbf16>, vector<72x64xbf16>, vector<32x64xf32> -> vector<32x64xf32>
    %70 = arith.addf %63, %69 : vector<32x64xf32>
    %c0_40 = arith.constant 0 : index
    %c0_41 = arith.constant 0 : index
    %71 = vector.load %arg5[%c0_40, %c0_41] : memref<1x64xf32, #tpu.memory_space<vmem>>, vector<1x64xf32>
    %72 = vector.broadcast %71 : vector<1x64xf32> to vector<32x64xf32>
    %73 = arith.mulf %70, %72 : vector<32x64xf32>
    %c0_42 = arith.constant 0 : index
    %c0_43 = arith.constant 0 : index
    %74 = vector.load %arg6[%c0_42, %c0_43] : memref<1x64xf32, #tpu.memory_space<vmem>>, vector<1x64xf32>
    %75 = vector.broadcast %74 : vector<1x64xf32> to vector<32x64xf32>
    %76 = arith.addf %73, %75 : vector<32x64xf32>
    %cst_44 = arith.constant 0.000000e+00 : f32
    %77 = vector.broadcast %cst_44 : f32 to vector<32x64xf32>
    %78 = arith.maximumf %76, %77 : vector<32x64xf32>
    %79 = vector.shape_cast %78 : vector<32x64xf32> to vector<4x8x64xf32>
    %80 = arith.truncf %79 : vector<4x8x64xf32> to vector<4x8x64xbf16>
    %c0_45 = arith.constant 0 : index
    %c0_46 = arith.constant 0 : index
    %c0_47 = arith.constant 0 : index
    %c0_48 = arith.constant 0 : index
    %81 = vector.load %arg7[%c0_45, %c0_46, %c0_47, %c0_48] : memref<1x4x8x64xbf16, #tpu.memory_space<vmem>>, vector<1x4x8x64xbf16>
    %82 = vector.shape_cast %81 : vector<1x4x8x64xbf16> to vector<4x8x64xbf16>
    %83 = vector.shape_cast %80 : vector<4x8x64xbf16> to vector<1x4x8x64xbf16>
    tpu.vector_store %arg7[%c0_45, %c0_46, %c0_47, %c0_48], %83 {strides = array<i32>} : memref<1x4x8x64xbf16, #tpu.memory_space<vmem>>, vector<1x4x8x64xbf16>,
    return
  }
  func.func @transform_0(%arg0: i32, %arg1: i32) -> (i32, i32, i32, i32, i32, i32) {
    %c0_i32 = arith.constant 0 : i32
    %c0_i32_0 = arith.constant 0 : i32
    %c0_i32_1 = arith.constant 0 : i32
    %c0_i32_2 = arith.constant 0 : i32
    %c0_i32_3 = arith.constant 0 : i32
    return %arg0, %arg1, %c0_i32, %c0_i32_0, %c0_i32_1, %c0_i32_2 : i32, i32, i32, i32, i32, i32
  }
  func.func @transform_1(%arg0: i32, %arg1: i32) -> (i32, i32, i32, i32, i32, i32) {
    %c1_i32 = arith.constant 1 : i32
    %0 = arith.addi %arg1, %c1_i32 : i32
    %c4_i32 = arith.constant 4 : i32
    %1 = arith.muli %0, %c4_i32 : i32
    %c0_i32 = arith.constant 0 : i32
    %2 = arith.addi %1, %c0_i32 : i32
    %c0_i32_0 = arith.constant 0 : i32
    %c0_i32_1 = arith.constant 0 : i32
    %c0_i32_2 = arith.constant 0 : i32
    %c0_i32_3 = arith.constant 0 : i32
    %c0_i32_4 = arith.constant 0 : i32
    return %arg0, %2, %c0_i32_0, %c0_i32_1, %c0_i32_2, %c0_i32_3 : i32, i32, i32, i32, i32, i32
  }
  func.func @transform_2(%arg0: i32, %arg1: i32) -> (i32, i32, i32) {
    %c0_i32 = arith.constant 0 : i32
    %c0_i32_0 = arith.constant 0 : i32
    %c0_i32_1 = arith.constant 0 : i32
    %c0_i32_2 = arith.constant 0 : i32
    return %c0_i32, %c0_i32_0, %c0_i32_1 : i32, i32, i32
  }
  func.func @transform_3(%arg0: i32, %arg1: i32) -> (i32, i32) {
    %c0_i32 = arith.constant 0 : i32
    %c0_i32_0 = arith.constant 0 : i32
    %c0_i32_1 = arith.constant 0 : i32
    return %c0_i32, %c0_i32_0 : i32, i32
  }
  func.func @transform_4(%arg0: i32, %arg1: i32) -> (i32, i32) {
    %c0_i32 = arith.constant 0 : i32
    %c0_i32_0 = arith.constant 0 : i32
    %c0_i32_1 = arith.constant 0 : i32
    return %c0_i32, %c0_i32_0 : i32, i32
  }
  func.func @transform_5(%arg0: i32, %arg1: i32) -> (i32, i32, i32, i32) {
    %c0_i32 = arith.constant 0 : i32
    %c0_i32_0 = arith.constant 0 : i32
    %c0_i32_1 = arith.constant 0 : i32
    return %arg0, %arg1, %c0_i32, %c0_i32_0 : i32, i32, i32, i32
  }
}

module attributes {stable_mosaic.version = 11 : i64} {
  func.func @_conv_bn_kernel(%arg0: i32, %arg1: i32, %arg2: memref<1x4x1x1x10x80xbf16, #tpu.memory_space<vmem>>, %arg3: memref<1x1x1x1x10x80xbf16, #tpu.memory_space<vmem>>, %arg4: memref<1x1x1x1x10x80xbf16, #tpu.memory_space<vmem>>, %arg5: memref<9x80x64xbf16, #tpu.memory_space<vmem>>, %arg6: memref<1x64xf32, #tpu.memory_space<vmem>>, %arg7: memref<1x64xf32, #tpu.memory_space<vmem>>, %arg8: memref<1x4x8x64xbf16, #tpu.memory_space<vmem>>) attributes {dimension_semantics = [#tpu.dimension_semantics<parallel>, #tpu.dimension_semantics<parallel>], iteration_bounds = array<i64: 2, 1>, scalar_prefetch = 0 : i64, scratch_operands = 0 : i64, tpu.core_type = #tpu.core_type<tc>, window_params = [{transform_indices = @transform_0, window_bounds = array<i64: 1, 4, 1, 1, 10, 80>}, {transform_indices = @transform_1, window_bounds = array<i64: 1, 1, 1, 1, 10, 80>}, {transform_indices = @transform_2, window_bounds = array<i64: 1, 1, 1, 1, 10, 80>}, {pipeline_mode = #tpu.pipeline_mode<synchronous>, transform_indices = @transform_3, window_bounds = array<i64: 9, 80, 64>}, {pipeline_mode = #tpu.pipeline_mode<synchronous>, transform_indices = @transform_4, window_bounds = array<i64: 1, 64>}, {pipeline_mode = #tpu.pipeline_mode<synchronous>, transform_indices = @transform_5, window_bounds = array<i64: 1, 64>}, {transform_indices = @transform_6, window_bounds = array<i64: 1, 4, 8, 64>}]} {
    %c0 = arith.constant 0 : index
    %c0_0 = arith.constant 0 : index
    %c0_1 = arith.constant 0 : index
    %c0_2 = arith.constant 0 : index
    %c0_3 = arith.constant 0 : index
    %c0_4 = arith.constant 0 : index
    %0 = vector.load %arg2[%c0, %c0_0, %c0_1, %c0_2, %c0_3, %c0_4] : memref<1x4x1x1x10x80xbf16, #tpu.memory_space<vmem>>, vector<1x4x1x1x10x80xbf16>
    %1 = vector.shape_cast %0 : vector<1x4x1x1x10x80xbf16> to vector<4x1x1x10x80xbf16>
    %c0_5 = arith.constant 0 : index
    %c0_6 = arith.constant 0 : index
    %c0_7 = arith.constant 0 : index
    %c0_8 = arith.constant 0 : index
    %c0_9 = arith.constant 0 : index
    %c0_10 = arith.constant 0 : index
    %2 = vector.load %arg3[%c0_5, %c0_6, %c0_7, %c0_8, %c0_9, %c0_10] : memref<1x1x1x1x10x80xbf16, #tpu.memory_space<vmem>>, vector<1x1x1x1x10x80xbf16>
    %3 = vector.shape_cast %2 : vector<1x1x1x1x10x80xbf16> to vector<1x1x1x10x80xbf16>
    %c0_11 = arith.constant 0 : index
    %c0_12 = arith.constant 0 : index
    %c0_13 = arith.constant 0 : index
    %c0_14 = arith.constant 0 : index
    %c0_15 = arith.constant 0 : index
    %c0_16 = arith.constant 0 : index
    %4 = vector.load %arg4[%c0_11, %c0_12, %c0_13, %c0_14, %c0_15, %c0_16] : memref<1x1x1x1x10x80xbf16, #tpu.memory_space<vmem>>, vector<1x1x1x1x10x80xbf16>
    %5 = vector.shape_cast %4 : vector<1x1x1x1x10x80xbf16> to vector<1x1x1x10x80xbf16>
    %6 = tpu.concatenate %1, %3, %5 in 0 : vector<4x1x1x10x80xbf16>, vector<1x1x1x10x80xbf16>, vector<1x1x1x10x80xbf16> -> vector<6x1x1x10x80xbf16>
    %cst = arith.constant 0.000000e+00 : f32
    %7 = vector.broadcast %cst : f32 to vector<32x64xf32>
    %8 = vector.extract_strided_slice %6 {offsets = [0, 0, 0, 0, 0], sizes = [4, 1, 1, 8, 80], strides = [1, 1, 1, 1, 1]} : vector<6x1x1x10x80xbf16> to vector<4x1x1x8x80xbf16>
    %9 = vector.shape_cast %8 : vector<4x1x1x8x80xbf16> to vector<4x8x80xbf16>
    %10 = vector.shape_cast %9 : vector<4x8x80xbf16> to vector<32x80xbf16>
    %c0_17 = arith.constant 0 : index
    %c0_18 = arith.constant 0 : index
    %c0_19 = arith.constant 0 : index
    %11 = vector.load %arg5[%c0_17, %c0_18, %c0_19] : memref<9x80x64xbf16, #tpu.memory_space<vmem>>, vector<1x80x64xbf16>
    %12 = vector.shape_cast %11 : vector<1x80x64xbf16> to vector<80x64xbf16>
    %cst_20 = arith.constant dense<0.000000e+00> : vector<32x64xf32>
    %13 = tpu.matmul %10, %12, %cst_20 {dimension_numbers = #tpu.dot_dimension_numbers<[1], [0], [0], [1], [0, 0, 1, 1], [], []>} : vector<32x80xbf16>, vector<80x64xbf16>, vector<32x64xf32> -> vector<32x64xf32>
    %14 = arith.addf %7, %13 : vector<32x64xf32>
    %15 = vector.extract_strided_slice %6 {offsets = [0, 0, 0, 1, 0], sizes = [4, 1, 1, 8, 80], strides = [1, 1, 1, 1, 1]} : vector<6x1x1x10x80xbf16> to vector<4x1x1x8x80xbf16>
    %16 = vector.shape_cast %15 : vector<4x1x1x8x80xbf16> to vector<4x8x80xbf16>
    %17 = vector.shape_cast %16 : vector<4x8x80xbf16> to vector<32x80xbf16>
    %c1 = arith.constant 1 : index
    %c0_21 = arith.constant 0 : index
    %c0_22 = arith.constant 0 : index
    %18 = vector.load %arg5[%c1, %c0_21, %c0_22] : memref<9x80x64xbf16, #tpu.memory_space<vmem>>, vector<1x80x64xbf16>
    %19 = vector.shape_cast %18 : vector<1x80x64xbf16> to vector<80x64xbf16>
    %cst_23 = arith.constant dense<0.000000e+00> : vector<32x64xf32>
    %20 = tpu.matmul %17, %19, %cst_23 {dimension_numbers = #tpu.dot_dimension_numbers<[1], [0], [0], [1], [0, 0, 1, 1], [], []>} : vector<32x80xbf16>, vector<80x64xbf16>, vector<32x64xf32> -> vector<32x64xf32>
    %21 = arith.addf %14, %20 : vector<32x64xf32>
    %22 = vector.extract_strided_slice %6 {offsets = [0, 0, 0, 2, 0], sizes = [4, 1, 1, 8, 80], strides = [1, 1, 1, 1, 1]} : vector<6x1x1x10x80xbf16> to vector<4x1x1x8x80xbf16>
    %23 = vector.shape_cast %22 : vector<4x1x1x8x80xbf16> to vector<4x8x80xbf16>
    %24 = vector.shape_cast %23 : vector<4x8x80xbf16> to vector<32x80xbf16>
    %c2 = arith.constant 2 : index
    %c0_24 = arith.constant 0 : index
    %c0_25 = arith.constant 0 : index
    %25 = vector.load %arg5[%c2, %c0_24, %c0_25] : memref<9x80x64xbf16, #tpu.memory_space<vmem>>, vector<1x80x64xbf16>
    %26 = vector.shape_cast %25 : vector<1x80x64xbf16> to vector<80x64xbf16>
    %cst_26 = arith.constant dense<0.000000e+00> : vector<32x64xf32>
    %27 = tpu.matmul %24, %26, %cst_26 {dimension_numbers = #tpu.dot_dimension_numbers<[1], [0], [0], [1], [0, 0, 1, 1], [], []>} : vector<32x80xbf16>, vector<80x64xbf16>, vector<32x64xf32> -> vector<32x64xf32>
    %28 = arith.addf %21, %27 : vector<32x64xf32>
    %29 = vector.extract_strided_slice %6 {offsets = [1, 0, 0, 0, 0], sizes = [4, 1, 1, 8, 80], strides = [1, 1, 1, 1, 1]} : vector<6x1x1x10x80xbf16> to vector<4x1x1x8x80xbf16>
    %30 = vector.shape_cast %29 : vector<4x1x1x8x80xbf16> to vector<4x8x80xbf16>
    %31 = vector.shape_cast %30 : vector<4x8x80xbf16> to vector<32x80xbf16>
    %c3 = arith.constant 3 : index
    %c0_27 = arith.constant 0 : index
    %c0_28 = arith.constant 0 : index
    %32 = vector.load %arg5[%c3, %c0_27, %c0_28] : memref<9x80x64xbf16, #tpu.memory_space<vmem>>, vector<1x80x64xbf16>
    %33 = vector.shape_cast %32 : vector<1x80x64xbf16> to vector<80x64xbf16>
    %cst_29 = arith.constant dense<0.000000e+00> : vector<32x64xf32>
    %34 = tpu.matmul %31, %33, %cst_29 {dimension_numbers = #tpu.dot_dimension_numbers<[1], [0], [0], [1], [0, 0, 1, 1], [], []>} : vector<32x80xbf16>, vector<80x64xbf16>, vector<32x64xf32> -> vector<32x64xf32>
    %35 = arith.addf %28, %34 : vector<32x64xf32>
    %36 = vector.extract_strided_slice %6 {offsets = [1, 0, 0, 1, 0], sizes = [4, 1, 1, 8, 80], strides = [1, 1, 1, 1, 1]} : vector<6x1x1x10x80xbf16> to vector<4x1x1x8x80xbf16>
    %37 = vector.shape_cast %36 : vector<4x1x1x8x80xbf16> to vector<4x8x80xbf16>
    %38 = vector.shape_cast %37 : vector<4x8x80xbf16> to vector<32x80xbf16>
    %c4 = arith.constant 4 : index
    %c0_30 = arith.constant 0 : index
    %c0_31 = arith.constant 0 : index
    %39 = vector.load %arg5[%c4, %c0_30, %c0_31] : memref<9x80x64xbf16, #tpu.memory_space<vmem>>, vector<1x80x64xbf16>
    %40 = vector.shape_cast %39 : vector<1x80x64xbf16> to vector<80x64xbf16>
    %cst_32 = arith.constant dense<0.000000e+00> : vector<32x64xf32>
    %41 = tpu.matmul %38, %40, %cst_32 {dimension_numbers = #tpu.dot_dimension_numbers<[1], [0], [0], [1], [0, 0, 1, 1], [], []>} : vector<32x80xbf16>, vector<80x64xbf16>, vector<32x64xf32> -> vector<32x64xf32>
    %42 = arith.addf %35, %41 : vector<32x64xf32>
    %43 = vector.extract_strided_slice %6 {offsets = [1, 0, 0, 2, 0], sizes = [4, 1, 1, 8, 80], strides = [1, 1, 1, 1, 1]} : vector<6x1x1x10x80xbf16> to vector<4x1x1x8x80xbf16>
    %44 = vector.shape_cast %43 : vector<4x1x1x8x80xbf16> to vector<4x8x80xbf16>
    %45 = vector.shape_cast %44 : vector<4x8x80xbf16> to vector<32x80xbf16>
    %c5 = arith.constant 5 : index
    %c0_33 = arith.constant 0 : index
    %c0_34 = arith.constant 0 : index
    %46 = vector.load %arg5[%c5, %c0_33, %c0_34] : memref<9x80x64xbf16, #tpu.memory_space<vmem>>, vector<1x80x64xbf16>
    %47 = vector.shape_cast %46 : vector<1x80x64xbf16> to vector<80x64xbf16>
    %cst_35 = arith.constant dense<0.000000e+00> : vector<32x64xf32>
    %48 = tpu.matmul %45, %47, %cst_35 {dimension_numbers = #tpu.dot_dimension_numbers<[1], [0], [0], [1], [0, 0, 1, 1], [], []>} : vector<32x80xbf16>, vector<80x64xbf16>, vector<32x64xf32> -> vector<32x64xf32>
    %49 = arith.addf %42, %48 : vector<32x64xf32>
    %50 = vector.extract_strided_slice %6 {offsets = [2, 0, 0, 0, 0], sizes = [4, 1, 1, 8, 80], strides = [1, 1, 1, 1, 1]} : vector<6x1x1x10x80xbf16> to vector<4x1x1x8x80xbf16>
    %51 = vector.shape_cast %50 : vector<4x1x1x8x80xbf16> to vector<4x8x80xbf16>
    %52 = vector.shape_cast %51 : vector<4x8x80xbf16> to vector<32x80xbf16>
    %c6 = arith.constant 6 : index
    %c0_36 = arith.constant 0 : index
    %c0_37 = arith.constant 0 : index
    %53 = vector.load %arg5[%c6, %c0_36, %c0_37] : memref<9x80x64xbf16, #tpu.memory_space<vmem>>, vector<1x80x64xbf16>
    %54 = vector.shape_cast %53 : vector<1x80x64xbf16> to vector<80x64xbf16>
    %cst_38 = arith.constant dense<0.000000e+00> : vector<32x64xf32>
    %55 = tpu.matmul %52, %54, %cst_38 {dimension_numbers = #tpu.dot_dimension_numbers<[1], [0], [0], [1], [0, 0, 1, 1], [], []>} : vector<32x80xbf16>, vector<80x64xbf16>, vector<32x64xf32> -> vector<32x64xf32>
    %56 = arith.addf %49, %55 : vector<32x64xf32>
    %57 = vector.extract_strided_slice %6 {offsets = [2, 0, 0, 1, 0], sizes = [4, 1, 1, 8, 80], strides = [1, 1, 1, 1, 1]} : vector<6x1x1x10x80xbf16> to vector<4x1x1x8x80xbf16>
    %58 = vector.shape_cast %57 : vector<4x1x1x8x80xbf16> to vector<4x8x80xbf16>
    %59 = vector.shape_cast %58 : vector<4x8x80xbf16> to vector<32x80xbf16>
    %c7 = arith.constant 7 : index
    %c0_39 = arith.constant 0 : index
    %c0_40 = arith.constant 0 : index
    %60 = vector.load %arg5[%c7, %c0_39, %c0_40] : memref<9x80x64xbf16, #tpu.memory_space<vmem>>, vector<1x80x64xbf16>
    %61 = vector.shape_cast %60 : vector<1x80x64xbf16> to vector<80x64xbf16>
    %cst_41 = arith.constant dense<0.000000e+00> : vector<32x64xf32>
    %62 = tpu.matmul %59, %61, %cst_41 {dimension_numbers = #tpu.dot_dimension_numbers<[1], [0], [0], [1], [0, 0, 1, 1], [], []>} : vector<32x80xbf16>, vector<80x64xbf16>, vector<32x64xf32> -> vector<32x64xf32>
    %63 = arith.addf %56, %62 : vector<32x64xf32>
    %64 = vector.extract_strided_slice %6 {offsets = [2, 0, 0, 2, 0], sizes = [4, 1, 1, 8, 80], strides = [1, 1, 1, 1, 1]} : vector<6x1x1x10x80xbf16> to vector<4x1x1x8x80xbf16>
    %65 = vector.shape_cast %64 : vector<4x1x1x8x80xbf16> to vector<4x8x80xbf16>
    %66 = vector.shape_cast %65 : vector<4x8x80xbf16> to vector<32x80xbf16>
    %c8 = arith.constant 8 : index
    %c0_42 = arith.constant 0 : index
    %c0_43 = arith.constant 0 : index
    %67 = vector.load %arg5[%c8, %c0_42, %c0_43] : memref<9x80x64xbf16, #tpu.memory_space<vmem>>, vector<1x80x64xbf16>
    %68 = vector.shape_cast %67 : vector<1x80x64xbf16> to vector<80x64xbf16>
    %cst_44 = arith.constant dense<0.000000e+00> : vector<32x64xf32>
    %69 = tpu.matmul %66, %68, %cst_44 {dimension_numbers = #tpu.dot_dimension_numbers<[1], [0], [0], [1], [0, 0, 1, 1], [], []>} : vector<32x80xbf16>, vector<80x64xbf16>, vector<32x64xf32> -> vector<32x64xf32>
    %70 = arith.addf %63, %69 : vector<32x64xf32>
    %c0_45 = arith.constant 0 : index
    %c0_46 = arith.constant 0 : index
    %71 = vector.load %arg6[%c0_45, %c0_46] : memref<1x64xf32, #tpu.memory_space<vmem>>, vector<1x64xf32>
    %72 = vector.broadcast %71 : vector<1x64xf32> to vector<32x64xf32>
    %73 = arith.mulf %70, %72 : vector<32x64xf32>
    %c0_47 = arith.constant 0 : index
    %c0_48 = arith.constant 0 : index
    %74 = vector.load %arg7[%c0_47, %c0_48] : memref<1x64xf32, #tpu.memory_space<vmem>>, vector<1x64xf32>
    %75 = vector.broadcast %74 : vector<1x64xf32> to vector<32x64xf32>
    %76 = arith.addf %73, %75 : vector<32x64xf32>
    %cst_49 = arith.constant 0.000000e+00 : f32
    %77 = vector.broadcast %cst_49 : f32 to vector<32x64xf32>
    %78 = arith.maximumf %76, %77 : vector<32x64xf32>
    %79 = vector.shape_cast %78 : vector<32x64xf32> to vector<4x8x64xf32>
    %80 = arith.truncf %79 : vector<4x8x64xf32> to vector<4x8x64xbf16>
    %c0_50 = arith.constant 0 : index
    %c0_51 = arith.constant 0 : index
    %c0_52 = arith.constant 0 : index
    %c0_53 = arith.constant 0 : index
    %81 = vector.load %arg8[%c0_50, %c0_51, %c0_52, %c0_53] : memref<1x4x8x64xbf16, #tpu.memory_space<vmem>>, vector<1x4x8x64xbf16>
    %82 = vector.shape_cast %81 : vector<1x4x8x64xbf16> to vector<4x8x64xbf16>
    %83 = vector.shape_cast %80 : vector<4x8x64xbf16> to vector<1x4x8x64xbf16>
    tpu.vector_store %arg8[%c0_50, %c0_51, %c0_52, %c0_53], %83 {strides = array<i32>} : memref<1x4x8x64xbf16, #tpu.memory_space<vmem>>, vector<1x4x8x64xbf16>,
    return
  }
  func.func @transform_0(%arg0: i32, %arg1: i32) -> (i32, i32, i32, i32, i32, i32) {
    %c0_i32 = arith.constant 0 : i32
    %c0_i32_0 = arith.constant 0 : i32
    %c0_i32_1 = arith.constant 0 : i32
    %c0_i32_2 = arith.constant 0 : i32
    %c0_i32_3 = arith.constant 0 : i32
    return %arg0, %arg1, %c0_i32, %c0_i32_0, %c0_i32_1, %c0_i32_2 : i32, i32, i32, i32, i32, i32
  }
  func.func @transform_1(%arg0: i32, %arg1: i32) -> (i32, i32, i32, i32, i32, i32) {
    %c1_i32 = arith.constant 1 : i32
    %0 = arith.addi %arg1, %c1_i32 : i32
    %c4_i32 = arith.constant 4 : i32
    %1 = arith.muli %0, %c4_i32 : i32
    %c0_i32 = arith.constant 0 : i32
    %2 = arith.addi %1, %c0_i32 : i32
    %c0_i32_0 = arith.constant 0 : i32
    %c0_i32_1 = arith.constant 0 : i32
    %c0_i32_2 = arith.constant 0 : i32
    %c0_i32_3 = arith.constant 0 : i32
    %c0_i32_4 = arith.constant 0 : i32
    return %arg0, %2, %c0_i32_0, %c0_i32_1, %c0_i32_2, %c0_i32_3 : i32, i32, i32, i32, i32, i32
  }
  func.func @transform_2(%arg0: i32, %arg1: i32) -> (i32, i32, i32, i32, i32, i32) {
    %c1_i32 = arith.constant 1 : i32
    %0 = arith.addi %arg1, %c1_i32 : i32
    %c4_i32 = arith.constant 4 : i32
    %1 = arith.muli %0, %c4_i32 : i32
    %c1_i32_0 = arith.constant 1 : i32
    %2 = arith.addi %1, %c1_i32_0 : i32
    %c0_i32 = arith.constant 0 : i32
    %c0_i32_1 = arith.constant 0 : i32
    %c0_i32_2 = arith.constant 0 : i32
    %c0_i32_3 = arith.constant 0 : i32
    %c0_i32_4 = arith.constant 0 : i32
    return %arg0, %2, %c0_i32, %c0_i32_1, %c0_i32_2, %c0_i32_3 : i32, i32, i32, i32, i32, i32
  }
  func.func @transform_3(%arg0: i32, %arg1: i32) -> (i32, i32, i32) {
    %c0_i32 = arith.constant 0 : i32
    %c0_i32_0 = arith.constant 0 : i32
    %c0_i32_1 = arith.constant 0 : i32
    %c0_i32_2 = arith.constant 0 : i32
    return %c0_i32, %c0_i32_0, %c0_i32_1 : i32, i32, i32
  }
  func.func @transform_4(%arg0: i32, %arg1: i32) -> (i32, i32) {
    %c0_i32 = arith.constant 0 : i32
    %c0_i32_0 = arith.constant 0 : i32
    %c0_i32_1 = arith.constant 0 : i32
    return %c0_i32, %c0_i32_0 : i32, i32
  }
  func.func @transform_5(%arg0: i32, %arg1: i32) -> (i32, i32) {
    %c0_i32 = arith.constant 0 : i32
    %c0_i32_0 = arith.constant 0 : i32
    %c0_i32_1 = arith.constant 0 : i32
    return %c0_i32, %c0_i32_0 : i32, i32
  }
  func.func @transform_6(%arg0: i32, %arg1: i32) -> (i32, i32, i32, i32) {
    %c0_i32 = arith.constant 0 : i32
    %c0_i32_0 = arith.constant 0 : i32
    %c0_i32_1 = arith.constant 0 : i32
    return %arg0, %arg1, %c0_i32, %c0_i32_0 : i32, i32, i32, i32
  }
}

module attributes {stable_mosaic.version = 11 : i64} {
  func.func @_conv_bn_kernel(%arg0: i32, %arg1: i32, %arg2: memref<1x2x2x2x5x80xbf16, #tpu.memory_space<vmem>>, %arg3: memref<1x1x1x2x5x80xbf16, #tpu.memory_space<vmem>>, %arg4: memref<9x80x32xbf16, #tpu.memory_space<vmem>>, %arg5: memref<1x32xf32, #tpu.memory_space<vmem>>, %arg6: memref<1x32xf32, #tpu.memory_space<vmem>>, %arg7: memref<1x2x4x32xbf16, #tpu.memory_space<vmem>>) attributes {dimension_semantics = [#tpu.dimension_semantics<parallel>, #tpu.dimension_semantics<parallel>], iteration_bounds = array<i64: 2, 1>, scalar_prefetch = 0 : i64, scratch_operands = 0 : i64, tpu.core_type = #tpu.core_type<tc>, window_params = [{transform_indices = @transform_0, window_bounds = array<i64: 1, 2, 2, 2, 5, 80>}, {transform_indices = @transform_1, window_bounds = array<i64: 1, 1, 1, 2, 5, 80>}, {pipeline_mode = #tpu.pipeline_mode<synchronous>, transform_indices = @transform_2, window_bounds = array<i64: 9, 80, 32>}, {pipeline_mode = #tpu.pipeline_mode<synchronous>, transform_indices = @transform_3, window_bounds = array<i64: 1, 32>}, {pipeline_mode = #tpu.pipeline_mode<synchronous>, transform_indices = @transform_4, window_bounds = array<i64: 1, 32>}, {transform_indices = @transform_5, window_bounds = array<i64: 1, 2, 4, 32>}]} {
    %c0 = arith.constant 0 : index
    %c0_0 = arith.constant 0 : index
    %c0_1 = arith.constant 0 : index
    %c0_2 = arith.constant 0 : index
    %c0_3 = arith.constant 0 : index
    %c0_4 = arith.constant 0 : index
    %0 = vector.load %arg3[%c0, %c0_0, %c0_1, %c0_2, %c0_3, %c0_4] : memref<1x1x1x2x5x80xbf16, #tpu.memory_space<vmem>>, vector<1x1x1x2x5x80xbf16>
    %1 = vector.shape_cast %0 : vector<1x1x1x2x5x80xbf16> to vector<1x1x2x5x80xbf16>
    %cst = arith.constant 0.000000e+00 : bf16
    %2 = vector.broadcast %cst : bf16 to vector<1x1x2x5x80xbf16>
    %3 = tpu.concatenate %1, %2 in 1 : vector<1x1x2x5x80xbf16>, vector<1x1x2x5x80xbf16> -> vector<1x2x2x5x80xbf16>
    %c0_5 = arith.constant 0 : index
    %c0_6 = arith.constant 0 : index
    %c0_7 = arith.constant 0 : index
    %c0_8 = arith.constant 0 : index
    %c0_9 = arith.constant 0 : index
    %c0_10 = arith.constant 0 : index
    %4 = vector.load %arg2[%c0_5, %c0_6, %c0_7, %c0_8, %c0_9, %c0_10] : memref<1x2x2x2x5x80xbf16, #tpu.memory_space<vmem>>, vector<1x2x2x2x5x80xbf16>
    %5 = vector.shape_cast %4 : vector<1x2x2x2x5x80xbf16> to vector<2x2x2x5x80xbf16>
    %6 = tpu.concatenate %5, %3 in 0 : vector<2x2x2x5x80xbf16>, vector<1x2x2x5x80xbf16> -> vector<3x2x2x5x80xbf16>
    %cst_11 = arith.constant 0.000000e+00 : f32
    %7 = vector.broadcast %cst_11 : f32 to vector<8x32xf32>
    %8 = vector.extract_strided_slice %6 {offsets = [0, 0, 0, 0, 0], sizes = [2, 1, 1, 4, 80], strides = [1, 1, 1, 1, 1]} : vector<3x2x2x5x80xbf16> to vector<2x1x1x4x80xbf16>
    %9 = vector.shape_cast %8 : vector<2x1x1x4x80xbf16> to vector<2x4x80xbf16>
    %10 = vector.shape_cast %9 : vector<2x4x80xbf16> to vector<8x80xbf16>
    %c0_12 = arith.constant 0 : index
    %c0_13 = arith.constant 0 : index
    %c0_14 = arith.constant 0 : index
    %11 = vector.load %arg4[%c0_12, %c0_13, %c0_14] : memref<9x80x32xbf16, #tpu.memory_space<vmem>>, vector<1x80x32xbf16>
    %12 = vector.shape_cast %11 : vector<1x80x32xbf16> to vector<80x32xbf16>
    %cst_15 = arith.constant dense<0.000000e+00> : vector<8x32xf32>
    %13 = tpu.matmul %10, %12, %cst_15 {dimension_numbers = #tpu.dot_dimension_numbers<[1], [0], [0], [1], [0, 0, 1, 1], [], []>} : vector<8x80xbf16>, vector<80x32xbf16>, vector<8x32xf32> -> vector<8x32xf32>
    %14 = arith.addf %7, %13 : vector<8x32xf32>
    %15 = vector.extract_strided_slice %6 {offsets = [0, 0, 1, 0, 0], sizes = [2, 1, 1, 4, 80], strides = [1, 1, 1, 1, 1]} : vector<3x2x2x5x80xbf16> to vector<2x1x1x4x80xbf16>
    %16 = vector.shape_cast %15 : vector<2x1x1x4x80xbf16> to vector<2x4x80xbf16>
    %17 = vector.shape_cast %16 : vector<2x4x80xbf16> to vector<8x80xbf16>
    %c1 = arith.constant 1 : index
    %c0_16 = arith.constant 0 : index
    %c0_17 = arith.constant 0 : index
    %18 = vector.load %arg4[%c1, %c0_16, %c0_17] : memref<9x80x32xbf16, #tpu.memory_space<vmem>>, vector<1x80x32xbf16>
    %19 = vector.shape_cast %18 : vector<1x80x32xbf16> to vector<80x32xbf16>
    %cst_18 = arith.constant dense<0.000000e+00> : vector<8x32xf32>
    %20 = tpu.matmul %17, %19, %cst_18 {dimension_numbers = #tpu.dot_dimension_numbers<[1], [0], [0], [1], [0, 0, 1, 1], [], []>} : vector<8x80xbf16>, vector<80x32xbf16>, vector<8x32xf32> -> vector<8x32xf32>
    %21 = arith.addf %14, %20 : vector<8x32xf32>
    %22 = vector.extract_strided_slice %6 {offsets = [0, 0, 0, 1, 0], sizes = [2, 1, 1, 4, 80], strides = [1, 1, 1, 1, 1]} : vector<3x2x2x5x80xbf16> to vector<2x1x1x4x80xbf16>
    %23 = vector.shape_cast %22 : vector<2x1x1x4x80xbf16> to vector<2x4x80xbf16>
    %24 = vector.shape_cast %23 : vector<2x4x80xbf16> to vector<8x80xbf16>
    %c2 = arith.constant 2 : index
    %c0_19 = arith.constant 0 : index
    %c0_20 = arith.constant 0 : index
    %25 = vector.load %arg4[%c2, %c0_19, %c0_20] : memref<9x80x32xbf16, #tpu.memory_space<vmem>>, vector<1x80x32xbf16>
    %26 = vector.shape_cast %25 : vector<1x80x32xbf16> to vector<80x32xbf16>
    %cst_21 = arith.constant dense<0.000000e+00> : vector<8x32xf32>
    %27 = tpu.matmul %24, %26, %cst_21 {dimension_numbers = #tpu.dot_dimension_numbers<[1], [0], [0], [1], [0, 0, 1, 1], [], []>} : vector<8x80xbf16>, vector<80x32xbf16>, vector<8x32xf32> -> vector<8x32xf32>
    %28 = arith.addf %21, %27 : vector<8x32xf32>
    %29 = vector.extract_strided_slice %6 {offsets = [0, 1, 0, 0, 0], sizes = [2, 1, 1, 4, 80], strides = [1, 1, 1, 1, 1]} : vector<3x2x2x5x80xbf16> to vector<2x1x1x4x80xbf16>
    %30 = vector.shape_cast %29 : vector<2x1x1x4x80xbf16> to vector<2x4x80xbf16>
    %31 = vector.shape_cast %30 : vector<2x4x80xbf16> to vector<8x80xbf16>
    %c3 = arith.constant 3 : index
    %c0_22 = arith.constant 0 : index
    %c0_23 = arith.constant 0 : index
    %32 = vector.load %arg4[%c3, %c0_22, %c0_23] : memref<9x80x32xbf16, #tpu.memory_space<vmem>>, vector<1x80x32xbf16>
    %33 = vector.shape_cast %32 : vector<1x80x32xbf16> to vector<80x32xbf16>
    %cst_24 = arith.constant dense<0.000000e+00> : vector<8x32xf32>
    %34 = tpu.matmul %31, %33, %cst_24 {dimension_numbers = #tpu.dot_dimension_numbers<[1], [0], [0], [1], [0, 0, 1, 1], [], []>} : vector<8x80xbf16>, vector<80x32xbf16>, vector<8x32xf32> -> vector<8x32xf32>
    %35 = arith.addf %28, %34 : vector<8x32xf32>
    %36 = vector.extract_strided_slice %6 {offsets = [0, 1, 1, 0, 0], sizes = [2, 1, 1, 4, 80], strides = [1, 1, 1, 1, 1]} : vector<3x2x2x5x80xbf16> to vector<2x1x1x4x80xbf16>
    %37 = vector.shape_cast %36 : vector<2x1x1x4x80xbf16> to vector<2x4x80xbf16>
    %38 = vector.shape_cast %37 : vector<2x4x80xbf16> to vector<8x80xbf16>
    %c4 = arith.constant 4 : index
    %c0_25 = arith.constant 0 : index
    %c0_26 = arith.constant 0 : index
    %39 = vector.load %arg4[%c4, %c0_25, %c0_26] : memref<9x80x32xbf16, #tpu.memory_space<vmem>>, vector<1x80x32xbf16>
    %40 = vector.shape_cast %39 : vector<1x80x32xbf16> to vector<80x32xbf16>
    %cst_27 = arith.constant dense<0.000000e+00> : vector<8x32xf32>
    %41 = tpu.matmul %38, %40, %cst_27 {dimension_numbers = #tpu.dot_dimension_numbers<[1], [0], [0], [1], [0, 0, 1, 1], [], []>} : vector<8x80xbf16>, vector<80x32xbf16>, vector<8x32xf32> -> vector<8x32xf32>
    %42 = arith.addf %35, %41 : vector<8x32xf32>
    %43 = vector.extract_strided_slice %6 {offsets = [0, 1, 0, 1, 0], sizes = [2, 1, 1, 4, 80], strides = [1, 1, 1, 1, 1]} : vector<3x2x2x5x80xbf16> to vector<2x1x1x4x80xbf16>
    %44 = vector.shape_cast %43 : vector<2x1x1x4x80xbf16> to vector<2x4x80xbf16>
    %45 = vector.shape_cast %44 : vector<2x4x80xbf16> to vector<8x80xbf16>
    %c5 = arith.constant 5 : index
    %c0_28 = arith.constant 0 : index
    %c0_29 = arith.constant 0 : index
    %46 = vector.load %arg4[%c5, %c0_28, %c0_29] : memref<9x80x32xbf16, #tpu.memory_space<vmem>>, vector<1x80x32xbf16>
    %47 = vector.shape_cast %46 : vector<1x80x32xbf16> to vector<80x32xbf16>
    %cst_30 = arith.constant dense<0.000000e+00> : vector<8x32xf32>
    %48 = tpu.matmul %45, %47, %cst_30 {dimension_numbers = #tpu.dot_dimension_numbers<[1], [0], [0], [1], [0, 0, 1, 1], [], []>} : vector<8x80xbf16>, vector<80x32xbf16>, vector<8x32xf32> -> vector<8x32xf32>
    %49 = arith.addf %42, %48 : vector<8x32xf32>
    %50 = vector.extract_strided_slice %6 {offsets = [1, 0, 0, 0, 0], sizes = [2, 1, 1, 4, 80], strides = [1, 1, 1, 1, 1]} : vector<3x2x2x5x80xbf16> to vector<2x1x1x4x80xbf16>
    %51 = vector.shape_cast %50 : vector<2x1x1x4x80xbf16> to vector<2x4x80xbf16>
    %52 = vector.shape_cast %51 : vector<2x4x80xbf16> to vector<8x80xbf16>
    %c6 = arith.constant 6 : index
    %c0_31 = arith.constant 0 : index
    %c0_32 = arith.constant 0 : index
    %53 = vector.load %arg4[%c6, %c0_31, %c0_32] : memref<9x80x32xbf16, #tpu.memory_space<vmem>>, vector<1x80x32xbf16>
    %54 = vector.shape_cast %53 : vector<1x80x32xbf16> to vector<80x32xbf16>
    %cst_33 = arith.constant dense<0.000000e+00> : vector<8x32xf32>
    %55 = tpu.matmul %52, %54, %cst_33 {dimension_numbers = #tpu.dot_dimension_numbers<[1], [0], [0], [1], [0, 0, 1, 1], [], []>} : vector<8x80xbf16>, vector<80x32xbf16>, vector<8x32xf32> -> vector<8x32xf32>
    %56 = arith.addf %49, %55 : vector<8x32xf32>
    %57 = vector.extract_strided_slice %6 {offsets = [1, 0, 1, 0, 0], sizes = [2, 1, 1, 4, 80], strides = [1, 1, 1, 1, 1]} : vector<3x2x2x5x80xbf16> to vector<2x1x1x4x80xbf16>
    %58 = vector.shape_cast %57 : vector<2x1x1x4x80xbf16> to vector<2x4x80xbf16>
    %59 = vector.shape_cast %58 : vector<2x4x80xbf16> to vector<8x80xbf16>
    %c7 = arith.constant 7 : index
    %c0_34 = arith.constant 0 : index
    %c0_35 = arith.constant 0 : index
    %60 = vector.load %arg4[%c7, %c0_34, %c0_35] : memref<9x80x32xbf16, #tpu.memory_space<vmem>>, vector<1x80x32xbf16>
    %61 = vector.shape_cast %60 : vector<1x80x32xbf16> to vector<80x32xbf16>
    %cst_36 = arith.constant dense<0.000000e+00> : vector<8x32xf32>
    %62 = tpu.matmul %59, %61, %cst_36 {dimension_numbers = #tpu.dot_dimension_numbers<[1], [0], [0], [1], [0, 0, 1, 1], [], []>} : vector<8x80xbf16>, vector<80x32xbf16>, vector<8x32xf32> -> vector<8x32xf32>
    %63 = arith.addf %56, %62 : vector<8x32xf32>
    %64 = vector.extract_strided_slice %6 {offsets = [1, 0, 0, 1, 0], sizes = [2, 1, 1, 4, 80], strides = [1, 1, 1, 1, 1]} : vector<3x2x2x5x80xbf16> to vector<2x1x1x4x80xbf16>
    %65 = vector.shape_cast %64 : vector<2x1x1x4x80xbf16> to vector<2x4x80xbf16>
    %66 = vector.shape_cast %65 : vector<2x4x80xbf16> to vector<8x80xbf16>
    %c8 = arith.constant 8 : index
    %c0_37 = arith.constant 0 : index
    %c0_38 = arith.constant 0 : index
    %67 = vector.load %arg4[%c8, %c0_37, %c0_38] : memref<9x80x32xbf16, #tpu.memory_space<vmem>>, vector<1x80x32xbf16>
    %68 = vector.shape_cast %67 : vector<1x80x32xbf16> to vector<80x32xbf16>
    %cst_39 = arith.constant dense<0.000000e+00> : vector<8x32xf32>
    %69 = tpu.matmul %66, %68, %cst_39 {dimension_numbers = #tpu.dot_dimension_numbers<[1], [0], [0], [1], [0, 0, 1, 1], [], []>} : vector<8x80xbf16>, vector<80x32xbf16>, vector<8x32xf32> -> vector<8x32xf32>
    %70 = arith.addf %63, %69 : vector<8x32xf32>
    %c0_40 = arith.constant 0 : index
    %c0_41 = arith.constant 0 : index
    %71 = vector.load %arg5[%c0_40, %c0_41] : memref<1x32xf32, #tpu.memory_space<vmem>>, vector<1x32xf32>
    %72 = vector.broadcast %71 : vector<1x32xf32> to vector<8x32xf32>
    %73 = arith.mulf %70, %72 : vector<8x32xf32>
    %c0_42 = arith.constant 0 : index
    %c0_43 = arith.constant 0 : index
    %74 = vector.load %arg6[%c0_42, %c0_43] : memref<1x32xf32, #tpu.memory_space<vmem>>, vector<1x32xf32>
    %75 = vector.broadcast %74 : vector<1x32xf32> to vector<8x32xf32>
    %76 = arith.addf %73, %75 : vector<8x32xf32>
    %cst_44 = arith.constant 0.000000e+00 : f32
    %77 = vector.broadcast %cst_44 : f32 to vector<8x32xf32>
    %78 = arith.maximumf %76, %77 : vector<8x32xf32>
    %79 = vector.shape_cast %78 : vector<8x32xf32> to vector<2x4x32xf32>
    %80 = arith.truncf %79 : vector<2x4x32xf32> to vector<2x4x32xbf16>
    %c0_45 = arith.constant 0 : index
    %c0_46 = arith.constant 0 : index
    %c0_47 = arith.constant 0 : index
    %c0_48 = arith.constant 0 : index
    %81 = vector.load %arg7[%c0_45, %c0_46, %c0_47, %c0_48] : memref<1x2x4x32xbf16, #tpu.memory_space<vmem>>, vector<1x2x4x32xbf16>
    %82 = vector.shape_cast %81 : vector<1x2x4x32xbf16> to vector<2x4x32xbf16>
    %83 = vector.shape_cast %80 : vector<2x4x32xbf16> to vector<1x2x4x32xbf16>
    tpu.vector_store %arg7[%c0_45, %c0_46, %c0_47, %c0_48], %83 {strides = array<i32>} : memref<1x2x4x32xbf16, #tpu.memory_space<vmem>>, vector<1x2x4x32xbf16>,
    return
  }
  func.func @transform_0(%arg0: i32, %arg1: i32) -> (i32, i32, i32, i32, i32, i32) {
    %c0_i32 = arith.constant 0 : i32
    %c0_i32_0 = arith.constant 0 : i32
    %c0_i32_1 = arith.constant 0 : i32
    %c0_i32_2 = arith.constant 0 : i32
    %c0_i32_3 = arith.constant 0 : i32
    return %arg0, %arg1, %c0_i32, %c0_i32_0, %c0_i32_1, %c0_i32_2 : i32, i32, i32, i32, i32, i32
  }
  func.func @transform_1(%arg0: i32, %arg1: i32) -> (i32, i32, i32, i32, i32, i32) {
    %c1_i32 = arith.constant 1 : i32
    %0 = arith.addi %arg1, %c1_i32 : i32
    %c2_i32 = arith.constant 2 : i32
    %1 = arith.muli %0, %c2_i32 : i32
    %c0_i32 = arith.constant 0 : i32
    %2 = arith.addi %1, %c0_i32 : i32
    %c0_i32_0 = arith.constant 0 : i32
    %c0_i32_1 = arith.constant 0 : i32
    %c0_i32_2 = arith.constant 0 : i32
    %c0_i32_3 = arith.constant 0 : i32
    %c0_i32_4 = arith.constant 0 : i32
    return %arg0, %2, %c0_i32_0, %c0_i32_1, %c0_i32_2, %c0_i32_3 : i32, i32, i32, i32, i32, i32
  }
  func.func @transform_2(%arg0: i32, %arg1: i32) -> (i32, i32, i32) {
    %c0_i32 = arith.constant 0 : i32
    %c0_i32_0 = arith.constant 0 : i32
    %c0_i32_1 = arith.constant 0 : i32
    %c0_i32_2 = arith.constant 0 : i32
    return %c0_i32, %c0_i32_0, %c0_i32_1 : i32, i32, i32
  }
  func.func @transform_3(%arg0: i32, %arg1: i32) -> (i32, i32) {
    %c0_i32 = arith.constant 0 : i32
    %c0_i32_0 = arith.constant 0 : i32
    %c0_i32_1 = arith.constant 0 : i32
    return %c0_i32, %c0_i32_0 : i32, i32
  }
  func.func @transform_4(%arg0: i32, %arg1: i32) -> (i32, i32) {
    %c0_i32 = arith.constant 0 : i32
    %c0_i32_0 = arith.constant 0 : i32
    %c0_i32_1 = arith.constant 0 : i32
    return %c0_i32, %c0_i32_0 : i32, i32
  }
  func.func @transform_5(%arg0: i32, %arg1: i32) -> (i32, i32, i32, i32) {
    %c0_i32 = arith.constant 0 : i32
    %c0_i32_0 = arith.constant 0 : i32
    %c0_i32_1 = arith.constant 0 : i32
    return %arg0, %arg1, %c0_i32, %c0_i32_0 : i32, i32, i32, i32
  }
}

module attributes {stable_mosaic.version = 11 : i64} {
  func.func @_conv_bn_kernel(%arg0: i32, %arg1: i32, %arg2: memref<1x2x1x1x6x48xbf16, #tpu.memory_space<vmem>>, %arg3: memref<1x1x1x1x6x48xbf16, #tpu.memory_space<vmem>>, %arg4: memref<1x1x1x1x6x48xbf16, #tpu.memory_space<vmem>>, %arg5: memref<9x48x32xbf16, #tpu.memory_space<vmem>>, %arg6: memref<1x32xf32, #tpu.memory_space<vmem>>, %arg7: memref<1x32xf32, #tpu.memory_space<vmem>>, %arg8: memref<1x2x4x32xbf16, #tpu.memory_space<vmem>>) attributes {dimension_semantics = [#tpu.dimension_semantics<parallel>, #tpu.dimension_semantics<parallel>], iteration_bounds = array<i64: 2, 1>, scalar_prefetch = 0 : i64, scratch_operands = 0 : i64, tpu.core_type = #tpu.core_type<tc>, window_params = [{transform_indices = @transform_0, window_bounds = array<i64: 1, 2, 1, 1, 6, 48>}, {transform_indices = @transform_1, window_bounds = array<i64: 1, 1, 1, 1, 6, 48>}, {transform_indices = @transform_2, window_bounds = array<i64: 1, 1, 1, 1, 6, 48>}, {pipeline_mode = #tpu.pipeline_mode<synchronous>, transform_indices = @transform_3, window_bounds = array<i64: 9, 48, 32>}, {pipeline_mode = #tpu.pipeline_mode<synchronous>, transform_indices = @transform_4, window_bounds = array<i64: 1, 32>}, {pipeline_mode = #tpu.pipeline_mode<synchronous>, transform_indices = @transform_5, window_bounds = array<i64: 1, 32>}, {transform_indices = @transform_6, window_bounds = array<i64: 1, 2, 4, 32>}]} {
    %c0 = arith.constant 0 : index
    %c0_0 = arith.constant 0 : index
    %c0_1 = arith.constant 0 : index
    %c0_2 = arith.constant 0 : index
    %c0_3 = arith.constant 0 : index
    %c0_4 = arith.constant 0 : index
    %0 = vector.load %arg2[%c0, %c0_0, %c0_1, %c0_2, %c0_3, %c0_4] : memref<1x2x1x1x6x48xbf16, #tpu.memory_space<vmem>>, vector<1x2x1x1x6x48xbf16>
    %1 = vector.shape_cast %0 : vector<1x2x1x1x6x48xbf16> to vector<2x1x1x6x48xbf16>
    %c0_5 = arith.constant 0 : index
    %c0_6 = arith.constant 0 : index
    %c0_7 = arith.constant 0 : index
    %c0_8 = arith.constant 0 : index
    %c0_9 = arith.constant 0 : index
    %c0_10 = arith.constant 0 : index
    %2 = vector.load %arg3[%c0_5, %c0_6, %c0_7, %c0_8, %c0_9, %c0_10] : memref<1x1x1x1x6x48xbf16, #tpu.memory_space<vmem>>, vector<1x1x1x1x6x48xbf16>
    %3 = vector.shape_cast %2 : vector<1x1x1x1x6x48xbf16> to vector<1x1x1x6x48xbf16>
    %c0_11 = arith.constant 0 : index
    %c0_12 = arith.constant 0 : index
    %c0_13 = arith.constant 0 : index
    %c0_14 = arith.constant 0 : index
    %c0_15 = arith.constant 0 : index
    %c0_16 = arith.constant 0 : index
    %4 = vector.load %arg4[%c0_11, %c0_12, %c0_13, %c0_14, %c0_15, %c0_16] : memref<1x1x1x1x6x48xbf16, #tpu.memory_space<vmem>>, vector<1x1x1x1x6x48xbf16>
    %5 = vector.shape_cast %4 : vector<1x1x1x1x6x48xbf16> to vector<1x1x1x6x48xbf16>
    %6 = tpu.concatenate %1, %3, %5 in 0 : vector<2x1x1x6x48xbf16>, vector<1x1x1x6x48xbf16>, vector<1x1x1x6x48xbf16> -> vector<4x1x1x6x48xbf16>
    %cst = arith.constant 0.000000e+00 : f32
    %7 = vector.broadcast %cst : f32 to vector<8x32xf32>
    %8 = vector.extract_strided_slice %6 {offsets = [0, 0, 0, 0, 0], sizes = [2, 1, 1, 4, 48], strides = [1, 1, 1, 1, 1]} : vector<4x1x1x6x48xbf16> to vector<2x1x1x4x48xbf16>
    %9 = vector.shape_cast %8 : vector<2x1x1x4x48xbf16> to vector<2x4x48xbf16>
    %10 = vector.shape_cast %9 : vector<2x4x48xbf16> to vector<8x48xbf16>
    %c0_17 = arith.constant 0 : index
    %c0_18 = arith.constant 0 : index
    %c0_19 = arith.constant 0 : index
    %11 = vector.load %arg5[%c0_17, %c0_18, %c0_19] : memref<9x48x32xbf16, #tpu.memory_space<vmem>>, vector<1x48x32xbf16>
    %12 = vector.shape_cast %11 : vector<1x48x32xbf16> to vector<48x32xbf16>
    %cst_20 = arith.constant dense<0.000000e+00> : vector<8x32xf32>
    %13 = tpu.matmul %10, %12, %cst_20 {dimension_numbers = #tpu.dot_dimension_numbers<[1], [0], [0], [1], [0, 0, 1, 1], [], []>} : vector<8x48xbf16>, vector<48x32xbf16>, vector<8x32xf32> -> vector<8x32xf32>
    %14 = arith.addf %7, %13 : vector<8x32xf32>
    %15 = vector.extract_strided_slice %6 {offsets = [0, 0, 0, 1, 0], sizes = [2, 1, 1, 4, 48], strides = [1, 1, 1, 1, 1]} : vector<4x1x1x6x48xbf16> to vector<2x1x1x4x48xbf16>
    %16 = vector.shape_cast %15 : vector<2x1x1x4x48xbf16> to vector<2x4x48xbf16>
    %17 = vector.shape_cast %16 : vector<2x4x48xbf16> to vector<8x48xbf16>
    %c1 = arith.constant 1 : index
    %c0_21 = arith.constant 0 : index
    %c0_22 = arith.constant 0 : index
    %18 = vector.load %arg5[%c1, %c0_21, %c0_22] : memref<9x48x32xbf16, #tpu.memory_space<vmem>>, vector<1x48x32xbf16>
    %19 = vector.shape_cast %18 : vector<1x48x32xbf16> to vector<48x32xbf16>
    %cst_23 = arith.constant dense<0.000000e+00> : vector<8x32xf32>
    %20 = tpu.matmul %17, %19, %cst_23 {dimension_numbers = #tpu.dot_dimension_numbers<[1], [0], [0], [1], [0, 0, 1, 1], [], []>} : vector<8x48xbf16>, vector<48x32xbf16>, vector<8x32xf32> -> vector<8x32xf32>
    %21 = arith.addf %14, %20 : vector<8x32xf32>
    %22 = vector.extract_strided_slice %6 {offsets = [0, 0, 0, 2, 0], sizes = [2, 1, 1, 4, 48], strides = [1, 1, 1, 1, 1]} : vector<4x1x1x6x48xbf16> to vector<2x1x1x4x48xbf16>
    %23 = vector.shape_cast %22 : vector<2x1x1x4x48xbf16> to vector<2x4x48xbf16>
    %24 = vector.shape_cast %23 : vector<2x4x48xbf16> to vector<8x48xbf16>
    %c2 = arith.constant 2 : index
    %c0_24 = arith.constant 0 : index
    %c0_25 = arith.constant 0 : index
    %25 = vector.load %arg5[%c2, %c0_24, %c0_25] : memref<9x48x32xbf16, #tpu.memory_space<vmem>>, vector<1x48x32xbf16>
    %26 = vector.shape_cast %25 : vector<1x48x32xbf16> to vector<48x32xbf16>
    %cst_26 = arith.constant dense<0.000000e+00> : vector<8x32xf32>
    %27 = tpu.matmul %24, %26, %cst_26 {dimension_numbers = #tpu.dot_dimension_numbers<[1], [0], [0], [1], [0, 0, 1, 1], [], []>} : vector<8x48xbf16>, vector<48x32xbf16>, vector<8x32xf32> -> vector<8x32xf32>
    %28 = arith.addf %21, %27 : vector<8x32xf32>
    %29 = vector.extract_strided_slice %6 {offsets = [1, 0, 0, 0, 0], sizes = [2, 1, 1, 4, 48], strides = [1, 1, 1, 1, 1]} : vector<4x1x1x6x48xbf16> to vector<2x1x1x4x48xbf16>
    %30 = vector.shape_cast %29 : vector<2x1x1x4x48xbf16> to vector<2x4x48xbf16>
    %31 = vector.shape_cast %30 : vector<2x4x48xbf16> to vector<8x48xbf16>
    %c3 = arith.constant 3 : index
    %c0_27 = arith.constant 0 : index
    %c0_28 = arith.constant 0 : index
    %32 = vector.load %arg5[%c3, %c0_27, %c0_28] : memref<9x48x32xbf16, #tpu.memory_space<vmem>>, vector<1x48x32xbf16>
    %33 = vector.shape_cast %32 : vector<1x48x32xbf16> to vector<48x32xbf16>
    %cst_29 = arith.constant dense<0.000000e+00> : vector<8x32xf32>
    %34 = tpu.matmul %31, %33, %cst_29 {dimension_numbers = #tpu.dot_dimension_numbers<[1], [0], [0], [1], [0, 0, 1, 1], [], []>} : vector<8x48xbf16>, vector<48x32xbf16>, vector<8x32xf32> -> vector<8x32xf32>
    %35 = arith.addf %28, %34 : vector<8x32xf32>
    %36 = vector.extract_strided_slice %6 {offsets = [1, 0, 0, 1, 0], sizes = [2, 1, 1, 4, 48], strides = [1, 1, 1, 1, 1]} : vector<4x1x1x6x48xbf16> to vector<2x1x1x4x48xbf16>
    %37 = vector.shape_cast %36 : vector<2x1x1x4x48xbf16> to vector<2x4x48xbf16>
    %38 = vector.shape_cast %37 : vector<2x4x48xbf16> to vector<8x48xbf16>
    %c4 = arith.constant 4 : index
    %c0_30 = arith.constant 0 : index
    %c0_31 = arith.constant 0 : index
    %39 = vector.load %arg5[%c4, %c0_30, %c0_31] : memref<9x48x32xbf16, #tpu.memory_space<vmem>>, vector<1x48x32xbf16>
    %40 = vector.shape_cast %39 : vector<1x48x32xbf16> to vector<48x32xbf16>
    %cst_32 = arith.constant dense<0.000000e+00> : vector<8x32xf32>
    %41 = tpu.matmul %38, %40, %cst_32 {dimension_numbers = #tpu.dot_dimension_numbers<[1], [0], [0], [1], [0, 0, 1, 1], [], []>} : vector<8x48xbf16>, vector<48x32xbf16>, vector<8x32xf32> -> vector<8x32xf32>
    %42 = arith.addf %35, %41 : vector<8x32xf32>
    %43 = vector.extract_strided_slice %6 {offsets = [1, 0, 0, 2, 0], sizes = [2, 1, 1, 4, 48], strides = [1, 1, 1, 1, 1]} : vector<4x1x1x6x48xbf16> to vector<2x1x1x4x48xbf16>
    %44 = vector.shape_cast %43 : vector<2x1x1x4x48xbf16> to vector<2x4x48xbf16>
    %45 = vector.shape_cast %44 : vector<2x4x48xbf16> to vector<8x48xbf16>
    %c5 = arith.constant 5 : index
    %c0_33 = arith.constant 0 : index
    %c0_34 = arith.constant 0 : index
    %46 = vector.load %arg5[%c5, %c0_33, %c0_34] : memref<9x48x32xbf16, #tpu.memory_space<vmem>>, vector<1x48x32xbf16>
    %47 = vector.shape_cast %46 : vector<1x48x32xbf16> to vector<48x32xbf16>
    %cst_35 = arith.constant dense<0.000000e+00> : vector<8x32xf32>
    %48 = tpu.matmul %45, %47, %cst_35 {dimension_numbers = #tpu.dot_dimension_numbers<[1], [0], [0], [1], [0, 0, 1, 1], [], []>} : vector<8x48xbf16>, vector<48x32xbf16>, vector<8x32xf32> -> vector<8x32xf32>
    %49 = arith.addf %42, %48 : vector<8x32xf32>
    %50 = vector.extract_strided_slice %6 {offsets = [2, 0, 0, 0, 0], sizes = [2, 1, 1, 4, 48], strides = [1, 1, 1, 1, 1]} : vector<4x1x1x6x48xbf16> to vector<2x1x1x4x48xbf16>
    %51 = vector.shape_cast %50 : vector<2x1x1x4x48xbf16> to vector<2x4x48xbf16>
    %52 = vector.shape_cast %51 : vector<2x4x48xbf16> to vector<8x48xbf16>
    %c6 = arith.constant 6 : index
    %c0_36 = arith.constant 0 : index
    %c0_37 = arith.constant 0 : index
    %53 = vector.load %arg5[%c6, %c0_36, %c0_37] : memref<9x48x32xbf16, #tpu.memory_space<vmem>>, vector<1x48x32xbf16>
    %54 = vector.shape_cast %53 : vector<1x48x32xbf16> to vector<48x32xbf16>
    %cst_38 = arith.constant dense<0.000000e+00> : vector<8x32xf32>
    %55 = tpu.matmul %52, %54, %cst_38 {dimension_numbers = #tpu.dot_dimension_numbers<[1], [0], [0], [1], [0, 0, 1, 1], [], []>} : vector<8x48xbf16>, vector<48x32xbf16>, vector<8x32xf32> -> vector<8x32xf32>
    %56 = arith.addf %49, %55 : vector<8x32xf32>
    %57 = vector.extract_strided_slice %6 {offsets = [2, 0, 0, 1, 0], sizes = [2, 1, 1, 4, 48], strides = [1, 1, 1, 1, 1]} : vector<4x1x1x6x48xbf16> to vector<2x1x1x4x48xbf16>
    %58 = vector.shape_cast %57 : vector<2x1x1x4x48xbf16> to vector<2x4x48xbf16>
    %59 = vector.shape_cast %58 : vector<2x4x48xbf16> to vector<8x48xbf16>
    %c7 = arith.constant 7 : index
    %c0_39 = arith.constant 0 : index
    %c0_40 = arith.constant 0 : index
    %60 = vector.load %arg5[%c7, %c0_39, %c0_40] : memref<9x48x32xbf16, #tpu.memory_space<vmem>>, vector<1x48x32xbf16>
    %61 = vector.shape_cast %60 : vector<1x48x32xbf16> to vector<48x32xbf16>
    %cst_41 = arith.constant dense<0.000000e+00> : vector<8x32xf32>
    %62 = tpu.matmul %59, %61, %cst_41 {dimension_numbers = #tpu.dot_dimension_numbers<[1], [0], [0], [1], [0, 0, 1, 1], [], []>} : vector<8x48xbf16>, vector<48x32xbf16>, vector<8x32xf32> -> vector<8x32xf32>
    %63 = arith.addf %56, %62 : vector<8x32xf32>
    %64 = vector.extract_strided_slice %6 {offsets = [2, 0, 0, 2, 0], sizes = [2, 1, 1, 4, 48], strides = [1, 1, 1, 1, 1]} : vector<4x1x1x6x48xbf16> to vector<2x1x1x4x48xbf16>
    %65 = vector.shape_cast %64 : vector<2x1x1x4x48xbf16> to vector<2x4x48xbf16>
    %66 = vector.shape_cast %65 : vector<2x4x48xbf16> to vector<8x48xbf16>
    %c8 = arith.constant 8 : index
    %c0_42 = arith.constant 0 : index
    %c0_43 = arith.constant 0 : index
    %67 = vector.load %arg5[%c8, %c0_42, %c0_43] : memref<9x48x32xbf16, #tpu.memory_space<vmem>>, vector<1x48x32xbf16>
    %68 = vector.shape_cast %67 : vector<1x48x32xbf16> to vector<48x32xbf16>
    %cst_44 = arith.constant dense<0.000000e+00> : vector<8x32xf32>
    %69 = tpu.matmul %66, %68, %cst_44 {dimension_numbers = #tpu.dot_dimension_numbers<[1], [0], [0], [1], [0, 0, 1, 1], [], []>} : vector<8x48xbf16>, vector<48x32xbf16>, vector<8x32xf32> -> vector<8x32xf32>
    %70 = arith.addf %63, %69 : vector<8x32xf32>
    %c0_45 = arith.constant 0 : index
    %c0_46 = arith.constant 0 : index
    %71 = vector.load %arg6[%c0_45, %c0_46] : memref<1x32xf32, #tpu.memory_space<vmem>>, vector<1x32xf32>
    %72 = vector.broadcast %71 : vector<1x32xf32> to vector<8x32xf32>
    %73 = arith.mulf %70, %72 : vector<8x32xf32>
    %c0_47 = arith.constant 0 : index
    %c0_48 = arith.constant 0 : index
    %74 = vector.load %arg7[%c0_47, %c0_48] : memref<1x32xf32, #tpu.memory_space<vmem>>, vector<1x32xf32>
    %75 = vector.broadcast %74 : vector<1x32xf32> to vector<8x32xf32>
    %76 = arith.addf %73, %75 : vector<8x32xf32>
    %cst_49 = arith.constant 0.000000e+00 : f32
    %77 = vector.broadcast %cst_49 : f32 to vector<8x32xf32>
    %78 = arith.maximumf %76, %77 : vector<8x32xf32>
    %79 = vector.shape_cast %78 : vector<8x32xf32> to vector<2x4x32xf32>
    %80 = arith.truncf %79 : vector<2x4x32xf32> to vector<2x4x32xbf16>
    %c0_50 = arith.constant 0 : index
    %c0_51 = arith.constant 0 : index
    %c0_52 = arith.constant 0 : index
    %c0_53 = arith.constant 0 : index
    %81 = vector.load %arg8[%c0_50, %c0_51, %c0_52, %c0_53] : memref<1x2x4x32xbf16, #tpu.memory_space<vmem>>, vector<1x2x4x32xbf16>
    %82 = vector.shape_cast %81 : vector<1x2x4x32xbf16> to vector<2x4x32xbf16>
    %83 = vector.shape_cast %80 : vector<2x4x32xbf16> to vector<1x2x4x32xbf16>
    tpu.vector_store %arg8[%c0_50, %c0_51, %c0_52, %c0_53], %83 {strides = array<i32>} : memref<1x2x4x32xbf16, #tpu.memory_space<vmem>>, vector<1x2x4x32xbf16>,
    return
  }
  func.func @transform_0(%arg0: i32, %arg1: i32) -> (i32, i32, i32, i32, i32, i32) {
    %c0_i32 = arith.constant 0 : i32
    %c0_i32_0 = arith.constant 0 : i32
    %c0_i32_1 = arith.constant 0 : i32
    %c0_i32_2 = arith.constant 0 : i32
    %c0_i32_3 = arith.constant 0 : i32
    return %arg0, %arg1, %c0_i32, %c0_i32_0, %c0_i32_1, %c0_i32_2 : i32, i32, i32, i32, i32, i32
  }
  func.func @transform_1(%arg0: i32, %arg1: i32) -> (i32, i32, i32, i32, i32, i32) {
    %c1_i32 = arith.constant 1 : i32
    %0 = arith.addi %arg1, %c1_i32 : i32
    %c2_i32 = arith.constant 2 : i32
    %1 = arith.muli %0, %c2_i32 : i32
    %c0_i32 = arith.constant 0 : i32
    %2 = arith.addi %1, %c0_i32 : i32
    %c0_i32_0 = arith.constant 0 : i32
    %c0_i32_1 = arith.constant 0 : i32
    %c0_i32_2 = arith.constant 0 : i32
    %c0_i32_3 = arith.constant 0 : i32
    %c0_i32_4 = arith.constant 0 : i32
    return %arg0, %2, %c0_i32_0, %c0_i32_1, %c0_i32_2, %c0_i32_3 : i32, i32, i32, i32, i32, i32
  }
  func.func @transform_2(%arg0: i32, %arg1: i32) -> (i32, i32, i32, i32, i32, i32) {
    %c1_i32 = arith.constant 1 : i32
    %0 = arith.addi %arg1, %c1_i32 : i32
    %c2_i32 = arith.constant 2 : i32
    %1 = arith.muli %0, %c2_i32 : i32
    %c1_i32_0 = arith.constant 1 : i32
    %2 = arith.addi %1, %c1_i32_0 : i32
    %c0_i32 = arith.constant 0 : i32
    %c0_i32_1 = arith.constant 0 : i32
    %c0_i32_2 = arith.constant 0 : i32
    %c0_i32_3 = arith.constant 0 : i32
    %c0_i32_4 = arith.constant 0 : i32
    return %arg0, %2, %c0_i32, %c0_i32_1, %c0_i32_2, %c0_i32_3 : i32, i32, i32, i32, i32, i32
  }
  func.func @transform_3(%arg0: i32, %arg1: i32) -> (i32, i32, i32) {
    %c0_i32 = arith.constant 0 : i32
    %c0_i32_0 = arith.constant 0 : i32
    %c0_i32_1 = arith.constant 0 : i32
    %c0_i32_2 = arith.constant 0 : i32
    return %c0_i32, %c0_i32_0, %c0_i32_1 : i32, i32, i32
  }
  func.func @transform_4(%arg0: i32, %arg1: i32) -> (i32, i32) {
    %c0_i32 = arith.constant 0 : i32
    %c0_i32_0 = arith.constant 0 : i32
    %c0_i32_1 = arith.constant 0 : i32
    return %c0_i32, %c0_i32_0 : i32, i32
  }
  func.func @transform_5(%arg0: i32, %arg1: i32) -> (i32, i32) {
    %c0_i32 = arith.constant 0 : i32
    %c0_i32_0 = arith.constant 0 : i32
    %c0_i32_1 = arith.constant 0 : i32
    return %c0_i32, %c0_i32_0 : i32, i32
  }
  func.func @transform_6(%arg0: i32, %arg1: i32) -> (i32, i32, i32, i32) {
    %c0_i32 = arith.constant 0 : i32
    %c0_i32_0 = arith.constant 0 : i32
    %c0_i32_1 = arith.constant 0 : i32
    return %arg0, %arg1, %c0_i32, %c0_i32_0 : i32, i32, i32, i32
  }
}

module attributes {stable_mosaic.version = 11 : i64} {
  func.func @_deconv_bn_kernel(%arg0: i32, %arg1: i32, %arg2: memref<1x2x5x40xbf16, #tpu.memory_space<vmem>>, %arg3: memref<1x1x5x40xbf16, #tpu.memory_space<vmem>>, %arg4: memref<18x40x32xbf16, #tpu.memory_space<vmem>>, %arg5: memref<1x32xf32, #tpu.memory_space<vmem>>, %arg6: memref<1x32xf32, #tpu.memory_space<vmem>>, %arg7: memref<1x2x8x4x32xbf16, #tpu.memory_space<vmem>>, %arg8: memref<1x2x8x4x32xbf16, #tpu.memory_space<vmem>>) attributes {dimension_semantics = [#tpu.dimension_semantics<parallel>, #tpu.dimension_semantics<parallel>], iteration_bounds = array<i64: 2, 1>, scalar_prefetch = 0 : i64, scratch_operands = 0 : i64, tpu.core_type = #tpu.core_type<tc>, window_params = [{transform_indices = @transform_0, window_bounds = array<i64: 1, 2, 5, 40>}, {transform_indices = @transform_1, window_bounds = array<i64: 1, 1, 5, 40>}, {pipeline_mode = #tpu.pipeline_mode<synchronous>, transform_indices = @transform_2, window_bounds = array<i64: 18, 40, 32>}, {pipeline_mode = #tpu.pipeline_mode<synchronous>, transform_indices = @transform_3, window_bounds = array<i64: 1, 32>}, {pipeline_mode = #tpu.pipeline_mode<synchronous>, transform_indices = @transform_4, window_bounds = array<i64: 1, 32>}, {transform_indices = @transform_5, window_bounds = array<i64: 1, 2, 8, 4, 32>}, {transform_indices = @transform_6, window_bounds = array<i64: 1, 2, 8, 4, 32>}]} {
    %c0 = arith.constant 0 : index
    %c0_0 = arith.constant 0 : index
    %c0_1 = arith.constant 0 : index
    %c0_2 = arith.constant 0 : index
    %0 = vector.load %arg2[%c0, %c0_0, %c0_1, %c0_2] : memref<1x2x5x40xbf16, #tpu.memory_space<vmem>>, vector<1x2x5x40xbf16>
    %1 = vector.shape_cast %0 : vector<1x2x5x40xbf16> to vector<2x5x40xbf16>
    %c0_3 = arith.constant 0 : index
    %c0_4 = arith.constant 0 : index
    %c0_5 = arith.constant 0 : index
    %c0_6 = arith.constant 0 : index
    %2 = vector.load %arg3[%c0_3, %c0_4, %c0_5, %c0_6] : memref<1x1x5x40xbf16, #tpu.memory_space<vmem>>, vector<1x1x5x40xbf16>
    %3 = vector.shape_cast %2 : vector<1x1x5x40xbf16> to vector<1x5x40xbf16>
    %4 = tpu.concatenate %1, %3 in 0 : vector<2x5x40xbf16>, vector<1x5x40xbf16> -> vector<3x5x40xbf16>
    %5 = vector.extract_strided_slice %4 {offsets = [0, 0, 0], sizes = [2, 4, 40], strides = [1, 1, 1]} : vector<3x5x40xbf16> to vector<2x4x40xbf16>
    %6 = vector.shape_cast %5 : vector<2x4x40xbf16> to vector<8x40xbf16>
    %7 = vector.extract_strided_slice %4 {offsets = [0, 1, 0], sizes = [2, 4, 40], strides = [1, 1, 1]} : vector<3x5x40xbf16> to vector<2x4x40xbf16>
    %8 = vector.shape_cast %7 : vector<2x4x40xbf16> to vector<8x40xbf16>
    %9 = vector.extract_strided_slice %4 {offsets = [1, 0, 0], sizes = [2, 4, 40], strides = [1, 1, 1]} : vector<3x5x40xbf16> to vector<2x4x40xbf16>
    %10 = vector.shape_cast %9 : vector<2x4x40xbf16> to vector<8x40xbf16>
    %11 = vector.extract_strided_slice %4 {offsets = [1, 1, 0], sizes = [2, 4, 40], strides = [1, 1, 1]} : vector<3x5x40xbf16> to vector<2x4x40xbf16>
    %12 = vector.shape_cast %11 : vector<2x4x40xbf16> to vector<8x40xbf16>
    %cst = arith.constant 0.000000e+00 : f32
    %13 = vector.broadcast %cst : f32 to vector<8x32xf32>
    %c0_7 = arith.constant 0 : index
    %c0_8 = arith.constant 0 : index
    %c0_9 = arith.constant 0 : index
    %14 = vector.load %arg4[%c0_7, %c0_8, %c0_9] : memref<18x40x32xbf16, #tpu.memory_space<vmem>>, vector<1x40x32xbf16>
    %15 = vector.shape_cast %14 : vector<1x40x32xbf16> to vector<40x32xbf16>
    %cst_10 = arith.constant dense<0.000000e+00> : vector<8x32xf32>
    %16 = tpu.matmul %6, %15, %cst_10 {dimension_numbers = #tpu.dot_dimension_numbers<[1], [0], [0], [1], [0, 0, 1, 1], [], []>} : vector<8x40xbf16>, vector<40x32xbf16>, vector<8x32xf32> -> vector<8x32xf32>
    %17 = arith.addf %13, %16 : vector<8x32xf32>
    %c0_11 = arith.constant 0 : index
    %c0_12 = arith.constant 0 : index
    %18 = vector.load %arg5[%c0_11, %c0_12] : memref<1x32xf32, #tpu.memory_space<vmem>>, vector<1x32xf32>
    %19 = vector.broadcast %18 : vector<1x32xf32> to vector<8x32xf32>
    %20 = arith.mulf %17, %19 : vector<8x32xf32>
    %c0_13 = arith.constant 0 : index
    %c0_14 = arith.constant 0 : index
    %21 = vector.load %arg6[%c0_13, %c0_14] : memref<1x32xf32, #tpu.memory_space<vmem>>, vector<1x32xf32>
    %22 = vector.broadcast %21 : vector<1x32xf32> to vector<8x32xf32>
    %23 = arith.addf %20, %22 : vector<8x32xf32>
    %c0_15 = arith.constant 0 : index
    %c0_16 = arith.constant 0 : index
    %c0_17 = arith.constant 0 : index
    %c0_18 = arith.constant 0 : index
    %c0_19 = arith.constant 0 : index
    %24 = vector.load %arg7[%c0_15, %c0_16, %c0_17, %c0_18, %c0_19] : memref<1x2x8x4x32xbf16, #tpu.memory_space<vmem>>, vector<1x2x1x4x32xbf16>
    %25 = vector.shape_cast %24 : vector<1x2x1x4x32xbf16> to vector<2x4x32xbf16>
    %26 = arith.extf %25 : vector<2x4x32xbf16> to vector<2x4x32xf32>
    %27 = vector.shape_cast %26 : vector<2x4x32xf32> to vector<8x32xf32>
    %28 = arith.addf %23, %27 : vector<8x32xf32>
    %cst_20 = arith.constant 0.000000e+00 : f32
    %29 = vector.broadcast %cst_20 : f32 to vector<8x32xf32>
    %30 = arith.maximumf %28, %29 : vector<8x32xf32>
    %31 = vector.shape_cast %30 : vector<8x32xf32> to vector<2x4x32xf32>
    %32 = arith.truncf %31 : vector<2x4x32xf32> to vector<2x4x32xbf16>
    %c0_21 = arith.constant 0 : index
    %c0_22 = arith.constant 0 : index
    %c0_23 = arith.constant 0 : index
    %c0_24 = arith.constant 0 : index
    %c0_25 = arith.constant 0 : index
    %33 = vector.load %arg8[%c0_21, %c0_22, %c0_23, %c0_24, %c0_25] : memref<1x2x8x4x32xbf16, #tpu.memory_space<vmem>>, vector<1x2x1x4x32xbf16>
    %34 = vector.shape_cast %33 : vector<1x2x1x4x32xbf16> to vector<2x4x32xbf16>
    %35 = vector.shape_cast %32 : vector<2x4x32xbf16> to vector<1x2x1x4x32xbf16>
    tpu.vector_store %arg8[%c0_21, %c0_22, %c0_23, %c0_24, %c0_25], %35 {strides = array<i32>} : memref<1x2x8x4x32xbf16, #tpu.memory_space<vmem>>, vector<1x2x1x4x32xbf16>,
    %cst_26 = arith.constant 0.000000e+00 : f32
    %36 = vector.broadcast %cst_26 : f32 to vector<8x32xf32>
    %c1 = arith.constant 1 : index
    %c0_27 = arith.constant 0 : index
    %c0_28 = arith.constant 0 : index
    %37 = vector.load %arg4[%c1, %c0_27, %c0_28] : memref<18x40x32xbf16, #tpu.memory_space<vmem>>, vector<1x40x32xbf16>
    %38 = vector.shape_cast %37 : vector<1x40x32xbf16> to vector<40x32xbf16>
    %cst_29 = arith.constant dense<0.000000e+00> : vector<8x32xf32>
    %39 = tpu.matmul %6, %38, %cst_29 {dimension_numbers = #tpu.dot_dimension_numbers<[1], [0], [0], [1], [0, 0, 1, 1], [], []>} : vector<8x40xbf16>, vector<40x32xbf16>, vector<8x32xf32> -> vector<8x32xf32>
    %40 = arith.addf %36, %39 : vector<8x32xf32>
    %c0_30 = arith.constant 0 : index
    %c0_31 = arith.constant 0 : index
    %41 = vector.load %arg5[%c0_30, %c0_31] : memref<1x32xf32, #tpu.memory_space<vmem>>, vector<1x32xf32>
    %42 = vector.broadcast %41 : vector<1x32xf32> to vector<8x32xf32>
    %43 = arith.mulf %40, %42 : vector<8x32xf32>
    %c0_32 = arith.constant 0 : index
    %c0_33 = arith.constant 0 : index
    %44 = vector.load %arg6[%c0_32, %c0_33] : memref<1x32xf32, #tpu.memory_space<vmem>>, vector<1x32xf32>
    %45 = vector.broadcast %44 : vector<1x32xf32> to vector<8x32xf32>
    %46 = arith.addf %43, %45 : vector<8x32xf32>
    %c0_34 = arith.constant 0 : index
    %c0_35 = arith.constant 0 : index
    %c1_36 = arith.constant 1 : index
    %c0_37 = arith.constant 0 : index
    %c0_38 = arith.constant 0 : index
    %47 = vector.load %arg7[%c0_34, %c0_35, %c1_36, %c0_37, %c0_38] : memref<1x2x8x4x32xbf16, #tpu.memory_space<vmem>>, vector<1x2x1x4x32xbf16>
    %48 = vector.shape_cast %47 : vector<1x2x1x4x32xbf16> to vector<2x4x32xbf16>
    %49 = arith.extf %48 : vector<2x4x32xbf16> to vector<2x4x32xf32>
    %50 = vector.shape_cast %49 : vector<2x4x32xf32> to vector<8x32xf32>
    %51 = arith.addf %46, %50 : vector<8x32xf32>
    %cst_39 = arith.constant 0.000000e+00 : f32
    %52 = vector.broadcast %cst_39 : f32 to vector<8x32xf32>
    %53 = arith.maximumf %51, %52 : vector<8x32xf32>
    %54 = vector.shape_cast %53 : vector<8x32xf32> to vector<2x4x32xf32>
    %55 = arith.truncf %54 : vector<2x4x32xf32> to vector<2x4x32xbf16>
    %c0_40 = arith.constant 0 : index
    %c0_41 = arith.constant 0 : index
    %c1_42 = arith.constant 1 : index
    %c0_43 = arith.constant 0 : index
    %c0_44 = arith.constant 0 : index
    %56 = vector.load %arg8[%c0_40, %c0_41, %c1_42, %c0_43, %c0_44] : memref<1x2x8x4x32xbf16, #tpu.memory_space<vmem>>, vector<1x2x1x4x32xbf16>
    %57 = vector.shape_cast %56 : vector<1x2x1x4x32xbf16> to vector<2x4x32xbf16>
    %58 = vector.shape_cast %55 : vector<2x4x32xbf16> to vector<1x2x1x4x32xbf16>
    tpu.vector_store %arg8[%c0_40, %c0_41, %c1_42, %c0_43, %c0_44], %58 {strides = array<i32>} : memref<1x2x8x4x32xbf16, #tpu.memory_space<vmem>>, vector<1x2x1x4x32xbf16>,
    %cst_45 = arith.constant 0.000000e+00 : f32
    %59 = vector.broadcast %cst_45 : f32 to vector<8x32xf32>
    %c2 = arith.constant 2 : index
    %c0_46 = arith.constant 0 : index
    %c0_47 = arith.constant 0 : index
    %60 = vector.load %arg4[%c2, %c0_46, %c0_47] : memref<18x40x32xbf16, #tpu.memory_space<vmem>>, vector<1x40x32xbf16>
    %61 = vector.shape_cast %60 : vector<1x40x32xbf16> to vector<40x32xbf16>
    %cst_48 = arith.constant dense<0.000000e+00> : vector<8x32xf32>
    %62 = tpu.matmul %6, %61, %cst_48 {dimension_numbers = #tpu.dot_dimension_numbers<[1], [0], [0], [1], [0, 0, 1, 1], [], []>} : vector<8x40xbf16>, vector<40x32xbf16>, vector<8x32xf32> -> vector<8x32xf32>
    %63 = arith.addf %59, %62 : vector<8x32xf32>
    %c3 = arith.constant 3 : index
    %c0_49 = arith.constant 0 : index
    %c0_50 = arith.constant 0 : index
    %64 = vector.load %arg4[%c3, %c0_49, %c0_50] : memref<18x40x32xbf16, #tpu.memory_space<vmem>>, vector<1x40x32xbf16>
    %65 = vector.shape_cast %64 : vector<1x40x32xbf16> to vector<40x32xbf16>
    %cst_51 = arith.constant dense<0.000000e+00> : vector<8x32xf32>
    %66 = tpu.matmul %8, %65, %cst_51 {dimension_numbers = #tpu.dot_dimension_numbers<[1], [0], [0], [1], [0, 0, 1, 1], [], []>} : vector<8x40xbf16>, vector<40x32xbf16>, vector<8x32xf32> -> vector<8x32xf32>
    %67 = arith.addf %63, %66 : vector<8x32xf32>
    %c0_52 = arith.constant 0 : index
    %c0_53 = arith.constant 0 : index
    %68 = vector.load %arg5[%c0_52, %c0_53] : memref<1x32xf32, #tpu.memory_space<vmem>>, vector<1x32xf32>
    %69 = vector.broadcast %68 : vector<1x32xf32> to vector<8x32xf32>
    %70 = arith.mulf %67, %69 : vector<8x32xf32>
    %c0_54 = arith.constant 0 : index
    %c0_55 = arith.constant 0 : index
    %71 = vector.load %arg6[%c0_54, %c0_55] : memref<1x32xf32, #tpu.memory_space<vmem>>, vector<1x32xf32>
    %72 = vector.broadcast %71 : vector<1x32xf32> to vector<8x32xf32>
    %73 = arith.addf %70, %72 : vector<8x32xf32>
    %c0_56 = arith.constant 0 : index
    %c0_57 = arith.constant 0 : index
    %c2_58 = arith.constant 2 : index
    %c0_59 = arith.constant 0 : index
    %c0_60 = arith.constant 0 : index
    %74 = vector.load %arg7[%c0_56, %c0_57, %c2_58, %c0_59, %c0_60] : memref<1x2x8x4x32xbf16, #tpu.memory_space<vmem>>, vector<1x2x1x4x32xbf16>
    %75 = vector.shape_cast %74 : vector<1x2x1x4x32xbf16> to vector<2x4x32xbf16>
    %76 = arith.extf %75 : vector<2x4x32xbf16> to vector<2x4x32xf32>
    %77 = vector.shape_cast %76 : vector<2x4x32xf32> to vector<8x32xf32>
    %78 = arith.addf %73, %77 : vector<8x32xf32>
    %cst_61 = arith.constant 0.000000e+00 : f32
    %79 = vector.broadcast %cst_61 : f32 to vector<8x32xf32>
    %80 = arith.maximumf %78, %79 : vector<8x32xf32>
    %81 = vector.shape_cast %80 : vector<8x32xf32> to vector<2x4x32xf32>
    %82 = arith.truncf %81 : vector<2x4x32xf32> to vector<2x4x32xbf16>
    %c0_62 = arith.constant 0 : index
    %c0_63 = arith.constant 0 : index
    %c2_64 = arith.constant 2 : index
    %c0_65 = arith.constant 0 : index
    %c0_66 = arith.constant 0 : index
    %83 = vector.load %arg8[%c0_62, %c0_63, %c2_64, %c0_65, %c0_66] : memref<1x2x8x4x32xbf16, #tpu.memory_space<vmem>>, vector<1x2x1x4x32xbf16>
    %84 = vector.shape_cast %83 : vector<1x2x1x4x32xbf16> to vector<2x4x32xbf16>
    %85 = vector.shape_cast %82 : vector<2x4x32xbf16> to vector<1x2x1x4x32xbf16>
    tpu.vector_store %arg8[%c0_62, %c0_63, %c2_64, %c0_65, %c0_66], %85 {strides = array<i32>} : memref<1x2x8x4x32xbf16, #tpu.memory_space<vmem>>, vector<1x2x1x4x32xbf16>,
    %cst_67 = arith.constant 0.000000e+00 : f32
    %86 = vector.broadcast %cst_67 : f32 to vector<8x32xf32>
    %c4 = arith.constant 4 : index
    %c0_68 = arith.constant 0 : index
    %c0_69 = arith.constant 0 : index
    %87 = vector.load %arg4[%c4, %c0_68, %c0_69] : memref<18x40x32xbf16, #tpu.memory_space<vmem>>, vector<1x40x32xbf16>
    %88 = vector.shape_cast %87 : vector<1x40x32xbf16> to vector<40x32xbf16>
    %cst_70 = arith.constant dense<0.000000e+00> : vector<8x32xf32>
    %89 = tpu.matmul %6, %88, %cst_70 {dimension_numbers = #tpu.dot_dimension_numbers<[1], [0], [0], [1], [0, 0, 1, 1], [], []>} : vector<8x40xbf16>, vector<40x32xbf16>, vector<8x32xf32> -> vector<8x32xf32>
    %90 = arith.addf %86, %89 : vector<8x32xf32>
    %c5 = arith.constant 5 : index
    %c0_71 = arith.constant 0 : index
    %c0_72 = arith.constant 0 : index
    %91 = vector.load %arg4[%c5, %c0_71, %c0_72] : memref<18x40x32xbf16, #tpu.memory_space<vmem>>, vector<1x40x32xbf16>
    %92 = vector.shape_cast %91 : vector<1x40x32xbf16> to vector<40x32xbf16>
    %cst_73 = arith.constant dense<0.000000e+00> : vector<8x32xf32>
    %93 = tpu.matmul %8, %92, %cst_73 {dimension_numbers = #tpu.dot_dimension_numbers<[1], [0], [0], [1], [0, 0, 1, 1], [], []>} : vector<8x40xbf16>, vector<40x32xbf16>, vector<8x32xf32> -> vector<8x32xf32>
    %94 = arith.addf %90, %93 : vector<8x32xf32>
    %c0_74 = arith.constant 0 : index
    %c0_75 = arith.constant 0 : index
    %95 = vector.load %arg5[%c0_74, %c0_75] : memref<1x32xf32, #tpu.memory_space<vmem>>, vector<1x32xf32>
    %96 = vector.broadcast %95 : vector<1x32xf32> to vector<8x32xf32>
    %97 = arith.mulf %94, %96 : vector<8x32xf32>
    %c0_76 = arith.constant 0 : index
    %c0_77 = arith.constant 0 : index
    %98 = vector.load %arg6[%c0_76, %c0_77] : memref<1x32xf32, #tpu.memory_space<vmem>>, vector<1x32xf32>
    %99 = vector.broadcast %98 : vector<1x32xf32> to vector<8x32xf32>
    %100 = arith.addf %97, %99 : vector<8x32xf32>
    %c0_78 = arith.constant 0 : index
    %c0_79 = arith.constant 0 : index
    %c3_80 = arith.constant 3 : index
    %c0_81 = arith.constant 0 : index
    %c0_82 = arith.constant 0 : index
    %101 = vector.load %arg7[%c0_78, %c0_79, %c3_80, %c0_81, %c0_82] : memref<1x2x8x4x32xbf16, #tpu.memory_space<vmem>>, vector<1x2x1x4x32xbf16>
    %102 = vector.shape_cast %101 : vector<1x2x1x4x32xbf16> to vector<2x4x32xbf16>
    %103 = arith.extf %102 : vector<2x4x32xbf16> to vector<2x4x32xf32>
    %104 = vector.shape_cast %103 : vector<2x4x32xf32> to vector<8x32xf32>
    %105 = arith.addf %100, %104 : vector<8x32xf32>
    %cst_83 = arith.constant 0.000000e+00 : f32
    %106 = vector.broadcast %cst_83 : f32 to vector<8x32xf32>
    %107 = arith.maximumf %105, %106 : vector<8x32xf32>
    %108 = vector.shape_cast %107 : vector<8x32xf32> to vector<2x4x32xf32>
    %109 = arith.truncf %108 : vector<2x4x32xf32> to vector<2x4x32xbf16>
    %c0_84 = arith.constant 0 : index
    %c0_85 = arith.constant 0 : index
    %c3_86 = arith.constant 3 : index
    %c0_87 = arith.constant 0 : index
    %c0_88 = arith.constant 0 : index
    %110 = vector.load %arg8[%c0_84, %c0_85, %c3_86, %c0_87, %c0_88] : memref<1x2x8x4x32xbf16, #tpu.memory_space<vmem>>, vector<1x2x1x4x32xbf16>
    %111 = vector.shape_cast %110 : vector<1x2x1x4x32xbf16> to vector<2x4x32xbf16>
    %112 = vector.shape_cast %109 : vector<2x4x32xbf16> to vector<1x2x1x4x32xbf16>
    tpu.vector_store %arg8[%c0_84, %c0_85, %c3_86, %c0_87, %c0_88], %112 {strides = array<i32>} : memref<1x2x8x4x32xbf16, #tpu.memory_space<vmem>>, vector<1x2x1x4x32xbf16>,
    %cst_89 = arith.constant 0.000000e+00 : f32
    %113 = vector.broadcast %cst_89 : f32 to vector<8x32xf32>
    %c6 = arith.constant 6 : index
    %c0_90 = arith.constant 0 : index
    %c0_91 = arith.constant 0 : index
    %114 = vector.load %arg4[%c6, %c0_90, %c0_91] : memref<18x40x32xbf16, #tpu.memory_space<vmem>>, vector<1x40x32xbf16>
    %115 = vector.shape_cast %114 : vector<1x40x32xbf16> to vector<40x32xbf16>
    %cst_92 = arith.constant dense<0.000000e+00> : vector<8x32xf32>
    %116 = tpu.matmul %6, %115, %cst_92 {dimension_numbers = #tpu.dot_dimension_numbers<[1], [0], [0], [1], [0, 0, 1, 1], [], []>} : vector<8x40xbf16>, vector<40x32xbf16>, vector<8x32xf32> -> vector<8x32xf32>
    %117 = arith.addf %113, %116 : vector<8x32xf32>
    %c7 = arith.constant 7 : index
    %c0_93 = arith.constant 0 : index
    %c0_94 = arith.constant 0 : index
    %118 = vector.load %arg4[%c7, %c0_93, %c0_94] : memref<18x40x32xbf16, #tpu.memory_space<vmem>>, vector<1x40x32xbf16>
    %119 = vector.shape_cast %118 : vector<1x40x32xbf16> to vector<40x32xbf16>
    %cst_95 = arith.constant dense<0.000000e+00> : vector<8x32xf32>
    %120 = tpu.matmul %10, %119, %cst_95 {dimension_numbers = #tpu.dot_dimension_numbers<[1], [0], [0], [1], [0, 0, 1, 1], [], []>} : vector<8x40xbf16>, vector<40x32xbf16>, vector<8x32xf32> -> vector<8x32xf32>
    %121 = arith.addf %117, %120 : vector<8x32xf32>
    %c0_96 = arith.constant 0 : index
    %c0_97 = arith.constant 0 : index
    %122 = vector.load %arg5[%c0_96, %c0_97] : memref<1x32xf32, #tpu.memory_space<vmem>>, vector<1x32xf32>
    %123 = vector.broadcast %122 : vector<1x32xf32> to vector<8x32xf32>
    %124 = arith.mulf %121, %123 : vector<8x32xf32>
    %c0_98 = arith.constant 0 : index
    %c0_99 = arith.constant 0 : index
    %125 = vector.load %arg6[%c0_98, %c0_99] : memref<1x32xf32, #tpu.memory_space<vmem>>, vector<1x32xf32>
    %126 = vector.broadcast %125 : vector<1x32xf32> to vector<8x32xf32>
    %127 = arith.addf %124, %126 : vector<8x32xf32>
    %c0_100 = arith.constant 0 : index
    %c0_101 = arith.constant 0 : index
    %c4_102 = arith.constant 4 : index
    %c0_103 = arith.constant 0 : index
    %c0_104 = arith.constant 0 : index
    %128 = vector.load %arg7[%c0_100, %c0_101, %c4_102, %c0_103, %c0_104] : memref<1x2x8x4x32xbf16, #tpu.memory_space<vmem>>, vector<1x2x1x4x32xbf16>
    %129 = vector.shape_cast %128 : vector<1x2x1x4x32xbf16> to vector<2x4x32xbf16>
    %130 = arith.extf %129 : vector<2x4x32xbf16> to vector<2x4x32xf32>
    %131 = vector.shape_cast %130 : vector<2x4x32xf32> to vector<8x32xf32>
    %132 = arith.addf %127, %131 : vector<8x32xf32>
    %cst_105 = arith.constant 0.000000e+00 : f32
    %133 = vector.broadcast %cst_105 : f32 to vector<8x32xf32>
    %134 = arith.maximumf %132, %133 : vector<8x32xf32>
    %135 = vector.shape_cast %134 : vector<8x32xf32> to vector<2x4x32xf32>
    %136 = arith.truncf %135 : vector<2x4x32xf32> to vector<2x4x32xbf16>
    %c0_106 = arith.constant 0 : index
    %c0_107 = arith.constant 0 : index
    %c4_108 = arith.constant 4 : index
    %c0_109 = arith.constant 0 : index
    %c0_110 = arith.constant 0 : index
    %137 = vector.load %arg8[%c0_106, %c0_107, %c4_108, %c0_109, %c0_110] : memref<1x2x8x4x32xbf16, #tpu.memory_space<vmem>>, vector<1x2x1x4x32xbf16>
    %138 = vector.shape_cast %137 : vector<1x2x1x4x32xbf16> to vector<2x4x32xbf16>
    %139 = vector.shape_cast %136 : vector<2x4x32xbf16> to vector<1x2x1x4x32xbf16>
    tpu.vector_store %arg8[%c0_106, %c0_107, %c4_108, %c0_109, %c0_110], %139 {strides = array<i32>} : memref<1x2x8x4x32xbf16, #tpu.memory_space<vmem>>, vector<1x2x1x4x32xbf16>,
    %cst_111 = arith.constant 0.000000e+00 : f32
    %140 = vector.broadcast %cst_111 : f32 to vector<8x32xf32>
    %c8 = arith.constant 8 : index
    %c0_112 = arith.constant 0 : index
    %c0_113 = arith.constant 0 : index
    %141 = vector.load %arg4[%c8, %c0_112, %c0_113] : memref<18x40x32xbf16, #tpu.memory_space<vmem>>, vector<1x40x32xbf16>
    %142 = vector.shape_cast %141 : vector<1x40x32xbf16> to vector<40x32xbf16>
    %cst_114 = arith.constant dense<0.000000e+00> : vector<8x32xf32>
    %143 = tpu.matmul %6, %142, %cst_114 {dimension_numbers = #tpu.dot_dimension_numbers<[1], [0], [0], [1], [0, 0, 1, 1], [], []>} : vector<8x40xbf16>, vector<40x32xbf16>, vector<8x32xf32> -> vector<8x32xf32>
    %144 = arith.addf %140, %143 : vector<8x32xf32>
    %c9 = arith.constant 9 : index
    %c0_115 = arith.constant 0 : index
    %c0_116 = arith.constant 0 : index
    %145 = vector.load %arg4[%c9, %c0_115, %c0_116] : memref<18x40x32xbf16, #tpu.memory_space<vmem>>, vector<1x40x32xbf16>
    %146 = vector.shape_cast %145 : vector<1x40x32xbf16> to vector<40x32xbf16>
    %cst_117 = arith.constant dense<0.000000e+00> : vector<8x32xf32>
    %147 = tpu.matmul %10, %146, %cst_117 {dimension_numbers = #tpu.dot_dimension_numbers<[1], [0], [0], [1], [0, 0, 1, 1], [], []>} : vector<8x40xbf16>, vector<40x32xbf16>, vector<8x32xf32> -> vector<8x32xf32>
    %148 = arith.addf %144, %147 : vector<8x32xf32>
    %c0_118 = arith.constant 0 : index
    %c0_119 = arith.constant 0 : index
    %149 = vector.load %arg5[%c0_118, %c0_119] : memref<1x32xf32, #tpu.memory_space<vmem>>, vector<1x32xf32>
    %150 = vector.broadcast %149 : vector<1x32xf32> to vector<8x32xf32>
    %151 = arith.mulf %148, %150 : vector<8x32xf32>
    %c0_120 = arith.constant 0 : index
    %c0_121 = arith.constant 0 : index
    %152 = vector.load %arg6[%c0_120, %c0_121] : memref<1x32xf32, #tpu.memory_space<vmem>>, vector<1x32xf32>
    %153 = vector.broadcast %152 : vector<1x32xf32> to vector<8x32xf32>
    %154 = arith.addf %151, %153 : vector<8x32xf32>
    %c0_122 = arith.constant 0 : index
    %c0_123 = arith.constant 0 : index
    %c5_124 = arith.constant 5 : index
    %c0_125 = arith.constant 0 : index
    %c0_126 = arith.constant 0 : index
    %155 = vector.load %arg7[%c0_122, %c0_123, %c5_124, %c0_125, %c0_126] : memref<1x2x8x4x32xbf16, #tpu.memory_space<vmem>>, vector<1x2x1x4x32xbf16>
    %156 = vector.shape_cast %155 : vector<1x2x1x4x32xbf16> to vector<2x4x32xbf16>
    %157 = arith.extf %156 : vector<2x4x32xbf16> to vector<2x4x32xf32>
    %158 = vector.shape_cast %157 : vector<2x4x32xf32> to vector<8x32xf32>
    %159 = arith.addf %154, %158 : vector<8x32xf32>
    %cst_127 = arith.constant 0.000000e+00 : f32
    %160 = vector.broadcast %cst_127 : f32 to vector<8x32xf32>
    %161 = arith.maximumf %159, %160 : vector<8x32xf32>
    %162 = vector.shape_cast %161 : vector<8x32xf32> to vector<2x4x32xf32>
    %163 = arith.truncf %162 : vector<2x4x32xf32> to vector<2x4x32xbf16>
    %c0_128 = arith.constant 0 : index
    %c0_129 = arith.constant 0 : index
    %c5_130 = arith.constant 5 : index
    %c0_131 = arith.constant 0 : index
    %c0_132 = arith.constant 0 : index
    %164 = vector.load %arg8[%c0_128, %c0_129, %c5_130, %c0_131, %c0_132] : memref<1x2x8x4x32xbf16, #tpu.memory_space<vmem>>, vector<1x2x1x4x32xbf16>
    %165 = vector.shape_cast %164 : vector<1x2x1x4x32xbf16> to vector<2x4x32xbf16>
    %166 = vector.shape_cast %163 : vector<2x4x32xbf16> to vector<1x2x1x4x32xbf16>
    tpu.vector_store %arg8[%c0_128, %c0_129, %c5_130, %c0_131, %c0_132], %166 {strides = array<i32>} : memref<1x2x8x4x32xbf16, #tpu.memory_space<vmem>>, vector<1x2x1x4x32xbf16>,
    %cst_133 = arith.constant 0.000000e+00 : f32
    %167 = vector.broadcast %cst_133 : f32 to vector<8x32xf32>
    %c10 = arith.constant 10 : index
    %c0_134 = arith.constant 0 : index
    %c0_135 = arith.constant 0 : index
    %168 = vector.load %arg4[%c10, %c0_134, %c0_135] : memref<18x40x32xbf16, #tpu.memory_space<vmem>>, vector<1x40x32xbf16>
    %169 = vector.shape_cast %168 : vector<1x40x32xbf16> to vector<40x32xbf16>
    %cst_136 = arith.constant dense<0.000000e+00> : vector<8x32xf32>
    %170 = tpu.matmul %6, %169, %cst_136 {dimension_numbers = #tpu.dot_dimension_numbers<[1], [0], [0], [1], [0, 0, 1, 1], [], []>} : vector<8x40xbf16>, vector<40x32xbf16>, vector<8x32xf32> -> vector<8x32xf32>
    %171 = arith.addf %167, %170 : vector<8x32xf32>
    %c11 = arith.constant 11 : index
    %c0_137 = arith.constant 0 : index
    %c0_138 = arith.constant 0 : index
    %172 = vector.load %arg4[%c11, %c0_137, %c0_138] : memref<18x40x32xbf16, #tpu.memory_space<vmem>>, vector<1x40x32xbf16>
    %173 = vector.shape_cast %172 : vector<1x40x32xbf16> to vector<40x32xbf16>
    %cst_139 = arith.constant dense<0.000000e+00> : vector<8x32xf32>
    %174 = tpu.matmul %8, %173, %cst_139 {dimension_numbers = #tpu.dot_dimension_numbers<[1], [0], [0], [1], [0, 0, 1, 1], [], []>} : vector<8x40xbf16>, vector<40x32xbf16>, vector<8x32xf32> -> vector<8x32xf32>
    %175 = arith.addf %171, %174 : vector<8x32xf32>
    %c12 = arith.constant 12 : index
    %c0_140 = arith.constant 0 : index
    %c0_141 = arith.constant 0 : index
    %176 = vector.load %arg4[%c12, %c0_140, %c0_141] : memref<18x40x32xbf16, #tpu.memory_space<vmem>>, vector<1x40x32xbf16>
    %177 = vector.shape_cast %176 : vector<1x40x32xbf16> to vector<40x32xbf16>
    %cst_142 = arith.constant dense<0.000000e+00> : vector<8x32xf32>
    %178 = tpu.matmul %10, %177, %cst_142 {dimension_numbers = #tpu.dot_dimension_numbers<[1], [0], [0], [1], [0, 0, 1, 1], [], []>} : vector<8x40xbf16>, vector<40x32xbf16>, vector<8x32xf32> -> vector<8x32xf32>
    %179 = arith.addf %175, %178 : vector<8x32xf32>
    %c13 = arith.constant 13 : index
    %c0_143 = arith.constant 0 : index
    %c0_144 = arith.constant 0 : index
    %180 = vector.load %arg4[%c13, %c0_143, %c0_144] : memref<18x40x32xbf16, #tpu.memory_space<vmem>>, vector<1x40x32xbf16>
    %181 = vector.shape_cast %180 : vector<1x40x32xbf16> to vector<40x32xbf16>
    %cst_145 = arith.constant dense<0.000000e+00> : vector<8x32xf32>
    %182 = tpu.matmul %12, %181, %cst_145 {dimension_numbers = #tpu.dot_dimension_numbers<[1], [0], [0], [1], [0, 0, 1, 1], [], []>} : vector<8x40xbf16>, vector<40x32xbf16>, vector<8x32xf32> -> vector<8x32xf32>
    %183 = arith.addf %179, %182 : vector<8x32xf32>
    %c0_146 = arith.constant 0 : index
    %c0_147 = arith.constant 0 : index
    %184 = vector.load %arg5[%c0_146, %c0_147] : memref<1x32xf32, #tpu.memory_space<vmem>>, vector<1x32xf32>
    %185 = vector.broadcast %184 : vector<1x32xf32> to vector<8x32xf32>
    %186 = arith.mulf %183, %185 : vector<8x32xf32>
    %c0_148 = arith.constant 0 : index
    %c0_149 = arith.constant 0 : index
    %187 = vector.load %arg6[%c0_148, %c0_149] : memref<1x32xf32, #tpu.memory_space<vmem>>, vector<1x32xf32>
    %188 = vector.broadcast %187 : vector<1x32xf32> to vector<8x32xf32>
    %189 = arith.addf %186, %188 : vector<8x32xf32>
    %c0_150 = arith.constant 0 : index
    %c0_151 = arith.constant 0 : index
    %c6_152 = arith.constant 6 : index
    %c0_153 = arith.constant 0 : index
    %c0_154 = arith.constant 0 : index
    %190 = vector.load %arg7[%c0_150, %c0_151, %c6_152, %c0_153, %c0_154] : memref<1x2x8x4x32xbf16, #tpu.memory_space<vmem>>, vector<1x2x1x4x32xbf16>
    %191 = vector.shape_cast %190 : vector<1x2x1x4x32xbf16> to vector<2x4x32xbf16>
    %192 = arith.extf %191 : vector<2x4x32xbf16> to vector<2x4x32xf32>
    %193 = vector.shape_cast %192 : vector<2x4x32xf32> to vector<8x32xf32>
    %194 = arith.addf %189, %193 : vector<8x32xf32>
    %cst_155 = arith.constant 0.000000e+00 : f32
    %195 = vector.broadcast %cst_155 : f32 to vector<8x32xf32>
    %196 = arith.maximumf %194, %195 : vector<8x32xf32>
    %197 = vector.shape_cast %196 : vector<8x32xf32> to vector<2x4x32xf32>
    %198 = arith.truncf %197 : vector<2x4x32xf32> to vector<2x4x32xbf16>
    %c0_156 = arith.constant 0 : index
    %c0_157 = arith.constant 0 : index
    %c6_158 = arith.constant 6 : index
    %c0_159 = arith.constant 0 : index
    %c0_160 = arith.constant 0 : index
    %199 = vector.load %arg8[%c0_156, %c0_157, %c6_158, %c0_159, %c0_160] : memref<1x2x8x4x32xbf16, #tpu.memory_space<vmem>>, vector<1x2x1x4x32xbf16>
    %200 = vector.shape_cast %199 : vector<1x2x1x4x32xbf16> to vector<2x4x32xbf16>
    %201 = vector.shape_cast %198 : vector<2x4x32xbf16> to vector<1x2x1x4x32xbf16>
    tpu.vector_store %arg8[%c0_156, %c0_157, %c6_158, %c0_159, %c0_160], %201 {strides = array<i32>} : memref<1x2x8x4x32xbf16, #tpu.memory_space<vmem>>, vector<1x2x1x4x32xbf16>,
    %cst_161 = arith.constant 0.000000e+00 : f32
    %202 = vector.broadcast %cst_161 : f32 to vector<8x32xf32>
    %c14 = arith.constant 14 : index
    %c0_162 = arith.constant 0 : index
    %c0_163 = arith.constant 0 : index
    %203 = vector.load %arg4[%c14, %c0_162, %c0_163] : memref<18x40x32xbf16, #tpu.memory_space<vmem>>, vector<1x40x32xbf16>
    %204 = vector.shape_cast %203 : vector<1x40x32xbf16> to vector<40x32xbf16>
    %cst_164 = arith.constant dense<0.000000e+00> : vector<8x32xf32>
    %205 = tpu.matmul %6, %204, %cst_164 {dimension_numbers = #tpu.dot_dimension_numbers<[1], [0], [0], [1], [0, 0, 1, 1], [], []>} : vector<8x40xbf16>, vector<40x32xbf16>, vector<8x32xf32> -> vector<8x32xf32>
    %206 = arith.addf %202, %205 : vector<8x32xf32>
    %c15 = arith.constant 15 : index
    %c0_165 = arith.constant 0 : index
    %c0_166 = arith.constant 0 : index
    %207 = vector.load %arg4[%c15, %c0_165, %c0_166] : memref<18x40x32xbf16, #tpu.memory_space<vmem>>, vector<1x40x32xbf16>
    %208 = vector.shape_cast %207 : vector<1x40x32xbf16> to vector<40x32xbf16>
    %cst_167 = arith.constant dense<0.000000e+00> : vector<8x32xf32>
    %209 = tpu.matmul %8, %208, %cst_167 {dimension_numbers = #tpu.dot_dimension_numbers<[1], [0], [0], [1], [0, 0, 1, 1], [], []>} : vector<8x40xbf16>, vector<40x32xbf16>, vector<8x32xf32> -> vector<8x32xf32>
    %210 = arith.addf %206, %209 : vector<8x32xf32>
    %c16 = arith.constant 16 : index
    %c0_168 = arith.constant 0 : index
    %c0_169 = arith.constant 0 : index
    %211 = vector.load %arg4[%c16, %c0_168, %c0_169] : memref<18x40x32xbf16, #tpu.memory_space<vmem>>, vector<1x40x32xbf16>
    %212 = vector.shape_cast %211 : vector<1x40x32xbf16> to vector<40x32xbf16>
    %cst_170 = arith.constant dense<0.000000e+00> : vector<8x32xf32>
    %213 = tpu.matmul %10, %212, %cst_170 {dimension_numbers = #tpu.dot_dimension_numbers<[1], [0], [0], [1], [0, 0, 1, 1], [], []>} : vector<8x40xbf16>, vector<40x32xbf16>, vector<8x32xf32> -> vector<8x32xf32>
    %214 = arith.addf %210, %213 : vector<8x32xf32>
    %c17 = arith.constant 17 : index
    %c0_171 = arith.constant 0 : index
    %c0_172 = arith.constant 0 : index
    %215 = vector.load %arg4[%c17, %c0_171, %c0_172] : memref<18x40x32xbf16, #tpu.memory_space<vmem>>, vector<1x40x32xbf16>
    %216 = vector.shape_cast %215 : vector<1x40x32xbf16> to vector<40x32xbf16>
    %cst_173 = arith.constant dense<0.000000e+00> : vector<8x32xf32>
    %217 = tpu.matmul %12, %216, %cst_173 {dimension_numbers = #tpu.dot_dimension_numbers<[1], [0], [0], [1], [0, 0, 1, 1], [], []>} : vector<8x40xbf16>, vector<40x32xbf16>, vector<8x32xf32> -> vector<8x32xf32>
    %218 = arith.addf %214, %217 : vector<8x32xf32>
    %c0_174 = arith.constant 0 : index
    %c0_175 = arith.constant 0 : index
    %219 = vector.load %arg5[%c0_174, %c0_175] : memref<1x32xf32, #tpu.memory_space<vmem>>, vector<1x32xf32>
    %220 = vector.broadcast %219 : vector<1x32xf32> to vector<8x32xf32>
    %221 = arith.mulf %218, %220 : vector<8x32xf32>
    %c0_176 = arith.constant 0 : index
    %c0_177 = arith.constant 0 : index
    %222 = vector.load %arg6[%c0_176, %c0_177] : memref<1x32xf32, #tpu.memory_space<vmem>>, vector<1x32xf32>
    %223 = vector.broadcast %222 : vector<1x32xf32> to vector<8x32xf32>
    %224 = arith.addf %221, %223 : vector<8x32xf32>
    %c0_178 = arith.constant 0 : index
    %c0_179 = arith.constant 0 : index
    %c7_180 = arith.constant 7 : index
    %c0_181 = arith.constant 0 : index
    %c0_182 = arith.constant 0 : index
    %225 = vector.load %arg7[%c0_178, %c0_179, %c7_180, %c0_181, %c0_182] : memref<1x2x8x4x32xbf16, #tpu.memory_space<vmem>>, vector<1x2x1x4x32xbf16>
    %226 = vector.shape_cast %225 : vector<1x2x1x4x32xbf16> to vector<2x4x32xbf16>
    %227 = arith.extf %226 : vector<2x4x32xbf16> to vector<2x4x32xf32>
    %228 = vector.shape_cast %227 : vector<2x4x32xf32> to vector<8x32xf32>
    %229 = arith.addf %224, %228 : vector<8x32xf32>
    %cst_183 = arith.constant 0.000000e+00 : f32
    %230 = vector.broadcast %cst_183 : f32 to vector<8x32xf32>
    %231 = arith.maximumf %229, %230 : vector<8x32xf32>
    %232 = vector.shape_cast %231 : vector<8x32xf32> to vector<2x4x32xf32>
    %233 = arith.truncf %232 : vector<2x4x32xf32> to vector<2x4x32xbf16>
    %c0_184 = arith.constant 0 : index
    %c0_185 = arith.constant 0 : index
    %c7_186 = arith.constant 7 : index
    %c0_187 = arith.constant 0 : index
    %c0_188 = arith.constant 0 : index
    %234 = vector.load %arg8[%c0_184, %c0_185, %c7_186, %c0_187, %c0_188] : memref<1x2x8x4x32xbf16, #tpu.memory_space<vmem>>, vector<1x2x1x4x32xbf16>
    %235 = vector.shape_cast %234 : vector<1x2x1x4x32xbf16> to vector<2x4x32xbf16>
    %236 = vector.shape_cast %233 : vector<2x4x32xbf16> to vector<1x2x1x4x32xbf16>
    tpu.vector_store %arg8[%c0_184, %c0_185, %c7_186, %c0_187, %c0_188], %236 {strides = array<i32>} : memref<1x2x8x4x32xbf16, #tpu.memory_space<vmem>>, vector<1x2x1x4x32xbf16>,
    return
  }
  func.func @transform_0(%arg0: i32, %arg1: i32) -> (i32, i32, i32, i32) {
    %c0_i32 = arith.constant 0 : i32
    %c0_i32_0 = arith.constant 0 : i32
    %c0_i32_1 = arith.constant 0 : i32
    return %arg0, %arg1, %c0_i32, %c0_i32_0 : i32, i32, i32, i32
  }
  func.func @transform_1(%arg0: i32, %arg1: i32) -> (i32, i32, i32, i32) {
    %c1_i32 = arith.constant 1 : i32
    %0 = arith.addi %arg1, %c1_i32 : i32
    %c2_i32 = arith.constant 2 : i32
    %1 = arith.muli %0, %c2_i32 : i32
    %c0_i32 = arith.constant 0 : i32
    %c0_i32_0 = arith.constant 0 : i32
    %c0_i32_1 = arith.constant 0 : i32
    return %arg0, %1, %c0_i32, %c0_i32_0 : i32, i32, i32, i32
  }
  func.func @transform_2(%arg0: i32, %arg1: i32) -> (i32, i32, i32) {
    %c0_i32 = arith.constant 0 : i32
    %c0_i32_0 = arith.constant 0 : i32
    %c0_i32_1 = arith.constant 0 : i32
    %c0_i32_2 = arith.constant 0 : i32
    return %c0_i32, %c0_i32_0, %c0_i32_1 : i32, i32, i32
  }
  func.func @transform_3(%arg0: i32, %arg1: i32) -> (i32, i32) {
    %c0_i32 = arith.constant 0 : i32
    %c0_i32_0 = arith.constant 0 : i32
    %c0_i32_1 = arith.constant 0 : i32
    return %c0_i32, %c0_i32_0 : i32, i32
  }
  func.func @transform_4(%arg0: i32, %arg1: i32) -> (i32, i32) {
    %c0_i32 = arith.constant 0 : i32
    %c0_i32_0 = arith.constant 0 : i32
    %c0_i32_1 = arith.constant 0 : i32
    return %c0_i32, %c0_i32_0 : i32, i32
  }
  func.func @transform_5(%arg0: i32, %arg1: i32) -> (i32, i32, i32, i32, i32) {
    %c0_i32 = arith.constant 0 : i32
    %c0_i32_0 = arith.constant 0 : i32
    %c0_i32_1 = arith.constant 0 : i32
    %c0_i32_2 = arith.constant 0 : i32
    return %arg0, %arg1, %c0_i32, %c0_i32_0, %c0_i32_1 : i32, i32, i32, i32, i32
  }
  func.func @transform_6(%arg0: i32, %arg1: i32) -> (i32, i32, i32, i32, i32) {
    %c0_i32 = arith.constant 0 : i32
    %c0_i32_0 = arith.constant 0 : i32
    %c0_i32_1 = arith.constant 0 : i32
    %c0_i32_2 = arith.constant 0 : i32
    return %arg0, %arg1, %c0_i32, %c0_i32_0, %c0_i32_1 : i32, i32, i32, i32, i32
  }
}

module attributes {stable_mosaic.version = 11 : i64} {
  func.func @_deconv_bn_kernel(%arg0: i32, %arg1: i32, %arg2: memref<1x4x9x72xbf16, #tpu.memory_space<vmem>>, %arg3: memref<1x1x9x72xbf16, #tpu.memory_space<vmem>>, %arg4: memref<18x72x32xbf16, #tpu.memory_space<vmem>>, %arg5: memref<1x32xf32, #tpu.memory_space<vmem>>, %arg6: memref<1x32xf32, #tpu.memory_space<vmem>>, %arg7: memref<1x4x8x8x32xbf16, #tpu.memory_space<vmem>>) attributes {dimension_semantics = [#tpu.dimension_semantics<parallel>, #tpu.dimension_semantics<parallel>], iteration_bounds = array<i64: 2, 1>, scalar_prefetch = 0 : i64, scratch_operands = 0 : i64, tpu.core_type = #tpu.core_type<tc>, window_params = [{transform_indices = @transform_0, window_bounds = array<i64: 1, 4, 9, 72>}, {transform_indices = @transform_1, window_bounds = array<i64: 1, 1, 9, 72>}, {pipeline_mode = #tpu.pipeline_mode<synchronous>, transform_indices = @transform_2, window_bounds = array<i64: 18, 72, 32>}, {pipeline_mode = #tpu.pipeline_mode<synchronous>, transform_indices = @transform_3, window_bounds = array<i64: 1, 32>}, {pipeline_mode = #tpu.pipeline_mode<synchronous>, transform_indices = @transform_4, window_bounds = array<i64: 1, 32>}, {transform_indices = @transform_5, window_bounds = array<i64: 1, 4, 8, 8, 32>}]} {
    %c0 = arith.constant 0 : index
    %c0_0 = arith.constant 0 : index
    %c0_1 = arith.constant 0 : index
    %c0_2 = arith.constant 0 : index
    %0 = vector.load %arg2[%c0, %c0_0, %c0_1, %c0_2] : memref<1x4x9x72xbf16, #tpu.memory_space<vmem>>, vector<1x4x9x72xbf16>
    %1 = vector.shape_cast %0 : vector<1x4x9x72xbf16> to vector<4x9x72xbf16>
    %c0_3 = arith.constant 0 : index
    %c0_4 = arith.constant 0 : index
    %c0_5 = arith.constant 0 : index
    %c0_6 = arith.constant 0 : index
    %2 = vector.load %arg3[%c0_3, %c0_4, %c0_5, %c0_6] : memref<1x1x9x72xbf16, #tpu.memory_space<vmem>>, vector<1x1x9x72xbf16>
    %3 = vector.shape_cast %2 : vector<1x1x9x72xbf16> to vector<1x9x72xbf16>
    %4 = tpu.concatenate %1, %3 in 0 : vector<4x9x72xbf16>, vector<1x9x72xbf16> -> vector<5x9x72xbf16>
    %5 = vector.extract_strided_slice %4 {offsets = [0, 0, 0], sizes = [4, 8, 72], strides = [1, 1, 1]} : vector<5x9x72xbf16> to vector<4x8x72xbf16>
    %6 = vector.shape_cast %5 : vector<4x8x72xbf16> to vector<32x72xbf16>
    %7 = vector.extract_strided_slice %4 {offsets = [0, 1, 0], sizes = [4, 8, 72], strides = [1, 1, 1]} : vector<5x9x72xbf16> to vector<4x8x72xbf16>
    %8 = vector.shape_cast %7 : vector<4x8x72xbf16> to vector<32x72xbf16>
    %9 = vector.extract_strided_slice %4 {offsets = [1, 0, 0], sizes = [4, 8, 72], strides = [1, 1, 1]} : vector<5x9x72xbf16> to vector<4x8x72xbf16>
    %10 = vector.shape_cast %9 : vector<4x8x72xbf16> to vector<32x72xbf16>
    %11 = vector.extract_strided_slice %4 {offsets = [1, 1, 0], sizes = [4, 8, 72], strides = [1, 1, 1]} : vector<5x9x72xbf16> to vector<4x8x72xbf16>
    %12 = vector.shape_cast %11 : vector<4x8x72xbf16> to vector<32x72xbf16>
    %cst = arith.constant 0.000000e+00 : f32
    %13 = vector.broadcast %cst : f32 to vector<32x32xf32>
    %c0_7 = arith.constant 0 : index
    %c0_8 = arith.constant 0 : index
    %c0_9 = arith.constant 0 : index
    %14 = vector.load %arg4[%c0_7, %c0_8, %c0_9] : memref<18x72x32xbf16, #tpu.memory_space<vmem>>, vector<1x72x32xbf16>
    %15 = vector.shape_cast %14 : vector<1x72x32xbf16> to vector<72x32xbf16>
    %cst_10 = arith.constant dense<0.000000e+00> : vector<32x32xf32>
    %16 = tpu.matmul %6, %15, %cst_10 {dimension_numbers = #tpu.dot_dimension_numbers<[1], [0], [0], [1], [0, 0, 1, 1], [], []>} : vector<32x72xbf16>, vector<72x32xbf16>, vector<32x32xf32> -> vector<32x32xf32>
    %17 = arith.addf %13, %16 : vector<32x32xf32>
    %c0_11 = arith.constant 0 : index
    %c0_12 = arith.constant 0 : index
    %18 = vector.load %arg5[%c0_11, %c0_12] : memref<1x32xf32, #tpu.memory_space<vmem>>, vector<1x32xf32>
    %19 = vector.broadcast %18 : vector<1x32xf32> to vector<32x32xf32>
    %20 = arith.mulf %17, %19 : vector<32x32xf32>
    %c0_13 = arith.constant 0 : index
    %c0_14 = arith.constant 0 : index
    %21 = vector.load %arg6[%c0_13, %c0_14] : memref<1x32xf32, #tpu.memory_space<vmem>>, vector<1x32xf32>
    %22 = vector.broadcast %21 : vector<1x32xf32> to vector<32x32xf32>
    %23 = arith.addf %20, %22 : vector<32x32xf32>
    %24 = vector.shape_cast %23 : vector<32x32xf32> to vector<4x8x32xf32>
    %25 = arith.truncf %24 : vector<4x8x32xf32> to vector<4x8x32xbf16>
    %c0_15 = arith.constant 0 : index
    %c0_16 = arith.constant 0 : index
    %c0_17 = arith.constant 0 : index
    %c0_18 = arith.constant 0 : index
    %c0_19 = arith.constant 0 : index
    %26 = vector.load %arg7[%c0_15, %c0_16, %c0_17, %c0_18, %c0_19] : memref<1x4x8x8x32xbf16, #tpu.memory_space<vmem>>, vector<1x4x1x8x32xbf16>
    %27 = vector.shape_cast %26 : vector<1x4x1x8x32xbf16> to vector<4x8x32xbf16>
    %28 = vector.shape_cast %25 : vector<4x8x32xbf16> to vector<1x4x1x8x32xbf16>
    tpu.vector_store %arg7[%c0_15, %c0_16, %c0_17, %c0_18, %c0_19], %28 {strides = array<i32>} : memref<1x4x8x8x32xbf16, #tpu.memory_space<vmem>>, vector<1x4x1x8x32xbf16>,
    %cst_20 = arith.constant 0.000000e+00 : f32
    %29 = vector.broadcast %cst_20 : f32 to vector<32x32xf32>
    %c1 = arith.constant 1 : index
    %c0_21 = arith.constant 0 : index
    %c0_22 = arith.constant 0 : index
    %30 = vector.load %arg4[%c1, %c0_21, %c0_22] : memref<18x72x32xbf16, #tpu.memory_space<vmem>>, vector<1x72x32xbf16>
    %31 = vector.shape_cast %30 : vector<1x72x32xbf16> to vector<72x32xbf16>
    %cst_23 = arith.constant dense<0.000000e+00> : vector<32x32xf32>
    %32 = tpu.matmul %6, %31, %cst_23 {dimension_numbers = #tpu.dot_dimension_numbers<[1], [0], [0], [1], [0, 0, 1, 1], [], []>} : vector<32x72xbf16>, vector<72x32xbf16>, vector<32x32xf32> -> vector<32x32xf32>
    %33 = arith.addf %29, %32 : vector<32x32xf32>
    %c0_24 = arith.constant 0 : index
    %c0_25 = arith.constant 0 : index
    %34 = vector.load %arg5[%c0_24, %c0_25] : memref<1x32xf32, #tpu.memory_space<vmem>>, vector<1x32xf32>
    %35 = vector.broadcast %34 : vector<1x32xf32> to vector<32x32xf32>
    %36 = arith.mulf %33, %35 : vector<32x32xf32>
    %c0_26 = arith.constant 0 : index
    %c0_27 = arith.constant 0 : index
    %37 = vector.load %arg6[%c0_26, %c0_27] : memref<1x32xf32, #tpu.memory_space<vmem>>, vector<1x32xf32>
    %38 = vector.broadcast %37 : vector<1x32xf32> to vector<32x32xf32>
    %39 = arith.addf %36, %38 : vector<32x32xf32>
    %40 = vector.shape_cast %39 : vector<32x32xf32> to vector<4x8x32xf32>
    %41 = arith.truncf %40 : vector<4x8x32xf32> to vector<4x8x32xbf16>
    %c0_28 = arith.constant 0 : index
    %c0_29 = arith.constant 0 : index
    %c1_30 = arith.constant 1 : index
    %c0_31 = arith.constant 0 : index
    %c0_32 = arith.constant 0 : index
    %42 = vector.load %arg7[%c0_28, %c0_29, %c1_30, %c0_31, %c0_32] : memref<1x4x8x8x32xbf16, #tpu.memory_space<vmem>>, vector<1x4x1x8x32xbf16>
    %43 = vector.shape_cast %42 : vector<1x4x1x8x32xbf16> to vector<4x8x32xbf16>
    %44 = vector.shape_cast %41 : vector<4x8x32xbf16> to vector<1x4x1x8x32xbf16>
    tpu.vector_store %arg7[%c0_28, %c0_29, %c1_30, %c0_31, %c0_32], %44 {strides = array<i32>} : memref<1x4x8x8x32xbf16, #tpu.memory_space<vmem>>, vector<1x4x1x8x32xbf16>,
    %cst_33 = arith.constant 0.000000e+00 : f32
    %45 = vector.broadcast %cst_33 : f32 to vector<32x32xf32>
    %c2 = arith.constant 2 : index
    %c0_34 = arith.constant 0 : index
    %c0_35 = arith.constant 0 : index
    %46 = vector.load %arg4[%c2, %c0_34, %c0_35] : memref<18x72x32xbf16, #tpu.memory_space<vmem>>, vector<1x72x32xbf16>
    %47 = vector.shape_cast %46 : vector<1x72x32xbf16> to vector<72x32xbf16>
    %cst_36 = arith.constant dense<0.000000e+00> : vector<32x32xf32>
    %48 = tpu.matmul %6, %47, %cst_36 {dimension_numbers = #tpu.dot_dimension_numbers<[1], [0], [0], [1], [0, 0, 1, 1], [], []>} : vector<32x72xbf16>, vector<72x32xbf16>, vector<32x32xf32> -> vector<32x32xf32>
    %49 = arith.addf %45, %48 : vector<32x32xf32>
    %c3 = arith.constant 3 : index
    %c0_37 = arith.constant 0 : index
    %c0_38 = arith.constant 0 : index
    %50 = vector.load %arg4[%c3, %c0_37, %c0_38] : memref<18x72x32xbf16, #tpu.memory_space<vmem>>, vector<1x72x32xbf16>
    %51 = vector.shape_cast %50 : vector<1x72x32xbf16> to vector<72x32xbf16>
    %cst_39 = arith.constant dense<0.000000e+00> : vector<32x32xf32>
    %52 = tpu.matmul %8, %51, %cst_39 {dimension_numbers = #tpu.dot_dimension_numbers<[1], [0], [0], [1], [0, 0, 1, 1], [], []>} : vector<32x72xbf16>, vector<72x32xbf16>, vector<32x32xf32> -> vector<32x32xf32>
    %53 = arith.addf %49, %52 : vector<32x32xf32>
    %c0_40 = arith.constant 0 : index
    %c0_41 = arith.constant 0 : index
    %54 = vector.load %arg5[%c0_40, %c0_41] : memref<1x32xf32, #tpu.memory_space<vmem>>, vector<1x32xf32>
    %55 = vector.broadcast %54 : vector<1x32xf32> to vector<32x32xf32>
    %56 = arith.mulf %53, %55 : vector<32x32xf32>
    %c0_42 = arith.constant 0 : index
    %c0_43 = arith.constant 0 : index
    %57 = vector.load %arg6[%c0_42, %c0_43] : memref<1x32xf32, #tpu.memory_space<vmem>>, vector<1x32xf32>
    %58 = vector.broadcast %57 : vector<1x32xf32> to vector<32x32xf32>
    %59 = arith.addf %56, %58 : vector<32x32xf32>
    %60 = vector.shape_cast %59 : vector<32x32xf32> to vector<4x8x32xf32>
    %61 = arith.truncf %60 : vector<4x8x32xf32> to vector<4x8x32xbf16>
    %c0_44 = arith.constant 0 : index
    %c0_45 = arith.constant 0 : index
    %c2_46 = arith.constant 2 : index
    %c0_47 = arith.constant 0 : index
    %c0_48 = arith.constant 0 : index
    %62 = vector.load %arg7[%c0_44, %c0_45, %c2_46, %c0_47, %c0_48] : memref<1x4x8x8x32xbf16, #tpu.memory_space<vmem>>, vector<1x4x1x8x32xbf16>
    %63 = vector.shape_cast %62 : vector<1x4x1x8x32xbf16> to vector<4x8x32xbf16>
    %64 = vector.shape_cast %61 : vector<4x8x32xbf16> to vector<1x4x1x8x32xbf16>
    tpu.vector_store %arg7[%c0_44, %c0_45, %c2_46, %c0_47, %c0_48], %64 {strides = array<i32>} : memref<1x4x8x8x32xbf16, #tpu.memory_space<vmem>>, vector<1x4x1x8x32xbf16>,
    %cst_49 = arith.constant 0.000000e+00 : f32
    %65 = vector.broadcast %cst_49 : f32 to vector<32x32xf32>
    %c4 = arith.constant 4 : index
    %c0_50 = arith.constant 0 : index
    %c0_51 = arith.constant 0 : index
    %66 = vector.load %arg4[%c4, %c0_50, %c0_51] : memref<18x72x32xbf16, #tpu.memory_space<vmem>>, vector<1x72x32xbf16>
    %67 = vector.shape_cast %66 : vector<1x72x32xbf16> to vector<72x32xbf16>
    %cst_52 = arith.constant dense<0.000000e+00> : vector<32x32xf32>
    %68 = tpu.matmul %6, %67, %cst_52 {dimension_numbers = #tpu.dot_dimension_numbers<[1], [0], [0], [1], [0, 0, 1, 1], [], []>} : vector<32x72xbf16>, vector<72x32xbf16>, vector<32x32xf32> -> vector<32x32xf32>
    %69 = arith.addf %65, %68 : vector<32x32xf32>
    %c5 = arith.constant 5 : index
    %c0_53 = arith.constant 0 : index
    %c0_54 = arith.constant 0 : index
    %70 = vector.load %arg4[%c5, %c0_53, %c0_54] : memref<18x72x32xbf16, #tpu.memory_space<vmem>>, vector<1x72x32xbf16>
    %71 = vector.shape_cast %70 : vector<1x72x32xbf16> to vector<72x32xbf16>
    %cst_55 = arith.constant dense<0.000000e+00> : vector<32x32xf32>
    %72 = tpu.matmul %8, %71, %cst_55 {dimension_numbers = #tpu.dot_dimension_numbers<[1], [0], [0], [1], [0, 0, 1, 1], [], []>} : vector<32x72xbf16>, vector<72x32xbf16>, vector<32x32xf32> -> vector<32x32xf32>
    %73 = arith.addf %69, %72 : vector<32x32xf32>
    %c0_56 = arith.constant 0 : index
    %c0_57 = arith.constant 0 : index
    %74 = vector.load %arg5[%c0_56, %c0_57] : memref<1x32xf32, #tpu.memory_space<vmem>>, vector<1x32xf32>
    %75 = vector.broadcast %74 : vector<1x32xf32> to vector<32x32xf32>
    %76 = arith.mulf %73, %75 : vector<32x32xf32>
    %c0_58 = arith.constant 0 : index
    %c0_59 = arith.constant 0 : index
    %77 = vector.load %arg6[%c0_58, %c0_59] : memref<1x32xf32, #tpu.memory_space<vmem>>, vector<1x32xf32>
    %78 = vector.broadcast %77 : vector<1x32xf32> to vector<32x32xf32>
    %79 = arith.addf %76, %78 : vector<32x32xf32>
    %80 = vector.shape_cast %79 : vector<32x32xf32> to vector<4x8x32xf32>
    %81 = arith.truncf %80 : vector<4x8x32xf32> to vector<4x8x32xbf16>
    %c0_60 = arith.constant 0 : index
    %c0_61 = arith.constant 0 : index
    %c3_62 = arith.constant 3 : index
    %c0_63 = arith.constant 0 : index
    %c0_64 = arith.constant 0 : index
    %82 = vector.load %arg7[%c0_60, %c0_61, %c3_62, %c0_63, %c0_64] : memref<1x4x8x8x32xbf16, #tpu.memory_space<vmem>>, vector<1x4x1x8x32xbf16>
    %83 = vector.shape_cast %82 : vector<1x4x1x8x32xbf16> to vector<4x8x32xbf16>
    %84 = vector.shape_cast %81 : vector<4x8x32xbf16> to vector<1x4x1x8x32xbf16>
    tpu.vector_store %arg7[%c0_60, %c0_61, %c3_62, %c0_63, %c0_64], %84 {strides = array<i32>} : memref<1x4x8x8x32xbf16, #tpu.memory_space<vmem>>, vector<1x4x1x8x32xbf16>,
    %cst_65 = arith.constant 0.000000e+00 : f32
    %85 = vector.broadcast %cst_65 : f32 to vector<32x32xf32>
    %c6 = arith.constant 6 : index
    %c0_66 = arith.constant 0 : index
    %c0_67 = arith.constant 0 : index
    %86 = vector.load %arg4[%c6, %c0_66, %c0_67] : memref<18x72x32xbf16, #tpu.memory_space<vmem>>, vector<1x72x32xbf16>
    %87 = vector.shape_cast %86 : vector<1x72x32xbf16> to vector<72x32xbf16>
    %cst_68 = arith.constant dense<0.000000e+00> : vector<32x32xf32>
    %88 = tpu.matmul %6, %87, %cst_68 {dimension_numbers = #tpu.dot_dimension_numbers<[1], [0], [0], [1], [0, 0, 1, 1], [], []>} : vector<32x72xbf16>, vector<72x32xbf16>, vector<32x32xf32> -> vector<32x32xf32>
    %89 = arith.addf %85, %88 : vector<32x32xf32>
    %c7 = arith.constant 7 : index
    %c0_69 = arith.constant 0 : index
    %c0_70 = arith.constant 0 : index
    %90 = vector.load %arg4[%c7, %c0_69, %c0_70] : memref<18x72x32xbf16, #tpu.memory_space<vmem>>, vector<1x72x32xbf16>
    %91 = vector.shape_cast %90 : vector<1x72x32xbf16> to vector<72x32xbf16>
    %cst_71 = arith.constant dense<0.000000e+00> : vector<32x32xf32>
    %92 = tpu.matmul %10, %91, %cst_71 {dimension_numbers = #tpu.dot_dimension_numbers<[1], [0], [0], [1], [0, 0, 1, 1], [], []>} : vector<32x72xbf16>, vector<72x32xbf16>, vector<32x32xf32> -> vector<32x32xf32>
    %93 = arith.addf %89, %92 : vector<32x32xf32>
    %c0_72 = arith.constant 0 : index
    %c0_73 = arith.constant 0 : index
    %94 = vector.load %arg5[%c0_72, %c0_73] : memref<1x32xf32, #tpu.memory_space<vmem>>, vector<1x32xf32>
    %95 = vector.broadcast %94 : vector<1x32xf32> to vector<32x32xf32>
    %96 = arith.mulf %93, %95 : vector<32x32xf32>
    %c0_74 = arith.constant 0 : index
    %c0_75 = arith.constant 0 : index
    %97 = vector.load %arg6[%c0_74, %c0_75] : memref<1x32xf32, #tpu.memory_space<vmem>>, vector<1x32xf32>
    %98 = vector.broadcast %97 : vector<1x32xf32> to vector<32x32xf32>
    %99 = arith.addf %96, %98 : vector<32x32xf32>
    %100 = vector.shape_cast %99 : vector<32x32xf32> to vector<4x8x32xf32>
    %101 = arith.truncf %100 : vector<4x8x32xf32> to vector<4x8x32xbf16>
    %c0_76 = arith.constant 0 : index
    %c0_77 = arith.constant 0 : index
    %c4_78 = arith.constant 4 : index
    %c0_79 = arith.constant 0 : index
    %c0_80 = arith.constant 0 : index
    %102 = vector.load %arg7[%c0_76, %c0_77, %c4_78, %c0_79, %c0_80] : memref<1x4x8x8x32xbf16, #tpu.memory_space<vmem>>, vector<1x4x1x8x32xbf16>
    %103 = vector.shape_cast %102 : vector<1x4x1x8x32xbf16> to vector<4x8x32xbf16>
    %104 = vector.shape_cast %101 : vector<4x8x32xbf16> to vector<1x4x1x8x32xbf16>
    tpu.vector_store %arg7[%c0_76, %c0_77, %c4_78, %c0_79, %c0_80], %104 {strides = array<i32>} : memref<1x4x8x8x32xbf16, #tpu.memory_space<vmem>>, vector<1x4x1x8x32xbf16>,
    %cst_81 = arith.constant 0.000000e+00 : f32
    %105 = vector.broadcast %cst_81 : f32 to vector<32x32xf32>
    %c8 = arith.constant 8 : index
    %c0_82 = arith.constant 0 : index
    %c0_83 = arith.constant 0 : index
    %106 = vector.load %arg4[%c8, %c0_82, %c0_83] : memref<18x72x32xbf16, #tpu.memory_space<vmem>>, vector<1x72x32xbf16>
    %107 = vector.shape_cast %106 : vector<1x72x32xbf16> to vector<72x32xbf16>
    %cst_84 = arith.constant dense<0.000000e+00> : vector<32x32xf32>
    %108 = tpu.matmul %6, %107, %cst_84 {dimension_numbers = #tpu.dot_dimension_numbers<[1], [0], [0], [1], [0, 0, 1, 1], [], []>} : vector<32x72xbf16>, vector<72x32xbf16>, vector<32x32xf32> -> vector<32x32xf32>
    %109 = arith.addf %105, %108 : vector<32x32xf32>
    %c9 = arith.constant 9 : index
    %c0_85 = arith.constant 0 : index
    %c0_86 = arith.constant 0 : index
    %110 = vector.load %arg4[%c9, %c0_85, %c0_86] : memref<18x72x32xbf16, #tpu.memory_space<vmem>>, vector<1x72x32xbf16>
    %111 = vector.shape_cast %110 : vector<1x72x32xbf16> to vector<72x32xbf16>
    %cst_87 = arith.constant dense<0.000000e+00> : vector<32x32xf32>
    %112 = tpu.matmul %10, %111, %cst_87 {dimension_numbers = #tpu.dot_dimension_numbers<[1], [0], [0], [1], [0, 0, 1, 1], [], []>} : vector<32x72xbf16>, vector<72x32xbf16>, vector<32x32xf32> -> vector<32x32xf32>
    %113 = arith.addf %109, %112 : vector<32x32xf32>
    %c0_88 = arith.constant 0 : index
    %c0_89 = arith.constant 0 : index
    %114 = vector.load %arg5[%c0_88, %c0_89] : memref<1x32xf32, #tpu.memory_space<vmem>>, vector<1x32xf32>
    %115 = vector.broadcast %114 : vector<1x32xf32> to vector<32x32xf32>
    %116 = arith.mulf %113, %115 : vector<32x32xf32>
    %c0_90 = arith.constant 0 : index
    %c0_91 = arith.constant 0 : index
    %117 = vector.load %arg6[%c0_90, %c0_91] : memref<1x32xf32, #tpu.memory_space<vmem>>, vector<1x32xf32>
    %118 = vector.broadcast %117 : vector<1x32xf32> to vector<32x32xf32>
    %119 = arith.addf %116, %118 : vector<32x32xf32>
    %120 = vector.shape_cast %119 : vector<32x32xf32> to vector<4x8x32xf32>
    %121 = arith.truncf %120 : vector<4x8x32xf32> to vector<4x8x32xbf16>
    %c0_92 = arith.constant 0 : index
    %c0_93 = arith.constant 0 : index
    %c5_94 = arith.constant 5 : index
    %c0_95 = arith.constant 0 : index
    %c0_96 = arith.constant 0 : index
    %122 = vector.load %arg7[%c0_92, %c0_93, %c5_94, %c0_95, %c0_96] : memref<1x4x8x8x32xbf16, #tpu.memory_space<vmem>>, vector<1x4x1x8x32xbf16>
    %123 = vector.shape_cast %122 : vector<1x4x1x8x32xbf16> to vector<4x8x32xbf16>
    %124 = vector.shape_cast %121 : vector<4x8x32xbf16> to vector<1x4x1x8x32xbf16>
    tpu.vector_store %arg7[%c0_92, %c0_93, %c5_94, %c0_95, %c0_96], %124 {strides = array<i32>} : memref<1x4x8x8x32xbf16, #tpu.memory_space<vmem>>, vector<1x4x1x8x32xbf16>,
    %cst_97 = arith.constant 0.000000e+00 : f32
    %125 = vector.broadcast %cst_97 : f32 to vector<32x32xf32>
    %c10 = arith.constant 10 : index
    %c0_98 = arith.constant 0 : index
    %c0_99 = arith.constant 0 : index
    %126 = vector.load %arg4[%c10, %c0_98, %c0_99] : memref<18x72x32xbf16, #tpu.memory_space<vmem>>, vector<1x72x32xbf16>
    %127 = vector.shape_cast %126 : vector<1x72x32xbf16> to vector<72x32xbf16>
    %cst_100 = arith.constant dense<0.000000e+00> : vector<32x32xf32>
    %128 = tpu.matmul %6, %127, %cst_100 {dimension_numbers = #tpu.dot_dimension_numbers<[1], [0], [0], [1], [0, 0, 1, 1], [], []>} : vector<32x72xbf16>, vector<72x32xbf16>, vector<32x32xf32> -> vector<32x32xf32>
    %129 = arith.addf %125, %128 : vector<32x32xf32>
    %c11 = arith.constant 11 : index
    %c0_101 = arith.constant 0 : index
    %c0_102 = arith.constant 0 : index
    %130 = vector.load %arg4[%c11, %c0_101, %c0_102] : memref<18x72x32xbf16, #tpu.memory_space<vmem>>, vector<1x72x32xbf16>
    %131 = vector.shape_cast %130 : vector<1x72x32xbf16> to vector<72x32xbf16>
    %cst_103 = arith.constant dense<0.000000e+00> : vector<32x32xf32>
    %132 = tpu.matmul %8, %131, %cst_103 {dimension_numbers = #tpu.dot_dimension_numbers<[1], [0], [0], [1], [0, 0, 1, 1], [], []>} : vector<32x72xbf16>, vector<72x32xbf16>, vector<32x32xf32> -> vector<32x32xf32>
    %133 = arith.addf %129, %132 : vector<32x32xf32>
    %c12 = arith.constant 12 : index
    %c0_104 = arith.constant 0 : index
    %c0_105 = arith.constant 0 : index
    %134 = vector.load %arg4[%c12, %c0_104, %c0_105] : memref<18x72x32xbf16, #tpu.memory_space<vmem>>, vector<1x72x32xbf16>
    %135 = vector.shape_cast %134 : vector<1x72x32xbf16> to vector<72x32xbf16>
    %cst_106 = arith.constant dense<0.000000e+00> : vector<32x32xf32>
    %136 = tpu.matmul %10, %135, %cst_106 {dimension_numbers = #tpu.dot_dimension_numbers<[1], [0], [0], [1], [0, 0, 1, 1], [], []>} : vector<32x72xbf16>, vector<72x32xbf16>, vector<32x32xf32> -> vector<32x32xf32>
    %137 = arith.addf %133, %136 : vector<32x32xf32>
    %c13 = arith.constant 13 : index
    %c0_107 = arith.constant 0 : index
    %c0_108 = arith.constant 0 : index
    %138 = vector.load %arg4[%c13, %c0_107, %c0_108] : memref<18x72x32xbf16, #tpu.memory_space<vmem>>, vector<1x72x32xbf16>
    %139 = vector.shape_cast %138 : vector<1x72x32xbf16> to vector<72x32xbf16>
    %cst_109 = arith.constant dense<0.000000e+00> : vector<32x32xf32>
    %140 = tpu.matmul %12, %139, %cst_109 {dimension_numbers = #tpu.dot_dimension_numbers<[1], [0], [0], [1], [0, 0, 1, 1], [], []>} : vector<32x72xbf16>, vector<72x32xbf16>, vector<32x32xf32> -> vector<32x32xf32>
    %141 = arith.addf %137, %140 : vector<32x32xf32>
    %c0_110 = arith.constant 0 : index
    %c0_111 = arith.constant 0 : index
    %142 = vector.load %arg5[%c0_110, %c0_111] : memref<1x32xf32, #tpu.memory_space<vmem>>, vector<1x32xf32>
    %143 = vector.broadcast %142 : vector<1x32xf32> to vector<32x32xf32>
    %144 = arith.mulf %141, %143 : vector<32x32xf32>
    %c0_112 = arith.constant 0 : index
    %c0_113 = arith.constant 0 : index
    %145 = vector.load %arg6[%c0_112, %c0_113] : memref<1x32xf32, #tpu.memory_space<vmem>>, vector<1x32xf32>
    %146 = vector.broadcast %145 : vector<1x32xf32> to vector<32x32xf32>
    %147 = arith.addf %144, %146 : vector<32x32xf32>
    %148 = vector.shape_cast %147 : vector<32x32xf32> to vector<4x8x32xf32>
    %149 = arith.truncf %148 : vector<4x8x32xf32> to vector<4x8x32xbf16>
    %c0_114 = arith.constant 0 : index
    %c0_115 = arith.constant 0 : index
    %c6_116 = arith.constant 6 : index
    %c0_117 = arith.constant 0 : index
    %c0_118 = arith.constant 0 : index
    %150 = vector.load %arg7[%c0_114, %c0_115, %c6_116, %c0_117, %c0_118] : memref<1x4x8x8x32xbf16, #tpu.memory_space<vmem>>, vector<1x4x1x8x32xbf16>
    %151 = vector.shape_cast %150 : vector<1x4x1x8x32xbf16> to vector<4x8x32xbf16>
    %152 = vector.shape_cast %149 : vector<4x8x32xbf16> to vector<1x4x1x8x32xbf16>
    tpu.vector_store %arg7[%c0_114, %c0_115, %c6_116, %c0_117, %c0_118], %152 {strides = array<i32>} : memref<1x4x8x8x32xbf16, #tpu.memory_space<vmem>>, vector<1x4x1x8x32xbf16>,
    %cst_119 = arith.constant 0.000000e+00 : f32
    %153 = vector.broadcast %cst_119 : f32 to vector<32x32xf32>
    %c14 = arith.constant 14 : index
    %c0_120 = arith.constant 0 : index
    %c0_121 = arith.constant 0 : index
    %154 = vector.load %arg4[%c14, %c0_120, %c0_121] : memref<18x72x32xbf16, #tpu.memory_space<vmem>>, vector<1x72x32xbf16>
    %155 = vector.shape_cast %154 : vector<1x72x32xbf16> to vector<72x32xbf16>
    %cst_122 = arith.constant dense<0.000000e+00> : vector<32x32xf32>
    %156 = tpu.matmul %6, %155, %cst_122 {dimension_numbers = #tpu.dot_dimension_numbers<[1], [0], [0], [1], [0, 0, 1, 1], [], []>} : vector<32x72xbf16>, vector<72x32xbf16>, vector<32x32xf32> -> vector<32x32xf32>
    %157 = arith.addf %153, %156 : vector<32x32xf32>
    %c15 = arith.constant 15 : index
    %c0_123 = arith.constant 0 : index
    %c0_124 = arith.constant 0 : index
    %158 = vector.load %arg4[%c15, %c0_123, %c0_124] : memref<18x72x32xbf16, #tpu.memory_space<vmem>>, vector<1x72x32xbf16>
    %159 = vector.shape_cast %158 : vector<1x72x32xbf16> to vector<72x32xbf16>
    %cst_125 = arith.constant dense<0.000000e+00> : vector<32x32xf32>
    %160 = tpu.matmul %8, %159, %cst_125 {dimension_numbers = #tpu.dot_dimension_numbers<[1], [0], [0], [1], [0, 0, 1, 1], [], []>} : vector<32x72xbf16>, vector<72x32xbf16>, vector<32x32xf32> -> vector<32x32xf32>
    %161 = arith.addf %157, %160 : vector<32x32xf32>
    %c16 = arith.constant 16 : index
    %c0_126 = arith.constant 0 : index
    %c0_127 = arith.constant 0 : index
    %162 = vector.load %arg4[%c16, %c0_126, %c0_127] : memref<18x72x32xbf16, #tpu.memory_space<vmem>>, vector<1x72x32xbf16>
    %163 = vector.shape_cast %162 : vector<1x72x32xbf16> to vector<72x32xbf16>
    %cst_128 = arith.constant dense<0.000000e+00> : vector<32x32xf32>
    %164 = tpu.matmul %10, %163, %cst_128 {dimension_numbers = #tpu.dot_dimension_numbers<[1], [0], [0], [1], [0, 0, 1, 1], [], []>} : vector<32x72xbf16>, vector<72x32xbf16>, vector<32x32xf32> -> vector<32x32xf32>
    %165 = arith.addf %161, %164 : vector<32x32xf32>
    %c17 = arith.constant 17 : index
    %c0_129 = arith.constant 0 : index
    %c0_130 = arith.constant 0 : index
    %166 = vector.load %arg4[%c17, %c0_129, %c0_130] : memref<18x72x32xbf16, #tpu.memory_space<vmem>>, vector<1x72x32xbf16>
    %167 = vector.shape_cast %166 : vector<1x72x32xbf16> to vector<72x32xbf16>
    %cst_131 = arith.constant dense<0.000000e+00> : vector<32x32xf32>
    %168 = tpu.matmul %12, %167, %cst_131 {dimension_numbers = #tpu.dot_dimension_numbers<[1], [0], [0], [1], [0, 0, 1, 1], [], []>} : vector<32x72xbf16>, vector<72x32xbf16>, vector<32x32xf32> -> vector<32x32xf32>
    %169 = arith.addf %165, %168 : vector<32x32xf32>
    %c0_132 = arith.constant 0 : index
    %c0_133 = arith.constant 0 : index
    %170 = vector.load %arg5[%c0_132, %c0_133] : memref<1x32xf32, #tpu.memory_space<vmem>>, vector<1x32xf32>
    %171 = vector.broadcast %170 : vector<1x32xf32> to vector<32x32xf32>
    %172 = arith.mulf %169, %171 : vector<32x32xf32>
    %c0_134 = arith.constant 0 : index
    %c0_135 = arith.constant 0 : index
    %173 = vector.load %arg6[%c0_134, %c0_135] : memref<1x32xf32, #tpu.memory_space<vmem>>, vector<1x32xf32>
    %174 = vector.broadcast %173 : vector<1x32xf32> to vector<32x32xf32>
    %175 = arith.addf %172, %174 : vector<32x32xf32>
    %176 = vector.shape_cast %175 : vector<32x32xf32> to vector<4x8x32xf32>
    %177 = arith.truncf %176 : vector<4x8x32xf32> to vector<4x8x32xbf16>
    %c0_136 = arith.constant 0 : index
    %c0_137 = arith.constant 0 : index
    %c7_138 = arith.constant 7 : index
    %c0_139 = arith.constant 0 : index
    %c0_140 = arith.constant 0 : index
    %178 = vector.load %arg7[%c0_136, %c0_137, %c7_138, %c0_139, %c0_140] : memref<1x4x8x8x32xbf16, #tpu.memory_space<vmem>>, vector<1x4x1x8x32xbf16>
    %179 = vector.shape_cast %178 : vector<1x4x1x8x32xbf16> to vector<4x8x32xbf16>
    %180 = vector.shape_cast %177 : vector<4x8x32xbf16> to vector<1x4x1x8x32xbf16>
    tpu.vector_store %arg7[%c0_136, %c0_137, %c7_138, %c0_139, %c0_140], %180 {strides = array<i32>} : memref<1x4x8x8x32xbf16, #tpu.memory_space<vmem>>, vector<1x4x1x8x32xbf16>,
    return
  }
  func.func @transform_0(%arg0: i32, %arg1: i32) -> (i32, i32, i32, i32) {
    %c0_i32 = arith.constant 0 : i32
    %c0_i32_0 = arith.constant 0 : i32
    %c0_i32_1 = arith.constant 0 : i32
    return %arg0, %arg1, %c0_i32, %c0_i32_0 : i32, i32, i32, i32
  }
  func.func @transform_1(%arg0: i32, %arg1: i32) -> (i32, i32, i32, i32) {
    %c1_i32 = arith.constant 1 : i32
    %0 = arith.addi %arg1, %c1_i32 : i32
    %c4_i32 = arith.constant 4 : i32
    %1 = arith.muli %0, %c4_i32 : i32
    %c0_i32 = arith.constant 0 : i32
    %c0_i32_0 = arith.constant 0 : i32
    %c0_i32_1 = arith.constant 0 : i32
    return %arg0, %1, %c0_i32, %c0_i32_0 : i32, i32, i32, i32
  }
  func.func @transform_2(%arg0: i32, %arg1: i32) -> (i32, i32, i32) {
    %c0_i32 = arith.constant 0 : i32
    %c0_i32_0 = arith.constant 0 : i32
    %c0_i32_1 = arith.constant 0 : i32
    %c0_i32_2 = arith.constant 0 : i32
    return %c0_i32, %c0_i32_0, %c0_i32_1 : i32, i32, i32
  }
  func.func @transform_3(%arg0: i32, %arg1: i32) -> (i32, i32) {
    %c0_i32 = arith.constant 0 : i32
    %c0_i32_0 = arith.constant 0 : i32
    %c0_i32_1 = arith.constant 0 : i32
    return %c0_i32, %c0_i32_0 : i32, i32
  }
  func.func @transform_4(%arg0: i32, %arg1: i32) -> (i32, i32) {
    %c0_i32 = arith.constant 0 : i32
    %c0_i32_0 = arith.constant 0 : i32
    %c0_i32_1 = arith.constant 0 : i32
    return %c0_i32, %c0_i32_0 : i32, i32
  }
  func.func @transform_5(%arg0: i32, %arg1: i32) -> (i32, i32, i32, i32, i32) {
    %c0_i32 = arith.constant 0 : i32
    %c0_i32_0 = arith.constant 0 : i32
    %c0_i32_1 = arith.constant 0 : i32
    %c0_i32_2 = arith.constant 0 : i32
    return %arg0, %arg1, %c0_i32, %c0_i32_0, %c0_i32_1 : i32, i32, i32, i32, i32
  }
}

</mosaic_0001>

<bundles_post_ra>
// kernel: tile.63
= control target key start
LH: loop header
LB: loop body
LE: loop exit
PB: predicated region body
PF: predicated region fallthrough
CT: control target
= control target key end

     0   :  { %s22_s0 = inlined_call_operand.vmem [shape: f32[8], index: 0, kind: input, shape index: {}]   ;;  %s23_s1 = inlined_call_operand.vmem [shape: f32[8,8], index: 1, kind: output, shape index: {}]  }
   0x1   :  { %v4_v0 = vld [vmem:[%s22_s0] ss:$0 sm:$0xff] }
   0x2   :  { %5 = vst [vmem:[%s23_s1] sm:$0xff] %v4_v0 }

// kernel: tile.64
= control target key start
LH: loop header
LB: loop body
LE: loop exit
PB: predicated region body
PF: predicated region fallthrough
CT: control target
= control target key end

     0   :  { %s69_s10 = smov 56   ;;  %s70_s11 = smov 40   ;;  %vm3_vm0 = vcmask 64512   ;;  %vm9_vm1 = vcmask 523712   ;;  %vm15_vm2 = vcmask 458112   ;;  %vm21_vm3 = vcmask 392512   ;;  %s113_s0 = inlined_call_operand.vmem [shape: f32[8,8], index: 0, kind: input, shape index: {}]   ;;  %s114_s1 = inlined_call_operand.vmem [shape: f32[1,64], index: 1, kind: output, shape index: {}]  }
   0x1   :  { %v55_v0 = vld [vmem:[%s113_s0 + $0x7] sm:$0x1]   ;;  %v57_v1 = vld [vmem:[%s113_s0 + $0x5] sm:$0x1]   ;;  %v56_v2 = vld [vmem:[%s113_s0 + $0x6] sm:$0x1]  }
   0x2   :  { %7 = vrot.lane.b32.xlu0 %v55_v0, %s69_s10  ;;  %19 = vrot.lane.b32.xlu1 %v57_v1, %s70_s11  ;;  %v58_v3 = vld [vmem:[%s113_s0 + $0x4] sm:$0x1]   ;;  %v2_v4 = vld [vmem:[%s113_s0] sm:$0x1]   ;;  %s71_s18 = smov 48   ;;  %s72_s19 = smov 32  }
   0x3   :  { %4 = vst.msk [vmem:[#allocation0] sm:$0x1] %vm3_vm0, %v2_v4   ;;  %v59_v5 = vld [vmem:[%s113_s0 + $0x3] sm:$0x1]   ;;  %v60_v6 = vld [vmem:[%s113_s0 + $0x2] sm:$0x1]  }
   0x4   :  { %s73_s24 = smov 24   ;;  %s74_s25 = smov 16   ;;  %v61_v7 = vld [vmem:[%s113_s0 + $0x1] sm:$0x1]   ;;  %vm27_vm4 = vcmask 326912   ;;  %vm33_vm5 = vcmask 261312  }
   0x5   :  { %s75_s0 = smov 8   ;;  %vm39_vm6 = vcmask 195712   ;;  %vm45_vm7 = vcmask 130112  }
   0x6   :  { %13 = vrot.lane.b32.xlu0 %v56_v2, %s71_s18  ;;  %25 = vrot.lane.b32.xlu1 %v58_v3, %s72_s19 }
   0xa   :  { %31 = vrot.lane.b32.xlu0 %v59_v5, %s73_s24  ;;  %37 = vrot.lane.b32.xlu1 %v60_v6, %s74_s25 }
   0xe   :  { %43 = vrot.lane.b32.xlu0 %v61_v7, %s75_s0 }
  0x74   :  { %v8_v8 = vpop.permute.xlu0 %7   ;;  %v20_v9 = vpop.permute.xlu1 %19  }
  0x75   :  { %10 = vst.msk [vmem:[#allocation0] sm:$0x1] %vm9_vm1, %v8_v8  }
  0x78   :  { %v14_v10 = vpop.permute.xlu0 %13   ;;  %v26_v11 = vpop.permute.xlu1 %25  }
  0x79   :  { %16 = vst.msk [vmem:[#allocation0] sm:$0x1] %vm15_vm2, %v14_v10  }
  0x7a   :  { %22 = vst.msk [vmem:[#allocation0] sm:$0x1] %vm21_vm3, %v20_v9  }
  0x7b   :  { %28 = vst.msk [vmem:[#allocation0] sm:$0x1] %vm27_vm4, %v26_v11  }
  0x7c   :  { %v32_v12 = vpop.permute.xlu0 %31   ;;  %v38_v13 = vpop.permute.xlu1 %37  }
  0x7d   :  { %34 = vst.msk [vmem:[#allocation0] sm:$0x1] %vm33_vm5, %v32_v12  }
  0x7e   :  { %40 = vst.msk [vmem:[#allocation0] sm:$0x1] %vm39_vm6, %v38_v13  }
  0x80   :  { %v44_v14 = vpop.permute.xlu0 %43  }
  0x81   :  { %46 = vst.msk [vmem:[#allocation0] sm:$0x1] %vm45_vm7, %v44_v14  }
  0x88   :  { %v51_v15 = vld [vmem:[#allocation0] sm:$0x1] }
  0x89   :  { %54 = vst [vmem:[%s114_s1] sm:$0x1] %v51_v15 }

// kernel: hourglass_forward.6
= control target key start
LH: loop header
LB: loop body
LE: loop exit
PB: predicated region body
PF: predicated region fallthrough
CT: control target
= control target key end

     0   :  { %s2093_s18 = smov 0   ;;  %s2095_s19 = smov 0   ;;  %s2421_s0 = inlined_call_operand.vmem [shape: bf16[2,5,2,2,9,72], index: 0, kind: input, shape index: {}, may-alias: {0,1}]   ;;  %s2422_s1 = inlined_call_operand.vmem [shape: bf16[2,5,2,2,9,72], index: 1, kind: input, shape index: {}, may-alias: {0,1}]   ;;  %s2423_s2 = inlined_call_operand.vmem [shape: bf16[9,72,64], index: 2, kind: input, shape index: {}]   ;;  %s2424_s3 = inlined_call_operand.vmem [shape: f32[1,64], index: 3, kind: input, shape index: {}]   ;;  %s2425_s4 = inlined_call_operand.vmem [shape: f32[1,64], index: 4, kind: input, shape index: {}]   ;;  %s2426_s5 = inlined_call_operand.vmem [shape: bf16[2,4,8,64], index: 5, kind: output, shape index: {}]  }
   0x1   :  { %s2097_s20 = smov 0  }
   0x2 LB: > { %s27_s21 = sadd.s32 1, %s2057_s19  ;;  %p1604_p0 = scmp.ge.s32.totalorder %s2061_s20, 1  ;;  %s2061_s20 = sphi %s2097_s20, %s15_s20   ;;  %s2057_s19 = sphi %s2095_s19, %s2430_s19   ;;  %s2053_s18 = sphi %s2093_s18, %s2429_s18  }
   0x3   : > { %p29_p1 = scmp.ge.s32.totalorder %s27_s21, 2  ;;  %p247_p2 = scmp.lt.s32.totalorder %s2061_s20, 3 }
   0x5   : > { %s2432_s21 = smov (%p29_p1, %s27_s21), 0  ;;  %p248_p3 = pnand %p1604_p0, %p247_p2 }
   0x6   : > { %p310_p4 = scmp.lt.s32.totalorder (!%p248_p3), %s2053_s18, 1 }
   0x7   : > { %251 = sbr.rel (%p248_p3) target bundleno = 323 (0x143), region = 40 }
   0xc   : > { %v1994_v0 = vld [vmem:[%s2423_s2 + $0x44] ss:$0 sps:$4 sm:$0xff]   ;;  %vm441_vm0 = vcmask 1043456   ;;  %v1996_v1 = vld [vmem:[%s2423_s2 + $0x3c] sm:$0xff]   ;;  %v1998_v6 = vld [vmem:[%s2423_s2 + $0x34] sm:$0xff]   ;;  %s2434_s18 = smov (!%p310_p4, %s2053_s18), 1 }
   0xd   : > { %v1995_v2 = vld [vmem:[%s2423_s2 + $0x20] ss:$0 sps:$4 sm:$0xff]   ;;  %1958 = vmatprep.subr.msk.bf16.mxu0 %vm441_vm0, %v1994_v0  ;;  %v443_v3 = vsel %vm441_vm0, %v1994_v0, 0  ;;  %v1997_v4 = vld [vmem:[%s2423_s2 + $0x18] sm:$0xff]   ;;  %v1999_v7 = vld [vmem:[%s2423_s2 + $0x10] sm:$0xff]   ;;  %s1967_s13 = smul.u32 160, %s2434_s18 }
   0xe   : > { %1959 = vmatprep.subr.msk.bf16.mxu1 %vm441_vm0, %v1995_v2  ;;  %1833 = vmatpush3.bf16.msra.mxu0 %v443_v3  ;;  %v538_v5 = vsel %vm441_vm0, %v1995_v2, 0  ;;  %v2000_v8 = vld [vmem:[%s2423_s2 + $0x2c] sm:$0xff]   ;;  %vm434_vm1 = vcmask 588800   ;;  %v2002_v10 = vld [vmem:[%s2423_s2 + $0x24] sm:$0xff]   ;;  %v2008_v57 = vld [vmem:[%s2423_s2 + $0x58] sm:$0xff]   ;;  %s1768_s22 = sshll.u32 %s2434_s18, 4 }
   0xf   : > { %1847 = vmatpush3.bf16.msra.mxu1 %v538_v5  ;;  %1834 = vmatprep.subr.bf16.mxu0 %v1996_v1  ;;  %v2001_v9 = vld [vmem:[%s2423_s2 + $0x8] sm:$0xff]   ;;  %v2003_v12 = vld [vmem:[%s2423_s2] sm:$0xff]   ;;  %s2154_s26 = scalar_lea.vmem %s2421_s0, %s1967_s13  ;;  %s1767_s27 = sadd.s32 128, %s1967_s13  ;;  %v2010_v63 = vld [vmem:[%s2423_s2 + $0x50] sm:$0xff]   ;;  %vm589_vm2 = vsmask.f32 3328 }
  0x10   : > { %1848 = vmatprep.subr.bf16.mxu1 %v1997_v4  ;;  %v2004_v11 = vld [vmem:[%s2423_s2 + $0x68] ss:$0 sps:$4 sm:$0xff]   ;;  %s2159_s30 = scalar_lea.vmem %s2422_s1, %s1767_s27  ;;  %v2005_v15 = vld [vmem:[%s2423_s2 + $0x8c] ss:$0 sps:$4 sm:$0xff]   ;;  %v354_v25 = vld [vmem:[%s2154_s26] sm:$0xf]  ;;  %s348_s25 = scalar_lea.vmem %s2426_s5, %s1768_s22 }
  0x11   : > { %v356_v13 = vld [vmem:[%s2154_s26 + $0x8] sm:$0xf]  ;;  %v2169_v16 = vld [vmem:[%s2159_s30] sm:$0xf]  ;;  %v352_v17 = vld [vmem:[%s2159_s30 + $0x4] sm:$0x1] }
  0x12   : > { %1835 = vmatpush3.bf16.msra.mxu0 %v1996_v1  ;;  %v2163_v14 = vld [vmem:[%s2154_s26 + $0x28] sm:$0xf]  ;;  %v1339_v21 = vshrl.u32 %v2169_v16, 16  ;;  %v1342_v22 = vshll.u32 %v2169_v16, 16  ;;  %v1348_v23 = vshll.u32 %v352_v17, 16  ;;  %v698_v24 = vsel %vm441_vm0, %v2004_v11, 0 }
  0x13   : > { %1849 = vmatpush3.bf16.msra.mxu1 %v1997_v4  ;;  %1836 = vmatprep.subr.bf16.mxu0 %v1998_v6  ;;  %v2173_v18 = vld [vmem:[%s2154_s26 + $0x48] sm:$0xf]  ;;  %v1618_v19 = vcombine.low %v356_v13, %v2163_v14  ;;  %v2185_v26 = vld [vmem:[%s2154_s26 + $0x20] sm:$0xf]  ;;  %v807_v32 = vsel %vm441_vm0, %v2005_v15, 0  ;;  %v593_v33 = vshrl.u32 %v354_v25, 16 }
  0x14   : > { %1850 = vmatprep.subr.bf16.mxu1 %v1999_v7  ;;  %v2177_v20 = vld [vmem:[%s2154_s26 + $0x68] sm:$0xf]  ;;  %v2188_v27 = vld [vmem:[%s2154_s26 + $0x40] sm:$0xf]  ;;  %v1341_v28 = vrot.slane %v1339_v21, 4  ;;  %v1344_v29 = vrot.slane %v1342_v22, 5  ;;  %v1627_v30 = vcombine.low %v354_v25, %v2185_v26 }
  0x15   : > { %1842 = vmatprep.mubr.msk.bf16.mxu0 %vm434_vm1, %v1618_v19  ;;  %v2192_v31 = vld [vmem:[%s2154_s26 + $0x60] sm:$0xf]  ;;  %v596_v34 = vshll.u32 %v354_v25, 16  ;;  %v607_v35 = vshrl.u32 %v2185_v26, 16  ;;  %v610_v36 = vshll.u32 %v2185_v26, 16  ;;  %v1619_v37 = vcombine.low %v2173_v18, %v2177_v20  ;;  %v2007_v50 = vld [vmem:[%s2423_s2 + $0x84] sm:$0xff]  }
  0x16   : > { %1837 = vmatpush3.bf16.msra.mxu0 %v1998_v6  ;;  %1856 = vmatprep.mubr.msk.bf16.mxu1 %vm434_vm1, %v1627_v30  ;;  %v1628_v38 = vcombine.low %v2188_v27, %v2192_v31  ;;  %v621_v39 = vshrl.u32 %v2188_v27, 16  ;;  %v624_v40 = vshll.u32 %v2188_v27, 16  ;;  %v595_v41 = vrot.slane %v593_v33, 4  ;;  %v2006_v49 = vld [vmem:[%s2423_s2 + $0x60] sm:$0xff]   ;;  %v357_v21 = vld [vmem:[%s2154_s26 + $0x10] sm:$0xf] }
  0x17   : > { %1851 = vmatpush3.bf16.msra.mxu1 %v1999_v7  ;;  %1838 = vmatprep.subr.bf16.mxu0 %v2000_v8  ;;  %v598_v42 = vrot.slane %v596_v34, 5  ;;  %v609_v43 = vrot.slane %v607_v35, 4  ;;  %v612_v44 = vrot.slane %v610_v36, 5  ;;  %v635_v47 = vshrl.u32 %v2192_v31, 16  ;;  %v2009_v59 = vld [vmem:[%s2423_s2 + $0x7c] sm:$0xff]   ;;  %v2013_v34 = vld [vmem:[%s2423_s2 + $0x6c] sm:$0xff]  }
  0x18   : > { %1852 = vmatprep.subr.bf16.mxu1 %v2001_v9  ;;  %v623_v45 = vrot.slane %v621_v39, 4  ;;  %v626_v46 = vrot.slane %v624_v40, 5  ;;  %v638_v48 = vshll.u32 %v2192_v31, 16  ;;  %v1345_v51 = vor.u32 %v1344_v29, %v1341_v28  ;;  %v355_v0 = vld [vmem:[%s2154_s26 + $0x4] sm:$0x1]  ;;  %v2012_v29 = vld [vmem:[%s2423_s2 + $0x48] sm:$0xff]  }
  0x19   : > { %v599_v52 = vor.u32 %v598_v42, %v595_v41  ;;  %v613_v53 = vor.u32 %v612_v44, %v609_v43  ;;  %v637_v54 = vrot.slane %v635_v47, 4  ;;  %v2215_v56 = vrot.slane %v1348_v23, 5  ;;  %v361_v1 = vld [vmem:[%s2154_s26 + $0x24] sm:$0x1]  ;;  %v363_v22 = vld [vmem:[%s2154_s26 + $0x30] sm:$0xf] }
  0x1a   : > { %1839 = vmatpush3.bf16.msra.mxu0 %v2000_v8  ;;  %v640_v55 = vrot.slane %v638_v48, 5  ;;  %v627_v60 = vor.u32 %v626_v46, %v623_v45  ;;  %v2224_v62 = vrot.slane %v1345_v51, 4  ;;  %vm590_vm3 = vsmask.f32 7440  ;;  %v367_v5 = vld [vmem:[%s2154_s26 + $0x44] sm:$0x1] }
  0x1b   : > { %1853 = vmatpush3.bf16.msra.mxu1 %v2001_v9  ;;  %1840 = vmatprep.subr.bf16.mxu0 %v2002_v10  ;;  %v600_v58 = vrot.slane %v599_v52, 4  ;;  %v614_v61 = vrot.slane %v613_v53, 4  ;;  %v602_v3 = vshll.u32 %v355_v0, 16  ;;  %v616_v4 = vshll.u32 %v361_v1, 16  ;;  %vm2232_vm4 = vmor %vm589_vm2, %vm590_vm3  ;;  %v373_v7 = vld [vmem:[%s2154_s26 + $0x64] sm:$0x1] }
  0x1c   : > { %1854 = vmatprep.subr.bf16.mxu1 %v2003_v12  ;;  %v641_v2 = vor.u32 %v640_v55, %v637_v54  ;;  %v628_v8 = vrot.slane %v627_v60, 4  ;;  %v630_v9 = vshll.u32 %v367_v5, 16  ;;  %v644_v13 = vshll.u32 %v373_v7, 16  ;;  %v375_v41 = vld [vmem:[%s2154_s26 + $0x70] sm:$0xf]  ;;  %v2016_v54 = vld [vmem:[%s2423_s2 + $0xa8] sm:$0xff]  }
  0x1d   : > { %v1663_v28 = vcombine.low %v357_v21, %v363_v22  ;;  %v975_v33 = vshll.u32 %v357_v21, 16  ;;  %v986_v35 = vshrl.u32 %v363_v22, 16  ;;  %v989_v36 = vshll.u32 %v363_v22, 16  ;;  %v2015_v42 = vld [vmem:[%s2423_s2 + $0xd4] ss:$0 sps:$4 sm:$0xff]  }
  0x1e   : > { %1841 = vmatpush3.bf16.msra.mxu0 %v2002_v10  ;;  %v2011_v10 = vld [vmem:[%s2423_s2 + $0x74] sm:$0xff]   ;;  %v632_v17 = vrot.slane %v630_v9, 5  ;;  %v642_v19 = vrot.slane %v641_v2, 4  ;;  %v646_v25 = vrot.slane %v644_v13, 5  ;;  %v1017_v51 = vshll.u32 %v375_v41, 16 }
  0x1f   : > { %1855 = vmatpush3.bf16.msra.mxu1 %v2003_v12  ;;  %1960 = vmatprep.subr.msk.bf16.mxu0 %vm441_vm0, %v2004_v11  ;;  %v604_v11 = vrot.slane %v602_v3, 5  ;;  %v618_v12 = vrot.slane %v616_v4, 5  ;;  %v977_v44 = vrot.slane %v975_v33, 5  ;;  %v988_v45 = vrot.slane %v986_v35, 4  ;;  %v365_v0 = vld [vmem:[%s2154_s26 + $0x38] sm:$0xf] }
  0x20   : > { %1961 = vmatprep.subr.msk.bf16.mxu1 %vm441_vm0, %v2005_v15  ;;  %v1351_v15 = vsel %vm2232_vm4, %v2224_v62, %v2215_v56  ;;  %v2267_v39 = vsel %vm2232_vm4, %v628_v8, %v632_v17  ;;  %v2271_v40 = vsel %vm2232_vm4, %v642_v19, %v646_v25  ;;  %v991_v46 = vrot.slane %v989_v36, 5  ;;  %v2019_v4 = vld [vmem:[%s2423_s2 + $0xc4] sm:$0xff]   ;;  %v358_v7 = vld [vmem:[%s2154_s26 + $0x14] sm:$0x1]  ;;  %v2020_v25 = vld [vmem:[%s2423_s2 + $0x98] sm:$0xff]  }
  0x21   : > { %1843 = vmatmul.mubr.msk.bf16.vlgmr.msra.gmra.mxu0 %vm434_vm1, %v1619_v37  ;;  %v605_v23 = vsel %vm2232_vm4, %v600_v58, %v604_v11  ;;  %v2014_v37 = vld [vmem:[%s2423_s2 + $0xb0] ss:$0 sps:$4 sm:$0xff]   ;;  %v1077_v58 = vsel %vm441_vm0, %v2015_v42, 0  ;;  %v1019_v3 = vrot.slane %v1017_v51, 5  ;;  %v364_v8 = vld [vmem:[%s2154_s26 + $0x34] sm:$0x1] }
  0x22   : > { %1857 = vmatmul.mubr.msk.bf16.vlgmr.msra.gmra.mxu1 %vm434_vm1, %v1628_v38  ;;  %1861 = vmatpush3.bf16.msra.mxu0 %v698_v24  ;;  %v2250_v24 = vsel %vm2232_vm4, %v614_v61, %v618_v12  ;;  %v369_v38 = vld [vmem:[%s2154_s26 + $0x50] sm:$0xf]  ;;  %v916_v53 = vsel %vm441_vm0, %v2014_v37, 0  ;;  %v2018_v61 = vld [vmem:[%s2423_s2 + $0xa0] sm:$0xff]   ;;  %v981_v11 = vshll.u32 %v358_v7, 16  ;;  %v995_v12 = vshll.u32 %v364_v8, 16 }
  0x23   : > { %1875 = vmatpush3.bf16.msra.mxu1 %v807_v32  ;;  %1862 = vmatprep.subr.bf16.mxu0 %v2006_v49  ;;  %v1645_v30 = vcombine.low %v605_v23, %v2250_v24  ;;  %v972_v32 = vshrl.u32 %v357_v21, 16  ;;  %v1000_v47 = vshrl.u32 %v369_v38, 16  ;;  %v1003_v48 = vshll.u32 %v369_v38, 16  ;;  %v370_v13 = vld [vmem:[%s2154_s26 + $0x54] sm:$0x1] }
  0x24   : > { %1876 = vmatprep.subr.bf16.mxu1 %v2007_v50  ;;  %1884 = vmatprep.mubr.msk.bf16.mxu1 %vm434_vm1, %v1663_v28  ;;  %v1664_v52 = vcombine.low %v369_v38, %v375_v41  ;;  %v376_v17 = vld [vmem:[%s2154_s26 + $0x74] sm:$0x1]  ;;  %v983_v19 = vrot.slane %v981_v11, 5  ;;  %v997_v21 = vrot.slane %v995_v12, 5  ;;  %v1009_v28 = vshll.u32 %v370_v13, 16 }
  0x25   : > { %1870 = vmatprep.mubr.msk.bf16.mxu0 %vm434_vm1, %v1645_v30  ;;  %v974_v43 = vrot.slane %v972_v32, 4  ;;  %v1002_v60 = vrot.slane %v1000_v47, 4  ;;  %v1005_v1 = vrot.slane %v1003_v48, 5  ;;  %v2021_v30 = vld [vmem:[%s2423_s2 + $0xbc] sm:$0xff]   ;;  %vm1484_vm5 = vcmask 519168  }
  0x26   : > { %1863 = vmatpush3.bf16.msra.mxu0 %v2006_v49  ;;  %v1646_v49 = vcombine.low %v2267_v39, %v2271_v40  ;;  %v1011_v38 = vrot.slane %v1009_v28, 5  ;;  %v2025_v48 = vld [vmem:[%s2423_s2 + $0x11c] ss:$0 sps:$4 sm:$0xff]  }
  0x27   : > { %1877 = vmatpush3.bf16.msra.mxu1 %v2007_v50  ;;  %1864 = vmatprep.subr.bf16.mxu0 %v2008_v57  ;;  %v1014_v50 = vshrl.u32 %v375_v41, 16  ;;  %v978_v55 = vor.u32 %v977_v44, %v974_v43  ;;  %v1006_v22 = vor.u32 %v1005_v1, %v1002_v60  ;;  %v371_v43 = vld [vmem:[%s2154_s26 + $0x58] sm:$0xf]  ;;  %v353_v60 = vld [vmem:[%s2159_s30 + $0x8] sm:$0xf] }
  0x28   : > { %1878 = vmatprep.subr.bf16.mxu1 %v2009_v59  ;;  %v377_v44 = vld [vmem:[%s2154_s26 + $0x78] sm:$0xf] }
  0x29   : > { %v1016_v2 = vrot.slane %v1014_v50, 4  ;;  %v979_v9 = vrot.slane %v978_v55, 4  ;;  %v1007_v36 = vrot.slane %v1006_v22, 4  ;;  %v1717_v55 = vcombine.low %v2185_v26, %v2188_v27  ;;  %v2032_v26 = vld [vmem:[%s2423_s2 + $0xd8] sm:$0xff]  }
  0x2a   : > { %1865 = vmatpush3.bf16.msra.mxu0 %v2008_v57  ;;  %v992_v57 = vor.u32 %v991_v46, %v988_v45  ;;  %v2024_v45 = vld [vmem:[%s2423_s2 + $0xf8] ss:$0 sps:$4 sm:$0xff]   ;;  %v2033_v27 = vld [vmem:[%s2423_s2 + $0xfc] sm:$0xff]  }
  0x2b   : > { %1879 = vmatpush3.bf16.msra.mxu1 %v2009_v59  ;;  %1866 = vmatprep.subr.bf16.mxu0 %v2010_v63  ;;  %v2017_v59 = vld [vmem:[%s2423_s2 + $0xcc] sm:$0xff]   ;;  %v1020_v23 = vor.u32 %v1019_v3, %v1016_v2  ;;  %v984_v32 = vsel %vm2232_vm4, %v979_v9, %v983_v19  ;;  %v1012_v46 = vsel %vm2232_vm4, %v1007_v36, %v1011_v38  ;;  %v1180_v51 = vsel %vm441_vm0, %v2024_v45, 0  ;;  %v2035_v2 = vld [vmem:[%s2423_s2 + $0x138] sm:$0xff]  }
  0x2c   : > { %1880 = vmatprep.subr.bf16.mxu1 %v2011_v10  ;;  %v1753_v3 = vcombine.low %v2250_v24, %v2267_v39  ;;  %v1754_v24 = vcombine.low %v2271_v40, %v1351_v15 }
  0x2e   : > { %1867 = vmatpush3.bf16.msra.mxu0 %v2010_v63  ;;  %v359_v63 = vld [vmem:[%s2154_s26 + $0x18] sm:$0xf] }
  0x2f   : > { %1881 = vmatpush3.bf16.msra.mxu1 %v2011_v10  ;;  %1868 = vmatprep.subr.bf16.mxu0 %v2012_v29  ;;  %v1681_v5 = vcombine.low %v359_v63, %v365_v0  ;;  %v993_v10 = vrot.slane %v992_v57, 4  ;;  %v1735_v57 = vcombine.low %v2163_v14, %v2173_v18  ;;  %v2030_v14 = vld [vmem:[%s2423_s2 + $0xe0] sm:$0xff]   ;;  %v1718_v63 = vcombine.low %v2192_v31, %v2169_v16  ;;  %v2036_v16 = vld [vmem:[%s2423_s2 + $0x130] sm:$0xff]  }
  0x30   : > { %1882 = vmatprep.subr.bf16.mxu1 %v2013_v34  ;;  %v2031_v18 = vld [vmem:[%s2423_s2 + $0x104] sm:$0xff]   ;;  %v1736_v0 = vcombine.low %v2177_v20, %v353_v60 }
  0x31   : > { %v998_v33 = vsel %vm2232_vm4, %v993_v10, %v997_v21  ;;  %v2037_v20 = vld [vmem:[%s2423_s2 + $0x128] sm:$0xff]   ;;  %v2038_v31 = vld [vmem:[%s2423_s2 + $0x120] sm:$0xff]  }
  0x32   : > { %1869 = vmatpush3.bf16.msra.mxu0 %v2012_v29  ;;  %v1023_v29 = vshll.u32 %v376_v17, 16  ;;  %v1699_v35 = vcombine.low %v984_v32, %v998_v33 }
  0x33   : > { %1883 = vmatpush3.bf16.msra.mxu1 %v2013_v34  ;;  %1962 = vmatprep.subr.msk.bf16.mxu0 %vm441_vm0, %v2014_v37  ;;  %v2022_v34 = vld [vmem:[%s2423_s2 + $0x90] sm:$0xff]   ;;  %v1021_v37 = vrot.slane %v1020_v23, 4 }
  0x34   : > { %1963 = vmatprep.subr.msk.bf16.mxu1 %vm441_vm0, %v2015_v42  ;;  %v1025_v41 = vrot.slane %v1023_v29, 5  ;;  %v2023_v42 = vld [vmem:[%s2423_s2 + $0xb4] sm:$0xff]  }
  0x35   : > { %1871 = vmatmul.mubr.msk.bf16.vlgmr.msra.gmra.mxu0 %vm434_vm1, %v1646_v49  ;;  %v1682_v49 = vcombine.low %v371_v43, %v377_v44 }
  0x36   : > { %1889 = vmatpush3.bf16.msra.mxu0 %v916_v53  ;;  %1885 = vmatmul.mubr.msk.bf16.vlgmr.msra.gmra.mxu1 %vm434_vm1, %v1664_v52  ;;  %v1026_v47 = vsel %vm2232_vm4, %v1021_v37, %v1025_v41  ;;  %v2026_v52 = vld [vmem:[%s2423_s2 + $0xf0] sm:$0xff]   ;;  %v1283_v53 = vsel %vm441_vm0, %v2025_v48, 0 }
  0x37   : > { %1903 = vmatpush3.bf16.msra.mxu1 %v1077_v58  ;;  %1890 = vmatprep.subr.bf16.mxu0 %v2016_v54  ;;  %v1700_v50 = vcombine.low %v1012_v46, %v1026_v47  ;;  %v2028_v58 = vld [vmem:[%s2423_s2 + $0xe8] sm:$0xff]  }
  0x38   : > { %1904 = vmatprep.subr.bf16.mxu1 %v2017_v59  ;;  %1898 = vmatprep.mubr.msk.bf16.mxu0 %vm434_vm1, %v1681_v5 }
  0x39   : > { %1912 = vmatprep.mubr.msk.bf16.mxu1 %vm434_vm1, %v1699_v35 }
  0x3a   : > { %1891 = vmatpush3.bf16.msra.mxu0 %v2016_v54  ;;  %v2027_v54 = vld [vmem:[%s2423_s2 + $0x114] sm:$0xff]  }
  0x3b   : > { %1905 = vmatpush3.bf16.msra.mxu1 %v2017_v59  ;;  %1892 = vmatprep.subr.bf16.mxu0 %v2018_v61  ;;  %v2029_v59 = vld [vmem:[%s2423_s2 + $0x10c] sm:$0xff]  }
  0x3c   : > { %1906 = vmatprep.subr.bf16.mxu1 %v2019_v4 }
  0x3e   : > { %1893 = vmatpush3.bf16.msra.mxu0 %v2018_v61  ;;  %v2034_v61 = vld [vmem:[%s2423_s2 + $0x140] ss:$0 sps:$4 sm:$0xff]  }
  0x3f   : > { %1907 = vmatpush3.bf16.msra.mxu1 %v2019_v4  ;;  %1894 = vmatprep.subr.bf16.mxu0 %v2020_v25  ;;  %v1399_v1 = vsel %vm441_vm0, %v2034_v61, 0 }
  0x40   : > { %1908 = vmatprep.subr.bf16.mxu1 %v2021_v30 }
  0x42   : > { %1895 = vmatpush3.bf16.msra.mxu0 %v2020_v25 }
  0x43   : > { %1909 = vmatpush3.bf16.msra.mxu1 %v2021_v30  ;;  %1896 = vmatprep.subr.bf16.mxu0 %v2022_v34 }
  0x44   : > { %1910 = vmatprep.subr.bf16.mxu1 %v2023_v42 }
  0x46   : > { %1897 = vmatpush3.bf16.msra.mxu0 %v2022_v34 }
  0x47   : > { %1911 = vmatpush3.bf16.msra.mxu1 %v2023_v42  ;;  %1964 = vmatprep.subr.msk.bf16.mxu0 %vm441_vm0, %v2024_v45 }
  0x48   : > { %1965 = vmatprep.subr.msk.bf16.mxu1 %vm441_vm0, %v2025_v48 }
  0x49   : > { %1899 = vmatmul.mubr.msk.bf16.vlgmr.msra.gmra.mxu0 %vm434_vm1, %v1682_v49 }
  0x4a   : > { %1917 = vmatpush3.bf16.msra.mxu0 %v1180_v51  ;;  %1913 = vmatmul.mubr.msk.bf16.vlgmr.msra.gmra.mxu1 %vm434_vm1, %v1700_v50 }
  0x4b   : > { %1931 = vmatpush3.bf16.msra.mxu1 %v1283_v53  ;;  %1918 = vmatprep.subr.bf16.mxu0 %v2026_v52 }
  0x4c   : > { %1932 = vmatprep.subr.bf16.mxu1 %v2027_v54  ;;  %1926 = vmatprep.mubr.msk.bf16.mxu0 %vm434_vm1, %v1717_v55 }
  0x4d   : > { %1940 = vmatprep.mubr.msk.bf16.mxu1 %vm434_vm1, %v1735_v57 }
  0x4e   : > { %1919 = vmatpush3.bf16.msra.mxu0 %v2026_v52 }
  0x4f   : > { %1933 = vmatpush3.bf16.msra.mxu1 %v2027_v54  ;;  %1920 = vmatprep.subr.bf16.mxu0 %v2028_v58 }
  0x50   : > { %1934 = vmatprep.subr.bf16.mxu1 %v2029_v59 }
  0x52   : > { %1921 = vmatpush3.bf16.msra.mxu0 %v2028_v58 }
  0x53   : > { %1935 = vmatpush3.bf16.msra.mxu1 %v2029_v59  ;;  %1922 = vmatprep.subr.bf16.mxu0 %v2030_v14 }
  0x54   : > { %1936 = vmatprep.subr.bf16.mxu1 %v2031_v18 }
  0x56   : > { %1923 = vmatpush3.bf16.msra.mxu0 %v2030_v14 }
  0x57   : > { %1937 = vmatpush3.bf16.msra.mxu1 %v2031_v18  ;;  %1924 = vmatprep.subr.bf16.mxu0 %v2032_v26 }
  0x58   : > { %1938 = vmatprep.subr.bf16.mxu1 %v2033_v27 }
  0x5a   : > { %1925 = vmatpush3.bf16.msra.mxu0 %v2032_v26 }
  0x5b   : > { %1939 = vmatpush3.bf16.msra.mxu1 %v2033_v27  ;;  %1966 = vmatprep.subr.msk.bf16.mxu0 %vm441_vm0, %v2034_v61 }
  0x5d   : > { %1927 = vmatmul.mubr.msk.bf16.vlgmr.msra.gmra.mxu0 %vm434_vm1, %v1718_v63 }
  0x5e   : > { %1945 = vmatpush3.bf16.msra.mxu0 %v1399_v1  ;;  %1941 = vmatmul.mubr.msk.bf16.vlgmr.msra.gmra.mxu1 %vm434_vm1, %v1736_v0  ;;  %v1762_v0 = vld [vmem:[%s2424_s3] ss:$0 sm:$0xff] }
  0x5f   : > { %1946 = vmatprep.subr.bf16.mxu0 %v2035_v2  ;;  %1954 = vmatprep.mubr.msk.bf16.mxu0 %vm434_vm1, %v1753_v3 }
  0x62   : > { %1947 = vmatpush3.bf16.msra.mxu0 %v2035_v2 }
  0x63   : > { %1948 = vmatprep.subr.bf16.mxu0 %v2036_v16 }
  0x66   : > { %1949 = vmatpush3.bf16.msra.mxu0 %v2036_v16 }
  0x67   : > { %1950 = vmatprep.subr.bf16.mxu0 %v2037_v20 }
  0x6a   : > { %1951 = vmatpush3.bf16.msra.mxu0 %v2037_v20  ;;  %v1763_v20 = vld [vmem:[%s2425_s4] ss:$0 sm:$0xff] }
  0x6b   : > { %1952 = vmatprep.subr.bf16.mxu0 %v2038_v31 }
  0x6e   : > { %1953 = vmatpush3.bf16.msra.mxu0 %v2038_v31 }
  0x71   : > { %1955 = vmatmul.mubr.msk.bf16.vlgmr.msra.gmra.mxu0 %vm434_vm1, %v1754_v24 }
  0xe1   : > { %v1844_v39 = vpop.f32.mrf.mxu0 }
  0xe2   : > { %v1858_v4 = vpop.f32.mrf.mxu1 }
  0xe3   : > { %v479_v5 = vpop.f32.mrf.mxu0  ;;  %v583_v28 = vadd.f32 %v1858_v4, %v1844_v39 }
  0xe4   : > { %v574_v7 = vpop.f32.mrf.mxu1 }
  0xe5   : > { %v1845_v8 = vpop.f32.mrf.mxu0  ;;  %v575_v29 = vadd.f32 %v574_v7, %v479_v5 }
  0xe6   : > { %v1859_v9 = vpop.f32.mrf.mxu1 }
  0xe7   : > { %v482_v10 = vpop.f32.mrf.mxu0  ;;  %v586_v34 = vadd.f32 %v1859_v9, %v1845_v8 }
  0xe8   : > { %v577_v12 = vpop.f32.mrf.mxu1 }
  0xe9   : > { %v578_v37 = vadd.f32 %v577_v12, %v482_v10 }
  0xf5   : > { %v1872_v11 = vpop.f32.mrf.mxu0 }
  0xf6   : > { %v1886_v17 = vpop.f32.mrf.mxu1  ;;  %v751_v30 = vadd.f32 %v1872_v11, %v583_v28 }
  0xf7   : > { %v734_v13 = vpop.f32.mrf.mxu0 }
  0xf8   : > { %v843_v19 = vpop.f32.mrf.mxu1  ;;  %v749_v35 = vadd.f32 %v734_v13, %v575_v29  ;;  %v860_v38 = vadd.f32 %v1886_v17, %v751_v30 }
  0xf9   : > { %v1873_v6 = vpop.f32.mrf.mxu0 }
  0xfa   : > { %v1887_v56 = vpop.f32.mrf.mxu1  ;;  %v752_v41 = vadd.f32 %v1873_v6, %v586_v34  ;;  %v858_v43 = vadd.f32 %v843_v19, %v749_v35 }
  0xfb   : > { %v737_v21 = vpop.f32.mrf.mxu0 }
  0xfc   : > { %v846_v15 = vpop.f32.mrf.mxu1  ;;  %v750_v44 = vadd.f32 %v737_v21, %v578_v37  ;;  %v861_v48 = vadd.f32 %v1887_v56, %v752_v41 }
  0xfe   : > { %v859_v50 = vadd.f32 %v846_v15, %v750_v44 }
 0x109   : > { %v1900_v62 = vpop.f32.mrf.mxu0 }
 0x10a   : > { %v1914_v22 = vpop.f32.mrf.mxu1  ;;  %v969_v45 = vadd.f32 %v1900_v62, %v860_v38 }
 0x10b   : > { %v952_v40 = vpop.f32.mrf.mxu0 }
 0x10c   : > { %v1113_v25 = vpop.f32.mrf.mxu1  ;;  %v967_v49 = vadd.f32 %v952_v40, %v858_v43  ;;  %v1130_v51 = vadd.f32 %v1914_v22, %v969_v45 }
 0x10d   : > { %v1901_v23 = vpop.f32.mrf.mxu0 }
 0x10e   : > { %v1915_v33 = vpop.f32.mrf.mxu1  ;;  %v970_v52 = vadd.f32 %v1901_v23, %v861_v48  ;;  %v1128_v55 = vadd.f32 %v1113_v25, %v967_v49 }
 0x10f   : > { %v955_v32 = vpop.f32.mrf.mxu0 }
 0x110   : > { %v1116_v42 = vpop.f32.mrf.mxu1  ;;  %v968_v57 = vadd.f32 %v955_v32, %v859_v50  ;;  %v1131_v59 = vadd.f32 %v1915_v33, %v970_v52 }
 0x112   : > { %v1129_v27 = vadd.f32 %v1116_v42, %v968_v57 }
 0x11d   : > { %v1928_v36 = vpop.f32.mrf.mxu0 }
 0x11e   : > { %v1942_v47 = vpop.f32.mrf.mxu1  ;;  %v1233_v58 = vadd.f32 %v1928_v36, %v1130_v51 }
 0x11f   : > { %v1216_v46 = vpop.f32.mrf.mxu0 }
 0x120   : > { %v1319_v54 = vpop.f32.mrf.mxu1  ;;  %v1231_v14 = vadd.f32 %v1216_v46, %v1128_v55  ;;  %v1336_v60 = vadd.f32 %v1942_v47, %v1233_v58 }
 0x121   : > { %v1929_v53 = vpop.f32.mrf.mxu0 }
 0x122   : > { %v1943_v26 = vpop.f32.mrf.mxu1  ;;  %v1234_v61 = vadd.f32 %v1929_v53, %v1131_v59  ;;  %v1334_v1 = vadd.f32 %v1319_v54, %v1231_v14 }
 0x123   : > { %v1219_v18 = vpop.f32.mrf.mxu0 }
 0x124   : > { %v1232_v2 = vadd.f32 %v1219_v18, %v1129_v27  ;;  %v1322_v16 = vpop.f32.mrf.mxu1  ;;  %v1337_v24 = vadd.f32 %v1943_v26, %v1234_v61 }
 0x126   : > { %v1335_v7 = vadd.f32 %v1322_v16, %v1232_v2 }
 0x131   : > { %v1956_v63 = vpop.f32.mrf.mxu0 }
 0x132   : > { %v1452_v3 = vadd.f32 %v1956_v63, %v1336_v60 }
 0x133   : > { %v1435_v31 = vpop.f32.mrf.mxu0 }
 0x134   : > { %v1463_v39 = vmul.f32 %v1762_v0, %v1452_v3  ;;  %v1450_v4 = vadd.f32 %v1435_v31, %v1334_v1 }
 0x135   : > { %v1957_v5 = vpop.f32.mrf.mxu0 }
 0x136   : > { %v1474_v8 = vadd.f32 %v1763_v20, %v1463_v39  ;;  %v1461_v9 = vmul.f32 %v1762_v0, %v1450_v4  ;;  %v1453_v10 = vadd.f32 %v1957_v5, %v1337_v24 }
 0x137   : > { %v1438_v11 = vpop.f32.mrf.mxu0 }
 0x138   : > { %v1478_v12 = vmax.f32 %v1474_v8, 0.0  ;;  %v1472_v13 = vadd.f32 %v1763_v20, %v1461_v9  ;;  %v1464_v17 = vmul.f32 %v1762_v0, %v1453_v10  ;;  %v1451_v6 = vadd.f32 %v1438_v11, %v1335_v7 }
 0x13a   : > { %v1482_v19 = vpack.c.bf16 %v1478_v12, %v1478_v12  ;;  %v1476_v21 = vmax.f32 %v1472_v13, 0.0  ;;  %v1475_v56 = vadd.f32 %v1763_v20, %v1464_v17  ;;  %v1462_v62 = vmul.f32 %v1762_v0, %v1451_v6 }
 0x13c   : > { %1487 = vst.msk [vmem:[%s348_s25 + $0x8] sm:$0xf] %vm1484_vm5, %v1482_v19  ;;  %v1480_v15 = vpack.c.bf16 %v1476_v21, %v1476_v21  ;;  %v1479_v40 = vmax.f32 %v1475_v56, 0.0  ;;  %v1473_v22 = vadd.f32 %v1763_v20, %v1462_v62 }
 0x13e   : > { %1485 = vst.msk [vmem:[%s348_s25] sm:$0xf] %vm1484_vm5, %v1480_v15  ;;  %v1483_v23 = vpack.c.bf16 %v1479_v40, %v1479_v40  ;;  %v1477_v25 = vmax.f32 %v1473_v22, 0.0 }
 0x140   : > { %1488 = vst.msk [vmem:[%s348_s25 + $0xc] sm:$0xf] %vm1484_vm5, %v1483_v23  ;;  %v1481_v28 = vpack.c.bf16 %v1477_v25, %v1477_v25 }
 0x142   : > { %1486 = vst.msk [vmem:[%s348_s25 + $0x4] sm:$0xf] %vm1484_vm5, %v1481_v28 }
 0x143 PF: > { %s15_s20 = sadd.s32 1, %s2061_s20   ;;  %s2429_s18 = smov %s2057_s19 }
 0x144   : > { %p12_p5 = scmp.ge.s32.totalorder %s15_s20, 4   ;;  %s2430_s19 = smov %s2432_s21 }
 0x146   :  { %14 = sbr.rel (!%p12_p5) target bundleno = 2 (0x2), region = 81 }

// kernel: hourglass_forward.7
= control target key start
LH: loop header
LB: loop body
LE: loop exit
PB: predicated region body
PF: predicated region fallthrough
CT: control target
= control target key end

     0   :  { %s2150_s21 = smov 0   ;;  %s2152_s22 = smov 0   ;;  %s2479_s0 = inlined_call_operand.vmem [shape: bf16[2,6,1,1,10,80], index: 0, kind: input, shape index: {}, may-alias: {0,1,2}]   ;;  %s2480_s1 = inlined_call_operand.vmem [shape: bf16[2,6,1,1,10,80], index: 1, kind: input, shape index: {}, may-alias: {0,1,2}]   ;;  %s2481_s2 = inlined_call_operand.vmem [shape: bf16[2,6,1,1,10,80], index: 2, kind: input, shape index: {}, may-alias: {0,1,2}]   ;;  %s2482_s3 = inlined_call_operand.vmem [shape: bf16[9,80,64], index: 3, kind: input, shape index: {}]   ;;  %s2483_s4 = inlined_call_operand.vmem [shape: f32[1,64], index: 4, kind: input, shape index: {}]   ;;  %s2484_s5 = inlined_call_operand.vmem [shape: f32[1,64], index: 5, kind: input, shape index: {}]   ;;  %s2485_s6 = inlined_call_operand.vmem [shape: bf16[2,4,8,64], index: 6, kind: output, shape index: {}]  }
   0x1   :  { %s2154_s23 = smov 0  }
   0x2 LB: > { %s28_s24 = sadd.s32 1, %s2109_s22  ;;  %p1648_p0 = scmp.ge.s32.totalorder %s2113_s23, 1  ;;  %s2113_s23 = sphi %s2154_s23, %s16_s23   ;;  %s2109_s22 = sphi %s2152_s22, %s2491_s22   ;;  %s2105_s21 = sphi %s2150_s21, %s2490_s21  }
   0x3   : > { %p30_p1 = scmp.ge.s32.totalorder %s28_s24, 2  ;;  %p296_p2 = scmp.lt.s32.totalorder %s2113_s23, 3 }
   0x5   : > { %s2493_s24 = smov (%p30_p1, %s28_s24), 0  ;;  %p297_p3 = pnand %p1648_p0, %p296_p2 }
   0x6   : > { %p369_p4 = scmp.lt.s32.totalorder (!%p297_p3), %s2105_s21, 1 }
   0x7   : > { %300 = sbr.rel (%p297_p3) target bundleno = 325 (0x145), region = 44 }
   0xc   : > { %v2043_v0 = vld [vmem:[%s2482_s3 + $0x48] sm:$0xff]   ;;  %v2044_v1 = vld [vmem:[%s2482_s3 + $0x20] sm:$0xff]   ;;  %s2495_s21 = smov (!%p369_p4, %s2105_s21), 1  ;;  %v2046_v3 = vld [vmem:[%s2482_s3 + $0x18] sm:$0xff]   ;;  %vm551_vm0 = vcmask 654336   ;;  %vm706_vm4 = vcmask 1042432  }
   0xd   : > { %1890 = vmatprep.subr.bf16.mxu0 %v2043_v0  ;;  %v2045_v2 = vld [vmem:[%s2482_s3 + $0x40] sm:$0xff]   ;;  %1904 = vmatprep.subr.bf16.mxu1 %v2044_v1  ;;  %v2047_v4 = vld [vmem:[%s2482_s3 + $0x38] sm:$0xff]   ;;  %s2186_s11 = smul.u32 48, %s2495_s21  ;;  %v2048_v5 = vld [vmem:[%s2482_s3 + $0x10] sm:$0xff]   ;;  %vm445_vm1 = vsmask.f32 3328 }
   0xe   : > { %1891 = vmatpush3.bf16.msra.mxu0 %v2043_v0  ;;  %1905 = vmatpush3.bf16.msra.mxu1 %v2044_v1  ;;  %v2049_v6 = vld [vmem:[%s2482_s3 + $0x30] sm:$0xff]   ;;  %v2050_v7 = vld [vmem:[%s2482_s3 + $0x8] sm:$0xff]   ;;  %v2052_v16 = vld [vmem:[%s2482_s3] sm:$0xff]   ;;  %vm446_vm2 = vsmask.f32 7440  ;;  %vm707_vm5 = vcmask 1046532  }
   0xf   : > { %1892 = vmatprep.subr.bf16.mxu0 %v2045_v2  ;;  %1906 = vmatprep.subr.bf16.mxu1 %v2046_v3  ;;  %s377_s16 = scalar_lea.vmem %s2479_s0, %s2186_s11  ;;  %v2051_v10 = vld [vmem:[%s2482_s3 + $0x28] sm:$0xff]   ;;  %v2055_v34 = vld [vmem:[%s2482_s3 + $0x70] sm:$0xff]   ;;  %v2056_v35 = vld [vmem:[%s2482_s3 + $0x98] sm:$0xff]   ;;  %s1823_s14 = sadd.s32 32, %s2186_s11  ;;  %vm1507_vm7 = vcmask 519168  }
  0x10   : > { %v2201_v8 = vld [vmem:[%s377_s16] sm:$0xf]  ;;  %v2203_v9 = vld [vmem:[%s377_s16 + $0x8] sm:$0xf]  ;;  %v2208_v11 = vld [vmem:[%s377_s16 + $0x4] sm:$0x1]  ;;  %s2305_s25 = scalar_lea.vmem %s2480_s1, %s1823_s14 }
  0x11   : > { %v1673_v12 = vcombine.low %v2201_v8, %v2203_v9  ;;  %v2212_v13 = vld [vmem:[%s377_s16 + $0xc] sm:$0x1]  ;;  %v2214_v14 = vld [vmem:[%s377_s16 + $0x10] sm:$0xf]  ;;  %v2216_v15 = vld [vmem:[%s377_s16 + $0x18] sm:$0xf] }
  0x12   : > { %1893 = vmatpush3.bf16.msra.mxu0 %v2045_v2  ;;  %1907 = vmatpush3.bf16.msra.mxu1 %v2046_v3  ;;  %v2221_v17 = vld [vmem:[%s377_s16 + $0x14] sm:$0x1]  ;;  %v2226_v18 = vcombine.low %v2214_v14, %v2216_v15  ;;  %v2228_v19 = vld [vmem:[%s377_s16 + $0x1c] sm:$0x1]  ;;  %v449_v20 = vshrl.u32 %v2201_v8, 16  ;;  %v452_v21 = vshll.u32 %v2201_v8, 16  ;;  %vm2247_vm3 = vmor %vm445_vm1, %vm446_vm2  ;;  %v1715_v48 = vcombine.low %v2203_v9, %v2214_v14 }
  0x13   : > { %1894 = vmatprep.subr.bf16.mxu0 %v2047_v4  ;;  %1908 = vmatprep.subr.bf16.mxu1 %v2048_v5  ;;  %v458_v22 = vshll.u32 %v2208_v11, 16  ;;  %v463_v23 = vshrl.u32 %v2203_v9, 16  ;;  %v466_v24 = vshll.u32 %v2203_v9, 16  ;;  %v472_v25 = vshll.u32 %v2212_v13, 16  ;;  %v2058_v47 = vld [vmem:[%s2482_s3 + $0x90] sm:$0xff]   ;;  %v2060_v61 = vld [vmem:[%s2482_s3 + $0x88] sm:$0xff]   ;;  %vm2291_vm6 = vmor %vm706_vm4, %vm707_vm5 }
  0x14   : > { %1914 = vmatprep.mubr.msk.bf16.mxu1 %vm551_vm0, %v1673_v12  ;;  %v451_v26 = vrot.slane %v449_v20, 4  ;;  %v454_v27 = vrot.slane %v452_v21, 5  ;;  %v477_v28 = vshrl.u32 %v2214_v14, 16  ;;  %v480_v29 = vshll.u32 %v2214_v14, 16  ;;  %v2057_v63 = vld [vmem:[%s2482_s3 + $0x68] sm:$0xff]   ;;  %s1825_s28 = sadd.s32 40, %s2186_s11 }
  0x15   : > { %v460_v30 = vrot.slane %v458_v22, 5  ;;  %v465_v31 = vrot.slane %v463_v23, 4  ;;  %v468_v32 = vrot.slane %v466_v24, 5  ;;  %v474_v33 = vrot.slane %v472_v25, 5  ;;  %v2318_v12 = vld [vmem:[%s2305_s25] sm:$0xf]  ;;  %s408_s9 = scalar_lea.vmem %s2481_s2, %s1825_s28 }
  0x16   : > { %1895 = vmatpush3.bf16.msra.mxu0 %v2047_v4  ;;  %1909 = vmatpush3.bf16.msra.mxu1 %v2048_v5  ;;  %v455_v36 = vor.u32 %v454_v27, %v451_v26  ;;  %v479_v37 = vrot.slane %v477_v28, 4  ;;  %v482_v38 = vrot.slane %v480_v29, 5  ;;  %v486_v39 = vshll.u32 %v2221_v17, 16  ;;  %v2062_v4 = vld [vmem:[%s2482_s3 + $0x80] sm:$0xff]   ;;  %v2067_v21 = vld [vmem:[%s2482_s3 + $0xe8] sm:$0xff]   ;;  %v2063_v24 = vld [vmem:[%s2482_s3 + $0x50] sm:$0xff]  }
  0x17   : > { %1896 = vmatprep.subr.bf16.mxu0 %v2049_v6  ;;  %1910 = vmatprep.subr.bf16.mxu1 %v2050_v7  ;;  %v469_v41 = vor.u32 %v468_v32, %v465_v31  ;;  %v491_v42 = vshrl.u32 %v2216_v15, 16  ;;  %v494_v43 = vshll.u32 %v2216_v15, 16  ;;  %v500_v44 = vshll.u32 %v2228_v19, 16  ;;  %v2065_v26 = vld [vmem:[%s2482_s3 + $0xc0] sm:$0xff]   ;;  %v2071_v27 = vld [vmem:[%s2482_s3 + $0xd8] sm:$0xff]   ;;  %s1826_s8 = sshll.u32 %s2495_s21, 4 }
  0x18   : > { %v456_v45 = vrot.slane %v455_v36, 4  ;;  %v483_v46 = vor.u32 %v482_v38, %v479_v37  ;;  %v488_v50 = vrot.slane %v486_v39, 5  ;;  %v711_v1 = vrot.slane %v2208_v11, 5  ;;  %v432_v32 = vld [vmem:[%s2305_s25 + $0x4] sm:$0x1]  ;;  %v2070_v38 = vld [vmem:[%s2482_s3 + $0xb0] sm:$0xff]   ;;  %s420_s12 = scalar_lea.vmem %s2485_s6, %s1826_s8 }
  0x19   : > { %v470_v49 = vrot.slane %v469_v41, 4  ;;  %v493_v51 = vrot.slane %v491_v42, 4  ;;  %v496_v52 = vrot.slane %v494_v43, 5  ;;  %v502_v57 = vrot.slane %v500_v44, 5  ;;  %v2075_v41 = vld [vmem:[%s2482_s3 + $0xc8] sm:$0xff]   ;;  %v2086_v40 = vld [vmem:[%s2482_s3 + $0x160] sm:$0xff]  }
  0x1a   : > { %1897 = vmatpush3.bf16.msra.mxu0 %v2049_v6  ;;  %1911 = vmatpush3.bf16.msra.mxu1 %v2050_v7  ;;  %v461_v53 = vsel %vm2247_vm3, %v456_v45, %v460_v30  ;;  %v484_v54 = vrot.slane %v483_v46, 4  ;;  %v715_v2 = vrot.slane %v2212_v13, 5  ;;  %v1682_v5 = vrot.slane %v2201_v8, 9  ;;  %v2059_v7 = vld [vmem:[%s2482_s3 + $0x60] sm:$0xff]   ;;  %v2072_v44 = vld [vmem:[%s2482_s3 + $0xa8] sm:$0xff]  }
  0x1b   : > { %1898 = vmatprep.subr.bf16.mxu0 %v2051_v10  ;;  %1912 = vmatprep.subr.bf16.mxu1 %v2052_v16  ;;  %v2263_v55 = vsel %vm2247_vm3, %v470_v49, %v474_v33  ;;  %v497_v56 = vor.u32 %v496_v52, %v493_v51  ;;  %v1683_v6 = vrot.slane %v2203_v9, 9  ;;  %v2064_v9 = vld [vmem:[%s2482_s3 + $0x78] sm:$0xff]   ;;  %v719_v13 = vrot.slane %v2221_v17, 5  ;;  %v2385_v46 = vld [vmem:[%s408_s9] sm:$0xf] }
  0x1c   : > { %v1664_v58 = vcombine.low %v461_v53, %v2263_v55  ;;  %v2271_v59 = vsel %vm2247_vm3, %v484_v54, %v488_v50  ;;  %v1684_v20 = vrot.slane %v2214_v14, 9  ;;  %v723_v22 = vrot.slane %v2228_v19, 5  ;;  %v2069_v19 = vld [vmem:[%s2482_s3 + $0xe0] sm:$0xff]   ;;  %v2068_v33 = vld [vmem:[%s2482_s3 + $0xb8] sm:$0xff]   ;;  %v2079_v54 = vld [vmem:[%s2482_s3 + $0x130] sm:$0xff]  }
  0x1d   : > { %v498_v60 = vrot.slane %v497_v56, 4  ;;  %v716_v8 = vsel %vm2291_vm6, %v1683_v6, %v715_v2  ;;  %v1685_v17 = vrot.slane %v2216_v15, 9  ;;  %v1716_v23 = vcombine.low %v2216_v15, %v2318_v12  ;;  %v2074_v53 = vld [vmem:[%s2482_s3 + $0xa0] sm:$0xff]   ;;  %v2078_v2 = vld [vmem:[%s2482_s3 + $0x108] sm:$0xff]   ;;  %v2085_v6 = vld [vmem:[%s2482_s3 + $0x118] sm:$0xff]  }
  0x1e   : > { %1899 = vmatpush3.bf16.msra.mxu0 %v2051_v10  ;;  %1913 = vmatpush3.bf16.msra.mxu1 %v2052_v16  ;;  %v712_v10 = vsel %vm2291_vm6, %v1682_v5, %v711_v1  ;;  %v2061_v16 = vld [vmem:[%s2482_s3 + $0x58] sm:$0xff]   ;;  %v720_v14 = vsel %vm2291_vm6, %v1684_v20, %v719_v13  ;;  %v936_v28 = vshrl.u32 %v2318_v12, 16  ;;  %v939_v30 = vshll.u32 %v2318_v12, 16  ;;  %v2080_v5 = vld [vmem:[%s2482_s3 + $0x100] sm:$0xff]   ;;  %v2088_v13 = vld [vmem:[%s2482_s3 + $0x150] sm:$0xff]  }
  0x1f   : > { %1918 = vmatprep.subr.bf16.mxu0 %v2055_v34  ;;  %1932 = vmatprep.subr.bf16.mxu1 %v2056_v35  ;;  %v2280_v62 = vsel %vm2247_vm3, %v498_v60, %v502_v57  ;;  %v1696_v11 = vcombine.low %v712_v10, %v716_v8  ;;  %v1754_v25 = vcombine.low %v716_v8, %v720_v14  ;;  %v1055_v37 = vrot.slane %v432_v32, 5  ;;  %v2081_v60 = vld [vmem:[%s2482_s3 + $0x128] sm:$0xff]   ;;  %v2084_v8 = vld [vmem:[%s2482_s3 + $0xf0] sm:$0xff]  }
  0x20   : > { %1900 = vmatprep.mubr.msk.bf16.mxu0 %vm551_vm0, %v1664_v58  ;;  %v2287_v0 = vcombine.low %v2271_v59, %v2280_v62  ;;  %v724_v15 = vsel %vm2291_vm6, %v1685_v17, %v723_v22  ;;  %v1734_v31 = vcombine.low %v2263_v55, %v2271_v59  ;;  %v941_v36 = vrot.slane %v939_v30, 5  ;;  %v2076_v58 = vld [vmem:[%s2482_s3 + $0x110] sm:$0xff]   ;;  %v434_v59 = vld [vmem:[%s408_s9 + $0x4] sm:$0x1] }
  0x21   : > { %1915 = vmatmul.mubr.msk.bf16.vlgmr.msra.gmra.mxu1 %vm551_vm0, %v2226_v18  ;;  %v2352_v29 = vcombine.low %v720_v14, %v724_v15  ;;  %v1743_v39 = vrot.slane %v2318_v12, 9  ;;  %v945_v43 = vshll.u32 %v432_v32, 16  ;;  %v1261_v51 = vshrl.u32 %v2385_v46, 16 }
  0x22   : > { %1933 = vmatpush3.bf16.msra.mxu1 %v2056_v35  ;;  %1942 = vmatprep.mubr.msk.bf16.mxu1 %vm551_vm0, %v1715_v48  ;;  %v938_v35 = vrot.slane %v936_v28, 4  ;;  %v1264_v52 = vshll.u32 %v2385_v46, 16  ;;  %v1270_v1 = vshll.u32 %v434_v59, 16  ;;  %v1376_v20 = vrot.slane %v434_v59, 5 }
  0x23   : > { %1934 = vmatprep.subr.bf16.mxu1 %v2058_v47  ;;  %1901 = vmatmul.mubr.msk.bf16.vlgmr.msra.gmra.mxu0 %vm551_vm0, %v2287_v0  ;;  %v2383_v45 = vsel %vm2291_vm6, %v1743_v39, %v1055_v37  ;;  %v947_v49 = vrot.slane %v945_v43, 5  ;;  %v1263_v56 = vrot.slane %v1261_v51, 4 }
  0x24   : > { %1919 = vmatpush3.bf16.msra.mxu0 %v2055_v34  ;;  %1928 = vmatprep.mubr.msk.bf16.mxu0 %vm551_vm0, %v1696_v11  ;;  %v2073_v34 = vld [vmem:[%s2482_s3 + $0xd0] sm:$0xff]   ;;  %v942_v42 = vor.u32 %v941_v36, %v938_v35  ;;  %v1755_v50 = vcombine.low %v724_v15, %v2383_v45  ;;  %v1266_v57 = vrot.slane %v1264_v52, 5  ;;  %v2087_v11 = vld [vmem:[%s2482_s3 + $0x158] sm:$0xff]  }
  0x25   : > { %1920 = vmatprep.subr.bf16.mxu0 %v2057_v63 }
  0x26   : > { %1935 = vmatpush3.bf16.msra.mxu1 %v2058_v47  ;;  %v2077_v47 = vld [vmem:[%s2482_s3 + $0x138] sm:$0xff]   ;;  %v943_v48 = vrot.slane %v942_v42, 4 }
  0x27   : > { %1936 = vmatprep.subr.bf16.mxu1 %v2060_v61 }
  0x28   : > { %1921 = vmatpush3.bf16.msra.mxu0 %v2057_v63  ;;  %v948_v55 = vsel %vm2247_vm3, %v943_v48, %v947_v49  ;;  %v1267_v63 = vor.u32 %v1266_v57, %v1263_v56 }
  0x29   : > { %1922 = vmatprep.subr.bf16.mxu0 %v2059_v7 }
  0x2a   : > { %1937 = vmatpush3.bf16.msra.mxu1 %v2060_v61  ;;  %v1735_v61 = vcombine.low %v2280_v62, %v948_v55  ;;  %v1268_v62 = vrot.slane %v1267_v63, 4 }
  0x2b   : > { %1938 = vmatprep.subr.bf16.mxu1 %v2062_v4 }
  0x2c   : > { %1923 = vmatpush3.bf16.msra.mxu0 %v2059_v7 }
  0x2d   : > { %1924 = vmatprep.subr.bf16.mxu0 %v2061_v16 }
  0x2e   : > { %1939 = vmatpush3.bf16.msra.mxu1 %v2062_v4  ;;  %v2083_v4 = vld [vmem:[%s2482_s3 + $0x120] sm:$0xff]  }
  0x2f   : > { %1940 = vmatprep.subr.bf16.mxu1 %v2064_v9 }
  0x30   : > { %1925 = vmatpush3.bf16.msra.mxu0 %v2061_v16  ;;  %v1799_v16 = vrot.slane %v2385_v46, 9 }
  0x31   : > { %1926 = vmatprep.subr.bf16.mxu0 %v2063_v24 }
  0x32   : > { %1941 = vmatpush3.bf16.msra.mxu1 %v2064_v9  ;;  %v1773_v9 = vcombine.low %v2318_v12, %v2385_v46  ;;  %v2089_v12 = vld [vmem:[%s2482_s3 + $0x148] sm:$0xff]   ;;  %v1377_v22 = vsel %vm2291_vm6, %v1799_v16, %v1376_v20 }
  0x33   : > { %1960 = vmatprep.subr.bf16.mxu1 %v2067_v21  ;;  %v1810_v17 = vcombine.low %v2383_v45, %v1377_v22 }
  0x34   : > { %1927 = vmatpush3.bf16.msra.mxu0 %v2063_v24 }
  0x35   : > { %1943 = vmatmul.mubr.msk.bf16.vlgmr.msra.gmra.mxu1 %vm551_vm0, %v1716_v23  ;;  %1946 = vmatprep.subr.bf16.mxu0 %v2065_v26 }
  0x36   : > { %1961 = vmatpush3.bf16.msra.mxu1 %v2067_v21  ;;  %1970 = vmatprep.mubr.msk.bf16.mxu1 %vm551_vm0, %v1754_v25  ;;  %v2090_v21 = vld [vmem:[%s2482_s3 + $0x140] sm:$0xff]  }
  0x37   : > { %1962 = vmatprep.subr.bf16.mxu1 %v2069_v19  ;;  %1929 = vmatmul.mubr.msk.bf16.vlgmr.msra.gmra.mxu0 %vm551_vm0, %v2352_v29 }
  0x38   : > { %1947 = vmatpush3.bf16.msra.mxu0 %v2065_v26  ;;  %1956 = vmatprep.mubr.msk.bf16.mxu0 %vm551_vm0, %v1734_v31 }
  0x39   : > { %1948 = vmatprep.subr.bf16.mxu0 %v2068_v33 }
  0x3a   : > { %1963 = vmatpush3.bf16.msra.mxu1 %v2069_v19 }
  0x3b   : > { %1964 = vmatprep.subr.bf16.mxu1 %v2071_v27 }
  0x3c   : > { %1949 = vmatpush3.bf16.msra.mxu0 %v2068_v33 }
  0x3d   : > { %1950 = vmatprep.subr.bf16.mxu0 %v2070_v38 }
  0x3e   : > { %1965 = vmatpush3.bf16.msra.mxu1 %v2071_v27 }
  0x3f   : > { %1966 = vmatprep.subr.bf16.mxu1 %v2073_v34 }
  0x40   : > { %1951 = vmatpush3.bf16.msra.mxu0 %v2070_v38 }
  0x41   : > { %1952 = vmatprep.subr.bf16.mxu0 %v2072_v44 }
  0x42   : > { %1967 = vmatpush3.bf16.msra.mxu1 %v2073_v34 }
  0x43   : > { %1968 = vmatprep.subr.bf16.mxu1 %v2075_v41 }
  0x44   : > { %1953 = vmatpush3.bf16.msra.mxu0 %v2072_v44 }
  0x45   : > { %1954 = vmatprep.subr.bf16.mxu0 %v2074_v53 }
  0x46   : > { %1969 = vmatpush3.bf16.msra.mxu1 %v2075_v41 }
  0x47   : > { %1988 = vmatprep.subr.bf16.mxu1 %v2077_v47 }
  0x48   : > { %1955 = vmatpush3.bf16.msra.mxu0 %v2074_v53 }
  0x49   : > { %1971 = vmatmul.mubr.msk.bf16.vlgmr.msra.gmra.mxu1 %vm551_vm0, %v1755_v50  ;;  %1974 = vmatprep.subr.bf16.mxu0 %v2076_v58 }
  0x4a   : > { %1989 = vmatpush3.bf16.msra.mxu1 %v2077_v47  ;;  %1998 = vmatprep.mubr.msk.bf16.mxu1 %vm551_vm0, %v2287_v0  ;;  %v1272_v0 = vrot.slane %v1270_v1, 5 }
  0x4b   : > { %1990 = vmatprep.subr.bf16.mxu1 %v2079_v54  ;;  %1957 = vmatmul.mubr.msk.bf16.vlgmr.msra.gmra.mxu0 %vm551_vm0, %v1735_v61 }
  0x4c   : > { %1975 = vmatpush3.bf16.msra.mxu0 %v2076_v58  ;;  %1984 = vmatprep.mubr.msk.bf16.mxu0 %vm551_vm0, %v2226_v18  ;;  %v1273_v7 = vsel %vm2247_vm3, %v1268_v62, %v1272_v0  ;;  %v2082_v18 = vld [vmem:[%s2482_s3 + $0xf8] sm:$0xff]  }
  0x4d   : > { %1976 = vmatprep.subr.bf16.mxu0 %v2078_v2  ;;  %v1791_v10 = vcombine.low %v948_v55, %v1273_v7 }
  0x4e   : > { %1991 = vmatpush3.bf16.msra.mxu1 %v2079_v54 }
  0x4f   : > { %1992 = vmatprep.subr.bf16.mxu1 %v2081_v60 }
  0x50   : > { %1977 = vmatpush3.bf16.msra.mxu0 %v2078_v2 }
  0x51   : > { %1978 = vmatprep.subr.bf16.mxu0 %v2080_v5 }
  0x52   : > { %1993 = vmatpush3.bf16.msra.mxu1 %v2081_v60 }
  0x53   : > { %1994 = vmatprep.subr.bf16.mxu1 %v2083_v4 }
  0x54   : > { %1979 = vmatpush3.bf16.msra.mxu0 %v2080_v5 }
  0x55   : > { %1980 = vmatprep.subr.bf16.mxu0 %v2082_v18 }
  0x56   : > { %1995 = vmatpush3.bf16.msra.mxu1 %v2083_v4 }
  0x57   : > { %1996 = vmatprep.subr.bf16.mxu1 %v2085_v6 }
  0x58   : > { %1981 = vmatpush3.bf16.msra.mxu0 %v2082_v18 }
  0x59   : > { %1982 = vmatprep.subr.bf16.mxu0 %v2084_v8 }
  0x5a   : > { %1997 = vmatpush3.bf16.msra.mxu1 %v2085_v6 }
  0x5c   : > { %1983 = vmatpush3.bf16.msra.mxu0 %v2084_v8 }
  0x5d   : > { %1999 = vmatmul.mubr.msk.bf16.vlgmr.msra.gmra.mxu1 %vm551_vm0, %v1791_v10  ;;  %2002 = vmatprep.subr.bf16.mxu0 %v2086_v40 }
  0x5f   : > { %1985 = vmatmul.mubr.msk.bf16.vlgmr.msra.gmra.mxu0 %vm551_vm0, %v1773_v9 }
  0x60   : > { %2003 = vmatpush3.bf16.msra.mxu0 %v2086_v40  ;;  %2012 = vmatprep.mubr.msk.bf16.mxu0 %vm551_vm0, %v2352_v29 }
  0x61   : > { %2004 = vmatprep.subr.bf16.mxu0 %v2087_v11 }
  0x64   : > { %2005 = vmatpush3.bf16.msra.mxu0 %v2087_v11  ;;  %v1818_v11 = vld [vmem:[%s2483_s4] ss:$0 sm:$0xff] }
  0x65   : > { %2006 = vmatprep.subr.bf16.mxu0 %v2088_v13 }
  0x68   : > { %2007 = vmatpush3.bf16.msra.mxu0 %v2088_v13 }
  0x69   : > { %2008 = vmatprep.subr.bf16.mxu0 %v2089_v12 }
  0x6c   : > { %2009 = vmatpush3.bf16.msra.mxu0 %v2089_v12 }
  0x6d   : > { %2010 = vmatprep.subr.bf16.mxu0 %v2090_v21 }
  0x70   : > { %2011 = vmatpush3.bf16.msra.mxu0 %v2090_v21  ;;  %v1819_v21 = vld [vmem:[%s2484_s5] ss:$0 sm:$0xff] }
  0x73   : > { %2013 = vmatmul.mubr.msk.bf16.vlgmr.msra.gmra.mxu0 %vm551_vm0, %v1810_v17 }
  0xe1   : > { %v1916_v24 = vpop.f32.mrf.mxu1 }
  0xe3   : > { %v1902_v23 = vpop.f32.mrf.mxu0  ;;  %v687_v19 = vpop.f32.mrf.mxu1 }
  0xe4   : > { %v696_v41 = vadd.f32 %v1916_v24, %v1902_v23 }
  0xe5   : > { %v592_v14 = vpop.f32.mrf.mxu0  ;;  %v1917_v15 = vpop.f32.mrf.mxu1 }
  0xe6   : > { %v688_v42 = vadd.f32 %v687_v19, %v592_v14 }
  0xe7   : > { %v1903_v25 = vpop.f32.mrf.mxu0  ;;  %v690_v28 = vpop.f32.mrf.mxu1 }
  0xe8   : > { %v699_v46 = vadd.f32 %v1917_v15, %v1903_v25 }
  0xe9   : > { %v595_v26 = vpop.f32.mrf.mxu0 }
  0xea   : > { %v691_v49 = vadd.f32 %v690_v28, %v595_v26 }
  0xf5   : > { %v1944_v30 = vpop.f32.mrf.mxu1 }
  0xf7   : > { %v1930_v27 = vpop.f32.mrf.mxu0  ;;  %v916_v3 = vpop.f32.mrf.mxu1 }
  0xf8   : > { %v829_v43 = vadd.f32 %v1930_v27, %v696_v41 }
  0xf9   : > { %v812_v29 = vpop.f32.mrf.mxu0  ;;  %v1945_v33 = vpop.f32.mrf.mxu1 }
  0xfa   : > { %v827_v47 = vadd.f32 %v812_v29, %v688_v42  ;;  %v933_v50 = vadd.f32 %v1944_v30, %v829_v43 }
  0xfb   : > { %v1931_v31 = vpop.f32.mrf.mxu0  ;;  %v919_v35 = vpop.f32.mrf.mxu1 }
  0xfc   : > { %v830_v51 = vadd.f32 %v1931_v31, %v699_v46  ;;  %v931_v53 = vadd.f32 %v916_v3, %v827_v47 }
  0xfd   : > { %v815_v32 = vpop.f32.mrf.mxu0 }
  0xfe   : > { %v828_v54 = vadd.f32 %v815_v32, %v691_v49  ;;  %v934_v58 = vadd.f32 %v1945_v33, %v830_v51 }
 0x100   : > { %v932_v60 = vadd.f32 %v919_v35, %v828_v54 }
 0x109   : > { %v1972_v37 = vpop.f32.mrf.mxu1 }
 0x10b   : > { %v1958_v34 = vpop.f32.mrf.mxu0  ;;  %v1141_v39 = vpop.f32.mrf.mxu1 }
 0x10c   : > { %v1050_v55 = vadd.f32 %v1958_v34, %v933_v50 }
 0x10d   : > { %v1033_v36 = vpop.f32.mrf.mxu0  ;;  %v1973_v45 = vpop.f32.mrf.mxu1 }
 0x10e   : > { %v1048_v59 = vadd.f32 %v1033_v36, %v931_v53  ;;  %v1158_v61 = vadd.f32 %v1972_v37, %v1050_v55 }
 0x10f   : > { %v1959_v38 = vpop.f32.mrf.mxu0  ;;  %v1144_v52 = vpop.f32.mrf.mxu1 }
 0x110   : > { %v1051_v63 = vadd.f32 %v1959_v38, %v934_v58  ;;  %v1156_v4 = vadd.f32 %v1141_v39, %v1048_v59 }
 0x111   : > { %v1036_v44 = vpop.f32.mrf.mxu0 }
 0x112   : > { %v1049_v62 = vadd.f32 %v1036_v44, %v932_v60  ;;  %v1159_v5 = vadd.f32 %v1973_v45, %v1051_v63 }
 0x114   : > { %v1157_v10 = vadd.f32 %v1144_v52, %v1049_v62 }
 0x11d   : > { %v2000_v57 = vpop.f32.mrf.mxu1 }
 0x11f   : > { %v1986_v48 = vpop.f32.mrf.mxu0  ;;  %v1354_v2 = vpop.f32.mrf.mxu1 }
 0x120   : > { %v1258_v0 = vadd.f32 %v1986_v48, %v1158_v61 }
 0x121   : > { %v1241_v56 = vpop.f32.mrf.mxu0  ;;  %v2001_v18 = vpop.f32.mrf.mxu1 }
 0x122   : > { %v1256_v6 = vadd.f32 %v1241_v56, %v1156_v4  ;;  %v1371_v8 = vadd.f32 %v2000_v57, %v1258_v0 }
 0x123   : > { %v1987_v1 = vpop.f32.mrf.mxu0  ;;  %v1357_v20 = vpop.f32.mrf.mxu1 }
 0x124   : > { %v1259_v40 = vadd.f32 %v1987_v1, %v1159_v5  ;;  %v1369_v13 = vadd.f32 %v1354_v2, %v1256_v6 }
 0x125   : > { %v1244_v7 = vpop.f32.mrf.mxu0 }
 0x126   : > { %v1257_v12 = vadd.f32 %v1244_v7, %v1157_v10  ;;  %v1372_v17 = vadd.f32 %v2001_v18, %v1259_v40 }
 0x128   : > { %v1370_v19 = vadd.f32 %v1357_v20, %v1257_v12 }
 0x133   : > { %v2014_v9 = vpop.f32.mrf.mxu0 }
 0x134   : > { %v1475_v16 = vadd.f32 %v2014_v9, %v1371_v8 }
 0x135   : > { %v1458_v22 = vpop.f32.mrf.mxu0 }
 0x136   : > { %v1486_v23 = vmul.f32 %v1818_v11, %v1475_v16  ;;  %v1473_v24 = vadd.f32 %v1458_v22, %v1369_v13 }
 0x137   : > { %v2015_v14 = vpop.f32.mrf.mxu0 }
 0x138   : > { %v1497_v25 = vadd.f32 %v1819_v21, %v1486_v23  ;;  %v1484_v15 = vmul.f32 %v1818_v11, %v1473_v24  ;;  %v1476_v26 = vadd.f32 %v2015_v14, %v1372_v17 }
 0x139   : > { %v1461_v27 = vpop.f32.mrf.mxu0 }
 0x13a   : > { %v1501_v28 = vmax.f32 %v1497_v25, 0.0  ;;  %v1495_v29 = vadd.f32 %v1819_v21, %v1484_v15  ;;  %v1487_v30 = vmul.f32 %v1818_v11, %v1476_v26  ;;  %v1474_v31 = vadd.f32 %v1461_v27, %v1370_v19 }
 0x13c   : > { %v1505_v3 = vpack.c.bf16 %v1501_v28, %v1501_v28  ;;  %v1499_v32 = vmax.f32 %v1495_v29, 0.0  ;;  %v1498_v33 = vadd.f32 %v1819_v21, %v1487_v30  ;;  %v1485_v34 = vmul.f32 %v1818_v11, %v1474_v31 }
 0x13e   : > { %1510 = vst.msk [vmem:[%s420_s12 + $0x8] sm:$0xf] %vm1507_vm7, %v1505_v3  ;;  %v1503_v35 = vpack.c.bf16 %v1499_v32, %v1499_v32  ;;  %v1502_v36 = vmax.f32 %v1498_v33, 0.0  ;;  %v1496_v37 = vadd.f32 %v1819_v21, %v1485_v34 }
 0x140   : > { %1508 = vst.msk [vmem:[%s420_s12] sm:$0xf] %vm1507_vm7, %v1503_v35  ;;  %v1506_v38 = vpack.c.bf16 %v1502_v36, %v1502_v36  ;;  %v1500_v39 = vmax.f32 %v1496_v37, 0.0 }
 0x142   : > { %1511 = vst.msk [vmem:[%s420_s12 + $0xc] sm:$0xf] %vm1507_vm7, %v1506_v38  ;;  %v1504_v41 = vpack.c.bf16 %v1500_v39, %v1500_v39 }
 0x144   : > { %1509 = vst.msk [vmem:[%s420_s12 + $0x4] sm:$0xf] %vm1507_vm7, %v1504_v41 }
 0x145 PF: > { %s16_s23 = sadd.s32 1, %s2113_s23   ;;  %s2490_s21 = smov %s2109_s22 }
 0x146   : > { %p13_p5 = scmp.ge.s32.totalorder %s16_s23, 4   ;;  %s2491_s22 = smov %s2493_s24 }
 0x148   :  { %15 = sbr.rel (!%p13_p5) target bundleno = 2 (0x2), region = 88 }

// kernel: tile.83
= control target key start
LH: loop header
LB: loop body
LE: loop exit
PB: predicated region body
PF: predicated region fallthrough
CT: control target
= control target key end

     0   :  { %s22_s0 = inlined_call_operand.vmem [shape: f32[8], index: 0, kind: input, shape index: {}]   ;;  %s23_s1 = inlined_call_operand.vmem [shape: f32[4,8], index: 1, kind: output, shape index: {}]  }
   0x1   :  { %v4_v0 = vld [vmem:[%s22_s0] ss:$0 sm:$0xff] }
   0x2   :  { %5 = vst [vmem:[%s23_s1] sm:$0xf] %v4_v0 }

// kernel: tile.84
= control target key start
LH: loop header
LB: loop body
LE: loop exit
PB: predicated region body
PF: predicated region fallthrough
CT: control target
= control target key end

     0   :  { %vm8_vm0 = vcmask 64512   ;;  %s40_s8 = smov 8   ;;  %s41_s9 = smov 16   ;;  %vm14_vm1 = vcmask 261312   ;;  %vm20_vm2 = vcmask 195712   ;;  %vm26_vm3 = vcmask 130112   ;;  %s58_s0 = inlined_call_operand.vmem [shape: f32[4,8], index: 0, kind: input, shape index: {}]   ;;  %s59_s1 = inlined_call_operand.vmem [shape: f32[1,32], index: 1, kind: output, shape index: {}]  }
   0x1   :  { %v5_v0 = vld [vmem:[%s58_s0] sm:$0xf]  ;;  %s39_s0 = smov 24  }
   0x2   :  { %6 = vst [vmem:[#allocation1] sm:$0xf] %v5_v0 }
   0x9   :  { %v11_v1 = vld [vmem:[#allocation1 + $0x3] sm:$0x1]   ;;  %v23_v2 = vld [vmem:[#allocation1 + $0x1] sm:$0x1]   ;;  %v7_v3 = vld [vmem:[#allocation1] sm:$0x1]  }
   0xa   :  { %12 = vrot.lane.b32.xlu0 %v11_v1, %s39_s0  ;;  %24 = vrot.lane.b32.xlu1 %v23_v2, %s40_s8  ;;  %v17_v4 = vld [vmem:[#allocation1 + $0x2] sm:$0x1]   ;;  %9 = vst.msk [vmem:[#allocation0] sm:$0x1] %vm8_vm0, %v7_v3  }
   0xe   :  { %18 = vrot.lane.b32.xlu0 %v17_v4, %s41_s9 }
  0x7c   :  { %v13_v5 = vpop.permute.xlu0 %12   ;;  %v25_v6 = vpop.permute.xlu1 %24  }
  0x7d   :  { %15 = vst.msk [vmem:[#allocation0] sm:$0x1] %vm14_vm1, %v13_v5  }
  0x80   :  { %v19_v7 = vpop.permute.xlu0 %18  }
  0x81   :  { %21 = vst.msk [vmem:[#allocation0] sm:$0x1] %vm20_vm2, %v19_v7  }
  0x82   :  { %27 = vst.msk [vmem:[#allocation0] sm:$0x1] %vm26_vm3, %v25_v6  }
  0x89   :  { %v32_v8 = vld [vmem:[#allocation0] sm:$0x1] }
  0x8a   :  { %35 = vst [vmem:[%s59_s1] sm:$0x1] %v32_v8 }

// kernel: hourglass_forward.8
= control target key start
LH: loop header
LB: loop body
LE: loop exit
PB: predicated region body
PF: predicated region fallthrough
CT: control target
= control target key end

     0   :  { %s1920_s18 = smov 0   ;;  %s1922_s19 = smov 0   ;;  %s2229_s0 = inlined_call_operand.vmem [shape: bf16[2,3,2,2,5,80], index: 0, kind: input, shape index: {}, may-alias: {0,1}]   ;;  %s2230_s1 = inlined_call_operand.vmem [shape: bf16[2,3,2,2,5,80], index: 1, kind: input, shape index: {}, may-alias: {0,1}]   ;;  %s2231_s2 = inlined_call_operand.vmem [shape: bf16[9,80,32], index: 2, kind: input, shape index: {}]   ;;  %s2232_s3 = inlined_call_operand.vmem [shape: f32[1,32], index: 3, kind: input, shape index: {}]   ;;  %s2233_s4 = inlined_call_operand.vmem [shape: f32[1,32], index: 4, kind: input, shape index: {}]   ;;  %s2234_s5 = inlined_call_operand.vmem [shape: bf16[2,2,4,32], index: 5, kind: output, shape index: {}]  }
   0x1   :  { %s1924_s20 = smov 0  }
   0x2 LB: > { %s27_s21 = sadd.s32 1, %s1881_s19  ;;  %p1458_p0 = scmp.ge.s32.totalorder %s1885_s20, 1  ;;  %s1885_s20 = sphi %s1924_s20, %s15_s20   ;;  %s1881_s19 = sphi %s1922_s19, %s2238_s19   ;;  %s1877_s18 = sphi %s1920_s18, %s2237_s18  }
   0x3   : > { %p29_p1 = scmp.ge.s32.totalorder %s27_s21, 2  ;;  %p245_p2 = scmp.lt.s32.totalorder %s1885_s20, 3 }
   0x5   : > { %s2240_s21 = smov (%p29_p1, %s27_s21), 0  ;;  %p246_p3 = pnand %p1458_p0, %p245_p2 }
   0x6   : > { %p306_p4 = scmp.lt.s32.totalorder (!%p246_p3), %s1877_s18, 1 }
   0x7   : > { %249 = sbr.rel (%p246_p3) target bundleno = 319 (0x13f), region = 40 }
   0xc   : > { %v1814_v0 = vld [vmem:[%s2231_s2 + $0x48] sm:$0xff]   ;;  %v1887_v1 = vmov 0.0   ;;  %v1815_v2 = vld [vmem:[%s2231_s2 + $0x20] sm:$0xff]   ;;  %vm1888_vm0 = vmmov 0   ;;  %v1817_v4 = vld [vmem:[%s2231_s2 + $0x18] sm:$0xff]   ;;  %s2242_s18 = smov (!%p306_p4, %s1877_s18), 1  ;;  %v383_v6 = vlaneseq }
   0xd   : > { %1658 = vmatprep.subr.bf16.mxu0 %v1887_v1  ;;  %1672 = vmatprep.subr.bf16.mxu1 %v1887_v1  ;;  %v1816_v3 = vld [vmem:[%s2231_s2 + $0x40] sm:$0xff]   ;;  %v1818_v5 = vld [vmem:[%s2231_s2 + $0x38] sm:$0xff]   ;;  %s1784_s7 = smul.u32 48, %s2242_s18  ;;  %v1819_v7 = vld [vmem:[%s2231_s2 + $0x10] sm:$0xff]   ;;  %v1889_v14 = vmov 1983009808  }
   0xe   : > { %1659 = vmatpush3.bf16.msra.mxu0 %v1814_v0  ;;  %1668 = vmatprep.mubr.msk.bf16.mxu0 %vm1888_vm0, %v1887_v1  ;;  %v1820_v8 = vld [vmem:[%s2231_s2 + $0x30] sm:$0xff]   ;;  %v1821_v9 = vld [vmem:[%s2231_s2 + $0x8] sm:$0xff]   ;;  %v384_v11 = vshrl.u32 %v383_v6, 7  ;;  %v381_v15 = vunpack.c.l.s4 %v1889_v14  ;;  %v1823_v21 = vld [vmem:[%s2231_s2] sm:$0xff]   ;;  %vm417_vm1 = vcmask 654336   ;;  %s1603_s23 = sshll.u32 %s2242_s18, 2 }
   0xf   : > { %1673 = vmatpush3.bf16.msra.mxu1 %v1815_v2  ;;  %1660 = vmatprep.subr.bf16.mxu0 %v1887_v1  ;;  %s1974_s12 = scalar_lea.vmem %s2229_s0, %s1784_s7  ;;  %v1822_v17 = vld [vmem:[%s2231_s2 + $0x28] sm:$0xff]   ;;  %v1826_v26 = vld [vmem:[%s2231_s2 + $0x70] sm:$0xff]   ;;  %v1827_v28 = vld [vmem:[%s2231_s2 + $0x98] sm:$0xff]   ;;  %vm560_vm2 = vsmask.f32 1280  ;;  %s1602_s8 = sadd.s32 32, %s1784_s7 }
  0x10   : > { %1674 = vmatprep.subr.bf16.mxu1 %v1887_v1  ;;  %1682 = vmatprep.mubr.msk.bf16.mxu1 %vm1888_vm0, %v1887_v1  ;;  %v349_v10 = vld [vmem:[%s1974_s12 + $0x4] sm:$0x7]  ;;  %v1985_v12 = vld [vmem:[%s1974_s12 + $0x14] sm:$0x7]  ;;  %v348_v13 = vld [vmem:[%s1974_s12] sm:$0x7]  ;;  %v382_v19 = vunpack.c.0.s8 %v381_v15  ;;  %s332_s14 = scalar_lea.vmem %s2230_s1, %s1602_s8 }
  0x11   : > { %v1990_v16 = vld [vmem:[%s1974_s12 + $0x10] sm:$0x7]  ;;  %v379_v18 = vcombine.low %v349_v10, %v1985_v12  ;;  %v1828_v36 = vld [vmem:[%s2231_s2 + $0x68] sm:$0xff]   ;;  %vm561_vm3 = vsmask.f32 3336  ;;  %v1830_v44 = vld [vmem:[%s2231_s2 + $0x60] sm:$0xff]  }
  0x12   : > { %1661 = vmatpush3.bf16.msra.mxu0 %v1816_v3  ;;  %v463_v20 = vcombine.low %v348_v13, %v1990_v16  ;;  %v2002_v22 = vsub.s32 %v382_v19, %v384_v11  ;;  %v1829_v37 = vld [vmem:[%s2231_s2 + $0x90] sm:$0xff]   ;;  %vm562_vm4 = vmor %vm560_vm2, %vm561_vm3  ;;  %vm563_vm5 = vsmask.f32 5392  ;;  %vm565_vm6 = vsmask.f32 7448  ;;  %v1831_v49 = vld [vmem:[%s2231_s2 + $0x88] sm:$0xff]  }
  0x13   : > { %1675 = vmatpush3.bf16.msra.mxu1 %v1817_v4  ;;  %1662 = vmatprep.subr.bf16.mxu0 %v1887_v1  ;;  %vm564_vm7 = vmor %vm562_vm4, %vm563_vm5  ;;  %v350_v51 = vld [vmem:[%s1974_s12 + $0x8] sm:$0x7]  ;;  %v1832_v53 = vld [vmem:[%s2231_s2 + $0x58] sm:$0xff]   ;;  %vm1340_vm9 = vcmask 254976  }
  0x14   : > { %1676 = vmatprep.subr.bf16.mxu1 %v1887_v1  ;;  %v386_v23 = vrot.slane %v379_v18, %v2002_v22  ;;  %v470_v24 = vrot.slane %v463_v20, %v2002_v22  ;;  %v550_v25 = vrot.slane %v348_v13, %v2002_v22  ;;  %v558_v27 = vrot.slane %v1990_v16, %v2002_v22  ;;  %vm2038_vm8 = vmor %vm564_vm7, %vm565_vm6  ;;  %v354_v57 = vld [vmem:[%s1974_s12 + $0x18] sm:$0x7]  ;;  %v1833_v58 = vld [vmem:[%s2231_s2 + $0x80] sm:$0xff]  }
  0x15   : > { %v884_v54 = vrot.slane %v350_v51, %v2002_v22  ;;  %v892_v59 = vrot.slane %v354_v57, %v2002_v22  ;;  %v1834_v60 = vld [vmem:[%s2231_s2 + $0x50] sm:$0xff]   ;;  %v1835_v61 = vld [vmem:[%s2231_s2 + $0x78] sm:$0xff]   ;;  %v701_v2 = vcombine.low %v350_v51, %v354_v57  ;;  %v1836_v6 = vld [vmem:[%s2231_s2 + $0xc0] sm:$0xff]  }
  0x16   : > { %1663 = vmatpush3.bf16.msra.mxu0 %v1818_v5  ;;  %v551_v29 = vcombine.high %v550_v25, %v550_v25  ;;  %v559_v30 = vcombine.high %v558_v27, %v558_v27  ;;  %v568_v31 = vshrl.u32 %v550_v25, 16  ;;  %v571_v32 = vshll.u32 %v550_v25, 16  ;;  %v1838_v10 = vld [vmem:[%s2231_s2 + $0xe8] sm:$0xff]   ;;  %v1840_v20 = vld [vmem:[%s2231_s2 + $0xe0] sm:$0xff]   ;;  %v1842_v25 = vld [vmem:[%s2231_s2 + $0xd8] sm:$0xff]  }
  0x17   : > { %1677 = vmatpush3.bf16.msra.mxu1 %v1819_v7  ;;  %1664 = vmatprep.subr.bf16.mxu0 %v1887_v1  ;;  %v582_v33 = vshrl.u32 %v558_v27, 16  ;;  %v585_v35 = vshll.u32 %v558_v27, 16  ;;  %v895_v63 = vshrl.u32 %v884_v54, 16  ;;  %v898_v0 = vshll.u32 %v884_v54, 16  ;;  %v1855_v51 = vld [vmem:[%s2231_s2 + $0x120] sm:$0xff]   ;;  %v1856_v57 = vld [vmem:[%s2231_s2 + $0xf0] sm:$0xff]  }
  0x18   : > { %1678 = vmatprep.subr.bf16.mxu1 %v1887_v1  ;;  %v577_v34 = vshll.u32 %v551_v29, 16  ;;  %v570_v38 = vrot.slane %v568_v31, 6  ;;  %v573_v39 = vrot.slane %v571_v32, 7  ;;  %v591_v41 = vshll.u32 %v559_v30, 16  ;;  %v1843_v30 = vld [vmem:[%s2231_s2 + $0xa8] sm:$0xff]   ;;  %v1844_v31 = vld [vmem:[%s2231_s2 + $0xd0] sm:$0xff]  }
  0x19   : > { %v584_v40 = vrot.slane %v582_v33, 6  ;;  %v587_v42 = vrot.slane %v585_v35, 7  ;;  %v909_v3 = vshrl.u32 %v892_v59, 16  ;;  %v912_v4 = vshll.u32 %v892_v59, 16  ;;  %v1845_v35 = vld [vmem:[%s2231_s2 + $0xa0] sm:$0xff]  }
  0x1a   : > { %1665 = vmatpush3.bf16.msra.mxu0 %v1820_v8  ;;  %v574_v43 = vor.u32 %v573_v39, %v570_v38  ;;  %v579_v45 = vrot.slane %v577_v34, 7  ;;  %v593_v47 = vrot.slane %v591_v41, 7  ;;  %v708_v7 = vrot.slane %v701_v2, %v2002_v22  ;;  %v1847_v32 = vld [vmem:[%s1974_s12 + $0xc] ss:$16 sps:$4 sm:$0x77]   ;;  %v1848_v39 = vld [vmem:[%s2231_s2 + $0x110] sm:$0xff]   ;;  %s343_s12 = scalar_lea.vmem %s2234_s5, %s1603_s23 }
  0x1b   : > { %1679 = vmatpush3.bf16.msra.mxu1 %v1821_v9  ;;  %1666 = vmatprep.subr.bf16.mxu0 %v1887_v1  ;;  %v588_v46 = vor.u32 %v587_v42, %v584_v40  ;;  %v897_v8 = vrot.slane %v895_v63, 6  ;;  %v900_v9 = vrot.slane %v898_v0, 7  ;;  %v885_v11 = vcombine.high %v884_v54, %v884_v54  ;;  %v1849_v41 = vld [vmem:[%s2231_s2 + $0x138] sm:$0xff]   ;;  %v1850_v42 = vld [vmem:[%s2231_s2 + $0x108] sm:$0xff]  }
  0x1c   : > { %1680 = vmatprep.subr.bf16.mxu1 %v1887_v1  ;;  %v575_v48 = vrot.slane %v574_v43, 2  ;;  %v911_v13 = vrot.slane %v909_v3, 6  ;;  %v914_v14 = vrot.slane %v912_v4, 7  ;;  %v893_v15 = vcombine.high %v892_v59, %v892_v59  ;;  %v1851_v43 = vld [vmem:[%s2231_s2 + $0x130] sm:$0xff]   ;;  %v1859_v63 = vld [vmem:[%s2231_s2 + $0x158] sm:$0xff]  }
  0x1d   : > { %v589_v52 = vrot.slane %v588_v46, 2  ;;  %v901_v18 = vor.u32 %v900_v9, %v897_v8  ;;  %v904_v19 = vshll.u32 %v885_v11, 16  ;;  %v803_v38 = vrot.slane %v1847_v32, %v2002_v22  ;;  %v346_v46 = vld [vmem:[%s332_s14] sm:$0x7]  ;;  %v1860_v3 = vld [vmem:[%s2231_s2 + $0x150] sm:$0xff]  }
  0x1e   : > { %1667 = vmatpush3.bf16.msra.mxu0 %v1822_v17  ;;  %v580_v55 = vsel %vm2038_vm8, %v575_v48, %v579_v45  ;;  %v1839_v17 = vld [vmem:[%s2231_s2 + $0xb8] sm:$0xff]   ;;  %v1853_v45 = vld [vmem:[%s2231_s2 + $0x128] sm:$0xff]   ;;  %v1862_v9 = vld [vmem:[%s2231_s2 + $0x140] sm:$0xff]  }
  0x1f   : > { %1681 = vmatpush3.bf16.msra.mxu1 %v1823_v21  ;;  %1686 = vmatprep.subr.bf16.mxu0 %v1887_v1  ;;  %v2052_v56 = vsel %vm2038_vm8, %v589_v52, %v593_v47  ;;  %v915_v21 = vor.u32 %v914_v14, %v911_v13  ;;  %v906_v27 = vrot.slane %v904_v19, 7  ;;  %v1209_v47 = vrot.slane %v346_v46, %v2002_v22  ;;  %v1854_v48 = vld [vmem:[%s2231_s2 + $0xf8] sm:$0xff]  }
  0x20   : > { %1700 = vmatprep.subr.bf16.mxu1 %v1887_v1  ;;  %v606_v62 = vcombine.low %v580_v55, %v2052_v56  ;;  %v1027_v52 = vcombine.low %v1990_v16, %v346_v46 }
  0x21   : > { %1669 = vmatmul.mubr.msk.bf16.vlgmr.msra.gmra.mxu0 %vm417_vm1, %v386_v23  ;;  %v918_v23 = vshll.u32 %v893_v15, 16  ;;  %v1212_v54 = vshrl.u32 %v1209_v47, 16  ;;  %v1215_v55 = vshll.u32 %v1209_v47, 16  ;;  %v1210_v59 = vcombine.high %v1209_v47, %v1209_v47 }
  0x22   : > { %1683 = vmatmul.mubr.msk.bf16.vlgmr.msra.gmra.mxu1 %vm417_vm1, %v470_v24  ;;  %1687 = vmatpush3.bf16.msra.mxu0 %v1826_v26  ;;  %v613_v5 = vrot.slane %v606_v62, %v2002_v22  ;;  %v1841_v24 = vld [vmem:[%s2231_s2 + $0xb0] sm:$0xff]   ;;  %v902_v26 = vrot.slane %v901_v18, 2  ;;  %v1034_v16 = vrot.slane %v1027_v52, %v2002_v22 }
  0x23   : > { %1701 = vmatpush3.bf16.msra.mxu1 %v1827_v28  ;;  %1688 = vmatprep.subr.bf16.mxu0 %v1887_v1  ;;  %v916_v28 = vrot.slane %v915_v21, 2  ;;  %v920_v29 = vrot.slane %v918_v23, 7  ;;  %v1221_v2 = vshll.u32 %v1210_v59, 16 }
  0x24   : > { %1702 = vmatprep.subr.bf16.mxu1 %v1887_v1  ;;  %1696 = vmatprep.mubr.msk.bf16.mxu0 %vm1888_vm0, %v1887_v1  ;;  %v907_v33 = vsel %vm2038_vm8, %v902_v26, %v906_v27 }
  0x25   : > { %1710 = vmatprep.mubr.msk.bf16.mxu1 %vm1888_vm0, %v1887_v1  ;;  %v921_v34 = vsel %vm2038_vm8, %v916_v28, %v920_v29 }
  0x26   : > { %1689 = vmatpush3.bf16.msra.mxu0 %v1828_v36  ;;  %v933_v36 = vcombine.low %v907_v33, %v921_v34 }
  0x27   : > { %1703 = vmatpush3.bf16.msra.mxu1 %v1829_v37  ;;  %1690 = vmatprep.subr.bf16.mxu0 %v1887_v1  ;;  %v1846_v37 = vld [vmem:[%s2231_s2 + $0xc8] sm:$0xff]  }
  0x28   : > { %1704 = vmatprep.subr.bf16.mxu1 %v1887_v1  ;;  %v940_v40 = vrot.slane %v933_v36, %v2002_v22 }
  0x2a   : > { %1691 = vmatpush3.bf16.msra.mxu0 %v1830_v44  ;;  %v1852_v44 = vld [vmem:[%s2231_s2 + $0x100] sm:$0xff]  }
  0x2b   : > { %1705 = vmatpush3.bf16.msra.mxu1 %v1831_v49  ;;  %1692 = vmatprep.subr.bf16.mxu0 %v1887_v1  ;;  %v347_v49 = vld [vmem:[%s332_s14 + $0x4] sm:$0x7] }
  0x2c   : > { %1706 = vmatprep.subr.bf16.mxu1 %v1887_v1 }
  0x2e   : > { %1693 = vmatpush3.bf16.msra.mxu0 %v1832_v53  ;;  %v1121_v53 = vcombine.low %v1985_v12, %v347_v49  ;;  %v1214_v12 = vrot.slane %v1212_v54, 6 }
  0x2f   : > { %1707 = vmatpush3.bf16.msra.mxu1 %v1833_v58  ;;  %1694 = vmatprep.subr.bf16.mxu0 %v1887_v1  ;;  %v1857_v58 = vld [vmem:[%s2231_s2 + $0x118] sm:$0xff]  }
  0x30   : > { %1708 = vmatprep.subr.bf16.mxu1 %v1887_v1  ;;  %v1128_v62 = vrot.slane %v1121_v53, %v2002_v22  ;;  %v1598_v53 = vld [vmem:[%s2233_s4] ss:$0 sm:$0xff] }
  0x32   : > { %1695 = vmatpush3.bf16.msra.mxu0 %v1834_v60  ;;  %v1217_v60 = vrot.slane %v1215_v55, 7 }
  0x33   : > { %1709 = vmatpush3.bf16.msra.mxu1 %v1835_v61  ;;  %1714 = vmatprep.subr.bf16.mxu0 %v1887_v1  ;;  %v1858_v61 = vld [vmem:[%s2231_s2 + $0x160] sm:$0xff]  }
  0x34   : > { %1728 = vmatprep.subr.bf16.mxu1 %v1887_v1  ;;  %v1218_v0 = vor.u32 %v1217_v60, %v1214_v12 }
  0x35   : > { %1697 = vmatmul.mubr.msk.bf16.vlgmr.msra.gmra.mxu0 %vm417_vm1, %v613_v5  ;;  %v1223_v5 = vrot.slane %v1221_v2, 7 }
  0x36   : > { %1715 = vmatpush3.bf16.msra.mxu0 %v1836_v6  ;;  %1711 = vmatmul.mubr.msk.bf16.vlgmr.msra.gmra.mxu1 %vm417_vm1, %v708_v7  ;;  %v1219_v4 = vrot.slane %v1218_v0, 2  ;;  %v1861_v6 = vld [vmem:[%s2231_s2 + $0x148] sm:$0xff]  }
  0x37   : > { %1729 = vmatpush3.bf16.msra.mxu1 %v1838_v10  ;;  %1716 = vmatprep.subr.bf16.mxu0 %v1887_v1 }
  0x38   : > { %1730 = vmatprep.subr.bf16.mxu1 %v1887_v1  ;;  %1724 = vmatprep.mubr.msk.bf16.mxu0 %vm1888_vm0, %v1887_v1  ;;  %v1224_v7 = vsel %vm2038_vm8, %v1219_v4, %v1223_v5 }
  0x39   : > { %1738 = vmatprep.mubr.msk.bf16.mxu1 %vm1888_vm0, %v1887_v1  ;;  %v1236_v8 = vcombine.low %v2052_v56, %v1224_v7 }
  0x3a   : > { %1717 = vmatpush3.bf16.msra.mxu0 %v1839_v17 }
  0x3b   : > { %1731 = vmatpush3.bf16.msra.mxu1 %v1840_v20  ;;  %1718 = vmatprep.subr.bf16.mxu0 %v1887_v1  ;;  %v1243_v10 = vrot.slane %v1236_v8, %v2002_v22 }
  0x3c   : > { %1732 = vmatprep.subr.bf16.mxu1 %v1887_v1 }
  0x3e   : > { %1719 = vmatpush3.bf16.msra.mxu0 %v1841_v24 }
  0x3f   : > { %1733 = vmatpush3.bf16.msra.mxu1 %v1842_v25  ;;  %1720 = vmatprep.subr.bf16.mxu0 %v1887_v1 }
  0x40   : > { %1734 = vmatprep.subr.bf16.mxu1 %v1887_v1 }
  0x42   : > { %1721 = vmatpush3.bf16.msra.mxu0 %v1843_v30 }
  0x43   : > { %1735 = vmatpush3.bf16.msra.mxu1 %v1844_v31  ;;  %1722 = vmatprep.subr.bf16.mxu0 %v1887_v1 }
  0x44   : > { %1736 = vmatprep.subr.bf16.mxu1 %v1887_v1 }
  0x46   : > { %1723 = vmatpush3.bf16.msra.mxu0 %v1845_v35 }
  0x47   : > { %1737 = vmatpush3.bf16.msra.mxu1 %v1846_v37  ;;  %1742 = vmatprep.subr.bf16.mxu0 %v1887_v1 }
  0x48   : > { %1756 = vmatprep.subr.bf16.mxu1 %v1887_v1 }
  0x49   : > { %1725 = vmatmul.mubr.msk.bf16.vlgmr.msra.gmra.mxu0 %vm417_vm1, %v803_v38 }
  0x4a   : > { %1743 = vmatpush3.bf16.msra.mxu0 %v1848_v39  ;;  %1739 = vmatmul.mubr.msk.bf16.vlgmr.msra.gmra.mxu1 %vm417_vm1, %v940_v40 }
  0x4b   : > { %1757 = vmatpush3.bf16.msra.mxu1 %v1849_v41  ;;  %1744 = vmatprep.subr.bf16.mxu0 %v1887_v1 }
  0x4c   : > { %1758 = vmatprep.subr.bf16.mxu1 %v1887_v1  ;;  %1752 = vmatprep.mubr.msk.bf16.mxu0 %vm1888_vm0, %v1887_v1 }
  0x4d   : > { %1766 = vmatprep.mubr.msk.bf16.mxu1 %vm1888_vm0, %v1887_v1 }
  0x4e   : > { %1745 = vmatpush3.bf16.msra.mxu0 %v1850_v42 }
  0x4f   : > { %1759 = vmatpush3.bf16.msra.mxu1 %v1851_v43  ;;  %1746 = vmatprep.subr.bf16.mxu0 %v1887_v1 }
  0x50   : > { %1760 = vmatprep.subr.bf16.mxu1 %v1887_v1 }
  0x52   : > { %1747 = vmatpush3.bf16.msra.mxu0 %v1852_v44 }
  0x53   : > { %1761 = vmatpush3.bf16.msra.mxu1 %v1853_v45  ;;  %1748 = vmatprep.subr.bf16.mxu0 %v1887_v1 }
  0x54   : > { %1762 = vmatprep.subr.bf16.mxu1 %v1887_v1 }
  0x56   : > { %1749 = vmatpush3.bf16.msra.mxu0 %v1854_v48 }
  0x57   : > { %1763 = vmatpush3.bf16.msra.mxu1 %v1855_v51  ;;  %1750 = vmatprep.subr.bf16.mxu0 %v1887_v1  ;;  %v1597_v51 = vld [vmem:[%s2232_s3] ss:$0 sm:$0xff] }
  0x58   : > { %1764 = vmatprep.subr.bf16.mxu1 %v1887_v1 }
  0x5a   : > { %1751 = vmatpush3.bf16.msra.mxu0 %v1856_v57 }
  0x5b   : > { %1765 = vmatpush3.bf16.msra.mxu1 %v1857_v58  ;;  %1770 = vmatprep.subr.bf16.mxu0 %v1887_v1 }
  0x5d   : > { %1753 = vmatmul.mubr.msk.bf16.vlgmr.msra.gmra.mxu0 %vm417_vm1, %v1034_v16 }
  0x5e   : > { %1771 = vmatpush3.bf16.msra.mxu0 %v1858_v61  ;;  %1767 = vmatmul.mubr.msk.bf16.vlgmr.msra.gmra.mxu1 %vm417_vm1, %v1128_v62 }
  0x5f   : > { %1772 = vmatprep.subr.bf16.mxu0 %v1887_v1  ;;  %1780 = vmatprep.mubr.msk.bf16.mxu0 %vm1888_vm0, %v1887_v1 }
  0x62   : > { %1773 = vmatpush3.bf16.msra.mxu0 %v1859_v63 }
  0x63   : > { %1774 = vmatprep.subr.bf16.mxu0 %v1887_v1 }
  0x66   : > { %1775 = vmatpush3.bf16.msra.mxu0 %v1860_v3 }
  0x67   : > { %1776 = vmatprep.subr.bf16.mxu0 %v1887_v1 }
  0x6a   : > { %1777 = vmatpush3.bf16.msra.mxu0 %v1861_v6 }
  0x6b   : > { %1778 = vmatprep.subr.bf16.mxu0 %v1887_v1 }
  0x6e   : > { %1779 = vmatpush3.bf16.msra.mxu0 %v1862_v9 }
  0x71   : > { %1781 = vmatmul.mubr.msk.bf16.vlgmr.msra.gmra.mxu0 %vm417_vm1, %v1243_v10 }
  0xe1   : > { %v455_v11 = vpop.f32.mrf.mxu0 }
  0xe2   : > { %v538_v13 = vpop.f32.mrf.mxu1 }
  0xe3   : > { %v539_v50 = vadd.f32 %v538_v13, %v455_v11  ;;  %v1670_v14 = vpop.f32.mrf.mxu0 }
  0xe4   : > { %v1684_v15 = vpop.f32.mrf.mxu1 }
  0xe5   : > { %v458_v17 = vpop.f32.mrf.mxu0 }
  0xe6   : > { %v541_v18 = vpop.f32.mrf.mxu1 }
  0xe7   : > { %v1671_v56 = vpop.f32.mrf.mxu0 }
  0xe8   : > { %v1685_v19 = vpop.f32.mrf.mxu1 }
  0xf5   : > { %v681_v20 = vpop.f32.mrf.mxu0 }
  0xf6   : > { %v776_v21 = vpop.f32.mrf.mxu1  ;;  %v687_v38 = vadd.f32 %v681_v20, %v539_v50 }
  0xf7   : > { %v1698_v23 = vpop.f32.mrf.mxu0 }
  0xf8   : > { %v1712_v24 = vpop.f32.mrf.mxu1  ;;  %v782_v43 = vadd.f32 %v776_v21, %v687_v38 }
  0xf9   : > { %v684_v25 = vpop.f32.mrf.mxu0 }
  0xfa   : > { %v779_v1 = vpop.f32.mrf.mxu1 }
  0xfb   : > { %v1699_v26 = vpop.f32.mrf.mxu0 }
  0xfc   : > { %v1713_v22 = vpop.f32.mrf.mxu1 }
 0x109   : > { %v871_v27 = vpop.f32.mrf.mxu0 }
 0x10a   : > { %v1008_v28 = vpop.f32.mrf.mxu1  ;;  %v877_v45 = vadd.f32 %v871_v27, %v782_v43 }
 0x10b   : > { %v1726_v29 = vpop.f32.mrf.mxu0 }
 0x10c   : > { %v1740_v30 = vpop.f32.mrf.mxu1  ;;  %v1014_v46 = vadd.f32 %v1008_v28, %v877_v45 }
 0x10d   : > { %v874_v31 = vpop.f32.mrf.mxu0 }
 0x10e   : > { %v1011_v32 = vpop.f32.mrf.mxu1 }
 0x10f   : > { %v1727_v33 = vpop.f32.mrf.mxu0 }
 0x110   : > { %v1741_v34 = vpop.f32.mrf.mxu1 }
 0x11d   : > { %v1102_v35 = vpop.f32.mrf.mxu0 }
 0x11e   : > { %v1196_v36 = vpop.f32.mrf.mxu1  ;;  %v1108_v47 = vadd.f32 %v1102_v35, %v1014_v46 }
 0x11f   : > { %v1754_v37 = vpop.f32.mrf.mxu0 }
 0x120   : > { %v1768_v39 = vpop.f32.mrf.mxu1  ;;  %v1202_v48 = vadd.f32 %v1196_v36, %v1108_v47 }
 0x121   : > { %v1105_v40 = vpop.f32.mrf.mxu0 }
 0x122   : > { %v1199_v41 = vpop.f32.mrf.mxu1 }
 0x123   : > { %v1755_v42 = vpop.f32.mrf.mxu0 }
 0x124   : > { %v1769_v44 = vpop.f32.mrf.mxu1 }
 0x131   : > { %v1311_v49 = vpop.f32.mrf.mxu0 }
 0x132   : > { %v1317_v52 = vadd.f32 %v1311_v49, %v1202_v48 }
 0x133   : > { %v1782_v54 = vpop.f32.mrf.mxu0 }
 0x134   : > { %v1325_v55 = vmul.f32 %v1597_v51, %v1317_v52 }
 0x135   : > { %v1314_v57 = vpop.f32.mrf.mxu0 }
 0x136   : > { %v1333_v58 = vadd.f32 %v1598_v53, %v1325_v55 }
 0x137   : > { %v1783_v16 = vpop.f32.mrf.mxu0 }
 0x138   : > { %v1334_v59 = vmax.f32 %v1333_v58, 0.0 }
 0x13a   : > { %v1336_v12 = vcombine.high %v1334_v59, %v1334_v59  ;;  %v1338_v60 = vpack.c.bf16 %v1334_v59, %v1334_v59 }
 0x13c   : > { %v1339_v61 = vpack.c.bf16 %v1336_v12, %v1336_v12  ;;  %1341 = vst.msk [vmem:[%s343_s12] sm:$0x3] %vm1340_vm9, %v1338_v60 }
 0x13e   : > { %1342 = vst.msk [vmem:[%s343_s12 + $0x2] sm:$0x3] %vm1340_vm9, %v1339_v61 }
 0x13f PF: > { %s15_s20 = sadd.s32 1, %s1885_s20   ;;  %s2237_s18 = smov %s1881_s19 }
 0x140   : > { %p12_p5 = scmp.ge.s32.totalorder %s15_s20, 4   ;;  %s2238_s19 = smov %s2240_s21 }
 0x142   :  { %14 = sbr.rel (!%p12_p5) target bundleno = 2 (0x2), region = 81 }

// kernel: hourglass_forward.9
= control target key start
LH: loop header
LB: loop body
LE: loop exit
PB: predicated region body
PF: predicated region fallthrough
CT: control target
= control target key end

     0   :  { %s1710_s21 = smov 0   ;;  %s1712_s22 = smov 0   ;;  %s2000_s0 = inlined_call_operand.vmem [shape: bf16[2,4,1,1,6,48], index: 0, kind: input, shape index: {}, may-alias: {0,1,2}]   ;;  %s2001_s1 = inlined_call_operand.vmem [shape: bf16[2,4,1,1,6,48], index: 1, kind: input, shape index: {}, may-alias: {0,1,2}]   ;;  %s2002_s2 = inlined_call_operand.vmem [shape: bf16[2,4,1,1,6,48], index: 2, kind: input, shape index: {}, may-alias: {0,1,2}]   ;;  %s2003_s3 = inlined_call_operand.vmem [shape: bf16[9,48,32], index: 3, kind: input, shape index: {}]   ;;  %s2004_s4 = inlined_call_operand.vmem [shape: f32[1,32], index: 4, kind: input, shape index: {}]   ;;  %s2005_s5 = inlined_call_operand.vmem [shape: f32[1,32], index: 5, kind: input, shape index: {}]   ;;  %s2006_s6 = inlined_call_operand.vmem [shape: bf16[2,2,4,32], index: 6, kind: output, shape index: {}]  }
   0x1   :  { %s1714_s23 = smov 0  }
   0x2 LB: > { %s28_s24 = sadd.s32 1, %s1666_s22  ;;  %p1358_p0 = scmp.ge.s32.totalorder %s1670_s23, 1  ;;  %s1670_s23 = sphi %s1714_s23, %s16_s23   ;;  %s1666_s22 = sphi %s1712_s22, %s2016_s22   ;;  %s1662_s21 = sphi %s1710_s21, %s2015_s21  }
   0x3   : > { %p30_p1 = scmp.ge.s32.totalorder %s28_s24, 2  ;;  %p283_p2 = scmp.lt.s32.totalorder %s1670_s23, 3 }
   0x5   : > { %s2018_s24 = smov (%p30_p1, %s28_s24), 0  ;;  %p284_p3 = pnand %p1358_p0, %p283_p2 }
   0x6   : > { %p343_p4 = scmp.lt.s32.totalorder (!%p284_p3), %s1662_s21, 1 }
   0x7   : > { %287 = sbr.rel (%p284_p3) target bundleno = 290 (0x122), region = 44 }
   0xc   : > { %v1620_v0 = vld [vmem:[%s2003_s3 + $0x28] sm:$0xff]   ;;  %v1672_v1 = vmov 0.0   ;;  %v1621_v2 = vld [vmem:[%s2003_s3 + $0x10] sm:$0xff]   ;;  %v1622_v3 = vld [vmem:[%s2003_s3 + $0x20] sm:$0xff]   ;;  %vm1673_vm0 = vmmov 0   ;;  %v404_v5 = vlaneseq  ;;  %s2020_s21 = smov (!%p343_p4, %s1662_s21), 1 }
   0xd   : > { %1503 = vmatprep.subr.bf16.mxu0 %v1672_v1  ;;  %1513 = vmatprep.subr.bf16.mxu1 %v1672_v1  ;;  %v1623_v4 = vld [vmem:[%s2003_s3 + $0x8] sm:$0xff]   ;;  %v1624_v6 = vld [vmem:[%s2003_s3 + $0x18] sm:$0xff]   ;;  %s1459_s11 = sshll.u32 %s2020_s21, 4  ;;  %v1625_v7 = vld [vmem:[%s2003_s3] sm:$0xff]   ;;  %v1674_v8 = vmov 1983009808  }
   0xe   : > { %1504 = vmatpush3.bf16.msra.mxu0 %v1620_v0  ;;  %1509 = vmatprep.mubr.msk.bf16.mxu0 %vm1673_vm0, %v1672_v1  ;;  %s350_s16 = scalar_lea.vmem %s2000_s0, %s1459_s11  ;;  %s1461_s17 = sadd.s32 8, %s1459_s11  ;;  %v402_v9 = vunpack.c.l.s4 %v1674_v8  ;;  %v405_v10 = vshrl.u32 %v404_v5, 7  ;;  %vm417_vm1 = vsmask.f32 1280  ;;  %vm418_vm2 = vsmask.f32 3336 }
   0xf   : > { %1514 = vmatpush3.bf16.msra.mxu1 %v1621_v2  ;;  %1505 = vmatprep.subr.bf16.mxu0 %v1672_v1  ;;  %s1463_s18 = sadd.s32 12, %s1459_s11  ;;  %v389_v11 = vld [vmem:[%s350_s16] sm:$0x7]  ;;  %v390_v12 = vld [vmem:[%s350_s16 + $0x4] sm:$0x7]  ;;  %s361_s25 = scalar_lea.vmem %s2001_s1, %s1461_s17  ;;  %vm485_vm4 = vcmask 392192   ;;  %vm419_vm5 = vmor %vm417_vm1, %vm418_vm2 }
  0x10   : > { %1515 = vmatprep.subr.bf16.mxu1 %v1672_v1  ;;  %1519 = vmatprep.mubr.msk.bf16.mxu1 %vm1673_vm0, %v1672_v1  ;;  %v403_v13 = vunpack.c.0.s8 %v402_v9  ;;  %vm420_vm3 = vsmask.f32 5392  ;;  %v529_v14 = vcombine.low %v389_v11, %v390_v12  ;;  %s374_s28 = scalar_lea.vmem %s2002_s2, %s1463_s18  ;;  %v1628_v16 = vld [vmem:[%s2003_s3 + $0x58] sm:$0xff]   ;;  %v1775_v17 = vld [vmem:[%s361_s25] sm:$0x7]  ;;  %v1630_v28 = vld [vmem:[%s2003_s3 + $0x50] sm:$0xff]  }
  0x11   : > { %vm422_vm6 = vsmask.f32 7448  ;;  %v1785_v21 = vld [vmem:[%s374_s28] sm:$0x7]  ;;  %vm598_vm7 = vcmask 1040384   ;;  %v698_v29 = vcombine.low %v390_v12, %v1775_v17  ;;  %vm1805_vm8 = vmor %vm419_vm5, %vm420_vm3  ;;  %vm599_vm9 = vcmask 1042434  }
  0x12   : > { %1506 = vmatpush3.bf16.msra.mxu0 %v1622_v3  ;;  %v1766_v15 = vsub.s32 %v403_v13, %v405_v10  ;;  %vm1823_vm10 = vmor %vm1805_vm8, %vm422_vm6  ;;  %v1632_v45 = vld [vmem:[%s2003_s3 + $0x48] sm:$0xff]   ;;  %vm601_vm12 = vcmask 1044484   ;;  %vm603_vm13 = vcmask 1046534   ;;  %v1627_v57 = vld [vmem:[%s2003_s3 + $0x40] sm:$0xff]   ;;  %v956_v46 = vcombine.low %v1775_v17, %v1785_v21  ;;  %s1464_s11 = sshll.u32 %s2020_s21, 2 }
  0x13   : > { %1516 = vmatpush3.bf16.msra.mxu1 %v1623_v4  ;;  %1507 = vmatprep.subr.bf16.mxu0 %v1672_v1  ;;  %vm1831_vm11 = vmor %vm598_vm7, %vm599_vm9  ;;  %v1634_v61 = vld [vmem:[%s2003_s3 + $0x88] sm:$0xff]   ;;  %v1629_v4 = vld [vmem:[%s2003_s3 + $0x38] sm:$0xff]   ;;  %s386_s14 = scalar_lea.vmem %s2006_s6, %s1464_s11 }
  0x14   : > { %1517 = vmatprep.subr.bf16.mxu1 %v1672_v1  ;;  %v1778_v18 = vrot.slane %v389_v11, %v1766_v15  ;;  %v1781_v19 = vrot.slane %v390_v12, %v1766_v15  ;;  %v536_v20 = vrot.slane %v529_v14, %v1766_v15  ;;  %v774_v37 = vrot.slane %v1775_v17, %v1766_v15  ;;  %vm602_vm14 = vmor %vm1831_vm11, %vm601_vm12  ;;  %v1636_v5 = vld [vmem:[%s2003_s3 + $0x80] sm:$0xff]   ;;  %v1646_v17 = vld [vmem:[%s2003_s3 + $0xc8] sm:$0xff]  }
  0x15   : > { %v1818_v40 = vrot.slane %v1785_v21, %v1766_v15  ;;  %v705_v47 = vrot.slane %v698_v29, %v1766_v15  ;;  %vm1861_vm15 = vmor %vm602_vm14, %vm603_vm13  ;;  %v1640_v29 = vld [vmem:[%s2003_s3 + $0xb8] sm:$0xff]   ;;  %v1637_v41 = vld [vmem:[%s2003_s3 + $0x60] sm:$0xff]  }
  0x16   : > { %1508 = vmatpush3.bf16.msra.mxu0 %v1624_v6  ;;  %v1789_v22 = vcombine.high %v1778_v18, %v1778_v18  ;;  %v1793_v23 = vcombine.high %v1781_v19, %v1781_v19  ;;  %v425_v24 = vshrl.u32 %v1778_v18, 16  ;;  %v428_v25 = vshll.u32 %v1778_v18, 16 }
  0x17   : > { %1518 = vmatpush3.bf16.msra.mxu1 %v1625_v7  ;;  %1523 = vmatprep.subr.bf16.mxu0 %v1672_v1  ;;  %v439_v26 = vshrl.u32 %v1781_v19, 16  ;;  %v442_v27 = vshll.u32 %v1781_v19, 16  ;;  %v775_v49 = vcombine.high %v774_v37, %v774_v37  ;;  %v777_v50 = vshrl.u32 %v774_v37, 16 }
  0x18   : > { %1533 = vmatprep.subr.bf16.mxu1 %v1672_v1  ;;  %v427_v31 = vrot.slane %v425_v24, 6  ;;  %v430_v32 = vrot.slane %v428_v25, 7  ;;  %v434_v33 = vshll.u32 %v1789_v22, 16  ;;  %v448_v34 = vshll.u32 %v1793_v23, 16  ;;  %v1631_v24 = vld [vmem:[%s2003_s3 + $0x30] sm:$0xff]  }
  0x19   : > { %v441_v35 = vrot.slane %v439_v26, 6  ;;  %v444_v36 = vrot.slane %v442_v27, 7  ;;  %v780_v51 = vshll.u32 %v774_v37, 16  ;;  %v1035_v53 = vshrl.u32 %v1818_v40, 16 }
  0x1a   : > { %1520 = vmatmul.mubr.msk.bf16.vlgmr.msra.gmra.mxu1 %vm485_vm4, %v536_v20  ;;  %v431_v38 = vor.u32 %v430_v32, %v427_v31  ;;  %v436_v39 = vrot.slane %v434_v33, 7  ;;  %v450_v43 = vrot.slane %v448_v34, 7  ;;  %v1038_v54 = vshll.u32 %v1818_v40, 16  ;;  %v1638_v20 = vld [vmem:[%s2003_s3 + $0x78] sm:$0xff]   ;;  %v1633_v32 = vld [vmem:[%s2003_s3 + $0x70] sm:$0xff]  }
  0x1b   : > { %1534 = vmatpush3.bf16.msra.mxu1 %v1628_v16  ;;  %1539 = vmatprep.mubr.msk.bf16.mxu1 %vm1673_vm0, %v1672_v1  ;;  %v445_v42 = vor.u32 %v444_v36, %v441_v35  ;;  %v1381_v55 = vrot.slane %v1778_v18, 9  ;;  %v607_v58 = vrot.slane %v1789_v22, 7  ;;  %v1382_v59 = vrot.slane %v1781_v19, 9  ;;  %v1642_v34 = vld [vmem:[%s2003_s3 + $0xb0] sm:$0xff]   ;;  %v1635_v36 = vld [vmem:[%s2003_s3 + $0x68] sm:$0xff]  }
  0x1c   : > { %1535 = vmatprep.subr.bf16.mxu1 %v1672_v1  ;;  %v432_v44 = vrot.slane %v431_v38, 2  ;;  %v611_v60 = vrot.slane %v1793_v23, 7  ;;  %v1413_v63 = vrot.slane %v774_v37, 9  ;;  %v869_v0 = vrot.slane %v775_v49, 7 }
  0x1d   : > { %v446_v48 = vrot.slane %v445_v42, 2  ;;  %v1875_v6 = vcombine.high %v1818_v40, %v1818_v40  ;;  %v1037_v7 = vrot.slane %v1035_v53, 6  ;;  %v1040_v8 = vrot.slane %v1038_v54, 7 }
  0x1e   : > { %v437_v52 = vsel %vm1823_vm10, %v432_v44, %v436_v39  ;;  %v1879_v9 = vsel %vm1861_vm15, %v1413_v63, %v869_v0  ;;  %v779_v10 = vrot.slane %v777_v50, 6  ;;  %v782_v11 = vrot.slane %v780_v51, 7  ;;  %v1644_v39 = vld [vmem:[%s2003_s3 + $0xa8] sm:$0xff]   ;;  %v1639_v44 = vld [vmem:[%s2003_s3 + $0xa0] sm:$0xff]  }
  0x1f   : > { %1536 = vmatpush3.bf16.msra.mxu1 %v1630_v28  ;;  %v1844_v56 = vsel %vm1823_vm10, %v446_v48, %v450_v43  ;;  %v608_v12 = vsel %vm1861_vm15, %v1381_v55, %v607_v58  ;;  %v612_v13 = vsel %vm1861_vm15, %v1382_v59, %v611_v60  ;;  %v1041_v16 = vor.u32 %v1040_v8, %v1037_v7 }
  0x20   : > { %1537 = vmatprep.subr.bf16.mxu1 %v1672_v1  ;;  %v459_v62 = vcombine.low %v437_v52, %v1844_v56  ;;  %v878_v14 = vcombine.low %v612_v13, %v1879_v9  ;;  %v1044_v18 = vshll.u32 %v1875_v6, 16  ;;  %v620_v19 = vcombine.low %v608_v12, %v612_v13  ;;  %v1647_v52 = vld [vmem:[%s2003_s3 + $0xc0] sm:$0xff]  }
  0x21   : > { %v783_v22 = vor.u32 %v782_v11, %v779_v10  ;;  %v786_v23 = vshll.u32 %v775_v49, 16  ;;  %v1042_v26 = vrot.slane %v1041_v16, 2  ;;  %v963_v48 = vrot.slane %v956_v46, %v1766_v15  ;;  %v1645_v49 = vld [vmem:[%s2003_s3 + $0xd0] sm:$0xff]  }
  0x22   : > { %v466_v2 = vrot.slane %v459_v62, %v1766_v15  ;;  %v885_v25 = vrot.slane %v878_v14, %v1766_v15  ;;  %v1046_v27 = vrot.slane %v1044_v18, 7  ;;  %v627_v28 = vrot.slane %v620_v19, %v1766_v15 }
  0x23   : > { %1538 = vmatpush3.bf16.msra.mxu1 %v1632_v45  ;;  %v784_v30 = vrot.slane %v783_v22, 2  ;;  %v788_v31 = vrot.slane %v786_v23, 7  ;;  %v1641_v45 = vld [vmem:[%s2003_s3 + $0x98] sm:$0xff]   ;;  %v1444_v50 = vrot.slane %v1818_v40, 9  ;;  %v1127_v51 = vrot.slane %v1875_v6, 7 }
  0x24   : > { %1553 = vmatprep.subr.bf16.mxu1 %v1672_v1  ;;  %1510 = vmatmul.mubr.msk.bf16.vlgmr.msra.gmra.mxu0 %vm485_vm4, %v466_v2  ;;  %v1047_v33 = vsel %vm1823_vm10, %v1042_v26, %v1046_v27 }
  0x25   : > { %1524 = vmatpush3.bf16.msra.mxu0 %v1627_v57  ;;  %1529 = vmatprep.mubr.msk.bf16.mxu0 %vm1673_vm0, %v1672_v1  ;;  %v789_v35 = vsel %vm1823_vm10, %v784_v30, %v788_v31  ;;  %v1128_v21 = vsel %vm1861_vm15, %v1444_v50, %v1127_v51 }
  0x26   : > { %1540 = vmatmul.mubr.msk.bf16.vlgmr.msra.gmra.mxu1 %vm485_vm4, %v705_v47  ;;  %1525 = vmatprep.subr.bf16.mxu0 %v1672_v1  ;;  %v1055_v37 = vcombine.low %v789_v35, %v1047_v33  ;;  %v797_v38 = vcombine.low %v1844_v56, %v789_v35  ;;  %v1643_v47 = vld [vmem:[%s2003_s3 + $0x90] sm:$0xff]   ;;  %v1136_v40 = vcombine.low %v1879_v9, %v1128_v21 }
  0x27   : > { %1554 = vmatpush3.bf16.msra.mxu1 %v1634_v61  ;;  %1559 = vmatprep.mubr.msk.bf16.mxu1 %vm1673_vm0, %v1672_v1 }
  0x28   : > { %1555 = vmatprep.subr.bf16.mxu1 %v1672_v1  ;;  %v1062_v42 = vrot.slane %v1055_v37, %v1766_v15  ;;  %v804_v43 = vrot.slane %v797_v38, %v1766_v15  ;;  %v1143_v53 = vrot.slane %v1136_v40, %v1766_v15 }
  0x29   : > { %1526 = vmatpush3.bf16.msra.mxu0 %v1629_v4 }
  0x2a   : > { %1527 = vmatprep.subr.bf16.mxu0 %v1672_v1 }
  0x2b   : > { %1556 = vmatpush3.bf16.msra.mxu1 %v1636_v5 }
  0x2c   : > { %1557 = vmatprep.subr.bf16.mxu1 %v1672_v1 }
  0x2d   : > { %1528 = vmatpush3.bf16.msra.mxu0 %v1631_v24 }
  0x2e   : > { %1543 = vmatprep.subr.bf16.mxu0 %v1672_v1 }
  0x2f   : > { %1558 = vmatpush3.bf16.msra.mxu1 %v1638_v20 }
  0x30   : > { %1573 = vmatprep.subr.bf16.mxu1 %v1672_v1  ;;  %1530 = vmatmul.mubr.msk.bf16.vlgmr.msra.gmra.mxu0 %vm485_vm4, %v627_v28 }
  0x31   : > { %1544 = vmatpush3.bf16.msra.mxu0 %v1633_v32  ;;  %1549 = vmatprep.mubr.msk.bf16.mxu0 %vm1673_vm0, %v1672_v1  ;;  %v1455_v32 = vld [vmem:[%s2004_s4] ss:$0 sm:$0xff] }
  0x32   : > { %1560 = vmatmul.mubr.msk.bf16.vlgmr.msra.gmra.mxu1 %vm485_vm4, %v885_v25  ;;  %1545 = vmatprep.subr.bf16.mxu0 %v1672_v1 }
  0x33   : > { %1574 = vmatpush3.bf16.msra.mxu1 %v1640_v29  ;;  %1579 = vmatprep.mubr.msk.bf16.mxu1 %vm1673_vm0, %v1672_v1 }
  0x34   : > { %1575 = vmatprep.subr.bf16.mxu1 %v1672_v1 }
  0x35   : > { %1546 = vmatpush3.bf16.msra.mxu0 %v1635_v36 }
  0x36   : > { %1547 = vmatprep.subr.bf16.mxu0 %v1672_v1 }
  0x37   : > { %1576 = vmatpush3.bf16.msra.mxu1 %v1642_v34  ;;  %v1456_v34 = vld [vmem:[%s2005_s5] ss:$0 sm:$0xff] }
  0x38   : > { %1577 = vmatprep.subr.bf16.mxu1 %v1672_v1 }
  0x39   : > { %1548 = vmatpush3.bf16.msra.mxu0 %v1637_v41 }
  0x3a   : > { %1563 = vmatprep.subr.bf16.mxu0 %v1672_v1 }
  0x3b   : > { %1578 = vmatpush3.bf16.msra.mxu1 %v1644_v39 }
  0x3c   : > { %1550 = vmatmul.mubr.msk.bf16.vlgmr.msra.gmra.mxu0 %vm485_vm4, %v804_v43 }
  0x3d   : > { %1564 = vmatpush3.bf16.msra.mxu0 %v1639_v44  ;;  %1569 = vmatprep.mubr.msk.bf16.mxu0 %vm1673_vm0, %v1672_v1 }
  0x3e   : > { %1580 = vmatmul.mubr.msk.bf16.vlgmr.msra.gmra.mxu1 %vm485_vm4, %v1062_v42  ;;  %1565 = vmatprep.subr.bf16.mxu0 %v1672_v1 }
  0x41   : > { %1566 = vmatpush3.bf16.msra.mxu0 %v1641_v45 }
  0x42   : > { %1567 = vmatprep.subr.bf16.mxu0 %v1672_v1 }
  0x45   : > { %1568 = vmatpush3.bf16.msra.mxu0 %v1643_v47 }
  0x46   : > { %1583 = vmatprep.subr.bf16.mxu0 %v1672_v1 }
  0x48   : > { %1570 = vmatmul.mubr.msk.bf16.vlgmr.msra.gmra.mxu0 %vm485_vm4, %v963_v48 }
  0x49   : > { %1584 = vmatpush3.bf16.msra.mxu0 %v1645_v49  ;;  %1589 = vmatprep.mubr.msk.bf16.mxu0 %vm1673_vm0, %v1672_v1  ;;  %vm1228_vm0 = vcmask 254976  }
  0x4a   : > { %1585 = vmatprep.subr.bf16.mxu0 %v1672_v1 }
  0x4d   : > { %1586 = vmatpush3.bf16.msra.mxu0 %v1646_v17 }
  0x4e   : > { %1587 = vmatprep.subr.bf16.mxu0 %v1672_v1 }
  0x51   : > { %1588 = vmatpush3.bf16.msra.mxu0 %v1647_v52 }
  0x54   : > { %1590 = vmatmul.mubr.msk.bf16.vlgmr.msra.gmra.mxu0 %vm485_vm4, %v1143_v53 }
  0xda   : > { %v592_v54 = vpop.f32.mrf.mxu1 }
  0xdc   : > { %v1521_v55 = vpop.f32.mrf.mxu1 }
  0xde   : > { %v595_v56 = vpop.f32.mrf.mxu1 }
  0xe0   : > { %v1522_v57 = vpop.f32.mrf.mxu1 }
  0xe4   : > { %v523_v59 = vpop.f32.mrf.mxu0 }
  0xe5   : > { %v593_v16 = vadd.f32 %v592_v54, %v523_v59 }
  0xe6   : > { %v761_v58 = vpop.f32.mrf.mxu1  ;;  %v1511_v61 = vpop.f32.mrf.mxu0 }
  0xe8   : > { %v1541_v60 = vpop.f32.mrf.mxu1  ;;  %v526_v63 = vpop.f32.mrf.mxu0 }
  0xea   : > { %v764_v62 = vpop.f32.mrf.mxu1  ;;  %v1512_v2 = vpop.f32.mrf.mxu0 }
  0xec   : > { %v1542_v0 = vpop.f32.mrf.mxu1 }
  0xf0   : > { %v683_v4 = vpop.f32.mrf.mxu0 }
  0xf1   : > { %v689_v20 = vadd.f32 %v683_v4, %v593_v16 }
  0xf2   : > { %v941_v3 = vpop.f32.mrf.mxu1  ;;  %v1531_v5 = vpop.f32.mrf.mxu0 }
  0xf3   : > { %v767_v22 = vadd.f32 %v761_v58, %v689_v20 }
  0xf4   : > { %v1561_v1 = vpop.f32.mrf.mxu1  ;;  %v686_v6 = vpop.f32.mrf.mxu0 }
  0xf6   : > { %v944_v15 = vpop.f32.mrf.mxu1  ;;  %v1532_v8 = vpop.f32.mrf.mxu0 }
  0xf8   : > { %v1562_v7 = vpop.f32.mrf.mxu1 }
  0xfc   : > { %v860_v10 = vpop.f32.mrf.mxu0 }
  0xfd   : > { %v866_v24 = vadd.f32 %v860_v10, %v767_v22 }
  0xfe   : > { %v1118_v9 = vpop.f32.mrf.mxu1  ;;  %v1551_v12 = vpop.f32.mrf.mxu0 }
  0xff   : > { %v947_v27 = vadd.f32 %v941_v3, %v866_v24 }
 0x100   : > { %v1581_v11 = vpop.f32.mrf.mxu1  ;;  %v863_v14 = vpop.f32.mrf.mxu0 }
 0x102   : > { %v1121_v13 = vpop.f32.mrf.mxu1  ;;  %v1552_v19 = vpop.f32.mrf.mxu0 }
 0x104   : > { %v1582_v18 = vpop.f32.mrf.mxu1 }
 0x108   : > { %v1019_v23 = vpop.f32.mrf.mxu0 }
 0x109   : > { %v1025_v29 = vadd.f32 %v1019_v23, %v947_v27 }
 0x10a   : > { %v1571_v25 = vpop.f32.mrf.mxu0 }
 0x10b   : > { %v1124_v30 = vadd.f32 %v1118_v9, %v1025_v29 }
 0x10c   : > { %v1022_v26 = vpop.f32.mrf.mxu0 }
 0x10e   : > { %v1572_v28 = vpop.f32.mrf.mxu0 }
 0x114   : > { %v1199_v31 = vpop.f32.mrf.mxu0 }
 0x115   : > { %v1205_v33 = vadd.f32 %v1199_v31, %v1124_v30 }
 0x116   : > { %v1591_v35 = vpop.f32.mrf.mxu0 }
 0x117   : > { %v1213_v36 = vmul.f32 %v1455_v32, %v1205_v33 }
 0x118   : > { %v1202_v37 = vpop.f32.mrf.mxu0 }
 0x119   : > { %v1221_v38 = vadd.f32 %v1456_v34, %v1213_v36 }
 0x11a   : > { %v1592_v39 = vpop.f32.mrf.mxu0 }
 0x11b   : > { %v1222_v41 = vmax.f32 %v1221_v38, 0.0 }
 0x11d   : > { %v1224_v42 = vcombine.high %v1222_v41, %v1222_v41  ;;  %v1226_v43 = vpack.c.bf16 %v1222_v41, %v1222_v41 }
 0x11f   : > { %v1227_v44 = vpack.c.bf16 %v1224_v42, %v1224_v42  ;;  %1229 = vst.msk [vmem:[%s386_s14] sm:$0x3] %vm1228_vm0, %v1226_v43 }
 0x121   : > { %1230 = vst.msk [vmem:[%s386_s14 + $0x2] sm:$0x3] %vm1228_vm0, %v1227_v44 }
 0x122 PF: > { %s16_s23 = sadd.s32 1, %s1670_s23   ;;  %s2015_s21 = smov %s1666_s22 }
 0x123   : > { %p13_p5 = scmp.ge.s32.totalorder %s16_s23, 4   ;;  %s2016_s22 = smov %s2018_s24 }
 0x125   :  { %15 = sbr.rel (!%p13_p5) target bundleno = 2 (0x2), region = 88 }

// kernel: hourglass_forward.10
= control target key start
LH: loop header
LB: loop body
LE: loop exit
PB: predicated region body
PF: predicated region fallthrough
CT: control target
= control target key end

     0   :  { %s2706_s21 = smov 0   ;;  %s2708_s22 = smov 0   ;;  %s3185_s0 = inlined_call_operand.vmem [shape: bf16[2,3,5,40], index: 0, kind: input, shape index: {}, may-alias: {0,1}]   ;;  %s3186_s1 = inlined_call_operand.vmem [shape: bf16[2,3,5,40], index: 1, kind: input, shape index: {}, may-alias: {0,1}]   ;;  %s3187_s2 = inlined_call_operand.vmem [shape: bf16[18,40,32], index: 2, kind: input, shape index: {}]   ;;  %s3188_s3 = inlined_call_operand.vmem [shape: f32[1,32], index: 3, kind: input, shape index: {}]   ;;  %s3189_s4 = inlined_call_operand.vmem [shape: f32[1,32], index: 4, kind: input, shape index: {}]   ;;  %s3190_s5 = inlined_call_operand.vmem [shape: bf16[2,2,8,4,32], index: 5, kind: input, shape index: {}]   ;;  %s3191_s6 = inlined_call_operand.vmem [shape: bf16[2,2,8,4,32], index: 6, kind: output, shape index: {}]  }
   0x1   :  { %s2710_s23 = smov 0  }
   0x2 LB: > { %s28_s24 = sadd.s32 1, %s2662_s22  ;;  %p2093_p0 = scmp.ge.s32.totalorder %s2666_s23, 1  ;;  %s2666_s23 = sphi %s2710_s23, %s16_s23   ;;  %s2662_s22 = sphi %s2708_s22, %s3197_s22   ;;  %s2658_s21 = sphi %s2706_s21, %s3196_s21  }
   0x3   : > { %p30_p1 = scmp.ge.s32.totalorder %s28_s24, 2  ;;  %p282_p2 = scmp.lt.s32.totalorder %s2666_s23, 3 }
   0x5   : > { %s3199_s24 = smov (%p30_p1, %s28_s24), 0  ;;  %p283_p3 = pnand %p2093_p0, %p282_p2 }
   0x6   : > { %p350_p4 = scmp.lt.s32.totalorder (!%p283_p3), %s2658_s21, 1 }
   0x7   : > { %286 = sbr.rel (%p283_p3) target bundleno = 331 (0x14b), region = 44 }
   0xc   : > { %v2589_v0 = vld [vmem:[%s3187_s2 + $0x10] ss:$0 sps:$4 sm:$0xff]   ;;  %vm509_vm0 = vcmask 1043456   ;;  %v2668_v1 = vmov 0.0   ;;  %v2590_v2 = vld [vmem:[%s3187_s2 + $0x24] ss:$0 sps:$4 sm:$0xff]   ;;  %v406_v4 = vlaneseq }
   0xd   : > { %2379 = vmatprep.subr.bf16.mxu0 %v2668_v1  ;;  %2389 = vmatprep.subr.bf16.mxu1 %v2668_v1  ;;  %v511_v3 = vsel %vm509_vm0, %v2589_v0, 0  ;;  %v609_v5 = vsel %vm509_vm0, %v2590_v2, 0  ;;  %v2591_v6 = vld [vmem:[%s3187_s2 + $0x8] sm:$0xff]   ;;  %v2592_v7 = vld [vmem:[%s3187_s2 + $0x1c] sm:$0xff]   ;;  %vm2669_vm1 = vmmov 0   ;;  %v2594_v12 = vld [vmem:[%s3187_s2 + $0x14] sm:$0xff]  }
   0xe   : > { %2380 = vmatpush3.bf16.msra.mxu0 %v511_v3  ;;  %2390 = vmatpush3.bf16.msra.mxu1 %v609_v5  ;;  %v2670_v8 = vmov 1983009808   ;;  %v407_v10 = vshrl.u32 %v406_v4, 7  ;;  %v2593_v11 = vld [vmem:[%s3187_s2] sm:$0xff]   ;;  %s3201_s21 = smov (!%p350_p4, %s2658_s21), 1  ;;  %vm505_vm2 = vcmask 326656  }
   0xf   : > { %2381 = vmatprep.subr.bf16.mxu0 %v2668_v1  ;;  %2391 = vmatprep.subr.bf16.mxu1 %v2668_v1  ;;  %v404_v9 = vunpack.c.l.s4 %v2670_v8  ;;  %v2596_v14 = vld [vmem:[%s3187_s2 + $0x4c] ss:$0 sps:$4 sm:$0xff]   ;;  %s2559_s15 = smul.u32 12, %s3201_s21  ;;  %v2597_v15 = vld [vmem:[%s3187_s2 + $0x38] ss:$0 sps:$4 sm:$0xff]   ;;  %v2598_v32 = vld [vmem:[%s3187_s2 + $0x44] sm:$0xff]  }
  0x10   : > { %2385 = vmatprep.mubr.msk.bf16.mxu0 %vm2669_vm1, %v2668_v1  ;;  %2395 = vmatprep.mubr.msk.bf16.mxu1 %vm2669_vm1, %v2668_v1  ;;  %vm419_vm3 = vsmask.f32 1280  ;;  %vm420_vm4 = vsmask.f32 3336  ;;  %v725_v22 = vsel %vm509_vm0, %v2596_v14, 0  ;;  %v783_v23 = vsel %vm509_vm0, %v2597_v15, 0 }
  0x11   : > { %v405_v13 = vunpack.c.0.s8 %v404_v9  ;;  %s357_s20 = scalar_lea.vmem %s3185_s0, %s2559_s15  ;;  %vm422_vm5 = vsmask.f32 5392  ;;  %vm2787_vm6 = vmor %vm419_vm3, %vm420_vm4  ;;  %vm424_vm7 = vsmask.f32 7448  ;;  %v2599_v36 = vld [vmem:[%s3187_s2 + $0x30] sm:$0xff]   ;;  %v2600_v42 = vld [vmem:[%s3187_s2 + $0x3c] sm:$0xff]  }
  0x12   : > { %2382 = vmatpush3.bf16.msra.mxu0 %v2591_v6  ;;  %2392 = vmatpush3.bf16.msra.mxu1 %v2592_v7  ;;  %v398_v17 = vld [vmem:[%s357_s20] sm:$0x7]  ;;  %v2774_v18 = vld [vmem:[%s357_s20 + $0x4] sm:$0x7]  ;;  %vm423_vm8 = vmor %vm2787_vm6, %vm422_vm5  ;;  %s2304_s30 = sadd.s32 8, %s2559_s15  ;;  %s2305_s18 = sshll.u32 %s3201_s21, 5 }
  0x13   : > { %2383 = vmatprep.subr.bf16.mxu0 %v2668_v1  ;;  %2393 = vmatprep.subr.bf16.mxu1 %v2668_v1  ;;  %v2767_v16 = vsub.s32 %v405_v13, %v407_v10  ;;  %v482_v19 = vcombine.low %v398_v17, %v2774_v18  ;;  %v2601_v45 = vld [vmem:[%s3187_s2 + $0x28] sm:$0xff]   ;;  %vm2817_vm9 = vmor %vm423_vm8, %vm424_vm7  ;;  %v2602_v49 = vld [vmem:[%s3187_s2 + $0x74] ss:$0 sps:$4 sm:$0xff]   ;;  %s372_s9 = scalar_lea.vmem %s3186_s1, %s2304_s30  ;;  %s3093_s25 = scalar_lea.vmem %s3190_s5, %s2305_s18  ;;  %vm584_vm10 = vcmask 254976  }
  0x14   : > { %v2603_v50 = vld [vmem:[%s3187_s2 + $0x60] ss:$0 sps:$4 sm:$0xff]   ;;  %v888_v55 = vsel %vm509_vm0, %v2602_v49, 0  ;;  %v2604_v57 = vld [vmem:[%s3187_s2 + $0x6c] sm:$0xff]   ;;  %v2605_v58 = vld [vmem:[%s3187_s2 + $0x58] sm:$0xff]   ;;  %s3118_s8 = scalar_lea.vmem %s3191_s6, %s2305_s18 }
  0x15   : > { %v409_v20 = vrot.slane %v398_v17, %v2767_v16  ;;  %v417_v21 = vrot.slane %v2774_v18, %v2767_v16  ;;  %v2785_v24 = vrot.slane %v482_v19, %v2767_v16  ;;  %v946_v56 = vsel %vm509_vm0, %v2603_v50, 0  ;;  %v2606_v59 = vld [vmem:[%s3187_s2 + $0x64] sm:$0xff]   ;;  %v2607_v60 = vld [vmem:[%s3187_s2 + $0x50] sm:$0xff]   ;;  %v2608_v61 = vld [vmem:[%s3187_s2 + $0x9c] ss:$0 sps:$4 sm:$0xff]  }
  0x16   : > { %2384 = vmatpush3.bf16.msra.mxu0 %v2593_v11  ;;  %2394 = vmatpush3.bf16.msra.mxu1 %v2594_v12  ;;  %v2609_v62 = vld [vmem:[%s3187_s2 + $0x88] ss:$0 sps:$4 sm:$0xff]   ;;  %v1062_v63 = vsel %vm509_vm0, %v2608_v61, 0  ;;  %v2610_v2 = vld [vmem:[%s3187_s2 + $0x94] sm:$0xff]   ;;  %v2611_v3 = vld [vmem:[%s3187_s2 + $0x80] sm:$0xff]  }
  0x17   : > { %2399 = vmatprep.subr.bf16.mxu0 %v2668_v1  ;;  %2409 = vmatprep.subr.bf16.mxu1 %v2668_v1  ;;  %v410_v25 = vcombine.high %v409_v20, %v409_v20  ;;  %v418_v26 = vcombine.high %v417_v21, %v417_v21  ;;  %v427_v28 = vshrl.u32 %v409_v20, 16  ;;  %v430_v29 = vshll.u32 %v409_v20, 16  ;;  %v400_v4 = vld [vmem:[%s372_s9] sm:$0x7]  ;;  %v2612_v5 = vld [vmem:[%s3187_s2 + $0x8c] sm:$0xff]   ;;  %v2613_v6 = vld [vmem:[%s3187_s2 + $0x78] sm:$0xff]  }
  0x18   : > { %v441_v30 = vshrl.u32 %v417_v21, 16  ;;  %v444_v31 = vshll.u32 %v417_v21, 16  ;;  %v1120_v0 = vsel %vm509_vm0, %v2609_v62, 0  ;;  %v1035_v7 = vcombine.low %v2774_v18, %v400_v4  ;;  %v2614_v8 = vld [vmem:[%s3187_s2 + $0xc4] ss:$0 sps:$4 sm:$0xff]   ;;  %v2616_v13 = vld [vmem:[%s3187_s2 + $0xbc] sm:$0xff]  }
  0x19   : > { %2386 = vmatmul.mubr.msk.bf16.vlgmr.msra.gmra.mxu0 %vm505_vm2, %v2785_v24  ;;  %2396 = vmatmul.mubr.msk.bf16.vlgmr.msra.gmra.mxu1 %vm505_vm2, %v2785_v24  ;;  %v429_v33 = vrot.slane %v427_v28, 6  ;;  %v436_v34 = vshll.u32 %v410_v25, 16  ;;  %v450_v35 = vshll.u32 %v418_v26, 16  ;;  %v432_v37 = vrot.slane %v430_v29, 7  ;;  %v2615_v9 = vld [vmem:[%s3187_s2 + $0xb0] ss:$0 sps:$4 sm:$0xff]  }
  0x1a   : > { %2400 = vmatpush3.bf16.msra.mxu0 %v725_v22  ;;  %2410 = vmatpush3.bf16.msra.mxu1 %v783_v23  ;;  %v443_v38 = vrot.slane %v441_v30, 6  ;;  %v446_v39 = vrot.slane %v444_v31, 7  ;;  %v2914_v10 = vrot.slane %v1035_v7, %v2767_v16  ;;  %v1225_v11 = vsel %vm509_vm0, %v2614_v8, 0  ;;  %v2617_v14 = vld [vmem:[%s3187_s2 + $0xa8] sm:$0xff]   ;;  %v2618_v17 = vld [vmem:[%s3187_s2 + $0xb4] sm:$0xff]   ;;  %v2619_v18 = vld [vmem:[%s3187_s2 + $0xa0] sm:$0xff]  }
  0x1b   : > { %2401 = vmatprep.subr.bf16.mxu0 %v2668_v1  ;;  %2411 = vmatprep.subr.bf16.mxu1 %v2668_v1  ;;  %v438_v40 = vrot.slane %v436_v34, 7  ;;  %v452_v41 = vrot.slane %v450_v35, 7  ;;  %v433_v43 = vor.u32 %v432_v37, %v429_v33  ;;  %v1283_v12 = vsel %vm509_vm0, %v2615_v9, 0  ;;  %v2620_v19 = vld [vmem:[%s3187_s2 + $0xec] ss:$0 sps:$4 sm:$0xff]   ;;  %v2622_v28 = vld [vmem:[%s3187_s2 + $0xe4] sm:$0xff]  }
  0x1c   : > { %2405 = vmatprep.mubr.msk.bf16.mxu0 %vm2669_vm1, %v2668_v1  ;;  %2415 = vmatprep.mubr.msk.bf16.mxu1 %vm2669_vm1, %v2668_v1  ;;  %v447_v44 = vor.u32 %v446_v39, %v443_v38  ;;  %v461_v15 = vrot.slane %v400_v4, %v2767_v16  ;;  %v2621_v20 = vld [vmem:[%s3187_s2 + $0xd8] ss:$0 sps:$4 sm:$0xff]   ;;  %v1388_v23 = vsel %vm509_vm0, %v2620_v19, 0  ;;  %v2623_v29 = vld [vmem:[%s3187_s2 + $0xd0] sm:$0xff]   ;;  %v2624_v31 = vld [vmem:[%s3187_s2 + $0xdc] sm:$0xff]  }
  0x1d   : > { %v434_v47 = vrot.slane %v433_v43, 2  ;;  %v1446_v25 = vsel %vm509_vm0, %v2621_v20, 0  ;;  %v2626_v35 = vld [vmem:[%s3187_s2 + $0x100] ss:$0 sps:$4 sm:$0xff]   ;;  %v2631_v46 = vld [vmem:[%s3187_s2 + $0x104] sm:$0xff]  }
  0x1e   : > { %2402 = vmatpush3.bf16.msra.mxu0 %v2598_v32  ;;  %2412 = vmatpush3.bf16.msra.mxu1 %v2599_v36  ;;  %v448_v48 = vrot.slane %v447_v44, 2  ;;  %v464_v21 = vshrl.u32 %v461_v15, 16  ;;  %v467_v22 = vshll.u32 %v461_v15, 16  ;;  %v462_v30 = vcombine.high %v461_v15, %v461_v15  ;;  %v2625_v32 = vld [vmem:[%s3187_s2 + $0xc8] sm:$0xff]   ;;  %v2627_v36 = vld [vmem:[%s3187_s2 + $0x114] ss:$0 sps:$4 sm:$0xff]  }
  0x1f   : > { %2403 = vmatprep.subr.bf16.mxu0 %v2668_v1  ;;  %2413 = vmatprep.subr.bf16.mxu1 %v2668_v1  ;;  %v439_v51 = vsel %vm2817_vm9, %v434_v47, %v438_v40  ;;  %v1510_v39 = vsel %vm509_vm0, %v2626_v35, 0  ;;  %v1586_v40 = vsel %vm509_vm0, %v2627_v36, 0  ;;  %v2632_v47 = vld [vmem:[%s3187_s2 + $0x13c] ss:$0 sps:$4 sm:$0xff]   ;;  %v569_v62 = vld [vmem:[%s3093_s25] sm:$0x3] }
  0x20   : > { %v2833_v52 = vsel %vm2817_vm9, %v448_v48, %v452_v41  ;;  %v466_v26 = vrot.slane %v464_v21, 6  ;;  %v469_v27 = vrot.slane %v467_v22, 7  ;;  %v473_v34 = vshll.u32 %v462_v30, 16  ;;  %v2628_v41 = vld [vmem:[%s3187_s2 + $0xf8] sm:$0xff]   ;;  %v2633_v48 = vld [vmem:[%s3187_s2 + $0x128] ss:$0 sps:$4 sm:$0xff]  }
  0x21   : > { %v698_v53 = vcombine.low %v439_v51, %v2833_v52  ;;  %v1692_v50 = vsel %vm509_vm0, %v2632_v47, 0  ;;  %v1750_v51 = vsel %vm509_vm0, %v2633_v48, 0  ;;  %v2641_v61 = vld [vmem:[%s3187_s2 + $0x15c] sm:$0xff]  }
  0x22   : > { %2404 = vmatpush3.bf16.msra.mxu0 %v2600_v42  ;;  %2414 = vmatpush3.bf16.msra.mxu1 %v2601_v45  ;;  %v470_v33 = vor.u32 %v469_v27, %v466_v26  ;;  %v475_v38 = vrot.slane %v473_v34, 7  ;;  %v2629_v42 = vld [vmem:[%s3187_s2 + $0x10c] sm:$0xff]   ;;  %v3107_v8 = vld [vmem:[%s3189_s4] ss:$0 sm:$0xff] }
  0x23   : > { %v2837_v54 = vrot.slane %v698_v53, %v2767_v16  ;;  %2419 = vmatprep.subr.bf16.mxu0 %v2668_v1  ;;  %2429 = vmatprep.subr.bf16.mxu1 %v2668_v1  ;;  %v2630_v45 = vld [vmem:[%s3187_s2 + $0xf0] sm:$0xff]  }
  0x24   : > { %v471_v37 = vrot.slane %v470_v33, 2  ;;  %v2636_v53 = vld [vmem:[%s3187_s2 + $0x12c] sm:$0xff]  }
  0x25   : > { %2406 = vmatmul.mubr.msk.bf16.vlgmr.msra.gmra.mxu0 %vm505_vm2, %v2837_v54  ;;  %2416 = vmatmul.mubr.msk.bf16.vlgmr.msra.gmra.mxu1 %vm505_vm2, %v2785_v24 }
  0x26   : > { %2420 = vmatpush3.bf16.msra.mxu0 %v888_v55  ;;  %2430 = vmatpush3.bf16.msra.mxu1 %v946_v56  ;;  %v476_v43 = vsel %vm2817_vm9, %v471_v37, %v475_v38  ;;  %v2637_v55 = vld [vmem:[%s3187_s2 + $0x118] sm:$0xff]   ;;  %v2638_v56 = vld [vmem:[%s3187_s2 + $0x150] ss:$0 sps:$4 sm:$0xff]  }
  0x27   : > { %2421 = vmatprep.subr.bf16.mxu0 %v2668_v1  ;;  %2431 = vmatprep.subr.bf16.mxu1 %v2668_v1  ;;  %v1559_v44 = vcombine.low %v2833_v52, %v476_v43  ;;  %v2635_v52 = vld [vmem:[%s3187_s2 + $0x120] sm:$0xff]  }
  0x28   : > { %2425 = vmatprep.mubr.msk.bf16.mxu0 %vm2669_vm1, %v2668_v1  ;;  %2435 = vmatprep.mubr.msk.bf16.mxu1 %vm2669_vm1, %v2668_v1 }
  0x29   : > { %v1566_v49 = vrot.slane %v1559_v44, %v2767_v16  ;;  %v2634_v16 = vld [vmem:[%s3187_s2 + $0x134] sm:$0xff]  }
  0x2a   : > { %2422 = vmatpush3.bf16.msra.mxu0 %v2604_v57  ;;  %2432 = vmatpush3.bf16.msra.mxu1 %v2605_v58  ;;  %v2639_v57 = vld [vmem:[%s3187_s2 + $0x164] ss:$0 sps:$4 sm:$0xff]   ;;  %v1814_v58 = vsel %vm509_vm0, %v2638_v56, 0 }
  0x2b   : > { %2423 = vmatprep.subr.bf16.mxu0 %v2668_v1  ;;  %2433 = vmatprep.subr.bf16.mxu1 %v2668_v1 }
  0x2e   : > { %2424 = vmatpush3.bf16.msra.mxu0 %v2606_v59  ;;  %2434 = vmatpush3.bf16.msra.mxu1 %v2607_v60  ;;  %v1879_v59 = vsel %vm509_vm0, %v2639_v57, 0  ;;  %v2640_v60 = vld [vmem:[%s3187_s2 + $0x148] sm:$0xff]  }
  0x2f   : > { %2439 = vmatprep.subr.bf16.mxu0 %v2668_v1  ;;  %2449 = vmatprep.subr.bf16.mxu1 %v2668_v1 }
  0x31   : > { %2426 = vmatmul.mubr.msk.bf16.vlgmr.msra.gmra.mxu0 %vm505_vm2, %v2837_v54  ;;  %2436 = vmatmul.mubr.msk.bf16.vlgmr.msra.gmra.mxu1 %vm505_vm2, %v2785_v24 }
  0x32   : > { %2440 = vmatpush3.bf16.msra.mxu0 %v1062_v63  ;;  %2450 = vmatpush3.bf16.msra.mxu1 %v1120_v0  ;;  %v2117_v63 = vld [vmem:[%s3093_s25 + $0x2] sm:$0x3]  ;;  %v2118_v0 = vld [vmem:[%s3093_s25 + $0x12] sm:$0x3] }
  0x33   : > { %2441 = vmatprep.subr.bf16.mxu0 %v2668_v1  ;;  %2451 = vmatprep.subr.bf16.mxu1 %v2668_v1  ;;  %v670_v4 = vunpack.c.l.bf16 %v2117_v63 }
  0x34   : > { %2445 = vmatprep.mubr.msk.bf16.mxu0 %vm2669_vm1, %v2668_v1  ;;  %2455 = vmatprep.mubr.msk.bf16.mxu1 %vm2669_vm1, %v2668_v1 }
  0x36   : > { %2442 = vmatpush3.bf16.msra.mxu0 %v2610_v2  ;;  %2452 = vmatpush3.bf16.msra.mxu1 %v2611_v3  ;;  %v571_v2 = vunpack.c.l.bf16 %v569_v62 }
  0x37   : > { %2443 = vmatprep.subr.bf16.mxu0 %v2668_v1  ;;  %2453 = vmatprep.subr.bf16.mxu1 %v2668_v1 }
  0x3a   : > { %2444 = vmatpush3.bf16.msra.mxu0 %v2612_v5  ;;  %2454 = vmatpush3.bf16.msra.mxu1 %v2613_v6  ;;  %v671_v5 = vunpack.c.l.bf16 %v2118_v0  ;;  %v3102_v6 = vld [vmem:[%s3188_s3] ss:$0 sm:$0xff] }
  0x3b   : > { %2459 = vmatprep.subr.bf16.mxu0 %v2668_v1  ;;  %2469 = vmatprep.subr.bf16.mxu1 %v2668_v1 }
  0x3d   : > { %2446 = vmatmul.mubr.msk.bf16.vlgmr.msra.gmra.mxu0 %vm505_vm2, %v2914_v10  ;;  %2456 = vmatmul.mubr.msk.bf16.vlgmr.msra.gmra.mxu1 %vm505_vm2, %v2785_v24 }
  0x3e   : > { %2460 = vmatpush3.bf16.msra.mxu0 %v1225_v11  ;;  %2470 = vmatpush3.bf16.msra.mxu1 %v1283_v12 }
  0x3f   : > { %2461 = vmatprep.subr.bf16.mxu0 %v2668_v1  ;;  %2471 = vmatprep.subr.bf16.mxu1 %v2668_v1 }
  0x40   : > { %2465 = vmatprep.mubr.msk.bf16.mxu0 %vm2669_vm1, %v2668_v1  ;;  %2475 = vmatprep.mubr.msk.bf16.mxu1 %vm2669_vm1, %v2668_v1 }
  0x42   : > { %2462 = vmatpush3.bf16.msra.mxu0 %v2616_v13  ;;  %2472 = vmatpush3.bf16.msra.mxu1 %v2617_v14  ;;  %v674_v13 = vcombine.low %v670_v4, %v671_v5 }
  0x43   : > { %2463 = vmatprep.subr.bf16.mxu0 %v2668_v1  ;;  %2473 = vmatprep.subr.bf16.mxu1 %v2668_v1 }
  0x46   : > { %2464 = vmatpush3.bf16.msra.mxu0 %v2618_v17  ;;  %2474 = vmatpush3.bf16.msra.mxu1 %v2619_v18 }
  0x47   : > { %2479 = vmatprep.subr.bf16.mxu0 %v2668_v1  ;;  %2489 = vmatprep.subr.bf16.mxu1 %v2668_v1 }
  0x49   : > { %2466 = vmatmul.mubr.msk.bf16.vlgmr.msra.gmra.mxu0 %vm505_vm2, %v2914_v10  ;;  %2476 = vmatmul.mubr.msk.bf16.vlgmr.msra.gmra.mxu1 %vm505_vm2, %v2785_v24 }
  0x4a   : > { %2480 = vmatpush3.bf16.msra.mxu0 %v1388_v23  ;;  %2490 = vmatpush3.bf16.msra.mxu1 %v1446_v25 }
  0x4b   : > { %2481 = vmatprep.subr.bf16.mxu0 %v2668_v1  ;;  %2491 = vmatprep.subr.bf16.mxu1 %v2668_v1 }
  0x4c   : > { %2485 = vmatprep.mubr.msk.bf16.mxu0 %vm2669_vm1, %v2668_v1  ;;  %2495 = vmatprep.mubr.msk.bf16.mxu1 %vm2669_vm1, %v2668_v1 }
  0x4e   : > { %2482 = vmatpush3.bf16.msra.mxu0 %v2622_v28  ;;  %2492 = vmatpush3.bf16.msra.mxu1 %v2623_v29  ;;  %v2141_v28 = vld [vmem:[%s3093_s25 + $0x4] sm:$0x3]  ;;  %v2142_v29 = vld [vmem:[%s3093_s25 + $0x14] sm:$0x3] }
  0x4f   : > { %2483 = vmatprep.subr.bf16.mxu0 %v2668_v1  ;;  %2493 = vmatprep.subr.bf16.mxu1 %v2668_v1  ;;  %v844_v36 = vunpack.c.l.bf16 %v2141_v28  ;;  %v845_v37 = vunpack.c.l.bf16 %v2142_v29 }
  0x51   : > { %v848_v44 = vcombine.low %v844_v36, %v845_v37 }
  0x52   : > { %2484 = vmatpush3.bf16.msra.mxu0 %v2624_v31  ;;  %2494 = vmatpush3.bf16.msra.mxu1 %v2625_v32 }
  0x53   : > { %2499 = vmatprep.subr.bf16.mxu0 %v2668_v1  ;;  %2509 = vmatprep.subr.bf16.mxu1 %v2668_v1 }
  0x55   : > { %2486 = vmatmul.mubr.msk.bf16.vlgmr.msra.gmra.mxu0 %vm505_vm2, %v2837_v54  ;;  %2496 = vmatmul.mubr.msk.bf16.vlgmr.msra.gmra.mxu1 %vm505_vm2, %v2785_v24 }
  0x56   : > { %2500 = vmatpush3.bf16.msra.mxu0 %v1510_v39  ;;  %2510 = vmatpush3.bf16.msra.mxu1 %v1586_v40 }
  0x57   : > { %2501 = vmatprep.subr.bf16.mxu0 %v2668_v1  ;;  %2511 = vmatprep.subr.bf16.mxu1 %v2668_v1 }
  0x58   : > { %2505 = vmatprep.mubr.msk.bf16.mxu0 %vm2669_vm1, %v2668_v1  ;;  %2515 = vmatprep.mubr.msk.bf16.mxu1 %vm2669_vm1, %v2668_v1 }
  0x5a   : > { %2502 = vmatpush3.bf16.msra.mxu0 %v2628_v41  ;;  %2512 = vmatpush3.bf16.msra.mxu1 %v2629_v42 }
  0x5b   : > { %2503 = vmatprep.subr.bf16.mxu0 %v2668_v1  ;;  %2513 = vmatprep.subr.bf16.mxu1 %v2668_v1 }
  0x5e   : > { %2504 = vmatpush3.bf16.msra.mxu0 %v2630_v45  ;;  %2514 = vmatpush3.bf16.msra.mxu1 %v2631_v46 }
  0x5f   : > { %2519 = vmatprep.subr.bf16.mxu0 %v2668_v1  ;;  %2529 = vmatprep.subr.bf16.mxu1 %v2668_v1 }
  0x61   : > { %2506 = vmatmul.mubr.msk.bf16.vlgmr.msra.gmra.mxu0 %vm505_vm2, %v2914_v10  ;;  %2516 = vmatmul.mubr.msk.bf16.vlgmr.msra.gmra.mxu1 %vm505_vm2, %v1566_v49 }
  0x62   : > { %2520 = vmatpush3.bf16.msra.mxu0 %v1692_v50  ;;  %2530 = vmatpush3.bf16.msra.mxu1 %v1750_v51  ;;  %v2165_v51 = vld [vmem:[%s3093_s25 + $0x6] sm:$0x3] }
  0x63   : > { %2521 = vmatprep.subr.bf16.mxu0 %v2668_v1  ;;  %2531 = vmatprep.subr.bf16.mxu1 %v2668_v1  ;;  %v1007_v56 = vunpack.c.l.bf16 %v2165_v51 }
  0x64   : > { %2525 = vmatprep.mubr.msk.bf16.mxu0 %vm2669_vm1, %v2668_v1  ;;  %2535 = vmatprep.mubr.msk.bf16.mxu1 %vm2669_vm1, %v2668_v1 }
  0x66   : > { %2522 = vmatpush3.bf16.msra.mxu0 %v2634_v16  ;;  %2532 = vmatpush3.bf16.msra.mxu1 %v2635_v52  ;;  %v2166_v16 = vld [vmem:[%s3093_s25 + $0x16] sm:$0x3] }
  0x67   : > { %2523 = vmatprep.subr.bf16.mxu0 %v2668_v1  ;;  %2533 = vmatprep.subr.bf16.mxu1 %v2668_v1  ;;  %v1008_v57 = vunpack.c.l.bf16 %v2166_v16 }
  0x6a   : > { %2524 = vmatpush3.bf16.msra.mxu0 %v2636_v53  ;;  %2534 = vmatpush3.bf16.msra.mxu1 %v2637_v55 }
  0x6b   : > { %2539 = vmatprep.subr.bf16.mxu0 %v2668_v1  ;;  %2549 = vmatprep.subr.bf16.mxu1 %v2668_v1 }
  0x6d   : > { %2526 = vmatmul.mubr.msk.bf16.vlgmr.msra.gmra.mxu0 %vm505_vm2, %v2837_v54  ;;  %2536 = vmatmul.mubr.msk.bf16.vlgmr.msra.gmra.mxu1 %vm505_vm2, %v2785_v24  ;;  %v2642_v24 = vld [vmem:[%s3187_s2 + $0x140] sm:$0xff]   ;;  %v2643_v54 = vld [vmem:[%s3187_s2 + $0x154] sm:$0xff]  }
  0x6e   : > { %2540 = vmatpush3.bf16.msra.mxu0 %v1814_v58  ;;  %2550 = vmatpush3.bf16.msra.mxu1 %v1879_v59 }
  0x6f   : > { %2541 = vmatprep.subr.bf16.mxu0 %v2668_v1  ;;  %2551 = vmatprep.subr.bf16.mxu1 %v2668_v1 }
  0x70   : > { %2545 = vmatprep.mubr.msk.bf16.mxu0 %vm2669_vm1, %v2668_v1  ;;  %2555 = vmatprep.mubr.msk.bf16.mxu1 %vm2669_vm1, %v2668_v1 }
  0x72   : > { %2542 = vmatpush3.bf16.msra.mxu0 %v2640_v60  ;;  %2552 = vmatpush3.bf16.msra.mxu1 %v2641_v61 }
  0x73   : > { %2543 = vmatprep.subr.bf16.mxu0 %v2668_v1  ;;  %2553 = vmatprep.subr.bf16.mxu1 %v2668_v1  ;;  %v570_v1 = vld [vmem:[%s3093_s25 + $0x10] sm:$0x3] }
  0x74   : > { %v572_v3 = vunpack.c.l.bf16 %v570_v1  ;;  %v1011_v1 = vcombine.low %v1007_v56, %v1008_v57 }
  0x76   : > { %2544 = vmatpush3.bf16.msra.mxu0 %v2642_v24  ;;  %2554 = vmatpush3.bf16.msra.mxu1 %v2643_v54  ;;  %v575_v11 = vcombine.low %v571_v2, %v572_v3 }
  0x79   : > { %2546 = vmatmul.mubr.msk.bf16.vlgmr.msra.gmra.mxu0 %vm505_vm2, %v2914_v10  ;;  %2556 = vmatmul.mubr.msk.bf16.vlgmr.msra.gmra.mxu1 %vm505_vm2, %v1566_v49 }
  0xd9   : > { %v547_v7 = vpop.f32.mrf.mxu0  ;;  %v645_v9 = vpop.f32.mrf.mxu1 }
  0xda   : > { %v560_v10 = vmul.f32 %v3102_v6, %v547_v7  ;;  %v658_v12 = vmul.f32 %v3102_v6, %v645_v9  ;;  %v2189_v7 = vld [vmem:[%s3093_s25 + $0x8] sm:$0x3]  ;;  %v2190_v9 = vld [vmem:[%s3093_s25 + $0x18] sm:$0x3] }
  0xdb   : > { %v2387_v14 = vpop.f32.mrf.mxu0  ;;  %v2397_v15 = vpop.f32.mrf.mxu1 }
  0xdc   : > { %v568_v17 = vadd.f32 %v3107_v8, %v560_v10  ;;  %v666_v18 = vadd.f32 %v3107_v8, %v658_v12  ;;  %v1182_v14 = vunpack.c.l.bf16 %v2190_v9 }
  0xdd   : > { %v550_v19 = vpop.f32.mrf.mxu0  ;;  %v648_v20 = vpop.f32.mrf.mxu1 }
  0xde   : > { %v577_v21 = vadd.f32 %v575_v11, %v568_v17  ;;  %v676_v22 = vadd.f32 %v674_v13, %v666_v18  ;;  %v1181_v13 = vunpack.c.l.bf16 %v2189_v7 }
  0xdf   : > { %v2388_v23 = vpop.f32.mrf.mxu0  ;;  %v2398_v25 = vpop.f32.mrf.mxu1 }
  0xe0   : > { %v578_v26 = vmax.f32 %v577_v21, 0.0  ;;  %v677_v27 = vmax.f32 %v676_v22, 0.0  ;;  %v1185_v23 = vcombine.low %v1181_v13, %v1182_v14 }
  0xe2   : > { %v580_v30 = vcombine.high %v578_v26, %v578_v26  ;;  %v582_v31 = vpack.c.bf16 %v578_v26, %v578_v26  ;;  %v679_v32 = vcombine.high %v677_v27, %v677_v27  ;;  %v681_v33 = vpack.c.bf16 %v677_v27, %v677_v27 }
  0xe4   : > { %v583_v34 = vpack.c.bf16 %v580_v30, %v580_v30  ;;  %585 = vst.msk [vmem:[%s3118_s8] sm:$0x3] %vm584_vm10, %v582_v31  ;;  %v682_v35 = vpack.c.bf16 %v679_v32, %v679_v32  ;;  %2119 = vst.msk [vmem:[%s3118_s8 + $0x2] sm:$0x3] %vm584_vm10, %v681_v33  ;;  %v2213_v31 = vld [vmem:[%s3093_s25 + $0xa] sm:$0x3] }
  0xe5   : > { %v761_v38 = vpop.f32.mrf.mxu0  ;;  %v819_v39 = vpop.f32.mrf.mxu1  ;;  %v2214_v32 = vld [vmem:[%s3093_s25 + $0x1a] sm:$0x3]  ;;  %v1344_v36 = vunpack.c.l.bf16 %v2213_v31 }
  0xe6   : > { %586 = vst.msk [vmem:[%s3118_s8 + $0x10] sm:$0x3] %vm584_vm10, %v583_v34  ;;  %2120 = vst.msk [vmem:[%s3118_s8 + $0x12] sm:$0x3] %vm584_vm10, %v682_v35  ;;  %v820_v40 = vadd.f32 %v819_v39, %v761_v38  ;;  %v1345_v37 = vunpack.c.l.bf16 %v2214_v32 }
  0xe7   : > { %v2407_v41 = vpop.f32.mrf.mxu0  ;;  %v2417_v42 = vpop.f32.mrf.mxu1 }
  0xe8   : > { %v832_v43 = vmul.f32 %v3102_v6, %v820_v40 }
  0xe9   : > { %v764_v45 = vpop.f32.mrf.mxu0  ;;  %v822_v46 = vpop.f32.mrf.mxu1 }
  0xea   : > { %v840_v47 = vadd.f32 %v3107_v8, %v832_v43  ;;  %v1348_v45 = vcombine.low %v1344_v36, %v1345_v37 }
  0xeb   : > { %v2408_v48 = vpop.f32.mrf.mxu0  ;;  %v2418_v49 = vpop.f32.mrf.mxu1 }
  0xec   : > { %v850_v50 = vadd.f32 %v848_v44, %v840_v47 }
  0xee   : > { %v851_v52 = vmax.f32 %v850_v50, 0.0 }
  0xf0   : > { %v853_v53 = vcombine.high %v851_v52, %v851_v52  ;;  %v855_v55 = vpack.c.bf16 %v851_v52, %v851_v52 }
  0xf1   : > { %v924_v58 = vpop.f32.mrf.mxu0  ;;  %v982_v59 = vpop.f32.mrf.mxu1 }
  0xf2   : > { %v856_v60 = vpack.c.bf16 %v853_v53, %v853_v53  ;;  %2143 = vst.msk [vmem:[%s3118_s8 + $0x4] sm:$0x3] %vm584_vm10, %v855_v55  ;;  %v983_v61 = vadd.f32 %v982_v59, %v924_v58 }
  0xf3   : > { %v2427_v24 = vpop.f32.mrf.mxu0  ;;  %v2437_v54 = vpop.f32.mrf.mxu1 }
  0xf4   : > { %2144 = vst.msk [vmem:[%s3118_s8 + $0x14] sm:$0x3] %vm584_vm10, %v856_v60  ;;  %v995_v62 = vmul.f32 %v3102_v6, %v983_v61 }
  0xf5   : > { %v927_v63 = vpop.f32.mrf.mxu0  ;;  %v985_v0 = vpop.f32.mrf.mxu1 }
  0xf6   : > { %v1003_v2 = vadd.f32 %v3107_v8, %v995_v62  ;;  %v2255_v62 = vld [vmem:[%s3093_s25 + $0xc] sm:$0x3] }
  0xf7   : > { %v2428_v3 = vpop.f32.mrf.mxu0  ;;  %v2438_v4 = vpop.f32.mrf.mxu1 }
  0xf8   : > { %v1013_v5 = vadd.f32 %v1011_v1, %v1003_v2  ;;  %v2256_v1 = vld [vmem:[%s3093_s25 + $0x1c] sm:$0x3]  ;;  %v1648_v4 = vunpack.c.l.bf16 %v2255_v62 }
  0xfa   : > { %v1014_v10 = vmax.f32 %v1013_v5, 0.0  ;;  %v1649_v5 = vunpack.c.l.bf16 %v2256_v1 }
  0xfc   : > { %v1016_v11 = vcombine.high %v1014_v10, %v1014_v10  ;;  %v1018_v12 = vpack.c.bf16 %v1014_v10, %v1014_v10  ;;  %v1652_v14 = vcombine.low %v1648_v4, %v1649_v5 }
  0xfd   : > { %v1098_v15 = vpop.f32.mrf.mxu0  ;;  %v1156_v17 = vpop.f32.mrf.mxu1 }
  0xfe   : > { %v1019_v18 = vpack.c.bf16 %v1016_v11, %v1016_v11  ;;  %2167 = vst.msk [vmem:[%s3118_s8 + $0x6] sm:$0x3] %vm584_vm10, %v1018_v12  ;;  %v1157_v19 = vadd.f32 %v1156_v17, %v1098_v15 }
  0xff   : > { %v2447_v20 = vpop.f32.mrf.mxu0  ;;  %v2457_v21 = vpop.f32.mrf.mxu1 }
 0x100   : > { %2168 = vst.msk [vmem:[%s3118_s8 + $0x16] sm:$0x3] %vm584_vm10, %v1019_v18  ;;  %v1169_v22 = vmul.f32 %v3102_v6, %v1157_v19 }
 0x101   : > { %v1101_v25 = vpop.f32.mrf.mxu0  ;;  %v1159_v26 = vpop.f32.mrf.mxu1 }
 0x102   : > { %v1177_v27 = vadd.f32 %v3107_v8, %v1169_v22 }
 0x103   : > { %v2448_v28 = vpop.f32.mrf.mxu0  ;;  %v2458_v29 = vpop.f32.mrf.mxu1 }
 0x104   : > { %v1187_v30 = vadd.f32 %v1185_v23, %v1177_v27 }
 0x106   : > { %v1188_v33 = vmax.f32 %v1187_v30, 0.0 }
 0x108   : > { %v1190_v34 = vcombine.high %v1188_v33, %v1188_v33  ;;  %v1192_v35 = vpack.c.bf16 %v1188_v33, %v1188_v33  ;;  %v2297_v33 = vld [vmem:[%s3093_s25 + $0xe] sm:$0x3] }
 0x109   : > { %v1261_v38 = vpop.f32.mrf.mxu0  ;;  %v1319_v39 = vpop.f32.mrf.mxu1 }
 0x10a   : > { %v1193_v40 = vpack.c.bf16 %v1190_v34, %v1190_v34  ;;  %2191 = vst.msk [vmem:[%s3118_s8 + $0x8] sm:$0x3] %vm584_vm10, %v1192_v35  ;;  %v1320_v41 = vadd.f32 %v1319_v39, %v1261_v38  ;;  %v2298_v34 = vld [vmem:[%s3093_s25 + $0x1e] sm:$0x3]  ;;  %v1941_v39 = vunpack.c.l.bf16 %v2297_v33 }
 0x10b   : > { %v2467_v42 = vpop.f32.mrf.mxu0  ;;  %v2477_v43 = vpop.f32.mrf.mxu1 }
 0x10c   : > { %2192 = vst.msk [vmem:[%s3118_s8 + $0x18] sm:$0x3] %vm584_vm10, %v1193_v40  ;;  %v1332_v44 = vmul.f32 %v3102_v6, %v1320_v41  ;;  %v1942_v40 = vunpack.c.l.bf16 %v2298_v34 }
 0x10d   : > { %v1264_v46 = vpop.f32.mrf.mxu0  ;;  %v1322_v47 = vpop.f32.mrf.mxu1 }
 0x10e   : > { %v1340_v48 = vadd.f32 %v3107_v8, %v1332_v44  ;;  %v1945_v47 = vcombine.low %v1941_v39, %v1942_v40 }
 0x10f   : > { %v2468_v49 = vpop.f32.mrf.mxu0  ;;  %v2478_v50 = vpop.f32.mrf.mxu1 }
 0x110   : > { %v1350_v51 = vadd.f32 %v1348_v45, %v1340_v48 }
 0x112   : > { %v1351_v16 = vmax.f32 %v1350_v51, 0.0 }
 0x114   : > { %v1353_v52 = vcombine.high %v1351_v16, %v1351_v16  ;;  %v1355_v53 = vpack.c.bf16 %v1351_v16, %v1351_v16 }
 0x115   : > { %v1424_v55 = vpop.f32.mrf.mxu0  ;;  %v1482_v56 = vpop.f32.mrf.mxu1 }
 0x116   : > { %v1356_v57 = vpack.c.bf16 %v1353_v52, %v1353_v52  ;;  %2215 = vst.msk [vmem:[%s3118_s8 + $0xa] sm:$0x3] %vm584_vm10, %v1355_v53  ;;  %v1483_v63 = vadd.f32 %v1482_v56, %v1424_v55 }
 0x117   : > { %v2487_v58 = vpop.f32.mrf.mxu0  ;;  %v2497_v59 = vpop.f32.mrf.mxu1 }
 0x118   : > { %2216 = vst.msk [vmem:[%s3118_s8 + $0x1a] sm:$0x3] %vm584_vm10, %v1356_v57 }
 0x119   : > { %v1427_v60 = vpop.f32.mrf.mxu0  ;;  %v1485_v61 = vpop.f32.mrf.mxu1 }
 0x11b   : > { %v2488_v24 = vpop.f32.mrf.mxu0  ;;  %v2498_v54 = vpop.f32.mrf.mxu1 }
 0x121   : > { %v1546_v0 = vpop.f32.mrf.mxu0  ;;  %v1622_v2 = vpop.f32.mrf.mxu1 }
 0x122   : > { %v1552_v3 = vadd.f32 %v1546_v0, %v1483_v63 }
 0x123   : > { %v2507_v7 = vpop.f32.mrf.mxu0  ;;  %v2517_v9 = vpop.f32.mrf.mxu1 }
 0x124   : > { %v1628_v10 = vadd.f32 %v1622_v2, %v1552_v3 }
 0x125   : > { %v1549_v11 = vpop.f32.mrf.mxu0  ;;  %v1625_v12 = vpop.f32.mrf.mxu1 }
 0x126   : > { %v1636_v13 = vmul.f32 %v3102_v6, %v1628_v10 }
 0x127   : > { %v2508_v15 = vpop.f32.mrf.mxu0  ;;  %v2518_v17 = vpop.f32.mrf.mxu1 }
 0x128   : > { %v1644_v18 = vadd.f32 %v3107_v8, %v1636_v13 }
 0x12a   : > { %v1654_v19 = vadd.f32 %v1652_v14, %v1644_v18 }
 0x12c   : > { %v1655_v20 = vmax.f32 %v1654_v19, 0.0 }
 0x12d   : > { %v1728_v21 = vpop.f32.mrf.mxu0  ;;  %v1786_v22 = vpop.f32.mrf.mxu1 }
 0x12e   : > { %v1657_v23 = vcombine.high %v1655_v20, %v1655_v20  ;;  %v1659_v25 = vpack.c.bf16 %v1655_v20, %v1655_v20  ;;  %v1787_v35 = vadd.f32 %v1786_v22, %v1728_v21 }
 0x12f   : > { %v2527_v26 = vpop.f32.mrf.mxu0  ;;  %v2537_v27 = vpop.f32.mrf.mxu1 }
 0x130   : > { %v1660_v28 = vpack.c.bf16 %v1657_v23, %v1657_v23  ;;  %2257 = vst.msk [vmem:[%s3118_s8 + $0xc] sm:$0x3] %vm584_vm10, %v1659_v25 }
 0x131   : > { %v1731_v29 = vpop.f32.mrf.mxu0  ;;  %v1789_v30 = vpop.f32.mrf.mxu1 }
 0x132   : > { %2258 = vst.msk [vmem:[%s3118_s8 + $0x1c] sm:$0x3] %vm584_vm10, %v1660_v28 }
 0x133   : > { %v2528_v31 = vpop.f32.mrf.mxu0  ;;  %v2538_v32 = vpop.f32.mrf.mxu1 }
 0x139   : > { %v1850_v36 = vpop.f32.mrf.mxu0  ;;  %v1915_v37 = vpop.f32.mrf.mxu1 }
 0x13a   : > { %v1856_v38 = vadd.f32 %v1850_v36, %v1787_v35 }
 0x13b   : > { %v2547_v41 = vpop.f32.mrf.mxu0  ;;  %v2557_v42 = vpop.f32.mrf.mxu1 }
 0x13c   : > { %v1921_v43 = vadd.f32 %v1915_v37, %v1856_v38 }
 0x13d   : > { %v1853_v44 = vpop.f32.mrf.mxu0  ;;  %v1918_v45 = vpop.f32.mrf.mxu1 }
 0x13e   : > { %v1929_v46 = vmul.f32 %v3102_v6, %v1921_v43 }
 0x13f   : > { %v2548_v48 = vpop.f32.mrf.mxu0  ;;  %v2558_v49 = vpop.f32.mrf.mxu1 }
 0x140   : > { %v1937_v50 = vadd.f32 %v3107_v8, %v1929_v46 }
 0x142   : > { %v1947_v51 = vadd.f32 %v1945_v47, %v1937_v50 }
 0x144   : > { %v1948_v16 = vmax.f32 %v1947_v51, 0.0 }
 0x146   : > { %v1950_v52 = vcombine.high %v1948_v16, %v1948_v16  ;;  %v1952_v53 = vpack.c.bf16 %v1948_v16, %v1948_v16 }
 0x148   : > { %v1953_v55 = vpack.c.bf16 %v1950_v52, %v1950_v52  ;;  %2299 = vst.msk [vmem:[%s3118_s8 + $0xe] sm:$0x3] %vm584_vm10, %v1952_v53 }
 0x14a   : > { %2300 = vst.msk [vmem:[%s3118_s8 + $0x1e] sm:$0x3] %vm584_vm10, %v1953_v55 }
 0x14b PF: > { %s16_s23 = sadd.s32 1, %s2666_s23   ;;  %s3196_s21 = smov %s2662_s22 }
 0x14c   : > { %p13_p5 = scmp.ge.s32.totalorder %s16_s23, 4   ;;  %s3197_s22 = smov %s3199_s24 }
 0x14e   :  { %15 = sbr.rel (!%p13_p5) target bundleno = 2 (0x2), region = 111 }

// kernel: tile.113
= control target key start
LH: loop header
LB: loop body
LE: loop exit
PB: predicated region body
PF: predicated region fallthrough
CT: control target
= control target key end

     0   :  { %s22_s0 = inlined_call_operand.vmem [shape: f32[4], index: 0, kind: input, shape index: {}]   ;;  %s23_s1 = inlined_call_operand.vmem [shape: f32[8,4], index: 1, kind: output, shape index: {}]  }
   0x1   :  { %v4_v0 = vld [vmem:[%s22_s0] ss:$0 sm:$0xff] }
   0x2   :  { %5 = vst [vmem:[%s23_s1] sm:$0xff] %v4_v0 }

// kernel: tile.114
= control target key start
LH: loop header
LB: loop body
LE: loop exit
PB: predicated region body
PF: predicated region fallthrough
CT: control target
= control target key end

     0   :  { %s69_s10 = smov 28   ;;  %s70_s11 = smov 20   ;;  %vm3_vm0 = vcmask 31744   ;;  %vm9_vm1 = vcmask 261344   ;;  %vm15_vm2 = vcmask 228544   ;;  %vm21_vm3 = vcmask 195744   ;;  %s113_s0 = inlined_call_operand.vmem [shape: f32[8,4], index: 0, kind: input, shape index: {}]   ;;  %s114_s1 = inlined_call_operand.vmem [shape: f32[1,32], index: 1, kind: output, shape index: {}]  }
   0x1   :  { %v55_v0 = vld [vmem:[%s113_s0 + $0x7] sm:$0x1]   ;;  %v57_v1 = vld [vmem:[%s113_s0 + $0x5] sm:$0x1]   ;;  %v56_v2 = vld [vmem:[%s113_s0 + $0x6] sm:$0x1]  }
   0x2   :  { %7 = vrot.lane.b32.xlu0 %v55_v0, %s69_s10  ;;  %19 = vrot.lane.b32.xlu1 %v57_v1, %s70_s11  ;;  %v58_v3 = vld [vmem:[%s113_s0 + $0x4] sm:$0x1]   ;;  %v2_v4 = vld [vmem:[%s113_s0] sm:$0x1]   ;;  %s71_s18 = smov 24   ;;  %s72_s19 = smov 16  }
   0x3   :  { %4 = vst.msk [vmem:[#allocation0] sm:$0x1] %vm3_vm0, %v2_v4   ;;  %v59_v5 = vld [vmem:[%s113_s0 + $0x3] sm:$0x1]   ;;  %v60_v6 = vld [vmem:[%s113_s0 + $0x2] sm:$0x1]  }
   0x4   :  { %s73_s24 = smov 12   ;;  %s74_s25 = smov 8   ;;  %v61_v7 = vld [vmem:[%s113_s0 + $0x1] sm:$0x1]   ;;  %vm27_vm4 = vcmask 162944   ;;  %vm33_vm5 = vcmask 130144  }
   0x5   :  { %s75_s0 = smov 4   ;;  %vm39_vm6 = vcmask 97344   ;;  %vm45_vm7 = vcmask 64544  }
   0x6   :  { %13 = vrot.lane.b32.xlu0 %v56_v2, %s71_s18  ;;  %25 = vrot.lane.b32.xlu1 %v58_v3, %s72_s19 }
   0xa   :  { %31 = vrot.lane.b32.xlu0 %v59_v5, %s73_s24  ;;  %37 = vrot.lane.b32.xlu1 %v60_v6, %s74_s25 }
   0xe   :  { %43 = vrot.lane.b32.xlu0 %v61_v7, %s75_s0 }
  0x74   :  { %v8_v8 = vpop.permute.xlu0 %7   ;;  %v20_v9 = vpop.permute.xlu1 %19  }
  0x75   :  { %10 = vst.msk [vmem:[#allocation0] sm:$0x1] %vm9_vm1, %v8_v8  }
  0x78   :  { %v14_v10 = vpop.permute.xlu0 %13   ;;  %v26_v11 = vpop.permute.xlu1 %25  }
  0x79   :  { %16 = vst.msk [vmem:[#allocation0] sm:$0x1] %vm15_vm2, %v14_v10  }
  0x7a   :  { %22 = vst.msk [vmem:[#allocation0] sm:$0x1] %vm21_vm3, %v20_v9  }
  0x7b   :  { %28 = vst.msk [vmem:[#allocation0] sm:$0x1] %vm27_vm4, %v26_v11  }
  0x7c   :  { %v32_v12 = vpop.permute.xlu0 %31   ;;  %v38_v13 = vpop.permute.xlu1 %37  }
  0x7d   :  { %34 = vst.msk [vmem:[#allocation0] sm:$0x1] %vm33_vm5, %v32_v12  }
  0x7e   :  { %40 = vst.msk [vmem:[#allocation0] sm:$0x1] %vm39_vm6, %v38_v13  }
  0x80   :  { %v44_v14 = vpop.permute.xlu0 %43  }
  0x81   :  { %46 = vst.msk [vmem:[#allocation0] sm:$0x1] %vm45_vm7, %v44_v14  }
  0x88   :  { %v51_v15 = vld [vmem:[#allocation0] sm:$0x1] }
  0x89   :  { %54 = vst [vmem:[%s114_s1] sm:$0x1] %v51_v15 }

// kernel: hourglass_forward.11
= control target key start
LH: loop header
LB: loop body
LE: loop exit
PB: predicated region body
PF: predicated region fallthrough
CT: control target
= control target key end

     0   :  { %s3372_s18 = smov 0   ;;  %s3374_s19 = smov 0   ;;  %s3997_s0 = inlined_call_operand.vmem [shape: bf16[2,5,9,72], index: 0, kind: input, shape index: {}, may-alias: {0,1}]   ;;  %s3998_s1 = inlined_call_operand.vmem [shape: bf16[2,5,9,72], index: 1, kind: input, shape index: {}, may-alias: {0,1}]   ;;  %s3999_s2 = inlined_call_operand.vmem [shape: bf16[18,72,32], index: 2, kind: input, shape index: {}]   ;;  %s4000_s3 = inlined_call_operand.vmem [shape: f32[1,32], index: 3, kind: input, shape index: {}]   ;;  %s4001_s4 = inlined_call_operand.vmem [shape: f32[1,32], index: 4, kind: input, shape index: {}]   ;;  %s4002_s5 = inlined_call_operand.vmem [shape: bf16[2,4,8,8,32], index: 5, kind: output, shape index: {}]  }
   0x1   :  { %s3376_s20 = smov 0  }
   0x2 LB: > { %s27_s21 = sadd.s32 1, %s3336_s19  ;;  %p2461_p0 = scmp.ge.s32.totalorder %s3340_s20, 1  ;;  %s3340_s20 = sphi %s3376_s20, %s15_s20   ;;  %s3336_s19 = sphi %s3374_s19, %s4006_s19   ;;  %s3332_s18 = sphi %s3372_s18, %s4005_s18  }
   0x3   : > { %p29_p1 = scmp.ge.s32.totalorder %s27_s21, 2  ;;  %p243_p2 = scmp.lt.s32.totalorder %s3340_s20, 3 }
   0x5   : > { %s4008_s21 = smov (%p29_p1, %s27_s21), 0  ;;  %p244_p3 = pnand %p2461_p0, %p243_p2 }
   0x6   : > { %p303_p4 = scmp.lt.s32.totalorder (!%p244_p3), %s3332_s18, 1 }
   0x7   : > { %247 = sbr.rel (%p244_p3) target bundleno = 403 (0x193), region = 40 }
   0xc   : > { %v3225_v0 = vld [vmem:[%s3999_s2 + $0x20] ss:$0 sps:$4 sm:$0xff]   ;;  %vm479_vm0 = vcmask 1043456   ;;  %v3227_v1 = vld [vmem:[%s3999_s2 + $0x18] sm:$0xff]   ;;  %v3226_v2 = vld [vmem:[%s3999_s2 + $0x44] ss:$0 sps:$4 sm:$0xff]  }
   0xd   : > { %3180 = vmatprep.subr.msk.bf16.mxu0 %vm479_vm0, %v3225_v0  ;;  %v481_v3 = vsel %vm479_vm0, %v3225_v0, 0  ;;  %v3228_v4 = vld [vmem:[%s3999_s2 + $0x3c] sm:$0xff]   ;;  %3181 = vmatprep.subr.msk.bf16.mxu1 %vm479_vm0, %v3226_v2  ;;  %v601_v5 = vsel %vm479_vm0, %v3226_v2, 0  ;;  %v3229_v6 = vld [vmem:[%s3999_s2 + $0x10] sm:$0xff]   ;;  %s4010_s18 = smov (!%p303_p4, %s3332_s18), 1  ;;  %v3231_v8 = vld [vmem:[%s3999_s2 + $0x8] sm:$0xff]  }
   0xe   : > { %2929 = vmatpush3.bf16.msra.mxu0 %v481_v3  ;;  %2943 = vmatpush3.bf16.msra.mxu1 %v601_v5  ;;  %v3230_v7 = vld [vmem:[%s3999_s2 + $0x34] sm:$0xff]   ;;  %v3232_v9 = vld [vmem:[%s3999_s2 + $0x2c] sm:$0xff]   ;;  %s3198_s13 = smul.u32 40, %s4010_s18  ;;  %v3233_v10 = vld [vmem:[%s3999_s2] sm:$0xff]   ;;  %vm472_vm1 = vcmask 588800   ;;  %s2801_s26 = sshll.u32 %s4010_s18, 7 }
   0xf   : > { %2930 = vmatprep.subr.bf16.mxu0 %v3227_v1  ;;  %2944 = vmatprep.subr.bf16.mxu1 %v3228_v4  ;;  %v3234_v11 = vld [vmem:[%s3999_s2 + $0x24] sm:$0xff]   ;;  %v3237_v17 = vld [vmem:[%s3999_s2 + $0x8c] ss:$0 sps:$4 sm:$0xff]   ;;  %vm353_vm2 = vsmask.f32 3328  ;;  %v3241_v46 = vld [vmem:[%s3999_s2 + $0x7c] sm:$0xff]  }
  0x10   : > { %s3429_s22 = scalar_lea.vmem %s3997_s0, %s3198_s13  ;;  %v3238_v18 = vld [vmem:[%s3999_s2 + $0x68] ss:$0 sps:$4 sm:$0xff]   ;;  %v743_v25 = vsel %vm479_vm0, %v3237_v17, 0  ;;  %v3240_v26 = vld [vmem:[%s3999_s2 + $0x60] sm:$0xff]   ;;  %vm354_vm3 = vsmask.f32 7440 }
  0x11   : > { %v343_v12 = vld [vmem:[%s3429_s22] sm:$0xf]  ;;  %v3436_v13 = vld [vmem:[%s3429_s22 + $0x8] sm:$0xf]  ;;  %v3442_v15 = vld [vmem:[%s3429_s22 + $0x10] sm:$0xf] }
  0x12   : > { %2931 = vmatpush3.bf16.msra.mxu0 %v3227_v1  ;;  %2945 = vmatpush3.bf16.msra.mxu1 %v3228_v4  ;;  %v3439_v14 = vcombine.low %v343_v12, %v3436_v13  ;;  %v3445_v16 = vld [vmem:[%s3429_s22 + $0x18] sm:$0xf]  ;;  %v357_v19 = vshrl.u32 %v343_v12, 16  ;;  %v360_v20 = vshll.u32 %v343_v12, 16  ;;  %v3239_v23 = vld [vmem:[%s3999_s2 + $0x84] sm:$0xff]   ;;  %v371_v27 = vshrl.u32 %v3436_v13, 16  ;;  %vm3481_vm4 = vmor %vm353_vm2, %vm354_vm3 }
  0x13   : > { %2932 = vmatprep.subr.bf16.mxu0 %v3229_v6  ;;  %2946 = vmatprep.subr.bf16.mxu1 %v3230_v7  ;;  %v3459_v22 = vcombine.low %v3442_v15, %v3445_v16  ;;  %v822_v28 = vsel %vm479_vm0, %v3238_v18, 0  ;;  %v344_v29 = vld [vmem:[%s3429_s22 + $0x4] sm:$0x1]  ;;  %v346_v30 = vld [vmem:[%s3429_s22 + $0xc] sm:$0x1]  ;;  %v374_v32 = vshll.u32 %v3436_v13, 16 }
  0x14   : > { %2938 = vmatprep.mubr.msk.bf16.mxu0 %vm472_vm1, %v3439_v14  ;;  %2952 = vmatprep.mubr.msk.bf16.mxu1 %vm472_vm1, %v3439_v14  ;;  %v359_v21 = vrot.slane %v357_v19, 4  ;;  %v362_v24 = vrot.slane %v360_v20, 5  ;;  %v366_v33 = vshll.u32 %v344_v29, 16  ;;  %v373_v34 = vrot.slane %v371_v27, 4  ;;  %v348_v38 = vld [vmem:[%s3429_s22 + $0x14] sm:$0x1] }
  0x15   : > { %v376_v36 = vrot.slane %v374_v32, 5  ;;  %v380_v37 = vshll.u32 %v346_v30, 16  ;;  %v385_v39 = vshrl.u32 %v3442_v15, 16  ;;  %v350_v42 = vld [vmem:[%s3429_s22 + $0x1c] sm:$0x1]  ;;  %v388_v43 = vshll.u32 %v3442_v15, 16 }
  0x16   : > { %2933 = vmatpush3.bf16.msra.mxu0 %v3229_v6  ;;  %2947 = vmatpush3.bf16.msra.mxu1 %v3230_v7  ;;  %v363_v31 = vor.u32 %v362_v24, %v359_v21  ;;  %v368_v41 = vrot.slane %v366_v33, 5  ;;  %v394_v44 = vshll.u32 %v348_v38, 16  ;;  %v399_v45 = vshrl.u32 %v3445_v16, 16  ;;  %v3242_v51 = vld [vmem:[%s3999_s2 + $0x58] sm:$0xff]   ;;  %v3244_v63 = vld [vmem:[%s3999_s2 + $0x50] sm:$0xff]   ;;  %v3246_v7 = vld [vmem:[%s3999_s2 + $0x48] sm:$0xff]  }
  0x17   : > { %2934 = vmatprep.subr.bf16.mxu0 %v3231_v8  ;;  %2948 = vmatprep.subr.bf16.mxu1 %v3232_v9  ;;  %v377_v47 = vor.u32 %v376_v36, %v373_v34  ;;  %v382_v48 = vrot.slane %v380_v37, 5  ;;  %v387_v49 = vrot.slane %v385_v39, 4  ;;  %v402_v50 = vshll.u32 %v3445_v16, 16  ;;  %v3243_v60 = vld [vmem:[%s3999_s2 + $0x74] sm:$0xff]   ;;  %v3245_v2 = vld [vmem:[%s3999_s2 + $0x6c] sm:$0xff]   ;;  %s2800_s29 = sadd.s32 32, %s3198_s13 }
  0x18   : > { %v364_v35 = vrot.slane %v363_v31, 4  ;;  %v390_v52 = vrot.slane %v388_v43, 5  ;;  %v401_v53 = vrot.slane %v399_v45, 4  ;;  %v408_v57 = vshll.u32 %v350_v42, 16  ;;  %v3250_v19 = vld [vmem:[%s3999_s2 + $0xa8] sm:$0xff]   ;;  %s328_s10 = scalar_lea.vmem %s3998_s1, %s2800_s29  ;;  %v3252_v24 = vld [vmem:[%s3999_s2 + $0xa0] sm:$0xff]   ;;  %s3862_s29 = scalar_lea.vmem %s4002_s5, %s2801_s26 }
  0x19   : > { %v378_v55 = vrot.slane %v377_v47, 4  ;;  %v404_v56 = vrot.slane %v402_v50, 5  ;;  %v396_v59 = vrot.slane %v394_v44, 5  ;;  %v3251_v20 = vld [vmem:[%s3999_s2 + $0xc4] sm:$0xff]   ;;  %v3553_v21 = vld [vmem:[%s328_s10] sm:$0xf]  ;;  %v3598_v45 = vcombine.low %v3436_v13, %v3442_v15 }
  0x1a   : > { %2935 = vmatpush3.bf16.msra.mxu0 %v3231_v8  ;;  %2949 = vmatpush3.bf16.msra.mxu1 %v3232_v9  ;;  %v369_v54 = vsel %vm3481_vm4, %v364_v35, %v368_v41  ;;  %v391_v58 = vor.u32 %v390_v52, %v387_v49  ;;  %v410_v4 = vrot.slane %v408_v57, 5  ;;  %v3247_v9 = vld [vmem:[%s3999_s2 + $0xd4] ss:$0 sps:$4 sm:$0xff]   ;;  %v3254_v31 = vld [vmem:[%s3999_s2 + $0x98] sm:$0xff]   ;;  %v3262_v47 = vld [vmem:[%s3999_s2 + $0xe8] sm:$0xff]   ;;  %v3634_v52 = vcombine.low %v3445_v16, %v3553_v21 }
  0x1b   : > { %2936 = vmatprep.subr.bf16.mxu0 %v3233_v10  ;;  %2950 = vmatprep.subr.bf16.mxu1 %v3234_v11  ;;  %v383_v61 = vsel %vm3481_vm4, %v378_v55, %v382_v48  ;;  %v405_v62 = vor.u32 %v404_v56, %v401_v53  ;;  %v952_v12 = vsel %vm479_vm0, %v3247_v9, 0  ;;  %v3255_v35 = vld [vmem:[%s3999_s2 + $0xb4] sm:$0xff]   ;;  %v3257_v39 = vld [vmem:[%s3999_s2 + $0x11c] ss:$0 sps:$4 sm:$0xff]   ;;  %v3263_v13 = vld [vmem:[%s3999_s2 + $0x104] sm:$0xff]   ;;  %vm558_vm5 = vcmask 257024  }
  0x1c   : > { %v3507_v0 = vcombine.low %v369_v54, %v383_v61  ;;  %v392_v1 = vrot.slane %v391_v58, 4  ;;  %v3256_v36 = vld [vmem:[%s3999_s2 + $0x90] sm:$0xff]   ;;  %v3258_v41 = vld [vmem:[%s3999_s2 + $0xf8] ss:$0 sps:$4 sm:$0xff]   ;;  %v1171_v40 = vsel %vm479_vm0, %v3257_v39, 0  ;;  %v3264_v15 = vld [vmem:[%s3999_s2 + $0xe0] sm:$0xff]  }
  0x1d   : > { %v406_v3 = vrot.slane %v405_v62, 4  ;;  %v3259_v42 = vld [vmem:[%s3999_s2 + $0x114] sm:$0xff]   ;;  %v1250_v43 = vsel %vm479_vm0, %v3258_v41, 0  ;;  %v3265_v48 = vld [vmem:[%s3999_s2 + $0xfc] sm:$0xff]   ;;  %v3268_v50 = vld [vmem:[%s3999_s2 + $0x164] ss:$0 sps:$4 sm:$0xff]  }
  0x1e   : > { %2937 = vmatpush3.bf16.msra.mxu0 %v3233_v10  ;;  %2951 = vmatpush3.bf16.msra.mxu1 %v3234_v11  ;;  %v397_v5 = vsel %vm3481_vm4, %v392_v1, %v396_v59  ;;  %v3248_v10 = vld [vmem:[%s3999_s2 + $0xb0] ss:$0 sps:$4 sm:$0xff]   ;;  %v3266_v49 = vld [vmem:[%s3999_s2 + $0xd8] sm:$0xff]   ;;  %v1380_v53 = vsel %vm479_vm0, %v3268_v50, 0  ;;  %v3275_v59 = vld [vmem:[%s3999_s2 + $0x128] sm:$0xff]  }
  0x1f   : > { %3182 = vmatprep.subr.msk.bf16.mxu0 %vm479_vm0, %v3237_v17  ;;  %3183 = vmatprep.subr.msk.bf16.mxu1 %vm479_vm0, %v3238_v18  ;;  %v3516_v6 = vcombine.low %v383_v61, %v397_v5  ;;  %v411_v8 = vsel %vm3481_vm4, %v406_v3, %v410_v4  ;;  %v3249_v17 = vld [vmem:[%s3999_s2 + $0xcc] sm:$0xff]   ;;  %v1031_v18 = vsel %vm479_vm0, %v3248_v10, 0  ;;  %v3270_v54 = vld [vmem:[%s3999_s2 + $0x15c] sm:$0xff]   ;;  %v3272_v16 = vld [vmem:[%s3999_s2 + $0x154] sm:$0xff]  }
  0x20   : > { %v3529_v11 = vcombine.low %v397_v5, %v411_v8  ;;  %v3260_v44 = vld [vmem:[%s3999_s2 + $0xf0] sm:$0xff]   ;;  %v3271_v56 = vld [vmem:[%s3999_s2 + $0x138] sm:$0xff]   ;;  %v3277_v61 = vld [vmem:[%s3999_s2 + $0x120] sm:$0xff]  }
  0x21   : > { %2939 = vmatmul.mubr.msk.bf16.vlgmr.msra.gmra.mxu0 %vm472_vm1, %v3459_v22  ;;  %2953 = vmatmul.mubr.msk.bf16.vlgmr.msra.gmra.mxu1 %vm472_vm1, %v3459_v22  ;;  %v3273_v57 = vld [vmem:[%s3999_s2 + $0x130] sm:$0xff]   ;;  %v3278_v62 = vld [vmem:[%s3999_s2 + $0x1ac] ss:$0 sps:$4 sm:$0xff]   ;;  %v3281_v4 = vld [vmem:[%s3999_s2 + $0x180] sm:$0xff]  }
  0x22   : > { %2957 = vmatpush3.bf16.msra.mxu0 %v743_v25  ;;  %2971 = vmatpush3.bf16.msra.mxu1 %v822_v28  ;;  %v413_v25 = vshrl.u32 %v3553_v21, 16  ;;  %v3253_v28 = vld [vmem:[%s3999_s2 + $0xbc] sm:$0xff]   ;;  %v3274_v58 = vld [vmem:[%s3999_s2 + $0x14c] sm:$0xff]   ;;  %v1589_v1 = vsel %vm479_vm0, %v3278_v62, 0 }
  0x23   : > { %2958 = vmatprep.subr.bf16.mxu0 %v3239_v23  ;;  %2972 = vmatprep.subr.bf16.mxu1 %v3240_v26  ;;  %v3282_v5 = vld [vmem:[%s3999_s2 + $0x19c] sm:$0xff]  }
  0x24   : > { %2980 = vmatprep.mubr.msk.bf16.mxu1 %vm472_vm1, %v3439_v14  ;;  %2966 = vmatprep.mubr.msk.bf16.mxu0 %vm472_vm1, %v3507_v0  ;;  %v415_v29 = vrot.slane %v413_v25, 4  ;;  %v3293_v25 = vld [vmem:[%s3999_s2 + $0x1e4] sm:$0xff]  }
  0x26   : > { %2959 = vmatpush3.bf16.msra.mxu0 %v3239_v23  ;;  %2973 = vmatpush3.bf16.msra.mxu1 %v3240_v26  ;;  %v352_v23 = vld [vmem:[%s328_s10 + $0x4] sm:$0x1]  ;;  %v416_v26 = vshll.u32 %v3553_v21, 16 }
  0x27   : > { %2960 = vmatprep.subr.bf16.mxu0 %v3241_v46  ;;  %2974 = vmatprep.subr.bf16.mxu1 %v3242_v51  ;;  %v422_v27 = vshll.u32 %v352_v23, 16  ;;  %v3291_v23 = vld [vmem:[%s3999_s2 + $0x1ec] sm:$0xff]  }
  0x28   : > { %v418_v30 = vrot.slane %v416_v26, 5  ;;  %v3294_v26 = vld [vmem:[%s3999_s2 + $0x1b8] sm:$0xff]  }
  0x29   : > { %v424_v32 = vrot.slane %v422_v27, 5  ;;  %v3295_v27 = vld [vmem:[%s3999_s2 + $0x1dc] sm:$0xff]  }
  0x2a   : > { %2961 = vmatpush3.bf16.msra.mxu0 %v3241_v46  ;;  %2975 = vmatpush3.bf16.msra.mxu1 %v3242_v51  ;;  %v419_v33 = vor.u32 %v418_v30, %v415_v29  ;;  %v3261_v46 = vld [vmem:[%s3999_s2 + $0x10c] sm:$0xff]   ;;  %v3269_v51 = vld [vmem:[%s3999_s2 + $0x140] ss:$0 sps:$4 sm:$0xff]   ;;  %v3297_v29 = vld [vmem:[%s3999_s2 + $0x1d4] sm:$0xff]  }
  0x2b   : > { %2962 = vmatprep.subr.bf16.mxu0 %v3243_v60  ;;  %2976 = vmatprep.subr.bf16.mxu1 %v3244_v63  ;;  %v1459_v55 = vsel %vm479_vm0, %v3269_v51, 0  ;;  %v3298_v30 = vld [vmem:[%s3999_s2 + $0x23c] ss:$0 sps:$4 sm:$0xff]  }
  0x2c   : > { %v420_v34 = vrot.slane %v419_v33, 4  ;;  %v3300_v33 = vld [vmem:[%s3999_s2 + $0x234] sm:$0xff]  }
  0x2e   : > { %2963 = vmatpush3.bf16.msra.mxu0 %v3243_v60  ;;  %2977 = vmatpush3.bf16.msra.mxu1 %v3244_v63  ;;  %v425_v37 = vsel %vm3481_vm4, %v420_v34, %v424_v32  ;;  %v3276_v60 = vld [vmem:[%s3999_s2 + $0x144] sm:$0xff]   ;;  %v1993_v32 = vsel %vm479_vm0, %v3298_v30, 0 }
  0x2f   : > { %2964 = vmatprep.subr.bf16.mxu0 %v3245_v2  ;;  %2978 = vmatprep.subr.bf16.mxu1 %v3246_v7  ;;  %v3578_v38 = vcombine.low %v411_v8, %v425_v37  ;;  %v3279_v63 = vld [vmem:[%s3999_s2 + $0x188] ss:$0 sps:$4 sm:$0xff]   ;;  %v3284_v8 = vld [vmem:[%s3999_s2 + $0x194] sm:$0xff]  }
  0x30   : > { %v1668_v3 = vsel %vm479_vm0, %v3279_v63, 0  ;;  %v3303_v37 = vld [vmem:[%s3999_s2 + $0x208] sm:$0xff]  }
  0x32   : > { %2965 = vmatpush3.bf16.msra.mxu0 %v3245_v2  ;;  %2979 = vmatpush3.bf16.msra.mxu1 %v3246_v7  ;;  %v3280_v2 = vld [vmem:[%s3999_s2 + $0x1a4] sm:$0xff]   ;;  %v3283_v7 = vld [vmem:[%s3999_s2 + $0x178] sm:$0xff]  }
  0x33   : > { %3184 = vmatprep.subr.msk.bf16.mxu0 %vm479_vm0, %v3247_v9  ;;  %3185 = vmatprep.subr.msk.bf16.mxu1 %vm479_vm0, %v3248_v10  ;;  %v3285_v9 = vld [vmem:[%s3999_s2 + $0x170] sm:$0xff]  }
  0x34   : > { %v3286_v10 = vld [vmem:[%s3999_s2 + $0x18c] sm:$0xff]  }
  0x35   : > { %2967 = vmatmul.mubr.msk.bf16.vlgmr.msra.gmra.mxu0 %vm472_vm1, %v3529_v11  ;;  %2981 = vmatmul.mubr.msk.bf16.vlgmr.msra.gmra.mxu1 %vm472_vm1, %v3459_v22 }
  0x36   : > { %2985 = vmatpush3.bf16.msra.mxu0 %v952_v12  ;;  %2999 = vmatpush3.bf16.msra.mxu1 %v1031_v18  ;;  %v3287_v12 = vld [vmem:[%s3999_s2 + $0x168] sm:$0xff]   ;;  %v3289_v18 = vld [vmem:[%s3999_s2 + $0x1f4] ss:$0 sps:$4 sm:$0xff]  }
  0x37   : > { %2986 = vmatprep.subr.bf16.mxu0 %v3249_v17  ;;  %3000 = vmatprep.subr.bf16.mxu1 %v3250_v19  ;;  %v1859_v21 = vsel %vm479_vm0, %v3289_v18, 0 }
  0x38   : > { %2994 = vmatprep.mubr.msk.bf16.mxu0 %vm472_vm1, %v3507_v0  ;;  %3008 = vmatprep.mubr.msk.bf16.mxu1 %vm472_vm1, %v3439_v14 }
  0x3a   : > { %2987 = vmatpush3.bf16.msra.mxu0 %v3249_v17  ;;  %3001 = vmatpush3.bf16.msra.mxu1 %v3250_v19  ;;  %v3288_v17 = vld [vmem:[%s3999_s2 + $0x1d0] ss:$0 sps:$4 sm:$0xff]  }
  0x3b   : > { %2988 = vmatprep.subr.bf16.mxu0 %v3251_v20  ;;  %3002 = vmatprep.subr.bf16.mxu1 %v3252_v24  ;;  %v1757_v19 = vsel %vm479_vm0, %v3288_v17, 0 }
  0x3e   : > { %2989 = vmatpush3.bf16.msra.mxu0 %v3251_v20  ;;  %3003 = vmatpush3.bf16.msra.mxu1 %v3252_v24  ;;  %v3290_v20 = vld [vmem:[%s3999_s2 + $0x1c8] sm:$0xff]   ;;  %v3292_v24 = vld [vmem:[%s3999_s2 + $0x1c0] sm:$0xff]  }
  0x3f   : > { %2990 = vmatprep.subr.bf16.mxu0 %v3253_v28  ;;  %3004 = vmatprep.subr.bf16.mxu1 %v3254_v31 }
  0x42   : > { %2991 = vmatpush3.bf16.msra.mxu0 %v3253_v28  ;;  %3005 = vmatpush3.bf16.msra.mxu1 %v3254_v31  ;;  %v3296_v28 = vld [vmem:[%s3999_s2 + $0x1b0] sm:$0xff]   ;;  %v3299_v31 = vld [vmem:[%s3999_s2 + $0x218] ss:$0 sps:$4 sm:$0xff]  }
  0x43   : > { %2992 = vmatprep.subr.bf16.mxu0 %v3255_v35  ;;  %3006 = vmatprep.subr.bf16.mxu1 %v3256_v36  ;;  %v2072_v34 = vsel %vm479_vm0, %v3299_v31, 0 }
  0x46   : > { %2993 = vmatpush3.bf16.msra.mxu0 %v3255_v35  ;;  %3007 = vmatpush3.bf16.msra.mxu1 %v3256_v36  ;;  %v3301_v35 = vld [vmem:[%s3999_s2 + $0x210] sm:$0xff]  }
  0x47   : > { %3186 = vmatprep.subr.msk.bf16.mxu0 %vm479_vm0, %v3257_v39  ;;  %3187 = vmatprep.subr.msk.bf16.mxu1 %vm479_vm0, %v3258_v41  ;;  %v3302_v36 = vld [vmem:[%s3999_s2 + $0x22c] sm:$0xff]   ;;  %v3304_v39 = vld [vmem:[%s3999_s2 + $0x224] sm:$0xff]  }
  0x48   : > { %v3305_v41 = vld [vmem:[%s3999_s2 + $0x200] sm:$0xff]  }
  0x49   : > { %2995 = vmatmul.mubr.msk.bf16.vlgmr.msra.gmra.mxu0 %vm472_vm1, %v3529_v11  ;;  %3009 = vmatmul.mubr.msk.bf16.vlgmr.msra.gmra.mxu1 %vm472_vm1, %v3459_v22 }
  0x4a   : > { %3013 = vmatpush3.bf16.msra.mxu0 %v1171_v40  ;;  %3027 = vmatpush3.bf16.msra.mxu1 %v1250_v43  ;;  %v3308_v40 = vld [vmem:[%s3999_s2 + $0x260] ss:$0 sps:$4 sm:$0xff]  }
  0x4b   : > { %3014 = vmatprep.subr.bf16.mxu0 %v3259_v42  ;;  %3028 = vmatprep.subr.bf16.mxu1 %v3260_v44  ;;  %v2161_v43 = vsel %vm479_vm0, %v3308_v40, 0 }
  0x4c   : > { %3022 = vmatprep.mubr.msk.bf16.mxu0 %vm472_vm1, %v3598_v45  ;;  %3036 = vmatprep.mubr.msk.bf16.mxu1 %vm472_vm1, %v3439_v14 }
  0x4e   : > { %3015 = vmatpush3.bf16.msra.mxu0 %v3259_v42  ;;  %3029 = vmatpush3.bf16.msra.mxu1 %v3260_v44  ;;  %v3309_v42 = vld [vmem:[%s3999_s2 + $0x284] ss:$0 sps:$4 sm:$0xff]   ;;  %v3310_v44 = vld [vmem:[%s3999_s2 + $0x258] sm:$0xff]  }
  0x4f   : > { %3016 = vmatprep.subr.bf16.mxu0 %v3261_v46  ;;  %3030 = vmatprep.subr.bf16.mxu1 %v3262_v47 }
  0x52   : > { %3017 = vmatpush3.bf16.msra.mxu0 %v3261_v46  ;;  %3031 = vmatpush3.bf16.msra.mxu1 %v3262_v47  ;;  %v2254_v46 = vsel %vm479_vm0, %v3309_v42, 0  ;;  %v3311_v47 = vld [vmem:[%s3999_s2 + $0x27c] sm:$0xff]  }
  0x53   : > { %3018 = vmatprep.subr.bf16.mxu0 %v3263_v13  ;;  %3032 = vmatprep.subr.bf16.mxu1 %v3264_v15 }
  0x56   : > { %3019 = vmatpush3.bf16.msra.mxu0 %v3263_v13  ;;  %3033 = vmatpush3.bf16.msra.mxu1 %v3264_v15  ;;  %v3312_v13 = vld [vmem:[%s3999_s2 + $0x250] sm:$0xff]  }
  0x57   : > { %3020 = vmatprep.subr.bf16.mxu0 %v3265_v48  ;;  %3034 = vmatprep.subr.bf16.mxu1 %v3266_v49  ;;  %v3313_v15 = vld [vmem:[%s3999_s2 + $0x274] sm:$0xff]  }
  0x5a   : > { %3021 = vmatpush3.bf16.msra.mxu0 %v3265_v48  ;;  %3035 = vmatpush3.bf16.msra.mxu1 %v3266_v49  ;;  %v3847_v48 = vld [vmem:[%s4000_s3] ss:$0 sm:$0xff] }
  0x5b   : > { %3188 = vmatprep.subr.msk.bf16.mxu0 %vm479_vm0, %v3268_v50  ;;  %3189 = vmatprep.subr.msk.bf16.mxu1 %vm479_vm0, %v3269_v51  ;;  %v3852_v50 = vld [vmem:[%s4001_s4] ss:$0 sm:$0xff] }
  0x5d   : > { %3023 = vmatmul.mubr.msk.bf16.vlgmr.msra.gmra.mxu0 %vm472_vm1, %v3634_v52  ;;  %3037 = vmatmul.mubr.msk.bf16.vlgmr.msra.gmra.mxu1 %vm472_vm1, %v3459_v22 }
  0x5e   : > { %3041 = vmatpush3.bf16.msra.mxu0 %v1380_v53  ;;  %3055 = vmatpush3.bf16.msra.mxu1 %v1459_v55 }
  0x5f   : > { %3042 = vmatprep.subr.bf16.mxu0 %v3270_v54  ;;  %3056 = vmatprep.subr.bf16.mxu1 %v3271_v56 }
  0x60   : > { %3050 = vmatprep.mubr.msk.bf16.mxu0 %vm472_vm1, %v3598_v45  ;;  %3064 = vmatprep.mubr.msk.bf16.mxu1 %vm472_vm1, %v3439_v14 }
  0x62   : > { %3043 = vmatpush3.bf16.msra.mxu0 %v3270_v54  ;;  %3057 = vmatpush3.bf16.msra.mxu1 %v3271_v56 }
  0x63   : > { %3044 = vmatprep.subr.bf16.mxu0 %v3272_v16  ;;  %3058 = vmatprep.subr.bf16.mxu1 %v3273_v57 }
  0x66   : > { %3045 = vmatpush3.bf16.msra.mxu0 %v3272_v16  ;;  %3059 = vmatpush3.bf16.msra.mxu1 %v3273_v57 }
  0x67   : > { %3046 = vmatprep.subr.bf16.mxu0 %v3274_v58  ;;  %3060 = vmatprep.subr.bf16.mxu1 %v3275_v59 }
  0x6a   : > { %3047 = vmatpush3.bf16.msra.mxu0 %v3274_v58  ;;  %3061 = vmatpush3.bf16.msra.mxu1 %v3275_v59 }
  0x6b   : > { %3048 = vmatprep.subr.bf16.mxu0 %v3276_v60  ;;  %3062 = vmatprep.subr.bf16.mxu1 %v3277_v61 }
  0x6e   : > { %3049 = vmatpush3.bf16.msra.mxu0 %v3276_v60  ;;  %3063 = vmatpush3.bf16.msra.mxu1 %v3277_v61 }
  0x6f   : > { %3190 = vmatprep.subr.msk.bf16.mxu0 %vm479_vm0, %v3278_v62  ;;  %3191 = vmatprep.subr.msk.bf16.mxu1 %vm479_vm0, %v3279_v63 }
  0x71   : > { %3051 = vmatmul.mubr.msk.bf16.vlgmr.msra.gmra.mxu0 %vm472_vm1, %v3634_v52  ;;  %3065 = vmatmul.mubr.msk.bf16.vlgmr.msra.gmra.mxu1 %vm472_vm1, %v3459_v22 }
  0x72   : > { %3069 = vmatpush3.bf16.msra.mxu0 %v1589_v1  ;;  %3083 = vmatpush3.bf16.msra.mxu1 %v1668_v3 }
  0x73   : > { %3070 = vmatprep.subr.bf16.mxu0 %v3280_v2  ;;  %3084 = vmatprep.subr.bf16.mxu1 %v3281_v4 }
  0x74   : > { %3078 = vmatprep.mubr.msk.bf16.mxu0 %vm472_vm1, %v3507_v0  ;;  %3092 = vmatprep.mubr.msk.bf16.mxu1 %vm472_vm1, %v3439_v14 }
  0x76   : > { %3071 = vmatpush3.bf16.msra.mxu0 %v3280_v2  ;;  %3085 = vmatpush3.bf16.msra.mxu1 %v3281_v4 }
  0x77   : > { %3072 = vmatprep.subr.bf16.mxu0 %v3282_v5  ;;  %3086 = vmatprep.subr.bf16.mxu1 %v3283_v7 }
  0x7a   : > { %3073 = vmatpush3.bf16.msra.mxu0 %v3282_v5  ;;  %3087 = vmatpush3.bf16.msra.mxu1 %v3283_v7 }
  0x7b   : > { %3074 = vmatprep.subr.bf16.mxu0 %v3284_v8  ;;  %3088 = vmatprep.subr.bf16.mxu1 %v3285_v9 }
  0x7e   : > { %3075 = vmatpush3.bf16.msra.mxu0 %v3284_v8  ;;  %3089 = vmatpush3.bf16.msra.mxu1 %v3285_v9 }
  0x7f   : > { %3076 = vmatprep.subr.bf16.mxu0 %v3286_v10  ;;  %3090 = vmatprep.subr.bf16.mxu1 %v3287_v12 }
  0x82   : > { %3077 = vmatpush3.bf16.msra.mxu0 %v3286_v10  ;;  %3091 = vmatpush3.bf16.msra.mxu1 %v3287_v12 }
  0x83   : > { %3192 = vmatprep.subr.msk.bf16.mxu0 %vm479_vm0, %v3288_v17  ;;  %3193 = vmatprep.subr.msk.bf16.mxu1 %vm479_vm0, %v3289_v18 }
  0x85   : > { %3079 = vmatmul.mubr.msk.bf16.vlgmr.msra.gmra.mxu0 %vm472_vm1, %v3529_v11  ;;  %3093 = vmatmul.mubr.msk.bf16.vlgmr.msra.gmra.mxu1 %vm472_vm1, %v3459_v22 }
  0x86   : > { %3097 = vmatpush3.bf16.msra.mxu0 %v1757_v19  ;;  %3111 = vmatpush3.bf16.msra.mxu1 %v1859_v21 }
  0x87   : > { %3098 = vmatprep.subr.bf16.mxu0 %v3290_v20  ;;  %3112 = vmatprep.subr.bf16.mxu1 %v3291_v23 }
  0x88   : > { %3106 = vmatprep.mubr.msk.bf16.mxu0 %vm472_vm1, %v3598_v45  ;;  %3120 = vmatprep.mubr.msk.bf16.mxu1 %vm472_vm1, %v3516_v6 }
  0x8a   : > { %3099 = vmatpush3.bf16.msra.mxu0 %v3290_v20  ;;  %3113 = vmatpush3.bf16.msra.mxu1 %v3291_v23 }
  0x8b   : > { %3100 = vmatprep.subr.bf16.mxu0 %v3292_v24  ;;  %3114 = vmatprep.subr.bf16.mxu1 %v3293_v25 }
  0x8e   : > { %3101 = vmatpush3.bf16.msra.mxu0 %v3292_v24  ;;  %3115 = vmatpush3.bf16.msra.mxu1 %v3293_v25 }
  0x8f   : > { %3102 = vmatprep.subr.bf16.mxu0 %v3294_v26  ;;  %3116 = vmatprep.subr.bf16.mxu1 %v3295_v27 }
  0x92   : > { %3103 = vmatpush3.bf16.msra.mxu0 %v3294_v26  ;;  %3117 = vmatpush3.bf16.msra.mxu1 %v3295_v27 }
  0x93   : > { %3104 = vmatprep.subr.bf16.mxu0 %v3296_v28  ;;  %3118 = vmatprep.subr.bf16.mxu1 %v3297_v29 }
  0x96   : > { %3105 = vmatpush3.bf16.msra.mxu0 %v3296_v28  ;;  %3119 = vmatpush3.bf16.msra.mxu1 %v3297_v29 }
  0x97   : > { %3194 = vmatprep.subr.msk.bf16.mxu0 %vm479_vm0, %v3298_v30  ;;  %3195 = vmatprep.subr.msk.bf16.mxu1 %vm479_vm0, %v3299_v31 }
  0x99   : > { %3107 = vmatmul.mubr.msk.bf16.vlgmr.msra.gmra.mxu0 %vm472_vm1, %v3634_v52  ;;  %3121 = vmatmul.mubr.msk.bf16.vlgmr.msra.gmra.mxu1 %vm472_vm1, %v3578_v38 }
  0x9a   : > { %3125 = vmatpush3.bf16.msra.mxu0 %v1993_v32  ;;  %3139 = vmatpush3.bf16.msra.mxu1 %v2072_v34 }
  0x9b   : > { %3126 = vmatprep.subr.bf16.mxu0 %v3300_v33  ;;  %3140 = vmatprep.subr.bf16.mxu1 %v3301_v35 }
  0x9c   : > { %3134 = vmatprep.mubr.msk.bf16.mxu0 %vm472_vm1, %v3507_v0  ;;  %3148 = vmatprep.mubr.msk.bf16.mxu1 %vm472_vm1, %v3439_v14  ;;  %v3306_v0 = vld [vmem:[%s3999_s2 + $0x21c] sm:$0xff]  }
  0x9d   : > { %v3307_v14 = vld [vmem:[%s3999_s2 + $0x1f8] sm:$0xff]  }
  0x9e   : > { %3127 = vmatpush3.bf16.msra.mxu0 %v3300_v33  ;;  %3141 = vmatpush3.bf16.msra.mxu1 %v3301_v35 }
  0x9f   : > { %3128 = vmatprep.subr.bf16.mxu0 %v3302_v36  ;;  %3142 = vmatprep.subr.bf16.mxu1 %v3303_v37 }
  0xa2   : > { %3129 = vmatpush3.bf16.msra.mxu0 %v3302_v36  ;;  %3143 = vmatpush3.bf16.msra.mxu1 %v3303_v37 }
  0xa3   : > { %3130 = vmatprep.subr.bf16.mxu0 %v3304_v39  ;;  %3144 = vmatprep.subr.bf16.mxu1 %v3305_v41 }
  0xa6   : > { %3131 = vmatpush3.bf16.msra.mxu0 %v3304_v39  ;;  %3145 = vmatpush3.bf16.msra.mxu1 %v3305_v41 }
  0xa7   : > { %3132 = vmatprep.subr.bf16.mxu0 %v3306_v0  ;;  %3146 = vmatprep.subr.bf16.mxu1 %v3307_v14 }
  0xaa   : > { %3133 = vmatpush3.bf16.msra.mxu0 %v3306_v0  ;;  %3147 = vmatpush3.bf16.msra.mxu1 %v3307_v14 }
  0xab   : > { %3196 = vmatprep.subr.msk.bf16.mxu0 %vm479_vm0, %v3308_v40  ;;  %3197 = vmatprep.subr.msk.bf16.mxu1 %vm479_vm0, %v3309_v42 }
  0xad   : > { %3135 = vmatmul.mubr.msk.bf16.vlgmr.msra.gmra.mxu0 %vm472_vm1, %v3529_v11  ;;  %3149 = vmatmul.mubr.msk.bf16.vlgmr.msra.gmra.mxu1 %vm472_vm1, %v3459_v22  ;;  %v3314_v22 = vld [vmem:[%s3999_s2 + $0x248] sm:$0xff]  }
  0xae   : > { %3153 = vmatpush3.bf16.msra.mxu0 %v2161_v43  ;;  %3167 = vmatpush3.bf16.msra.mxu1 %v2254_v46  ;;  %v3315_v11 = vld [vmem:[%s3999_s2 + $0x26c] sm:$0xff]  }
  0xaf   : > { %3154 = vmatprep.subr.bf16.mxu0 %v3310_v44  ;;  %3168 = vmatprep.subr.bf16.mxu1 %v3311_v47 }
  0xb0   : > { %3162 = vmatprep.mubr.msk.bf16.mxu0 %vm472_vm1, %v3598_v45  ;;  %3176 = vmatprep.mubr.msk.bf16.mxu1 %vm472_vm1, %v3516_v6  ;;  %v3316_v6 = vld [vmem:[%s3999_s2 + $0x240] sm:$0xff]  }
  0xb1   : > { %v3317_v45 = vld [vmem:[%s3999_s2 + $0x264] sm:$0xff]  }
  0xb2   : > { %3155 = vmatpush3.bf16.msra.mxu0 %v3310_v44  ;;  %3169 = vmatpush3.bf16.msra.mxu1 %v3311_v47 }
  0xb3   : > { %3156 = vmatprep.subr.bf16.mxu0 %v3312_v13  ;;  %3170 = vmatprep.subr.bf16.mxu1 %v3313_v15 }
  0xb6   : > { %3157 = vmatpush3.bf16.msra.mxu0 %v3312_v13  ;;  %3171 = vmatpush3.bf16.msra.mxu1 %v3313_v15 }
  0xb7   : > { %3158 = vmatprep.subr.bf16.mxu0 %v3314_v22  ;;  %3172 = vmatprep.subr.bf16.mxu1 %v3315_v11 }
  0xba   : > { %3159 = vmatpush3.bf16.msra.mxu0 %v3314_v22  ;;  %3173 = vmatpush3.bf16.msra.mxu1 %v3315_v11 }
  0xbb   : > { %3160 = vmatprep.subr.bf16.mxu0 %v3316_v6  ;;  %3174 = vmatprep.subr.bf16.mxu1 %v3317_v45 }
  0xbe   : > { %3161 = vmatpush3.bf16.msra.mxu0 %v3316_v6  ;;  %3175 = vmatpush3.bf16.msra.mxu1 %v3317_v45 }
  0xc1   : > { %3163 = vmatmul.mubr.msk.bf16.vlgmr.msra.gmra.mxu0 %vm472_vm1, %v3634_v52  ;;  %3177 = vmatmul.mubr.msk.bf16.vlgmr.msra.gmra.mxu1 %vm472_vm1, %v3578_v38 }
  0xe1   : > { %v2940_v49 = vpop.f32.mrf.mxu0  ;;  %v2954_v53 = vpop.f32.mrf.mxu1 }
  0xe2   : > { %v541_v51 = vmul.f32 %v2940_v49, %v3847_v48  ;;  %v661_v52 = vmul.f32 %v2954_v53, %v3847_v48 }
  0xe3   : > { %v517_v54 = vpop.f32.mrf.mxu0  ;;  %v637_v56 = vpop.f32.mrf.mxu1 }
  0xe4   : > { %v552_v38 = vadd.f32 %v3852_v50, %v541_v51  ;;  %v539_v55 = vmul.f32 %v3847_v48, %v517_v54  ;;  %v672_v16 = vadd.f32 %v3852_v50, %v661_v52  ;;  %v659_v57 = vmul.f32 %v3847_v48, %v637_v56 }
  0xe5   : > { %v2941_v58 = vpop.f32.mrf.mxu0  ;;  %v2955_v62 = vpop.f32.mrf.mxu1 }
  0xe6   : > { %v556_v59 = vpack.c.bf16 %v552_v38, %v552_v38  ;;  %v550_v60 = vadd.f32 %v3852_v50, %v539_v55  ;;  %v542_v61 = vmul.f32 %v2941_v58, %v3847_v48  ;;  %v676_v63 = vpack.c.bf16 %v672_v16, %v672_v16 }
  0xe7   : > { %v670_v1 = vadd.f32 %v3852_v50, %v659_v57  ;;  %v662_v2 = vmul.f32 %v2955_v62, %v3847_v48  ;;  %v520_v3 = vpop.f32.mrf.mxu0  ;;  %v640_v8 = vpop.f32.mrf.mxu1 }
  0xe8   : > { %561 = vst.msk [vmem:[%s3862_s29 + $0x40] sm:$0xf] %vm558_vm5, %v556_v59  ;;  %v554_v4 = vpack.c.bf16 %v550_v60, %v550_v60  ;;  %v553_v5 = vadd.f32 %v3852_v50, %v542_v61  ;;  %v540_v7 = vmul.f32 %v3847_v48, %v520_v3  ;;  %2497 = vst.msk [vmem:[%s3862_s29 + $0x44] sm:$0xf] %vm558_vm5, %v676_v63 }
  0xe9   : > { %v674_v9 = vpack.c.bf16 %v670_v1, %v670_v1  ;;  %v673_v10 = vadd.f32 %v3852_v50, %v662_v2  ;;  %v660_v12 = vmul.f32 %v3847_v48, %v640_v8 }
  0xea   : > { %559 = vst.msk [vmem:[%s3862_s29] sm:$0xf] %vm558_vm5, %v554_v4  ;;  %v557_v17 = vpack.c.bf16 %v553_v5, %v553_v5  ;;  %v551_v18 = vadd.f32 %v3852_v50, %v540_v7 }
  0xeb   : > { %2495 = vst.msk [vmem:[%s3862_s29 + $0x4] sm:$0xf] %vm558_vm5, %v674_v9  ;;  %v677_v19 = vpack.c.bf16 %v673_v10, %v673_v10  ;;  %v671_v20 = vadd.f32 %v3852_v50, %v660_v12 }
  0xec   : > { %562 = vst.msk [vmem:[%s3862_s29 + $0x60] sm:$0xf] %vm558_vm5, %v557_v17  ;;  %v555_v21 = vpack.c.bf16 %v551_v18, %v551_v18 }
  0xed   : > { %2498 = vst.msk [vmem:[%s3862_s29 + $0x64] sm:$0xf] %vm558_vm5, %v677_v19  ;;  %v675_v23 = vpack.c.bf16 %v671_v20, %v671_v20 }
  0xee   : > { %560 = vst.msk [vmem:[%s3862_s29 + $0x20] sm:$0xf] %vm558_vm5, %v555_v21 }
  0xef   : > { %2496 = vst.msk [vmem:[%s3862_s29 + $0x24] sm:$0xf] %vm558_vm5, %v675_v23 }
  0xf5   : > { %v2968_v24 = vpop.f32.mrf.mxu0  ;;  %v2982_v25 = vpop.f32.mrf.mxu1 }
  0xf6   : > { %v867_v26 = vadd.f32 %v2982_v25, %v2968_v24 }
  0xf7   : > { %v779_v27 = vpop.f32.mrf.mxu0  ;;  %v858_v28 = vpop.f32.mrf.mxu1 }
  0xf8   : > { %v882_v29 = vmul.f32 %v3847_v48, %v867_v26  ;;  %v859_v30 = vadd.f32 %v858_v28, %v779_v27 }
  0xf9   : > { %v2969_v31 = vpop.f32.mrf.mxu0  ;;  %v2983_v32 = vpop.f32.mrf.mxu1 }
  0xfa   : > { %v893_v33 = vadd.f32 %v3852_v50, %v882_v29  ;;  %v880_v34 = vmul.f32 %v3847_v48, %v859_v30  ;;  %v870_v35 = vadd.f32 %v2983_v32, %v2969_v31 }
  0xfb   : > { %v782_v36 = vpop.f32.mrf.mxu0  ;;  %v861_v37 = vpop.f32.mrf.mxu1 }
  0xfc   : > { %v897_v39 = vpack.c.bf16 %v893_v33, %v893_v33  ;;  %v891_v41 = vadd.f32 %v3852_v50, %v880_v34  ;;  %v883_v0 = vmul.f32 %v3847_v48, %v870_v35  ;;  %v862_v14 = vadd.f32 %v861_v37, %v782_v36 }
  0xfe   : > { %2537 = vst.msk [vmem:[%s3862_s29 + $0x48] sm:$0xf] %vm558_vm5, %v897_v39  ;;  %v895_v40 = vpack.c.bf16 %v891_v41, %v891_v41  ;;  %v894_v42 = vadd.f32 %v3852_v50, %v883_v0  ;;  %v881_v43 = vmul.f32 %v3847_v48, %v862_v14 }
 0x100   : > { %2535 = vst.msk [vmem:[%s3862_s29 + $0x8] sm:$0xf] %vm558_vm5, %v895_v40  ;;  %v898_v44 = vpack.c.bf16 %v894_v42, %v894_v42  ;;  %v892_v46 = vadd.f32 %v3852_v50, %v881_v43 }
 0x102   : > { %2538 = vst.msk [vmem:[%s3862_s29 + $0x68] sm:$0xf] %vm558_vm5, %v898_v44  ;;  %v896_v47 = vpack.c.bf16 %v892_v46, %v892_v46 }
 0x104   : > { %2536 = vst.msk [vmem:[%s3862_s29 + $0x28] sm:$0xf] %vm558_vm5, %v896_v47 }
 0x109   : > { %v2996_v13 = vpop.f32.mrf.mxu0  ;;  %v3010_v15 = vpop.f32.mrf.mxu1 }
 0x10a   : > { %v1076_v22 = vadd.f32 %v3010_v15, %v2996_v13 }
 0x10b   : > { %v988_v11 = vpop.f32.mrf.mxu0  ;;  %v1067_v6 = vpop.f32.mrf.mxu1 }
 0x10c   : > { %v1091_v45 = vmul.f32 %v3847_v48, %v1076_v22  ;;  %v1068_v49 = vadd.f32 %v1067_v6, %v988_v11 }
 0x10d   : > { %v2997_v51 = vpop.f32.mrf.mxu0  ;;  %v3011_v53 = vpop.f32.mrf.mxu1 }
 0x10e   : > { %v1102_v52 = vadd.f32 %v3852_v50, %v1091_v45  ;;  %v1089_v54 = vmul.f32 %v3847_v48, %v1068_v49  ;;  %v1079_v38 = vadd.f32 %v3011_v53, %v2997_v51 }
 0x10f   : > { %v991_v55 = vpop.f32.mrf.mxu0  ;;  %v1070_v56 = vpop.f32.mrf.mxu1 }
 0x110   : > { %v1106_v16 = vpack.c.bf16 %v1102_v52, %v1102_v52  ;;  %v1100_v57 = vadd.f32 %v3852_v50, %v1089_v54  ;;  %v1092_v58 = vmul.f32 %v3847_v48, %v1079_v38  ;;  %v1071_v59 = vadd.f32 %v1070_v56, %v991_v55 }
 0x112   : > { %2575 = vst.msk [vmem:[%s3862_s29 + $0x4c] sm:$0xf] %vm558_vm5, %v1106_v16  ;;  %v1104_v60 = vpack.c.bf16 %v1100_v57, %v1100_v57  ;;  %v1103_v61 = vadd.f32 %v3852_v50, %v1092_v58  ;;  %v1090_v62 = vmul.f32 %v3847_v48, %v1071_v59 }
 0x114   : > { %2573 = vst.msk [vmem:[%s3862_s29 + $0xc] sm:$0xf] %vm558_vm5, %v1104_v60  ;;  %v1107_v63 = vpack.c.bf16 %v1103_v61, %v1103_v61  ;;  %v1101_v1 = vadd.f32 %v3852_v50, %v1090_v62 }
 0x116   : > { %2576 = vst.msk [vmem:[%s3862_s29 + $0x6c] sm:$0xf] %vm558_vm5, %v1107_v63  ;;  %v1105_v2 = vpack.c.bf16 %v1101_v1, %v1101_v1 }
 0x118   : > { %2574 = vst.msk [vmem:[%s3862_s29 + $0x2c] sm:$0xf] %vm558_vm5, %v1105_v2 }
 0x11d   : > { %v3024_v3 = vpop.f32.mrf.mxu0  ;;  %v3038_v4 = vpop.f32.mrf.mxu1 }
 0x11e   : > { %v1295_v5 = vadd.f32 %v3038_v4, %v3024_v3 }
 0x11f   : > { %v1207_v7 = vpop.f32.mrf.mxu0  ;;  %v1286_v8 = vpop.f32.mrf.mxu1 }
 0x120   : > { %v1310_v9 = vmul.f32 %v3847_v48, %v1295_v5  ;;  %v1287_v10 = vadd.f32 %v1286_v8, %v1207_v7 }
 0x121   : > { %v3025_v12 = vpop.f32.mrf.mxu0  ;;  %v3039_v17 = vpop.f32.mrf.mxu1 }
 0x122   : > { %v1321_v18 = vadd.f32 %v3852_v50, %v1310_v9  ;;  %v1308_v19 = vmul.f32 %v3847_v48, %v1287_v10  ;;  %v1298_v20 = vadd.f32 %v3039_v17, %v3025_v12 }
 0x123   : > { %v1210_v21 = vpop.f32.mrf.mxu0  ;;  %v1289_v23 = vpop.f32.mrf.mxu1 }
 0x124   : > { %v1325_v24 = vpack.c.bf16 %v1321_v18, %v1321_v18  ;;  %v1319_v25 = vadd.f32 %v3852_v50, %v1308_v19  ;;  %v1311_v26 = vmul.f32 %v3847_v48, %v1298_v20  ;;  %v1290_v27 = vadd.f32 %v1289_v23, %v1210_v21 }
 0x126   : > { %2615 = vst.msk [vmem:[%s3862_s29 + $0x50] sm:$0xf] %vm558_vm5, %v1325_v24  ;;  %v1323_v28 = vpack.c.bf16 %v1319_v25, %v1319_v25  ;;  %v1322_v29 = vadd.f32 %v3852_v50, %v1311_v26  ;;  %v1309_v30 = vmul.f32 %v3847_v48, %v1290_v27 }
 0x128   : > { %2613 = vst.msk [vmem:[%s3862_s29 + $0x10] sm:$0xf] %vm558_vm5, %v1323_v28  ;;  %v1326_v31 = vpack.c.bf16 %v1322_v29, %v1322_v29  ;;  %v1320_v32 = vadd.f32 %v3852_v50, %v1309_v30 }
 0x12a   : > { %2616 = vst.msk [vmem:[%s3862_s29 + $0x70] sm:$0xf] %vm558_vm5, %v1326_v31  ;;  %v1324_v33 = vpack.c.bf16 %v1320_v32, %v1320_v32 }
 0x12c   : > { %2614 = vst.msk [vmem:[%s3862_s29 + $0x30] sm:$0xf] %vm558_vm5, %v1324_v33 }
 0x131   : > { %v3052_v34 = vpop.f32.mrf.mxu0  ;;  %v3066_v35 = vpop.f32.mrf.mxu1 }
 0x132   : > { %v1504_v36 = vadd.f32 %v3066_v35, %v3052_v34 }
 0x133   : > { %v1416_v37 = vpop.f32.mrf.mxu0  ;;  %v1495_v39 = vpop.f32.mrf.mxu1 }
 0x134   : > { %v1519_v41 = vmul.f32 %v3847_v48, %v1504_v36  ;;  %v1496_v0 = vadd.f32 %v1495_v39, %v1416_v37 }
 0x135   : > { %v3053_v14 = vpop.f32.mrf.mxu0  ;;  %v3067_v40 = vpop.f32.mrf.mxu1 }
 0x136   : > { %v1530_v42 = vadd.f32 %v3852_v50, %v1519_v41  ;;  %v1517_v43 = vmul.f32 %v3847_v48, %v1496_v0  ;;  %v1507_v44 = vadd.f32 %v3067_v40, %v3053_v14 }
 0x137   : > { %v1419_v46 = vpop.f32.mrf.mxu0  ;;  %v1498_v47 = vpop.f32.mrf.mxu1 }
 0x138   : > { %v1534_v13 = vpack.c.bf16 %v1530_v42, %v1530_v42  ;;  %v1528_v15 = vadd.f32 %v3852_v50, %v1517_v43  ;;  %v1520_v22 = vmul.f32 %v3847_v48, %v1507_v44  ;;  %v1499_v11 = vadd.f32 %v1498_v47, %v1419_v46 }
 0x13a   : > { %2653 = vst.msk [vmem:[%s3862_s29 + $0x54] sm:$0xf] %vm558_vm5, %v1534_v13  ;;  %v1532_v6 = vpack.c.bf16 %v1528_v15, %v1528_v15  ;;  %v1531_v45 = vadd.f32 %v3852_v50, %v1520_v22  ;;  %v1518_v49 = vmul.f32 %v3847_v48, %v1499_v11 }
 0x13c   : > { %2651 = vst.msk [vmem:[%s3862_s29 + $0x14] sm:$0xf] %vm558_vm5, %v1532_v6  ;;  %v1535_v51 = vpack.c.bf16 %v1531_v45, %v1531_v45  ;;  %v1529_v53 = vadd.f32 %v3852_v50, %v1518_v49 }
 0x13e   : > { %2654 = vst.msk [vmem:[%s3862_s29 + $0x74] sm:$0xf] %vm558_vm5, %v1535_v51  ;;  %v1533_v52 = vpack.c.bf16 %v1529_v53, %v1529_v53 }
 0x140   : > { %2652 = vst.msk [vmem:[%s3862_s29 + $0x34] sm:$0xf] %vm558_vm5, %v1533_v52 }
 0x145   : > { %v3080_v54 = vpop.f32.mrf.mxu0  ;;  %v3094_v38 = vpop.f32.mrf.mxu1 }
 0x146   : > { %v1713_v59 = vadd.f32 %v3094_v38, %v3080_v54 }
 0x147   : > { %v1625_v55 = vpop.f32.mrf.mxu0  ;;  %v1704_v56 = vpop.f32.mrf.mxu1 }
 0x148   : > { %v1705_v62 = vadd.f32 %v1704_v56, %v1625_v55 }
 0x149   : > { %v3081_v16 = vpop.f32.mrf.mxu0  ;;  %v3095_v57 = vpop.f32.mrf.mxu1 }
 0x14a   : > { %v1716_v3 = vadd.f32 %v3095_v57, %v3081_v16 }
 0x14b   : > { %v1628_v58 = vpop.f32.mrf.mxu0  ;;  %v1707_v60 = vpop.f32.mrf.mxu1 }
 0x14c   : > { %v1708_v9 = vadd.f32 %v1707_v60, %v1628_v58 }
 0x159   : > { %v3108_v61 = vpop.f32.mrf.mxu0  ;;  %v3122_v1 = vpop.f32.mrf.mxu1 }
 0x15a   : > { %v1810_v63 = vadd.f32 %v3108_v61, %v1713_v59 }
 0x15b   : > { %v1793_v2 = vpop.f32.mrf.mxu0  ;;  %v1895_v7 = vpop.f32.mrf.mxu1 }
 0x15c   : > { %v1912_v4 = vadd.f32 %v3122_v1, %v1810_v63  ;;  %v1808_v5 = vadd.f32 %v1793_v2, %v1705_v62 }
 0x15d   : > { %v3109_v8 = vpop.f32.mrf.mxu0  ;;  %v3123_v18 = vpop.f32.mrf.mxu1 }
 0x15e   : > { %v1923_v10 = vmul.f32 %v3847_v48, %v1912_v4  ;;  %v1910_v12 = vadd.f32 %v1895_v7, %v1808_v5  ;;  %v1811_v17 = vadd.f32 %v3109_v8, %v1716_v3 }
 0x15f   : > { %v1796_v19 = vpop.f32.mrf.mxu0  ;;  %v1898_v25 = vpop.f32.mrf.mxu1 }
 0x160   : > { %v1934_v20 = vadd.f32 %v3852_v50, %v1923_v10  ;;  %v1921_v21 = vmul.f32 %v3847_v48, %v1910_v12  ;;  %v1913_v23 = vadd.f32 %v3123_v18, %v1811_v17  ;;  %v1809_v24 = vadd.f32 %v1796_v19, %v1708_v9 }
 0x162   : > { %v1938_v26 = vpack.c.bf16 %v1934_v20, %v1934_v20  ;;  %v1932_v27 = vadd.f32 %v3852_v50, %v1921_v21  ;;  %v1924_v28 = vmul.f32 %v3847_v48, %v1913_v23  ;;  %v1911_v29 = vadd.f32 %v1898_v25, %v1809_v24 }
 0x164   : > { %2725 = vst.msk [vmem:[%s3862_s29 + $0x58] sm:$0xf] %vm558_vm5, %v1938_v26  ;;  %v1936_v30 = vpack.c.bf16 %v1932_v27, %v1932_v27  ;;  %v1935_v31 = vadd.f32 %v3852_v50, %v1924_v28  ;;  %v1922_v32 = vmul.f32 %v3847_v48, %v1911_v29 }
 0x166   : > { %2723 = vst.msk [vmem:[%s3862_s29 + $0x18] sm:$0xf] %vm558_vm5, %v1936_v30  ;;  %v1939_v33 = vpack.c.bf16 %v1935_v31, %v1935_v31  ;;  %v1933_v34 = vadd.f32 %v3852_v50, %v1922_v32 }
 0x168   : > { %2726 = vst.msk [vmem:[%s3862_s29 + $0x78] sm:$0xf] %vm558_vm5, %v1939_v33  ;;  %v1937_v35 = vpack.c.bf16 %v1933_v34, %v1933_v34 }
 0x16a   : > { %2724 = vst.msk [vmem:[%s3862_s29 + $0x38] sm:$0xf] %vm558_vm5, %v1937_v35 }
 0x16d   : > { %v3136_v36 = vpop.f32.mrf.mxu0  ;;  %v3150_v37 = vpop.f32.mrf.mxu1 }
 0x16e   : > { %v2117_v42 = vadd.f32 %v3150_v37, %v3136_v36 }
 0x16f   : > { %v2029_v39 = vpop.f32.mrf.mxu0  ;;  %v2108_v41 = vpop.f32.mrf.mxu1 }
 0x170   : > { %v2109_v46 = vadd.f32 %v2108_v41, %v2029_v39 }
 0x171   : > { %v3137_v0 = vpop.f32.mrf.mxu0  ;;  %v3151_v14 = vpop.f32.mrf.mxu1 }
 0x172   : > { %v2120_v22 = vadd.f32 %v3151_v14, %v3137_v0 }
 0x173   : > { %v2032_v40 = vpop.f32.mrf.mxu0  ;;  %v2111_v43 = vpop.f32.mrf.mxu1 }
 0x174   : > { %v2112_v51 = vadd.f32 %v2111_v43, %v2032_v40 }
 0x181   : > { %v3164_v44 = vpop.f32.mrf.mxu0  ;;  %v3178_v13 = vpop.f32.mrf.mxu1 }
 0x182   : > { %v2214_v47 = vadd.f32 %v3164_v44, %v2117_v42 }
 0x183   : > { %v2197_v15 = vpop.f32.mrf.mxu0  ;;  %v2290_v45 = vpop.f32.mrf.mxu1 }
 0x184   : > { %v2307_v11 = vadd.f32 %v3178_v13, %v2214_v47  ;;  %v2212_v6 = vadd.f32 %v2197_v15, %v2109_v46 }
 0x185   : > { %v3165_v49 = vpop.f32.mrf.mxu0  ;;  %v3179_v38 = vpop.f32.mrf.mxu1 }
 0x186   : > { %v2318_v53 = vmul.f32 %v3847_v48, %v2307_v11  ;;  %v2305_v52 = vadd.f32 %v2290_v45, %v2212_v6  ;;  %v2215_v54 = vadd.f32 %v3165_v49, %v2120_v22 }
 0x187   : > { %v2200_v55 = vpop.f32.mrf.mxu0  ;;  %v2293_v59 = vpop.f32.mrf.mxu1 }
 0x188   : > { %v2329_v56 = vadd.f32 %v3852_v50, %v2318_v53  ;;  %v2316_v16 = vmul.f32 %v3847_v48, %v2305_v52  ;;  %v2308_v57 = vadd.f32 %v3179_v38, %v2215_v54  ;;  %v2213_v58 = vadd.f32 %v2200_v55, %v2112_v51 }
 0x18a   : > { %v2333_v60 = vpack.c.bf16 %v2329_v56, %v2329_v56  ;;  %v2327_v61 = vadd.f32 %v3852_v50, %v2316_v16  ;;  %v2319_v62 = vmul.f32 %v3847_v48, %v2308_v57  ;;  %v2306_v63 = vadd.f32 %v2293_v59, %v2213_v58 }
 0x18c   : > { %2795 = vst.msk [vmem:[%s3862_s29 + $0x5c] sm:$0xf] %vm558_vm5, %v2333_v60  ;;  %v2331_v1 = vpack.c.bf16 %v2327_v61, %v2327_v61  ;;  %v2330_v2 = vadd.f32 %v3852_v50, %v2319_v62  ;;  %v2317_v3 = vmul.f32 %v3847_v48, %v2306_v63 }
 0x18e   : > { %2793 = vst.msk [vmem:[%s3862_s29 + $0x1c] sm:$0xf] %vm558_vm5, %v2331_v1  ;;  %v2334_v4 = vpack.c.bf16 %v2330_v2, %v2330_v2  ;;  %v2328_v5 = vadd.f32 %v3852_v50, %v2317_v3 }
 0x190   : > { %2796 = vst.msk [vmem:[%s3862_s29 + $0x7c] sm:$0xf] %vm558_vm5, %v2334_v4  ;;  %v2332_v7 = vpack.c.bf16 %v2328_v5, %v2328_v5 }
 0x192   : > { %2794 = vst.msk [vmem:[%s3862_s29 + $0x3c] sm:$0xf] %vm558_vm5, %v2332_v7 }
 0x193 PF: > { %s15_s20 = sadd.s32 1, %s3340_s20   ;;  %s4005_s18 = smov %s3336_s19 }
 0x194   : > { %p12_p5 = scmp.ge.s32.totalorder %s15_s20, 4   ;;  %s4006_s19 = smov %s4008_s21 }
 0x196   :  { %14 = sbr.rel (!%p12_p5) target bundleno = 2 (0x2), region = 97 }

</bundles_post_ra>
